<compile_context>
chip_gen: v7x
topology: tpu7x:2x2x1
jax: 0.10.0
libtpu: 0.0.40
codegen_flags: <defaults>
</compile_context>

<pallas_src>
import functools

import jax
import jax.numpy as jnp
from jax.experimental import pallas as pl
from jax.experimental.pallas import tpu as pltpu

N_CLASSES = 43
_SUBLANE = 8


def _round_up(n, m):
    return ((n + m - 1) // m) * m


# ----------------------------------------------------------------------------
# Conv (as im2col matmul) + bias + ReLU.  Grid-less: whole arrays in VMEM.
# The 2x2 max-pool is done by the caller in XLA (tiny arrays; doing it inside
# the kernel forced small-last-dim reshapes -> relayouts).
# ----------------------------------------------------------------------------
def conv_relu_kernel(p_ref, w_ref, b_ref, o_ref):
    y = jnp.dot(p_ref[...], w_ref[...], preferred_element_type=jnp.float32)
    o_ref[...] = jnp.maximum(y + b_ref[...], 0.0)


def _im2col(x, kh, kw):
    # x: (B, H, W, C) -> (B*OH*OW, KH*KW*C), column order (kh, kw, c)
    B, H, W, C = x.shape
    oh, ow = H - kh + 1, W - kw + 1
    cols = [x[:, i:i + oh, j:j + ow, :] for i in range(kh) for j in range(kw)]
    return jnp.concatenate(cols, axis=-1).reshape(B * oh * ow, kh * kw * C)


def conv_relu_pool(x, w2d, b2d, *, kh, kw):
    # x: (B, H, W, Cin) NHWC; w2d: (kh*kw*cin, cout); b2d: (1, cout)
    B, H, W, C = x.shape
    cout = w2d.shape[1]
    oh, ow = H - kh + 1, W - kw + 1
    assert oh % 2 == 0 and ow % 2 == 0, "maxpool(2,2) needs even conv output"
    patches = _im2col(x, kh, kw)                 # tiny; built (and fused) by XLA
    y = pl.pallas_call(
        conv_relu_kernel,
        out_shape=jax.ShapeDtypeStruct((B * oh * ow, cout), jnp.float32),
        in_specs=[
            pl.BlockSpec(memory_space=pltpu.MemorySpace.VMEM),
            pl.BlockSpec(memory_space=pltpu.MemorySpace.VMEM),
            pl.BlockSpec(memory_space=pltpu.MemorySpace.VMEM),
        ],
        out_specs=pl.BlockSpec(memory_space=pltpu.MemorySpace.VMEM),
    )(patches, w2d, b2d)
    # 2x2 / stride-2 max-pool in the wrapper (rows are ordered (b, oh, ow)).
    y = y.reshape(B, oh // 2, 2, ow // 2, 2, cout)
    return jnp.max(y, axis=(2, 4))               # (B, OH/2, OW/2, Cout)


# ----------------------------------------------------------------------------
# Fused FC stack: fc1 -> relu -> fc2 -> relu -> fc3, one pallas_call.
# Grid runs over the shared 4096-wide dim (fc1 out == fc2 in), "arbitrary".
# ----------------------------------------------------------------------------
def fc_stack_kernel(x_ref, w1_ref, b1_ref, w2_ref, w3_ref, b2_ref, b3_ref,
                    o_ref, acc_ref):
    k = pl.program_id(0)

    @pl.when(k == 0)
    def _():
        acc_ref[...] = jnp.zeros_like(acc_ref)

    # fc1 tile: relu(x @ W1[:, kt] + b1[kt])  -> (Bp, tk)
    h = jnp.dot(x_ref[...], w1_ref[...], preferred_element_type=jnp.float32)
    h = jnp.maximum(h + b1_ref[...], 0.0)
    # fc2 partial: accumulate h_kt @ W2[kt, :] -> (Bp, N2)
    acc_ref[...] += jnp.dot(h.astype(w2_ref.dtype), w2_ref[...],
                            preferred_element_type=jnp.float32)

    @pl.when(k == pl.num_programs(0) - 1)
    def _():
        y2 = jnp.maximum(acc_ref[...] + b2_ref[...], 0.0)
        logits = jnp.dot(y2.astype(w3_ref.dtype), w3_ref[...],
                         preferred_element_type=jnp.float32) + b3_ref[...]
        o_ref[...] = logits.astype(o_ref.dtype)


def fc_stack(x, prep):
    # x: (B, 400) f32, conv features flattened in (h, w, c) order.
    B, K = x.shape
    w1, b1 = prep["fc1_w"], prep["fc1_b"]        # (512, 4096) bf16, (1, 4096) f32
    w2, b2 = prep["fc2_w"], prep["fc2_b"]        # (4096, 1024) bf16, (1, 1024) f32
    w3, b3 = prep["fc3_w"], prep["fc3_b"]        # (1024, 128) bf16, (1, 128) f32
    kp, n1 = w1.shape
    n2 = w2.shape[1]
    n3 = w3.shape[1]
    assert w2.shape[0] == n1 and w3.shape[0] == n2

    # Pad batch to a full sublane granule and K to the padded weight rows.
    # Padded rows/cols are zero and stay zero through relu; sliced off below.
    bp = _round_up(max(B, _SUBLANE), _SUBLANE)
    xp = jnp.pad(x, ((0, bp - B), (0, kp - K))).astype(w1.dtype)

    # K-tile over the shared 4096 dim: ~3 MB bf16 weights per grid step
    # (1 MB W1 tile + 2 MB W2 tile) -> 4 steps; DMA per step >> 0.35 us step
    # overhead; double-buffered VMEM ~7 MB (fits v5e's 16 MiB scoped default).
    tk = next(t for t in (1024, 512, 256, 128) if n1 % t == 0)
    assert n1 % tk == 0

    out = pl.pallas_call(
        fc_stack_kernel,
        out_shape=jax.ShapeDtypeStruct((bp, n3), jnp.float32),
        grid=(n1 // tk,),
        in_specs=[
            pl.BlockSpec((bp, kp), lambda k: (0, 0)),   # x (same block every step)
            pl.BlockSpec((kp, tk), lambda k: (0, k)),   # W1 K-tile
            pl.BlockSpec((1, tk), lambda k: (0, k)),    # b1 K-tile
            pl.BlockSpec((tk, n2), lambda k: (k, 0)),   # W2 K-tile
            pl.BlockSpec((n2, n3), lambda k: (0, 0)),   # W3 (whole, 256 KB)
            pl.BlockSpec((1, n2), lambda k: (0, 0)),    # b2 (whole)
            pl.BlockSpec((1, n3), lambda k: (0, 0)),    # b3 (whole)
        ],
        out_specs=pl.BlockSpec((bp, n3), lambda k: (0, 0)),
        scratch_shapes=[pltpu.VMEM((bp, n2), jnp.float32)],
        compiler_params=pltpu.CompilerParams(
            dimension_semantics=("arbitrary",)),
    )(xp, w1, b1, w2, w3, b2, b3)
    return out[:B, :N_CLASSES]


# ----------------------------------------------------------------------------
# Parameters (deterministic synthetic init, PyTorch shape conventions) and
# one-time (outside-jit) weight preparation.
# ----------------------------------------------------------------------------
def init_params(key):
    ks = jax.random.split(key, 10)
    rnd = lambda k, shape, s: s * jax.random.normal(k, shape, dtype=jnp.float32)
    return {
        "conv1_w": rnd(ks[0], (6, 1, 5, 5), 0.2),     # (Cout, Cin, KH, KW)
        "conv1_b": rnd(ks[1], (6,), 0.1),
        "conv2_w": rnd(ks[2], (16, 6, 5, 5), 0.1),
        "conv2_b": rnd(ks[3], (16,), 0.1),
        "fc1_w": rnd(ks[4], (4000, 400), 0.05),       # (out_features, in_features)
        "fc1_b": rnd(ks[5], (4000,), 0.05),
        "fc2_w": rnd(ks[6], (1000, 4000), 0.02),
        "fc2_b": rnd(ks[7], (1000,), 0.02),
        "fc3_w": rnd(ks[8], (43, 1000), 0.02),
        "fc3_b": rnd(ks[9], (43,), 0.02),
    }


def _prep_fc(w, b, dtype=jnp.bfloat16):
    # w: (N, K) torch layout -> (Kp, Np) zero-padded bf16, ready for x @ w.
    # Zero-padded rows/cols + zero-padded f32 bias keep padded outputs at 0.
    wt = w.T
    K, N = wt.shape
    kp, npad = _round_up(K, 128), _round_up(N, 128)
    wp = jnp.pad(wt, ((0, kp - K), (0, npad - N))).astype(dtype)
    bp = jnp.pad(b, (0, npad - N)).reshape(1, npad).astype(jnp.float32)
    return wp, bp


def prepare_params(params):
    """One-time weight prep (call OUTSIDE jit): conv weight reshape, fc
    transpose/pad/bf16 cast, and folding the torch NCHW flatten into fc1."""
    prep = {}
    # conv weights -> (kh*kw*cin, cout), row order (kh, kw, cin) == im2col cols
    prep["conv1_w"] = jnp.transpose(params["conv1_w"], (2, 3, 1, 0)).reshape(25, 6)
    prep["conv1_b"] = params["conv1_b"].reshape(1, 6)
    prep["conv2_w"] = jnp.transpose(params["conv2_w"], (2, 3, 1, 0)).reshape(150, 16)
    prep["conv2_b"] = params["conv2_b"].reshape(1, 16)

    # torch flattens the (B,16,5,5) map in (C,H,W) order; our activation is in
    # (H,W,C) order -> permute fc1's input columns once here (free at prep).
    perm = jnp.arange(16 * 5 * 5).reshape(16, 5, 5).transpose(1, 2, 0).reshape(-1)
    fc1_w_hwc = params["fc1_w"][:, perm]
    prep["fc1_w"], prep["fc1_b"] = _prep_fc(fc1_w_hwc, params["fc1_b"])
    prep["fc2_w"], prep["fc2_b"] = _prep_fc(params["fc2_w"], params["fc2_b"])
    prep["fc3_w"], prep["fc3_b"] = _prep_fc(params["fc3_w"], params["fc3_b"])
    return prep


def lenet_forward(prep, x_nchw):
    # x_nchw: (B, 1, 32, 32) float32, PyTorch layout.
    B = x_nchw.shape[0]
    x = jnp.transpose(x_nchw, (0, 2, 3, 1))                              # NHWC
    x = conv_relu_pool(x, prep["conv1_w"], prep["conv1_b"], kh=5, kw=5)  # (B,14,14,6)
    x = conv_relu_pool(x, prep["conv2_w"], prep["conv2_b"], kh=5, kw=5)  # (B,5,5,16)
    x = x.reshape(B, 16 * 5 * 5)   # (h,w,c) flatten; fc1 columns pre-permuted
    return fc_stack(x, prep)                                             # (B,43)


# ----------------------------------------------------------------------------
# Pure-JAX reference with the same FC numerics (bf16 weights AND activations,
# f32 accumulation) to validate im2col / pooling / flatten-permutation / fusion.
# ----------------------------------------------------------------------------
def lenet_reference(params, x_nchw):
    hp = jax.lax.Precision.HIGHEST

    def conv(x, w, b):
        y = jax.lax.conv_general_dilated(
            x, w, window_strides=(1, 1), padding="VALID",
            dimension_numbers=("NCHW", "OIHW", "NCHW"), precision=hp)
        return y + b.reshape(1, -1, 1, 1)

    def pool(x):
        return jax.lax.reduce_window(x, -jnp.inf, jax.lax.max,
                                     (1, 1, 2, 2), (1, 1, 2, 2), "VALID")

    def fc(x, w, b, relu):
        y = jnp.dot(x.astype(jnp.bfloat16), w.T.astype(jnp.bfloat16),
                    preferred_element_type=jnp.float32) + b
        return jnp.maximum(y, 0.0) if relu else y

    x = pool(jnp.maximum(conv(x_nchw, params["conv1_w"], params["conv1_b"]), 0.0))
    x = pool(jnp.maximum(conv(x, params["conv2_w"], params["conv2_b"]), 0.0))
    x = x.reshape(x.shape[0], -1)
    x = fc(x, params["fc1_w"], params["fc1_b"], True)
    x = fc(x, params["fc2_w"], params["fc2_b"], True)
    x = fc(x, params["fc3_w"], params["fc3_b"], False)
    return x


if __name__ == "__main__":
    key = jax.random.PRNGKey(0)
    pkey, xkey = jax.random.split(key)
    params = init_params(pkey)
    prep = prepare_params(params)        # one-time weight prep, outside jit
    # LeNet's fc1 (16*5*5) forces 32x32 single-channel input; batch = 2.
    x = jax.random.normal(xkey, (2, 1, 32, 32), dtype=jnp.float32)

    fwd = jax.jit(lenet_forward)
    out = jax.block_until_ready(fwd(prep, x))

    assert out.shape == (2, N_CLASSES), out.shape
    assert bool(jnp.all(jnp.isfinite(out)))

    # Numerical check against a pure-JAX reference using the same bf16
    # weight/activation rounding (only accumulation/tiling order differs).
    ref = jax.block_until_ready(jax.jit(lenet_reference)(params, x))
    max_err = float(jnp.max(jnp.abs(out - ref)))
    assert max_err < 0.15, f"max abs err {max_err}"

    print("KERNEL_OK")
</pallas_src>

<mosaic_0001>
module attributes {stable_mosaic.version = 11 : i64} {
  func.func @conv_relu_kernel(%arg0: memref<1568x25xf32, #tpu.memory_space<vmem>>, %arg1: memref<25x6xf32, #tpu.memory_space<vmem>>, %arg2: memref<1x6xf32, #tpu.memory_space<vmem>>, %arg3: memref<1568x6xf32, #tpu.memory_space<vmem>>) attributes {dimension_semantics = [], scalar_prefetch = 0 : i64, scratch_operands = 0 : i64, tpu.core_type = #tpu.core_type<tc>} {
    %c0 = arith.constant 0 : index
    %c0_0 = arith.constant 0 : index
    %0 = vector.load %arg0[%c0, %c0_0] : memref<1568x25xf32, #tpu.memory_space<vmem>>, vector<1568x25xf32>
    %c0_1 = arith.constant 0 : index
    %c0_2 = arith.constant 0 : index
    %1 = vector.load %arg1[%c0_1, %c0_2] : memref<25x6xf32, #tpu.memory_space<vmem>>, vector<25x6xf32>
    %cst = arith.constant dense<0.000000e+00> : vector<1568x6xf32>
    %2 = tpu.matmul %0, %1, %cst {dimension_numbers = #tpu.dot_dimension_numbers<[1], [0], [0], [1], [0, 0, 1, 1], [], []>} : vector<1568x25xf32>, vector<25x6xf32>, vector<1568x6xf32> -> vector<1568x6xf32>
    %c0_3 = arith.constant 0 : index
    %c0_4 = arith.constant 0 : index
    %3 = vector.load %arg2[%c0_3, %c0_4] : memref<1x6xf32, #tpu.memory_space<vmem>>, vector<1x6xf32>
    %4 = vector.broadcast %3 : vector<1x6xf32> to vector<1568x6xf32>
    %5 = arith.addf %2, %4 : vector<1568x6xf32>
    %cst_5 = arith.constant 0.000000e+00 : f32
    %6 = vector.broadcast %cst_5 : f32 to vector<1568x6xf32>
    %7 = arith.maximumf %5, %6 : vector<1568x6xf32>
    %c0_6 = arith.constant 0 : index
    %c0_7 = arith.constant 0 : index
    %8 = vector.load %arg3[%c0_6, %c0_7] : memref<1568x6xf32, #tpu.memory_space<vmem>>, vector<1568x6xf32>
    tpu.vector_store %arg3[%c0_6, %c0_7], %7 {strides = array<i32>} : memref<1568x6xf32, #tpu.memory_space<vmem>>, vector<1568x6xf32>,
    return
  }
}

module attributes {stable_mosaic.version = 11 : i64} {
  func.func @conv_relu_kernel(%arg0: memref<200x150xf32, #tpu.memory_space<vmem>>, %arg1: memref<150x16xf32, #tpu.memory_space<vmem>>, %arg2: memref<1x16xf32, #tpu.memory_space<vmem>>, %arg3: memref<200x16xf32, #tpu.memory_space<vmem>>) attributes {dimension_semantics = [], scalar_prefetch = 0 : i64, scratch_operands = 0 : i64, tpu.core_type = #tpu.core_type<tc>} {
    %c0 = arith.constant 0 : index
    %c0_0 = arith.constant 0 : index
    %0 = vector.load %arg0[%c0, %c0_0] : memref<200x150xf32, #tpu.memory_space<vmem>>, vector<200x150xf32>
    %c0_1 = arith.constant 0 : index
    %c0_2 = arith.constant 0 : index
    %1 = vector.load %arg1[%c0_1, %c0_2] : memref<150x16xf32, #tpu.memory_space<vmem>>, vector<150x16xf32>
    %cst = arith.constant dense<0.000000e+00> : vector<200x16xf32>
    %2 = tpu.matmul %0, %1, %cst {dimension_numbers = #tpu.dot_dimension_numbers<[1], [0], [0], [1], [0, 0, 1, 1], [], []>} : vector<200x150xf32>, vector<150x16xf32>, vector<200x16xf32> -> vector<200x16xf32>
    %c0_3 = arith.constant 0 : index
    %c0_4 = arith.constant 0 : index
    %3 = vector.load %arg2[%c0_3, %c0_4] : memref<1x16xf32, #tpu.memory_space<vmem>>, vector<1x16xf32>
    %4 = vector.broadcast %3 : vector<1x16xf32> to vector<200x16xf32>
    %5 = arith.addf %2, %4 : vector<200x16xf32>
    %cst_5 = arith.constant 0.000000e+00 : f32
    %6 = vector.broadcast %cst_5 : f32 to vector<200x16xf32>
    %7 = arith.maximumf %5, %6 : vector<200x16xf32>
    %c0_6 = arith.constant 0 : index
    %c0_7 = arith.constant 0 : index
    %8 = vector.load %arg3[%c0_6, %c0_7] : memref<200x16xf32, #tpu.memory_space<vmem>>, vector<200x16xf32>
    tpu.vector_store %arg3[%c0_6, %c0_7], %7 {strides = array<i32>} : memref<200x16xf32, #tpu.memory_space<vmem>>, vector<200x16xf32>,
    return
  }
}

module attributes {stable_mosaic.version = 11 : i64} {
  func.func @fc_stack_kernel(%arg0: i32, %arg1: memref<8x512xbf16, #tpu.memory_space<vmem>>, %arg2: memref<512x1024xbf16, #tpu.memory_space<vmem>>, %arg3: memref<1x1024xf32, #tpu.memory_space<vmem>>, %arg4: memref<1024x1024xbf16, #tpu.memory_space<vmem>>, %arg5: memref<1024x128xbf16, #tpu.memory_space<vmem>>, %arg6: memref<1x1024xf32, #tpu.memory_space<vmem>>, %arg7: memref<1x128xf32, #tpu.memory_space<vmem>>, %arg8: memref<8x128xf32, #tpu.memory_space<vmem>>, %arg9: memref<8x1024xf32, #tpu.memory_space<vmem>>) attributes {dimension_semantics = [#tpu.dimension_semantics<arbitrary>], iteration_bounds = array<i64: 4>, scalar_prefetch = 0 : i64, scratch_operands = 1 : i64, tpu.core_type = #tpu.core_type<tc>, window_params = [{pipeline_mode = #tpu.pipeline_mode<synchronous>, transform_indices = @transform_0, window_bounds = array<i64: 8, 512>}, {transform_indices = @transform_1, window_bounds = array<i64: 512, 1024>}, {transform_indices = @transform_2, window_bounds = array<i64: 1, 1024>}, {transform_indices = @transform_3, window_bounds = array<i64: 1024, 1024>}, {pipeline_mode = #tpu.pipeline_mode<synchronous>, transform_indices = @transform_4, window_bounds = array<i64: 1024, 128>}, {pipeline_mode = #tpu.pipeline_mode<synchronous>, transform_indices = @transform_5, window_bounds = array<i64: 1, 1024>}, {pipeline_mode = #tpu.pipeline_mode<synchronous>, transform_indices = @transform_6, window_bounds = array<i64: 1, 128>}, {pipeline_mode = #tpu.pipeline_mode<synchronous>, transform_indices = @transform_7, window_bounds = array<i64: 8, 128>}]} {
    %c0_i32 = arith.constant 0 : i32
    %0 = arith.cmpi eq, %arg0, %c0_i32 : i32
    %1 = arith.extui %0 : i1 to i32
    %c0_i32_0 = arith.constant 0 : i32
    %2 = arith.cmpi ne, %1, %c0_i32_0 : i32
    scf.if %2 {
      %cst_15 = arith.constant 0.000000e+00 : f32
      %20 = vector.broadcast %cst_15 : f32 to vector<8x1024xf32>
      %c0_16 = arith.constant 0 : index
      %c0_17 = arith.constant 0 : index
      %21 = vector.load %arg9[%c0_16, %c0_17] : memref<8x1024xf32, #tpu.memory_space<vmem>>, vector<8x1024xf32>
      tpu.vector_store %arg9[%c0_16, %c0_17], %20 {strides = array<i32>} : memref<8x1024xf32, #tpu.memory_space<vmem>>, vector<8x1024xf32>,
    } else {
    }
    %c0 = arith.constant 0 : index
    %c0_1 = arith.constant 0 : index
    %3 = vector.load %arg1[%c0, %c0_1] : memref<8x512xbf16, #tpu.memory_space<vmem>>, vector<8x512xbf16>
    %c0_2 = arith.constant 0 : index
    %c0_3 = arith.constant 0 : index
    %4 = vector.load %arg2[%c0_2, %c0_3] : memref<512x1024xbf16, #tpu.memory_space<vmem>>, vector<512x1024xbf16>
    %cst = arith.constant dense<0.000000e+00> : vector<8x1024xf32>
    %5 = tpu.matmul %3, %4, %cst {dimension_numbers = #tpu.dot_dimension_numbers<[1], [0], [0], [1], [0, 0, 1, 1], [], []>} : vector<8x512xbf16>, vector<512x1024xbf16>, vector<8x1024xf32> -> vector<8x1024xf32>
    %c0_4 = arith.constant 0 : index
    %c0_5 = arith.constant 0 : index
    %6 = vector.load %arg3[%c0_4, %c0_5] : memref<1x1024xf32, #tpu.memory_space<vmem>>, vector<1x1024xf32>
    %7 = vector.broadcast %6 : vector<1x1024xf32> to vector<8x1024xf32>
    %8 = arith.addf %5, %7 : vector<8x1024xf32>
    %cst_6 = arith.constant 0.000000e+00 : f32
    %9 = vector.broadcast %cst_6 : f32 to vector<8x1024xf32>
    %10 = arith.maximumf %8, %9 : vector<8x1024xf32>
    %c0_7 = arith.constant 0 : index
    %c0_8 = arith.constant 0 : index
    %11 = vector.load %arg9[%c0_7, %c0_8] : memref<8x1024xf32, #tpu.memory_space<vmem>>, vector<8x1024xf32>
    %12 = arith.truncf %10 : vector<8x1024xf32> to vector<8x1024xbf16>
    %c0_9 = arith.constant 0 : index
    %c0_10 = arith.constant 0 : index
    %13 = vector.load %arg4[%c0_9, %c0_10] : memref<1024x1024xbf16, #tpu.memory_space<vmem>>, vector<1024x1024xbf16>
    %cst_11 = arith.constant dense<0.000000e+00> : vector<8x1024xf32>
    %14 = tpu.matmul %12, %13, %cst_11 {dimension_numbers = #tpu.dot_dimension_numbers<[1], [0], [0], [1], [0, 0, 1, 1], [], []>} : vector<8x1024xbf16>, vector<1024x1024xbf16>, vector<8x1024xf32> -> vector<8x1024xf32>
    %15 = arith.addf %11, %14 : vector<8x1024xf32>
    %c0_12 = arith.constant 0 : index
    %c0_13 = arith.constant 0 : index
    %16 = vector.load %arg9[%c0_12, %c0_13] : memref<8x1024xf32, #tpu.memory_space<vmem>>, vector<8x1024xf32>
    tpu.vector_store %arg9[%c0_12, %c0_13], %15 {strides = array<i32>} : memref<8x1024xf32, #tpu.memory_space<vmem>>, vector<8x1024xf32>,
    %c3_i32 = arith.constant 3 : i32
    %17 = arith.cmpi eq, %arg0, %c3_i32 : i32
    %18 = arith.extui %17 : i1 to i32
    %c0_i32_14 = arith.constant 0 : i32
    %19 = arith.cmpi ne, %18, %c0_i32_14 : i32
    scf.if %19 {
      %c0_15 = arith.constant 0 : index
      %c0_16 = arith.constant 0 : index
      %20 = vector.load %arg9[%c0_15, %c0_16] : memref<8x1024xf32, #tpu.memory_space<vmem>>, vector<8x1024xf32>
      %c0_17 = arith.constant 0 : index
      %c0_18 = arith.constant 0 : index
      %21 = vector.load %arg6[%c0_17, %c0_18] : memref<1x1024xf32, #tpu.memory_space<vmem>>, vector<1x1024xf32>
      %22 = vector.broadcast %21 : vector<1x1024xf32> to vector<8x1024xf32>
      %23 = arith.addf %20, %22 : vector<8x1024xf32>
      %cst_19 = arith.constant 0.000000e+00 : f32
      %24 = vector.broadcast %cst_19 : f32 to vector<8x1024xf32>
      %25 = arith.maximumf %23, %24 : vector<8x1024xf32>
      %26 = arith.truncf %25 : vector<8x1024xf32> to vector<8x1024xbf16>
      %c0_20 = arith.constant 0 : index
      %c0_21 = arith.constant 0 : index
      %27 = vector.load %arg5[%c0_20, %c0_21] : memref<1024x128xbf16, #tpu.memory_space<vmem>>, vector<1024x128xbf16>
      %cst_22 = arith.constant dense<0.000000e+00> : vector<8x128xf32>
      %28 = tpu.matmul %26, %27, %cst_22 {dimension_numbers = #tpu.dot_dimension_numbers<[1], [0], [0], [1], [0, 0, 1, 1], [], []>} : vector<8x1024xbf16>, vector<1024x128xbf16>, vector<8x128xf32> -> vector<8x128xf32>
      %c0_23 = arith.constant 0 : index
      %c0_24 = arith.constant 0 : index
      %29 = vector.load %arg7[%c0_23, %c0_24] : memref<1x128xf32, #tpu.memory_space<vmem>>, vector<1x128xf32>
      %30 = vector.broadcast %29 : vector<1x128xf32> to vector<8x128xf32>
      %31 = arith.addf %28, %30 : vector<8x128xf32>
      %c0_25 = arith.constant 0 : index
      %c0_26 = arith.constant 0 : index
      %32 = vector.load %arg8[%c0_25, %c0_26] : memref<8x128xf32, #tpu.memory_space<vmem>>, vector<8x128xf32>
      tpu.vector_store %arg8[%c0_25, %c0_26], %31 {strides = array<i32>} : memref<8x128xf32, #tpu.memory_space<vmem>>, vector<8x128xf32>,
    } else {
    }
    return
  }
  func.func @transform_0(%arg0: i32) -> (i32, i32) {
    %c0_i32 = arith.constant 0 : i32
    %c0_i32_0 = arith.constant 0 : i32
    %c0_i32_1 = arith.constant 0 : i32
    return %c0_i32, %c0_i32_0 : i32, i32
  }
  func.func @transform_1(%arg0: i32) -> (i32, i32) {
    %c0_i32 = arith.constant 0 : i32
    %c0_i32_0 = arith.constant 0 : i32
    return %c0_i32, %arg0 : i32, i32
  }
  func.func @transform_2(%arg0: i32) -> (i32, i32) {
    %c0_i32 = arith.constant 0 : i32
    %c0_i32_0 = arith.constant 0 : i32
    return %c0_i32, %arg0 : i32, i32
  }
  func.func @transform_3(%arg0: i32) -> (i32, i32) {
    %c0_i32 = arith.constant 0 : i32
    %c0_i32_0 = arith.constant 0 : i32
    return %arg0, %c0_i32 : i32, i32
  }
  func.func @transform_4(%arg0: i32) -> (i32, i32) {
    %c0_i32 = arith.constant 0 : i32
    %c0_i32_0 = arith.constant 0 : i32
    %c0_i32_1 = arith.constant 0 : i32
    return %c0_i32, %c0_i32_0 : i32, i32
  }
  func.func @transform_5(%arg0: i32) -> (i32, i32) {
    %c0_i32 = arith.constant 0 : i32
    %c0_i32_0 = arith.constant 0 : i32
    %c0_i32_1 = arith.constant 0 : i32
    return %c0_i32, %c0_i32_0 : i32, i32
  }
  func.func @transform_6(%arg0: i32) -> (i32, i32) {
    %c0_i32 = arith.constant 0 : i32
    %c0_i32_0 = arith.constant 0 : i32
    %c0_i32_1 = arith.constant 0 : i32
    return %c0_i32, %c0_i32_0 : i32, i32
  }
  func.func @transform_7(%arg0: i32) -> (i32, i32) {
    %c0_i32 = arith.constant 0 : i32
    %c0_i32_0 = arith.constant 0 : i32
    %c0_i32_1 = arith.constant 0 : i32
    return %c0_i32, %c0_i32_0 : i32, i32
  }
}

</mosaic_0001>

<bundles_post_ra>
// kernel: lenet_forward.3
= control target key start
LH: loop header
LB: loop body
LE: loop exit
PB: predicated region body
PF: predicated region fallthrough
CT: control target
= control target key end

     0   :  { %8 = vsyncpa [#allocation3], 0  ;;  %s3010_s12 = smov [#allocation2]   ;;  %s4824_s0 = inlined_call_operand.vmem [shape: f32[1568,25], index: 0, kind: input, shape index: {}]   ;;  %s4825_s1 = inlined_call_operand.vmem [shape: f32[25,6], index: 1, kind: input, shape index: {}]   ;;  %s4826_s2 = inlined_call_operand.hbm [shape: f32[1,6], index: 2, kind: input, shape index: {}]   ;;  %s4827_s3 = inlined_call_operand.vmem [shape: f32[1568,6], index: 3, kind: output, shape index: {}]  }
   0x1   :  { %s19_s13 = sshll.u32 %s3010_s12, 4  ;;  %s2986_s16 = scalar_lea.hbm %s4826_s2, 16  ;;  %s20_s13 = int_to_ptr.vmem [resolvable:$true] %s19_s13 }
   0x2   :  { %p2987_p0 = scmp.ne.s32.totalorder %s4826_s2, %s2986_s16  ;;  %p2990_p1 = scmp.lt.u32.totalorder %s2986_s16, %s4826_s2 }
   0x4   :  { %p2992_p2 = pnand %p2990_p1, %p2987_p0 }
   0x6   :  { %2995 = shalt.err (!%p2992_p2)
}
   0x7   :  { %s2996_s21 = scalar_lea.vmem %s20_s13, 16  ;;  %s3000_s22 = scalar_lea.vmem %s20_s13, 32 }
   0x8   :  { %p2997_p3 = scmp.ne.s32.totalorder %s20_s13, %s2996_s21  ;;  %p3001_p4 = scmp.lt.s32.totalorder %s20_s13, %s20_s13 }
   0x9   :  { %p3002_p5 = scmp.lt.s32.totalorder %s3000_s22, %s2996_s21 }
   0xb   :  { %p3003_p6 = por %p3002_p5, %p3001_p4 }
   0xd   :  { %p3004_p7 = pnand %p3003_p6, %p2997_p3 }
   0xf   :  { %3007 = shalt.err (!%p3004_p7)
}
  0x10   :  { %22 = dma.hbm_to_vmem [thread:$0]  %s4826_s2, 16, %s20_s13, [#allocation3]  }
  0x11   :  { %3008 = dma.done.wait [#allocation3], 16  }
  0x12   :  { %3009 = vsyncadd [#allocation3], 4294967280  ;;  %vm822_vm0 = vcmask 1040384   ;;  %vm233_vm1 = vcmask 203776   ;;  %v222_v0 = vld [vmem:[%s4825_s1] sm:$0xff]  ;;  %v223_v1 = vld [vmem:[%s4825_s1 + $0x8] sm:$0xff] }
  0x13   :  { %v224_v2 = vld [vmem:[%s4825_s1 + $0x10] sm:$0xff]  ;;  %v2969_v3 = vpack.c.bf16 %v223_v1, %v222_v0  ;;  %v225_v4 = vld [vmem:[%s4825_s1 + $0x18] sm:$0x1]  ;;  %v26_v5 = vld [vmem:[%s4824_s0] sm:$0xff]  ;;  %vm3011_vm2 = vmmov 1   ;;  %vm2067_vm4 = vcmask 48128  }
  0x14   :  { %v124_v6 = vld [vmem:[%s4824_s0 + $0x310] sm:$0xff]  ;;  %v2973_v7 = vpack.c.bf16 %v225_v4, %v224_v2  ;;  %vm2974_vm3 = vmpackc.low %vm822_vm0, %vm3011_vm2  ;;  %2675 = vmatprep.mubr.msk.f32.mxu0 %vm233_vm1, %v26_v5  ;;  %v27_v8 = vld [vmem:[%s4824_s0 + $0x8] sm:$0xff] }
  0x15   :  { %2822 = vmatprep.mubr.msk.f32.mxu1 %vm233_vm1, %v124_v6  ;;  %2970 = vmatprep.subr.bf16.mxu0 %v2969_v3  ;;  %v125_v9 = vld [vmem:[%s4824_s0 + $0x318] sm:$0xff]  ;;  %v28_v10 = vld [vmem:[%s4824_s0 + $0x10] sm:$0xff]  ;;  %v126_v11 = vld [vmem:[%s4824_s0 + $0x320] sm:$0xff] }
  0x16   :  { %2979 = vmatprep.subr.bf16.mxu1 %v2969_v3  ;;  %2972 = vmatpush3.bf16.msra.mxu0 %v2969_v3  ;;  %v29_v12 = vld [vmem:[%s4824_s0 + $0x18] sm:$0xff]  ;;  %v127_v13 = vld [vmem:[%s4824_s0 + $0x328] sm:$0xff]  ;;  %v30_v14 = vld [vmem:[%s4824_s0 + $0x20] sm:$0xff] }
  0x17   :  { %2981 = vmatpush3.bf16.msra.mxu1 %v2969_v3  ;;  %2975 = vmatprep.subr.msk.bf16.mxu0 %vm2974_vm3, %v2973_v7  ;;  %v128_v15 = vld [vmem:[%s4824_s0 + $0x330] sm:$0xff]  ;;  %v31_v16 = vld [vmem:[%s4824_s0 + $0x28] sm:$0xff]  ;;  %v129_v17 = vld [vmem:[%s4824_s0 + $0x338] sm:$0xff] }
  0x18   :  { %2980 = vmatprep.subr.msk.bf16.mxu1 %vm2974_vm3, %v2973_v7  ;;  %v32_v18 = vld [vmem:[%s4824_s0 + $0x30] sm:$0xff]  ;;  %v130_v19 = vld [vmem:[%s4824_s0 + $0x340] sm:$0xff]  ;;  %v33_v20 = vld [vmem:[%s4824_s0 + $0x38] sm:$0xff] }
  0x19   :  { %v131_v21 = vld [vmem:[%s4824_s0 + $0x348] sm:$0xff]  ;;  %v34_v22 = vld [vmem:[%s4824_s0 + $0x40] sm:$0xff]  ;;  %v132_v23 = vld [vmem:[%s4824_s0 + $0x350] sm:$0xff] }
  0x1a   :  { %2978 = vmatpush3.bf16.msk.msra.mxu0 %vm2974_vm3, %v2973_v7  ;;  %v35_v24 = vld [vmem:[%s4824_s0 + $0x48] sm:$0xff]  ;;  %v133_v25 = vld [vmem:[%s4824_s0 + $0x358] sm:$0xff]  ;;  %v36_v26 = vld [vmem:[%s4824_s0 + $0x50] sm:$0xff] }
  0x1b   :  { %2982 = vmatpush3.bf16.msk.msra.mxu1 %vm2974_vm3, %v2973_v7  ;;  %v134_v27 = vld [vmem:[%s4824_s0 + $0x360] sm:$0xff]  ;;  %v37_v28 = vld [vmem:[%s4824_s0 + $0x58] sm:$0xff]  ;;  %v135_v29 = vld [vmem:[%s4824_s0 + $0x368] sm:$0xff] }
  0x1c   :  { %v38_v30 = vld [vmem:[%s4824_s0 + $0x60] sm:$0xff]  ;;  %v136_v31 = vld [vmem:[%s4824_s0 + $0x370] sm:$0xff]  ;;  %v39_v32 = vld [vmem:[%s4824_s0 + $0x68] sm:$0xff] }
  0x1d   :  { %2676 = vmatmul.mubr.msk.f32.vlgmr.msra.gmra.mrb[0].mxu0 %vm233_vm1, %v27_v8  ;;  %v137_v33 = vld [vmem:[%s4824_s0 + $0x378] sm:$0xff]  ;;  %v40_v34 = vld [vmem:[%s4824_s0 + $0x70] sm:$0xff]  ;;  %v138_v35 = vld [vmem:[%s4824_s0 + $0x380] sm:$0xff] }
  0x1e   :  { %2823 = vmatmul.mubr.msk.f32.vlgmr.msra.gmra.mrb[0].mxu1 %vm233_vm1, %v125_v9  ;;  %2678 = vmatprep.mubr.msk.f32.mxu0 %vm233_vm1, %v28_v10  ;;  %v41_v36 = vld [vmem:[%s4824_s0 + $0x78] sm:$0xff]  ;;  %v139_v37 = vld [vmem:[%s4824_s0 + $0x388] sm:$0xff]  ;;  %v42_v38 = vld [vmem:[%s4824_s0 + $0x80] sm:$0xff] }
  0x1f   :  { %2825 = vmatprep.mubr.msk.f32.mxu1 %vm233_vm1, %v126_v11  ;;  %v140_v39 = vld [vmem:[%s4824_s0 + $0x390] sm:$0xff]  ;;  %v43_v40 = vld [vmem:[%s4824_s0 + $0x88] sm:$0xff]  ;;  %v141_v41 = vld [vmem:[%s4824_s0 + $0x398] sm:$0xff] }
  0x20   :  { %v44_v42 = vld [vmem:[%s4824_s0 + $0x90] sm:$0xff]  ;;  %v142_v43 = vld [vmem:[%s4824_s0 + $0x3a0] sm:$0xff]  ;;  %v45_v44 = vld [vmem:[%s4824_s0 + $0x98] sm:$0xff] }
  0x21   :  { %2679 = vmatmul.mubr.msk.f32.gmra.mrb[2].mxu0 %vm233_vm1, %v29_v12  ;;  %v143_v45 = vld [vmem:[%s4824_s0 + $0x3a8] sm:$0xff]  ;;  %v46_v46 = vld [vmem:[%s4824_s0 + $0xa0] sm:$0xff]  ;;  %v144_v47 = vld [vmem:[%s4824_s0 + $0x3b0] sm:$0xff] }
  0x22   :  { %2826 = vmatmul.mubr.msk.f32.gmra.mrb[2].mxu1 %vm233_vm1, %v127_v13  ;;  %2681 = vmatprep.mubr.msk.f32.mxu0 %vm233_vm1, %v30_v14  ;;  %v47_v48 = vld [vmem:[%s4824_s0 + $0xa8] sm:$0xff]  ;;  %v145_v49 = vld [vmem:[%s4824_s0 + $0x3b8] sm:$0xff]  ;;  %v48_v50 = vld [vmem:[%s4824_s0 + $0xb0] sm:$0xff] }
  0x23   :  { %2828 = vmatprep.mubr.msk.f32.mxu1 %vm233_vm1, %v128_v15  ;;  %v146_v51 = vld [vmem:[%s4824_s0 + $0x3c0] sm:$0xff]  ;;  %v49_v52 = vld [vmem:[%s4824_s0 + $0xb8] sm:$0xff]  ;;  %v147_v53 = vld [vmem:[%s4824_s0 + $0x3c8] sm:$0xff] }
  0x24   :  { %v50_v54 = vld [vmem:[%s4824_s0 + $0xc0] sm:$0xff]  ;;  %v148_v55 = vld [vmem:[%s4824_s0 + $0x3d0] sm:$0xff]  ;;  %v51_v56 = vld [vmem:[%s4824_s0 + $0xc8] sm:$0xff] }
  0x25   :  { %2682 = vmatmul.mubr.msk.f32.gmra.mrb[4].mxu0 %vm233_vm1, %v31_v16  ;;  %v149_v57 = vld [vmem:[%s4824_s0 + $0x3d8] sm:$0xff]  ;;  %v52_v58 = vld [vmem:[%s4824_s0 + $0xd0] sm:$0xff]  ;;  %v150_v59 = vld [vmem:[%s4824_s0 + $0x3e0] sm:$0xff] }
  0x26   :  { %2829 = vmatmul.mubr.msk.f32.gmra.mrb[4].mxu1 %vm233_vm1, %v129_v17  ;;  %2684 = vmatprep.mubr.msk.f32.mxu0 %vm233_vm1, %v32_v18  ;;  %v53_v60 = vld [vmem:[%s4824_s0 + $0xd8] sm:$0xff]  ;;  %v151_v61 = vld [vmem:[%s4824_s0 + $0x3e8] sm:$0xff]  ;;  %v54_v62 = vld [vmem:[%s4824_s0 + $0xe0] sm:$0xff] }
  0x27   :  { %2831 = vmatprep.mubr.msk.f32.mxu1 %vm233_vm1, %v130_v19  ;;  %v152_v63 = vld [vmem:[%s4824_s0 + $0x3f0] sm:$0xff]  ;;  %v55_v0 = vld [vmem:[%s4824_s0 + $0xe8] sm:$0xff]  ;;  %v153_v1 = vld [vmem:[%s4824_s0 + $0x3f8] sm:$0xff] }
  0x28   :  { %v56_v2 = vld [vmem:[%s4824_s0 + $0xf0] sm:$0xff]  ;;  %v154_v3 = vld [vmem:[%s4824_s0 + $0x400] sm:$0xff]  ;;  %v57_v4 = vld [vmem:[%s4824_s0 + $0xf8] sm:$0xff] }
  0x29   :  { %2685 = vmatmul.mubr.msk.f32.gmra.mrb[6].mxu0 %vm233_vm1, %v33_v20  ;;  %v155_v5 = vld [vmem:[%s4824_s0 + $0x408] sm:$0xff]  ;;  %v58_v6 = vld [vmem:[%s4824_s0 + $0x100] sm:$0xff]  ;;  %v156_v7 = vld [vmem:[%s4824_s0 + $0x410] sm:$0xff] }
  0x2a   :  { %2832 = vmatmul.mubr.msk.f32.gmra.mrb[6].mxu1 %vm233_vm1, %v131_v21  ;;  %2687 = vmatprep.mubr.msk.f32.mxu0 %vm233_vm1, %v34_v22  ;;  %v59_v8 = vld [vmem:[%s4824_s0 + $0x108] sm:$0xff]  ;;  %v157_v9 = vld [vmem:[%s4824_s0 + $0x418] sm:$0xff]  ;;  %v60_v10 = vld [vmem:[%s4824_s0 + $0x110] sm:$0xff] }
  0x2b   :  { %2834 = vmatprep.mubr.msk.f32.mxu1 %vm233_vm1, %v132_v23  ;;  %v158_v11 = vld [vmem:[%s4824_s0 + $0x420] sm:$0xff]  ;;  %v61_v12 = vld [vmem:[%s4824_s0 + $0x118] sm:$0xff]  ;;  %v159_v13 = vld [vmem:[%s4824_s0 + $0x428] sm:$0xff] }
  0x2c   :  { %v62_v14 = vld [vmem:[%s4824_s0 + $0x120] sm:$0xff]  ;;  %v160_v15 = vld [vmem:[%s4824_s0 + $0x430] sm:$0xff]  ;;  %v63_v16 = vld [vmem:[%s4824_s0 + $0x128] sm:$0xff] }
  0x2d   :  { %2688 = vmatmul.mubr.msk.f32.gmra.mrb[8].mxu0 %vm233_vm1, %v35_v24  ;;  %v161_v17 = vld [vmem:[%s4824_s0 + $0x438] sm:$0xff]  ;;  %v64_v18 = vld [vmem:[%s4824_s0 + $0x130] sm:$0xff]  ;;  %v162_v19 = vld [vmem:[%s4824_s0 + $0x440] sm:$0xff] }
  0x2e   :  { %2835 = vmatmul.mubr.msk.f32.gmra.mrb[8].mxu1 %vm233_vm1, %v133_v25  ;;  %2690 = vmatprep.mubr.msk.f32.mxu0 %vm233_vm1, %v36_v26  ;;  %v65_v20 = vld [vmem:[%s4824_s0 + $0x138] sm:$0xff]  ;;  %v163_v21 = vld [vmem:[%s4824_s0 + $0x448] sm:$0xff]  ;;  %v66_v22 = vld [vmem:[%s4824_s0 + $0x140] sm:$0xff] }
  0x2f   :  { %2837 = vmatprep.mubr.msk.f32.mxu1 %vm233_vm1, %v134_v27  ;;  %v164_v23 = vld [vmem:[%s4824_s0 + $0x450] sm:$0xff]  ;;  %v67_v24 = vld [vmem:[%s4824_s0 + $0x148] sm:$0xff]  ;;  %v165_v25 = vld [vmem:[%s4824_s0 + $0x458] sm:$0xff] }
  0x30   :  { %v68_v26 = vld [vmem:[%s4824_s0 + $0x150] sm:$0xff]  ;;  %v166_v27 = vld [vmem:[%s4824_s0 + $0x460] sm:$0xff] }
  0x31   :  { %2691 = vmatmul.mubr.msk.f32.gmra.mrb[10].mxu0 %vm233_vm1, %v37_v28  ;;  %v69_v28 = vld [vmem:[%s4824_s0 + $0x158] sm:$0xff] }
  0x32   :  { %2838 = vmatmul.mubr.msk.f32.gmra.mrb[10].mxu1 %vm233_vm1, %v135_v29  ;;  %2693 = vmatprep.mubr.msk.f32.mxu0 %vm233_vm1, %v38_v30  ;;  %v167_v29 = vld [vmem:[%s4824_s0 + $0x468] sm:$0xff]  ;;  %v70_v30 = vld [vmem:[%s4824_s0 + $0x160] sm:$0xff] }
  0x33   :  { %2840 = vmatprep.mubr.msk.f32.mxu1 %vm233_vm1, %v136_v31  ;;  %v168_v31 = vld [vmem:[%s4824_s0 + $0x470] sm:$0xff] }
  0x35   :  { %2694 = vmatmul.mubr.msk.f32.gmra.mrb[12].mxu0 %vm233_vm1, %v39_v32  ;;  %v71_v32 = vld [vmem:[%s4824_s0 + $0x168] sm:$0xff] }
  0x36   :  { %2841 = vmatmul.mubr.msk.f32.gmra.mrb[12].mxu1 %vm233_vm1, %v137_v33  ;;  %2696 = vmatprep.mubr.msk.f32.mxu0 %vm233_vm1, %v40_v34  ;;  %v169_v33 = vld [vmem:[%s4824_s0 + $0x478] sm:$0xff]  ;;  %v72_v34 = vld [vmem:[%s4824_s0 + $0x170] sm:$0xff] }
  0x37   :  { %2843 = vmatprep.mubr.msk.f32.mxu1 %vm233_vm1, %v138_v35  ;;  %v170_v35 = vld [vmem:[%s4824_s0 + $0x480] sm:$0xff] }
  0x39   :  { %2697 = vmatmul.mubr.msk.f32.gmra.mrb[14].mxu0 %vm233_vm1, %v41_v36  ;;  %v73_v36 = vld [vmem:[%s4824_s0 + $0x178] sm:$0xff] }
  0x3a   :  { %2844 = vmatmul.mubr.msk.f32.gmra.mrb[14].mxu1 %vm233_vm1, %v139_v37  ;;  %2699 = vmatprep.mubr.msk.f32.mxu0 %vm233_vm1, %v42_v38  ;;  %v171_v37 = vld [vmem:[%s4824_s0 + $0x488] sm:$0xff]  ;;  %v74_v38 = vld [vmem:[%s4824_s0 + $0x180] sm:$0xff] }
  0x3b   :  { %2846 = vmatprep.mubr.msk.f32.mxu1 %vm233_vm1, %v140_v39  ;;  %v172_v39 = vld [vmem:[%s4824_s0 + $0x490] sm:$0xff] }
  0x3d   :  { %2700 = vmatmul.mubr.msk.f32.gmra.mrb[16].mxu0 %vm233_vm1, %v43_v40  ;;  %v75_v40 = vld [vmem:[%s4824_s0 + $0x188] sm:$0xff] }
  0x3e   :  { %2847 = vmatmul.mubr.msk.f32.gmra.mrb[16].mxu1 %vm233_vm1, %v141_v41  ;;  %2702 = vmatprep.mubr.msk.f32.mxu0 %vm233_vm1, %v44_v42  ;;  %v173_v41 = vld [vmem:[%s4824_s0 + $0x498] sm:$0xff]  ;;  %v76_v42 = vld [vmem:[%s4824_s0 + $0x190] sm:$0xff] }
  0x3f   :  { %2849 = vmatprep.mubr.msk.f32.mxu1 %vm233_vm1, %v142_v43  ;;  %v174_v43 = vld [vmem:[%s4824_s0 + $0x4a0] sm:$0xff] }
  0x41   :  { %2703 = vmatmul.mubr.msk.f32.gmra.mrb[18].mxu0 %vm233_vm1, %v45_v44  ;;  %v77_v44 = vld [vmem:[%s4824_s0 + $0x198] sm:$0xff] }
  0x42   :  { %2850 = vmatmul.mubr.msk.f32.gmra.mrb[18].mxu1 %vm233_vm1, %v143_v45  ;;  %2705 = vmatprep.mubr.msk.f32.mxu0 %vm233_vm1, %v46_v46  ;;  %v175_v45 = vld [vmem:[%s4824_s0 + $0x4a8] sm:$0xff]  ;;  %v78_v46 = vld [vmem:[%s4824_s0 + $0x1a0] sm:$0xff] }
  0x43   :  { %2852 = vmatprep.mubr.msk.f32.mxu1 %vm233_vm1, %v144_v47  ;;  %v176_v47 = vld [vmem:[%s4824_s0 + $0x4b0] sm:$0xff] }
  0x45   :  { %2706 = vmatmul.mubr.msk.f32.gmra.mrb[20].mxu0 %vm233_vm1, %v47_v48  ;;  %v79_v48 = vld [vmem:[%s4824_s0 + $0x1a8] sm:$0xff] }
  0x46   :  { %2853 = vmatmul.mubr.msk.f32.gmra.mrb[20].mxu1 %vm233_vm1, %v145_v49  ;;  %2708 = vmatprep.mubr.msk.f32.mxu0 %vm233_vm1, %v48_v50  ;;  %v177_v49 = vld [vmem:[%s4824_s0 + $0x4b8] sm:$0xff]  ;;  %v80_v50 = vld [vmem:[%s4824_s0 + $0x1b0] sm:$0xff] }
  0x47   :  { %2855 = vmatprep.mubr.msk.f32.mxu1 %vm233_vm1, %v146_v51  ;;  %v178_v51 = vld [vmem:[%s4824_s0 + $0x4c0] sm:$0xff] }
  0x49   :  { %2709 = vmatmul.mubr.msk.f32.gmra.mrb[22].mxu0 %vm233_vm1, %v49_v52  ;;  %v81_v52 = vld [vmem:[%s4824_s0 + $0x1b8] sm:$0xff] }
  0x4a   :  { %2856 = vmatmul.mubr.msk.f32.gmra.mrb[22].mxu1 %vm233_vm1, %v147_v53  ;;  %2711 = vmatprep.mubr.msk.f32.mxu0 %vm233_vm1, %v50_v54  ;;  %v179_v53 = vld [vmem:[%s4824_s0 + $0x4c8] sm:$0xff]  ;;  %v82_v54 = vld [vmem:[%s4824_s0 + $0x1c0] sm:$0xff] }
  0x4b   :  { %2858 = vmatprep.mubr.msk.f32.mxu1 %vm233_vm1, %v148_v55  ;;  %v180_v55 = vld [vmem:[%s4824_s0 + $0x4d0] sm:$0xff] }
  0x4d   :  { %2712 = vmatmul.mubr.msk.f32.gmra.mrb[24].mxu0 %vm233_vm1, %v51_v56  ;;  %v83_v56 = vld [vmem:[%s4824_s0 + $0x1c8] sm:$0xff] }
  0x4e   :  { %2859 = vmatmul.mubr.msk.f32.gmra.mrb[24].mxu1 %vm233_vm1, %v149_v57  ;;  %2714 = vmatprep.mubr.msk.f32.mxu0 %vm233_vm1, %v52_v58  ;;  %v181_v57 = vld [vmem:[%s4824_s0 + $0x4d8] sm:$0xff]  ;;  %v84_v58 = vld [vmem:[%s4824_s0 + $0x1d0] sm:$0xff] }
  0x4f   :  { %2861 = vmatprep.mubr.msk.f32.mxu1 %vm233_vm1, %v150_v59  ;;  %v182_v59 = vld [vmem:[%s4824_s0 + $0x4e0] sm:$0xff] }
  0x51   :  { %2715 = vmatmul.mubr.msk.f32.gmra.mrb[26].mxu0 %vm233_vm1, %v53_v60  ;;  %v85_v60 = vld [vmem:[%s4824_s0 + $0x1d8] sm:$0xff] }
  0x52   :  { %2862 = vmatmul.mubr.msk.f32.gmra.mrb[26].mxu1 %vm233_vm1, %v151_v61  ;;  %2717 = vmatprep.mubr.msk.f32.mxu0 %vm233_vm1, %v54_v62  ;;  %v183_v61 = vld [vmem:[%s4824_s0 + $0x4e8] sm:$0xff]  ;;  %v86_v62 = vld [vmem:[%s4824_s0 + $0x1e0] sm:$0xff] }
  0x53   :  { %2864 = vmatprep.mubr.msk.f32.mxu1 %vm233_vm1, %v152_v63  ;;  %v184_v63 = vld [vmem:[%s4824_s0 + $0x4f0] sm:$0xff] }
  0x55   :  { %2718 = vmatmul.mubr.msk.f32.gmra.mrb[28].mxu0 %vm233_vm1, %v55_v0  ;;  %v87_v0 = vld [vmem:[%s4824_s0 + $0x1e8] sm:$0xff] }
  0x56   :  { %2865 = vmatmul.mubr.msk.f32.gmra.mrb[28].mxu1 %vm233_vm1, %v153_v1  ;;  %2720 = vmatprep.mubr.msk.f32.mxu0 %vm233_vm1, %v56_v2  ;;  %v185_v1 = vld [vmem:[%s4824_s0 + $0x4f8] sm:$0xff]  ;;  %v88_v2 = vld [vmem:[%s4824_s0 + $0x1f0] sm:$0xff] }
  0x57   :  { %2867 = vmatprep.mubr.msk.f32.mxu1 %vm233_vm1, %v154_v3  ;;  %v186_v3 = vld [vmem:[%s4824_s0 + $0x500] sm:$0xff] }
  0x59   :  { %2721 = vmatmul.mubr.msk.f32.gmra.mrb[30].mxu0 %vm233_vm1, %v57_v4  ;;  %v89_v4 = vld [vmem:[%s4824_s0 + $0x1f8] sm:$0xff] }
  0x5a   :  { %2868 = vmatmul.mubr.msk.f32.gmra.mrb[30].mxu1 %vm233_vm1, %v155_v5  ;;  %2723 = vmatprep.mubr.msk.f32.mxu0 %vm233_vm1, %v58_v6  ;;  %v187_v5 = vld [vmem:[%s4824_s0 + $0x508] sm:$0xff]  ;;  %v90_v6 = vld [vmem:[%s4824_s0 + $0x200] sm:$0xff] }
  0x5b   :  { %2870 = vmatprep.mubr.msk.f32.mxu1 %vm233_vm1, %v156_v7  ;;  %v188_v7 = vld [vmem:[%s4824_s0 + $0x510] sm:$0xff] }
  0x5d   :  { %2724 = vmatmul.mubr.msk.f32.gmra.mrb[32].mxu0 %vm233_vm1, %v59_v8  ;;  %v91_v8 = vld [vmem:[%s4824_s0 + $0x208] sm:$0xff] }
  0x5e   :  { %2871 = vmatmul.mubr.msk.f32.gmra.mrb[32].mxu1 %vm233_vm1, %v157_v9  ;;  %2726 = vmatprep.mubr.msk.f32.mxu0 %vm233_vm1, %v60_v10  ;;  %v189_v9 = vld [vmem:[%s4824_s0 + $0x518] sm:$0xff]  ;;  %v92_v10 = vld [vmem:[%s4824_s0 + $0x210] sm:$0xff] }
  0x5f   :  { %2873 = vmatprep.mubr.msk.f32.mxu1 %vm233_vm1, %v158_v11  ;;  %v190_v11 = vld [vmem:[%s4824_s0 + $0x520] sm:$0xff] }
  0x61   :  { %2727 = vmatmul.mubr.msk.f32.gmra.mrb[34].mxu0 %vm233_vm1, %v61_v12  ;;  %v93_v12 = vld [vmem:[%s4824_s0 + $0x218] sm:$0xff] }
  0x62   :  { %2874 = vmatmul.mubr.msk.f32.gmra.mrb[34].mxu1 %vm233_vm1, %v159_v13  ;;  %2729 = vmatprep.mubr.msk.f32.mxu0 %vm233_vm1, %v62_v14  ;;  %v191_v13 = vld [vmem:[%s4824_s0 + $0x528] sm:$0xff]  ;;  %v94_v14 = vld [vmem:[%s4824_s0 + $0x220] sm:$0xff] }
  0x63   :  { %2876 = vmatprep.mubr.msk.f32.mxu1 %vm233_vm1, %v160_v15  ;;  %v192_v15 = vld [vmem:[%s4824_s0 + $0x530] sm:$0xff] }
  0x65   :  { %2730 = vmatmul.mubr.msk.f32.gmra.mrb[36].mxu0 %vm233_vm1, %v63_v16  ;;  %v95_v16 = vld [vmem:[%s4824_s0 + $0x228] sm:$0xff] }
  0x66   :  { %2877 = vmatmul.mubr.msk.f32.gmra.mrb[36].mxu1 %vm233_vm1, %v161_v17  ;;  %2732 = vmatprep.mubr.msk.f32.mxu0 %vm233_vm1, %v64_v18  ;;  %v193_v17 = vld [vmem:[%s4824_s0 + $0x538] sm:$0xff]  ;;  %v96_v18 = vld [vmem:[%s4824_s0 + $0x230] sm:$0xff] }
  0x67   :  { %2879 = vmatprep.mubr.msk.f32.mxu1 %vm233_vm1, %v162_v19  ;;  %v194_v19 = vld [vmem:[%s4824_s0 + $0x540] sm:$0xff] }
  0x69   :  { %2733 = vmatmul.mubr.msk.f32.gmra.mrb[38].mxu0 %vm233_vm1, %v65_v20  ;;  %v97_v20 = vld [vmem:[%s4824_s0 + $0x238] sm:$0xff] }
  0x6a   :  { %2880 = vmatmul.mubr.msk.f32.gmra.mrb[38].mxu1 %vm233_vm1, %v163_v21  ;;  %2735 = vmatprep.mubr.msk.f32.mxu0 %vm233_vm1, %v66_v22  ;;  %v195_v21 = vld [vmem:[%s4824_s0 + $0x548] sm:$0xff]  ;;  %v98_v22 = vld [vmem:[%s4824_s0 + $0x240] sm:$0xff] }
  0x6b   :  { %2882 = vmatprep.mubr.msk.f32.mxu1 %vm233_vm1, %v164_v23  ;;  %v196_v23 = vld [vmem:[%s4824_s0 + $0x550] sm:$0xff] }
  0x6d   :  { %2736 = vmatmul.mubr.msk.f32.gmra.mrb[40].mxu0 %vm233_vm1, %v67_v24  ;;  %v99_v24 = vld [vmem:[%s4824_s0 + $0x248] sm:$0xff] }
  0x6e   :  { %2883 = vmatmul.mubr.msk.f32.gmra.mrb[40].mxu1 %vm233_vm1, %v165_v25  ;;  %2738 = vmatprep.mubr.msk.f32.mxu0 %vm233_vm1, %v68_v26  ;;  %v197_v25 = vld [vmem:[%s4824_s0 + $0x558] sm:$0xff]  ;;  %v100_v26 = vld [vmem:[%s4824_s0 + $0x250] sm:$0xff] }
  0x6f   :  { %2885 = vmatprep.mubr.msk.f32.mxu1 %vm233_vm1, %v166_v27  ;;  %v198_v27 = vld [vmem:[%s4824_s0 + $0x560] sm:$0xff] }
  0x71   :  { %2739 = vmatmul.mubr.msk.f32.gmra.mrb[42].mxu0 %vm233_vm1, %v69_v28  ;;  %v101_v28 = vld [vmem:[%s4824_s0 + $0x258] sm:$0xff] }
  0x72   :  { %2886 = vmatmul.mubr.msk.f32.gmra.mrb[42].mxu1 %vm233_vm1, %v167_v29  ;;  %2741 = vmatprep.mubr.msk.f32.mxu0 %vm233_vm1, %v70_v30  ;;  %v199_v29 = vld [vmem:[%s4824_s0 + $0x568] sm:$0xff]  ;;  %v102_v30 = vld [vmem:[%s4824_s0 + $0x260] sm:$0xff] }
  0x73   :  { %2888 = vmatprep.mubr.msk.f32.mxu1 %vm233_vm1, %v168_v31  ;;  %v200_v31 = vld [vmem:[%s4824_s0 + $0x570] sm:$0xff] }
  0x75   :  { %2742 = vmatmul.mubr.msk.f32.gmra.mrb[44].mxu0 %vm233_vm1, %v71_v32  ;;  %v103_v32 = vld [vmem:[%s4824_s0 + $0x268] sm:$0xff] }
  0x76   :  { %2889 = vmatmul.mubr.msk.f32.gmra.mrb[44].mxu1 %vm233_vm1, %v169_v33  ;;  %2744 = vmatprep.mubr.msk.f32.mxu0 %vm233_vm1, %v72_v34  ;;  %v201_v33 = vld [vmem:[%s4824_s0 + $0x578] sm:$0xff]  ;;  %v104_v34 = vld [vmem:[%s4824_s0 + $0x270] sm:$0xff] }
  0x77   :  { %2891 = vmatprep.mubr.msk.f32.mxu1 %vm233_vm1, %v170_v35  ;;  %v202_v35 = vld [vmem:[%s4824_s0 + $0x580] sm:$0xff] }
  0x79   :  { %2745 = vmatmul.mubr.msk.f32.gmra.mrb[46].mxu0 %vm233_vm1, %v73_v36  ;;  %v105_v36 = vld [vmem:[%s4824_s0 + $0x278] sm:$0xff] }
  0x7a   :  { %2892 = vmatmul.mubr.msk.f32.gmra.mrb[46].mxu1 %vm233_vm1, %v171_v37  ;;  %2747 = vmatprep.mubr.msk.f32.mxu0 %vm233_vm1, %v74_v38  ;;  %v203_v37 = vld [vmem:[%s4824_s0 + $0x588] sm:$0xff]  ;;  %v106_v38 = vld [vmem:[%s4824_s0 + $0x280] sm:$0xff] }
  0x7b   :  { %2894 = vmatprep.mubr.msk.f32.mxu1 %vm233_vm1, %v172_v39  ;;  %v204_v39 = vld [vmem:[%s4824_s0 + $0x590] sm:$0xff] }
  0x7d   :  { %2748 = vmatmul.mubr.msk.f32.gmra.mrb[48].mxu0 %vm233_vm1, %v75_v40  ;;  %v107_v40 = vld [vmem:[%s4824_s0 + $0x288] sm:$0xff] }
  0x7e   :  { %2895 = vmatmul.mubr.msk.f32.gmra.mrb[48].mxu1 %vm233_vm1, %v173_v41  ;;  %2750 = vmatprep.mubr.msk.f32.mxu0 %vm233_vm1, %v76_v42  ;;  %v205_v41 = vld [vmem:[%s4824_s0 + $0x598] sm:$0xff]  ;;  %v108_v42 = vld [vmem:[%s4824_s0 + $0x290] sm:$0xff] }
  0x7f   :  { %2897 = vmatprep.mubr.msk.f32.mxu1 %vm233_vm1, %v174_v43  ;;  %v206_v43 = vld [vmem:[%s4824_s0 + $0x5a0] sm:$0xff] }
  0x81   :  { %2751 = vmatmul.mubr.msk.f32.gmra.mrb[50].mxu0 %vm233_vm1, %v77_v44  ;;  %v109_v44 = vld [vmem:[%s4824_s0 + $0x298] sm:$0xff] }
  0x82   :  { %2898 = vmatmul.mubr.msk.f32.gmra.mrb[50].mxu1 %vm233_vm1, %v175_v45  ;;  %2753 = vmatprep.mubr.msk.f32.mxu0 %vm233_vm1, %v78_v46  ;;  %v207_v45 = vld [vmem:[%s4824_s0 + $0x5a8] sm:$0xff]  ;;  %v110_v46 = vld [vmem:[%s4824_s0 + $0x2a0] sm:$0xff] }
  0x83   :  { %2900 = vmatprep.mubr.msk.f32.mxu1 %vm233_vm1, %v176_v47  ;;  %v208_v47 = vld [vmem:[%s4824_s0 + $0x5b0] sm:$0xff] }
  0x85   :  { %2754 = vmatmul.mubr.msk.f32.gmra.mrb[52].mxu0 %vm233_vm1, %v79_v48  ;;  %v111_v48 = vld [vmem:[%s4824_s0 + $0x2a8] sm:$0xff] }
  0x86   :  { %2901 = vmatmul.mubr.msk.f32.gmra.mrb[52].mxu1 %vm233_vm1, %v177_v49  ;;  %2756 = vmatprep.mubr.msk.f32.mxu0 %vm233_vm1, %v80_v50  ;;  %v209_v49 = vld [vmem:[%s4824_s0 + $0x5b8] sm:$0xff]  ;;  %v112_v50 = vld [vmem:[%s4824_s0 + $0x2b0] sm:$0xff] }
  0x87   :  { %2903 = vmatprep.mubr.msk.f32.mxu1 %vm233_vm1, %v178_v51  ;;  %v210_v51 = vld [vmem:[%s4824_s0 + $0x5c0] sm:$0xff] }
  0x89   :  { %2757 = vmatmul.mubr.msk.f32.gmra.mrb[54].mxu0 %vm233_vm1, %v81_v52  ;;  %v113_v52 = vld [vmem:[%s4824_s0 + $0x2b8] sm:$0xff] }
  0x8a   :  { %2904 = vmatmul.mubr.msk.f32.gmra.mrb[54].mxu1 %vm233_vm1, %v179_v53  ;;  %2759 = vmatprep.mubr.msk.f32.mxu0 %vm233_vm1, %v82_v54  ;;  %v211_v53 = vld [vmem:[%s4824_s0 + $0x5c8] sm:$0xff]  ;;  %v114_v54 = vld [vmem:[%s4824_s0 + $0x2c0] sm:$0xff] }
  0x8b   :  { %2906 = vmatprep.mubr.msk.f32.mxu1 %vm233_vm1, %v180_v55  ;;  %v212_v55 = vld [vmem:[%s4824_s0 + $0x5d0] sm:$0xff] }
  0x8d   :  { %2760 = vmatmul.mubr.msk.f32.gmra.mrb[56].mxu0 %vm233_vm1, %v83_v56  ;;  %v115_v56 = vld [vmem:[%s4824_s0 + $0x2c8] sm:$0xff] }
  0x8e   :  { %2907 = vmatmul.mubr.msk.f32.gmra.mrb[56].mxu1 %vm233_vm1, %v181_v57  ;;  %2762 = vmatprep.mubr.msk.f32.mxu0 %vm233_vm1, %v84_v58  ;;  %v213_v57 = vld [vmem:[%s4824_s0 + $0x5d8] sm:$0xff]  ;;  %v116_v58 = vld [vmem:[%s4824_s0 + $0x2d0] sm:$0xff] }
  0x8f   :  { %2909 = vmatprep.mubr.msk.f32.mxu1 %vm233_vm1, %v182_v59  ;;  %v214_v59 = vld [vmem:[%s4824_s0 + $0x5e0] sm:$0xff] }
  0x91   :  { %2763 = vmatmul.mubr.msk.f32.gmra.mrb[58].mxu0 %vm233_vm1, %v85_v60  ;;  %v117_v60 = vld [vmem:[%s4824_s0 + $0x2d8] sm:$0xff] }
  0x92   :  { %2910 = vmatmul.mubr.msk.f32.gmra.mrb[58].mxu1 %vm233_vm1, %v183_v61  ;;  %2765 = vmatprep.mubr.msk.f32.mxu0 %vm233_vm1, %v86_v62  ;;  %v215_v61 = vld [vmem:[%s4824_s0 + $0x5e8] sm:$0xff]  ;;  %v118_v62 = vld [vmem:[%s4824_s0 + $0x2e0] sm:$0xff] }
  0x93   :  { %2912 = vmatprep.mubr.msk.f32.mxu1 %vm233_vm1, %v184_v63  ;;  %v216_v63 = vld [vmem:[%s4824_s0 + $0x5f0] sm:$0xff] }
  0x95   :  { %2766 = vmatmul.mubr.msk.f32.gmra.mrb[60].mxu0 %vm233_vm1, %v87_v0  ;;  %v119_v0 = vld [vmem:[%s4824_s0 + $0x2e8] sm:$0xff] }
  0x96   :  { %2913 = vmatmul.mubr.msk.f32.gmra.mrb[60].mxu1 %vm233_vm1, %v185_v1  ;;  %2768 = vmatprep.mubr.msk.f32.mxu0 %vm233_vm1, %v88_v2  ;;  %v217_v1 = vld [vmem:[%s4824_s0 + $0x5f8] sm:$0xff]  ;;  %v120_v2 = vld [vmem:[%s4824_s0 + $0x2f0] sm:$0xff] }
  0x97   :  { %2915 = vmatprep.mubr.msk.f32.mxu1 %vm233_vm1, %v186_v3  ;;  %v218_v3 = vld [vmem:[%s4824_s0 + $0x600] sm:$0xff] }
  0x99   :  { %2769 = vmatmul.mubr.msk.f32.gmra.mrb[62].mxu0 %vm233_vm1, %v89_v4  ;;  %v121_v4 = vld [vmem:[%s4824_s0 + $0x2f8] sm:$0xff] }
  0x9a   :  { %2916 = vmatmul.mubr.msk.f32.gmra.mrb[62].mxu1 %vm233_vm1, %v187_v5  ;;  %2771 = vmatprep.mubr.msk.f32.mxu0 %vm233_vm1, %v90_v6  ;;  %v219_v5 = vld [vmem:[%s4824_s0 + $0x608] sm:$0xff]  ;;  %v122_v6 = vld [vmem:[%s4824_s0 + $0x300] sm:$0xff] }
  0x9b   :  { %2918 = vmatprep.mubr.msk.f32.mxu1 %vm233_vm1, %v188_v7  ;;  %v220_v7 = vld [vmem:[%s4824_s0 + $0x610] sm:$0xff] }
  0x9d   :  { %2772 = vmatmul.mubr.msk.f32.gmra.mrb[64].mxu0 %vm233_vm1, %v91_v8  ;;  %v123_v8 = vld [vmem:[%s4824_s0 + $0x308] sm:$0xff] }
  0x9e   :  { %2919 = vmatmul.mubr.msk.f32.gmra.mrb[64].mxu1 %vm233_vm1, %v189_v9  ;;  %2774 = vmatprep.mubr.msk.f32.mxu0 %vm233_vm1, %v92_v10  ;;  %v221_v9 = vld [vmem:[%s4824_s0 + $0x618] sm:$0xff]  ;;  %v3840_v10 = vld [vmem:[#allocation2] ss:$0 sm:$0xff] }
  0x9f   :  { %2921 = vmatprep.mubr.msk.f32.mxu1 %vm233_vm1, %v190_v11 }
  0xa1   :  { %2775 = vmatmul.mubr.msk.f32.gmra.mrb[66].mxu0 %vm233_vm1, %v93_v12 }
  0xa2   :  { %2922 = vmatmul.mubr.msk.f32.gmra.mrb[66].mxu1 %vm233_vm1, %v191_v13  ;;  %2777 = vmatprep.mubr.msk.f32.mxu0 %vm233_vm1, %v94_v14 }
  0xa3   :  { %2924 = vmatprep.mubr.msk.f32.mxu1 %vm233_vm1, %v192_v15 }
  0xa5   :  { %2778 = vmatmul.mubr.msk.f32.gmra.mrb[68].mxu0 %vm233_vm1, %v95_v16 }
  0xa6   :  { %2925 = vmatmul.mubr.msk.f32.gmra.mrb[68].mxu1 %vm233_vm1, %v193_v17  ;;  %2780 = vmatprep.mubr.msk.f32.mxu0 %vm233_vm1, %v96_v18 }
  0xa7   :  { %2927 = vmatprep.mubr.msk.f32.mxu1 %vm233_vm1, %v194_v19 }
  0xa9   :  { %2781 = vmatmul.mubr.msk.f32.gmra.mrb[70].mxu0 %vm233_vm1, %v97_v20 }
  0xaa   :  { %2928 = vmatmul.mubr.msk.f32.gmra.mrb[70].mxu1 %vm233_vm1, %v195_v21  ;;  %2783 = vmatprep.mubr.msk.f32.mxu0 %vm233_vm1, %v98_v22 }
  0xab   :  { %2930 = vmatprep.mubr.msk.f32.mxu1 %vm233_vm1, %v196_v23 }
  0xad   :  { %2784 = vmatmul.mubr.msk.f32.gmra.mrb[72].mxu0 %vm233_vm1, %v99_v24 }
  0xae   :  { %2931 = vmatmul.mubr.msk.f32.gmra.mrb[72].mxu1 %vm233_vm1, %v197_v25  ;;  %2786 = vmatprep.mubr.msk.f32.mxu0 %vm233_vm1, %v100_v26 }
  0xaf   :  { %2933 = vmatprep.mubr.msk.f32.mxu1 %vm233_vm1, %v198_v27 }
  0xb1   :  { %2787 = vmatmul.mubr.msk.f32.gmra.mrb[74].mxu0 %vm233_vm1, %v101_v28 }
  0xb2   :  { %2934 = vmatmul.mubr.msk.f32.gmra.mrb[74].mxu1 %vm233_vm1, %v199_v29  ;;  %2789 = vmatprep.mubr.msk.f32.mxu0 %vm233_vm1, %v102_v30 }
  0xb3   :  { %2936 = vmatprep.mubr.msk.f32.mxu1 %vm233_vm1, %v200_v31 }
  0xb5   :  { %2790 = vmatmul.mubr.msk.f32.gmra.mrb[76].mxu0 %vm233_vm1, %v103_v32 }
  0xb6   :  { %2937 = vmatmul.mubr.msk.f32.gmra.mrb[76].mxu1 %vm233_vm1, %v201_v33  ;;  %2792 = vmatprep.mubr.msk.f32.mxu0 %vm233_vm1, %v104_v34 }
  0xb7   :  { %2939 = vmatprep.mubr.msk.f32.mxu1 %vm233_vm1, %v202_v35 }
  0xb9   :  { %2793 = vmatmul.mubr.msk.f32.gmra.mrb[78].mxu0 %vm233_vm1, %v105_v36 }
  0xba   :  { %2940 = vmatmul.mubr.msk.f32.gmra.mrb[78].mxu1 %vm233_vm1, %v203_v37  ;;  %2795 = vmatprep.mubr.msk.f32.mxu0 %vm233_vm1, %v106_v38 }
  0xbb   :  { %2942 = vmatprep.mubr.msk.f32.mxu1 %vm233_vm1, %v204_v39 }
  0xbd   :  { %2796 = vmatmul.mubr.msk.f32.gmra.mrb[80].mxu0 %vm233_vm1, %v107_v40 }
  0xbe   :  { %2943 = vmatmul.mubr.msk.f32.gmra.mrb[80].mxu1 %vm233_vm1, %v205_v41  ;;  %2798 = vmatprep.mubr.msk.f32.mxu0 %vm233_vm1, %v108_v42 }
  0xbf   :  { %2945 = vmatprep.mubr.msk.f32.mxu1 %vm233_vm1, %v206_v43 }
  0xc1   :  { %2799 = vmatmul.mubr.msk.f32.gmra.mrb[82].mxu0 %vm233_vm1, %v109_v44 }
  0xc2   :  { %2946 = vmatmul.mubr.msk.f32.gmra.mrb[82].mxu1 %vm233_vm1, %v207_v45  ;;  %2801 = vmatprep.mubr.msk.f32.mxu0 %vm233_vm1, %v110_v46 }
  0xc3   :  { %2948 = vmatprep.mubr.msk.f32.mxu1 %vm233_vm1, %v208_v47 }
  0xc5   :  { %2802 = vmatmul.mubr.msk.f32.gmra.mrb[84].mxu0 %vm233_vm1, %v111_v48 }
  0xc6   :  { %2949 = vmatmul.mubr.msk.f32.gmra.mrb[84].mxu1 %vm233_vm1, %v209_v49  ;;  %2804 = vmatprep.mubr.msk.f32.mxu0 %vm233_vm1, %v112_v50 }
  0xc7   :  { %2951 = vmatprep.mubr.msk.f32.mxu1 %vm233_vm1, %v210_v51 }
  0xc9   :  { %2805 = vmatmul.mubr.msk.f32.gmra.mrb[86].mxu0 %vm233_vm1, %v113_v52 }
  0xca   :  { %2952 = vmatmul.mubr.msk.f32.gmra.mrb[86].mxu1 %vm233_vm1, %v211_v53  ;;  %2807 = vmatprep.mubr.msk.f32.mxu0 %vm233_vm1, %v114_v54 }
  0xcb   :  { %2954 = vmatprep.mubr.msk.f32.mxu1 %vm233_vm1, %v212_v55 }
  0xcd   :  { %2808 = vmatmul.mubr.msk.f32.gmra.mrb[88].mxu0 %vm233_vm1, %v115_v56 }
  0xce   :  { %2955 = vmatmul.mubr.msk.f32.gmra.mrb[88].mxu1 %vm233_vm1, %v213_v57  ;;  %2810 = vmatprep.mubr.msk.f32.mxu0 %vm233_vm1, %v116_v58 }
  0xcf   :  { %2957 = vmatprep.mubr.msk.f32.mxu1 %vm233_vm1, %v214_v59 }
  0xd1   :  { %2811 = vmatmul.mubr.msk.f32.gmra.mrb[90].mxu0 %vm233_vm1, %v117_v60 }
  0xd2   :  { %2958 = vmatmul.mubr.msk.f32.gmra.mrb[90].mxu1 %vm233_vm1, %v215_v61  ;;  %2813 = vmatprep.mubr.msk.f32.mxu0 %vm233_vm1, %v118_v62 }
  0xd3   :  { %2960 = vmatprep.mubr.msk.f32.mxu1 %vm233_vm1, %v216_v63 }
  0xd5   :  { %2814 = vmatmul.mubr.msk.f32.gmra.mrb[92].mxu0 %vm233_vm1, %v119_v0 }
  0xd6   :  { %2961 = vmatmul.mubr.msk.f32.gmra.mrb[92].mxu1 %vm233_vm1, %v217_v1  ;;  %2816 = vmatprep.mubr.msk.f32.mxu0 %vm233_vm1, %v120_v2 }
  0xd7   :  { %2963 = vmatprep.mubr.msk.f32.mxu1 %vm233_vm1, %v218_v3 }
  0xd9   :  { %2817 = vmatmul.mubr.msk.f32.gmra.mrb[94].mxu0 %vm233_vm1, %v121_v4 }
  0xda   :  { %2964 = vmatmul.mubr.msk.f32.gmra.mrb[94].mxu1 %vm233_vm1, %v219_v5  ;;  %2819 = vmatprep.mubr.msk.f32.mxu0 %vm233_vm1, %v122_v6 }
  0xdb   :  { %2966 = vmatprep.mubr.msk.f32.mxu1 %vm233_vm1, %v220_v7 }
  0xdd   :  { %2820 = vmatmul.mubr.msk.f32.gmra.mrb[96].mxu0 %vm233_vm1, %v123_v8 }
  0xde   :  { %2967 = vmatmul.mubr.msk.f32.gmra.mrb[96].mxu1 %vm233_vm1, %v221_v9 }
  0xf0   :  { %v2677_v11 = vpop.f32.mrb[0].mxu0 }
  0xf1   :  { %v2824_v12 = vpop.f32.mrb[0].mxu1  ;;  %v898_v13 = vadd.f32 %v2677_v11, %v3840_v10  ;;  %v892_v15 = vpop.f32.mrb[1].mxu0 }
  0xf2   :  { %v1388_v14 = vadd.f32 %v2824_v12, %v3840_v10  ;;  %v1382_v16 = vpop.f32.mrb[1].mxu1  ;;  %v893_v17 = vadd.f32 %v3840_v10, %v892_v15 }
  0xf3   :  { %v1383_v18 = vadd.f32 %v3840_v10, %v1382_v16  ;;  %v1872_v19 = vmax.f32 %v898_v13, 0.0 }
  0xf4   :  { %v1970_v20 = vmax.f32 %v1388_v14, 0.0  ;;  %v1871_v21 = vmax.f32 %v893_v17, 0.0  ;;  %v2680_v23 = vpop.f32.mrb[2].mxu0 }
  0xf5   :  { %v1969_v22 = vmax.f32 %v1383_v18, 0.0  ;;  %v2827_v24 = vpop.f32.mrb[2].mxu1  ;;  %2069 = vst.msk [vmem:[%s4827_s3 + $0x8] sm:$0xff] %vm2067_vm4, %v1872_v19  ;;  %v908_v25 = vadd.f32 %v2680_v23, %v3840_v10  ;;  %v902_v27 = vpop.f32.mrb[3].mxu0 }
  0xf6   :  { %2167 = vst.msk [vmem:[%s4827_s3 + $0x318] sm:$0xff] %vm2067_vm4, %v1970_v20  ;;  %v1398_v26 = vadd.f32 %v2827_v24, %v3840_v10  ;;  %v1392_v28 = vpop.f32.mrb[3].mxu1  ;;  %2068 = vst.msk [vmem:[%s4827_s3] sm:$0xff] %vm2067_vm4, %v1871_v21  ;;  %v903_v29 = vadd.f32 %v3840_v10, %v902_v27 }
  0xf7   :  { %2166 = vst.msk [vmem:[%s4827_s3 + $0x310] sm:$0xff] %vm2067_vm4, %v1969_v22  ;;  %v1393_v30 = vadd.f32 %v3840_v10, %v1392_v28  ;;  %v1874_v31 = vmax.f32 %v908_v25, 0.0 }
  0xf8   :  { %v1972_v32 = vmax.f32 %v1398_v26, 0.0  ;;  %v1873_v33 = vmax.f32 %v903_v29, 0.0  ;;  %v2683_v35 = vpop.f32.mrb[4].mxu0 }
  0xf9   :  { %v1971_v34 = vmax.f32 %v1393_v30, 0.0  ;;  %v2830_v36 = vpop.f32.mrb[4].mxu1  ;;  %2071 = vst.msk [vmem:[%s4827_s3 + $0x18] sm:$0xff] %vm2067_vm4, %v1874_v31  ;;  %v918_v37 = vadd.f32 %v2683_v35, %v3840_v10  ;;  %v912_v39 = vpop.f32.mrb[5].mxu0 }
  0xfa   :  { %2169 = vst.msk [vmem:[%s4827_s3 + $0x328] sm:$0xff] %vm2067_vm4, %v1972_v32  ;;  %v1408_v38 = vadd.f32 %v2830_v36, %v3840_v10  ;;  %v1402_v40 = vpop.f32.mrb[5].mxu1  ;;  %2070 = vst.msk [vmem:[%s4827_s3 + $0x10] sm:$0xff] %vm2067_vm4, %v1873_v33  ;;  %v913_v41 = vadd.f32 %v3840_v10, %v912_v39 }
  0xfb   :  { %2168 = vst.msk [vmem:[%s4827_s3 + $0x320] sm:$0xff] %vm2067_vm4, %v1971_v34  ;;  %v1403_v42 = vadd.f32 %v3840_v10, %v1402_v40  ;;  %v1876_v43 = vmax.f32 %v918_v37, 0.0 }
  0xfc   :  { %v1974_v44 = vmax.f32 %v1408_v38, 0.0  ;;  %v1875_v45 = vmax.f32 %v913_v41, 0.0  ;;  %v2686_v47 = vpop.f32.mrb[6].mxu0 }
  0xfd   :  { %v1973_v46 = vmax.f32 %v1403_v42, 0.0  ;;  %v2833_v48 = vpop.f32.mrb[6].mxu1  ;;  %2073 = vst.msk [vmem:[%s4827_s3 + $0x28] sm:$0xff] %vm2067_vm4, %v1876_v43  ;;  %v928_v49 = vadd.f32 %v2686_v47, %v3840_v10  ;;  %v922_v51 = vpop.f32.mrb[7].mxu0 }
  0xfe   :  { %2171 = vst.msk [vmem:[%s4827_s3 + $0x338] sm:$0xff] %vm2067_vm4, %v1974_v44  ;;  %v1418_v50 = vadd.f32 %v2833_v48, %v3840_v10  ;;  %v1412_v52 = vpop.f32.mrb[7].mxu1  ;;  %2072 = vst.msk [vmem:[%s4827_s3 + $0x20] sm:$0xff] %vm2067_vm4, %v1875_v45  ;;  %v923_v53 = vadd.f32 %v3840_v10, %v922_v51 }
  0xff   :  { %2170 = vst.msk [vmem:[%s4827_s3 + $0x330] sm:$0xff] %vm2067_vm4, %v1973_v46  ;;  %v1413_v54 = vadd.f32 %v3840_v10, %v1412_v52  ;;  %v1878_v55 = vmax.f32 %v928_v49, 0.0 }
 0x100   :  { %v1976_v56 = vmax.f32 %v1418_v50, 0.0  ;;  %v1877_v57 = vmax.f32 %v923_v53, 0.0  ;;  %v2689_v59 = vpop.f32.mrb[8].mxu0 }
 0x101   :  { %v1975_v58 = vmax.f32 %v1413_v54, 0.0  ;;  %v2836_v60 = vpop.f32.mrb[8].mxu1  ;;  %2075 = vst.msk [vmem:[%s4827_s3 + $0x38] sm:$0xff] %vm2067_vm4, %v1878_v55  ;;  %v938_v61 = vadd.f32 %v2689_v59, %v3840_v10  ;;  %v932_v63 = vpop.f32.mrb[9].mxu0 }
 0x102   :  { %2173 = vst.msk [vmem:[%s4827_s3 + $0x348] sm:$0xff] %vm2067_vm4, %v1976_v56  ;;  %v1428_v62 = vadd.f32 %v2836_v60, %v3840_v10  ;;  %v1422_v0 = vpop.f32.mrb[9].mxu1  ;;  %2074 = vst.msk [vmem:[%s4827_s3 + $0x30] sm:$0xff] %vm2067_vm4, %v1877_v57  ;;  %v933_v1 = vadd.f32 %v3840_v10, %v932_v63 }
 0x103   :  { %2172 = vst.msk [vmem:[%s4827_s3 + $0x340] sm:$0xff] %vm2067_vm4, %v1975_v58  ;;  %v1423_v2 = vadd.f32 %v3840_v10, %v1422_v0  ;;  %v1880_v3 = vmax.f32 %v938_v61, 0.0 }
 0x104   :  { %v1978_v4 = vmax.f32 %v1428_v62, 0.0  ;;  %v1879_v5 = vmax.f32 %v933_v1, 0.0  ;;  %v2692_v7 = vpop.f32.mrb[10].mxu0 }
 0x105   :  { %v1977_v6 = vmax.f32 %v1423_v2, 0.0  ;;  %v2839_v8 = vpop.f32.mrb[10].mxu1  ;;  %2077 = vst.msk [vmem:[%s4827_s3 + $0x48] sm:$0xff] %vm2067_vm4, %v1880_v3  ;;  %v948_v9 = vadd.f32 %v2692_v7, %v3840_v10  ;;  %v942_v12 = vpop.f32.mrb[11].mxu0 }
 0x106   :  { %2175 = vst.msk [vmem:[%s4827_s3 + $0x358] sm:$0xff] %vm2067_vm4, %v1978_v4  ;;  %v1438_v11 = vadd.f32 %v2839_v8, %v3840_v10  ;;  %v1432_v13 = vpop.f32.mrb[11].mxu1  ;;  %2076 = vst.msk [vmem:[%s4827_s3 + $0x40] sm:$0xff] %vm2067_vm4, %v1879_v5  ;;  %v943_v14 = vadd.f32 %v3840_v10, %v942_v12 }
 0x107   :  { %2174 = vst.msk [vmem:[%s4827_s3 + $0x350] sm:$0xff] %vm2067_vm4, %v1977_v6  ;;  %v1433_v15 = vadd.f32 %v3840_v10, %v1432_v13  ;;  %v1882_v16 = vmax.f32 %v948_v9, 0.0 }
 0x108   :  { %v1980_v17 = vmax.f32 %v1438_v11, 0.0  ;;  %v1881_v18 = vmax.f32 %v943_v14, 0.0  ;;  %v2695_v20 = vpop.f32.mrb[12].mxu0 }
 0x109   :  { %v1979_v19 = vmax.f32 %v1433_v15, 0.0  ;;  %v2842_v21 = vpop.f32.mrb[12].mxu1  ;;  %2079 = vst.msk [vmem:[%s4827_s3 + $0x58] sm:$0xff] %vm2067_vm4, %v1882_v16  ;;  %v958_v22 = vadd.f32 %v2695_v20, %v3840_v10  ;;  %v952_v24 = vpop.f32.mrb[13].mxu0 }
 0x10a   :  { %2177 = vst.msk [vmem:[%s4827_s3 + $0x368] sm:$0xff] %vm2067_vm4, %v1980_v17  ;;  %v1448_v23 = vadd.f32 %v2842_v21, %v3840_v10  ;;  %v1442_v25 = vpop.f32.mrb[13].mxu1  ;;  %2078 = vst.msk [vmem:[%s4827_s3 + $0x50] sm:$0xff] %vm2067_vm4, %v1881_v18  ;;  %v953_v26 = vadd.f32 %v3840_v10, %v952_v24 }
 0x10b   :  { %2176 = vst.msk [vmem:[%s4827_s3 + $0x360] sm:$0xff] %vm2067_vm4, %v1979_v19  ;;  %v1443_v27 = vadd.f32 %v3840_v10, %v1442_v25  ;;  %v1884_v28 = vmax.f32 %v958_v22, 0.0 }
 0x10c   :  { %v1982_v29 = vmax.f32 %v1448_v23, 0.0  ;;  %v1883_v30 = vmax.f32 %v953_v26, 0.0  ;;  %v2698_v32 = vpop.f32.mrb[14].mxu0 }
 0x10d   :  { %v1981_v31 = vmax.f32 %v1443_v27, 0.0  ;;  %v2845_v33 = vpop.f32.mrb[14].mxu1  ;;  %2081 = vst.msk [vmem:[%s4827_s3 + $0x68] sm:$0xff] %vm2067_vm4, %v1884_v28  ;;  %v968_v34 = vadd.f32 %v2698_v32, %v3840_v10  ;;  %v962_v36 = vpop.f32.mrb[15].mxu0 }
 0x10e   :  { %2179 = vst.msk [vmem:[%s4827_s3 + $0x378] sm:$0xff] %vm2067_vm4, %v1982_v29  ;;  %v1458_v35 = vadd.f32 %v2845_v33, %v3840_v10  ;;  %v1452_v37 = vpop.f32.mrb[15].mxu1  ;;  %2080 = vst.msk [vmem:[%s4827_s3 + $0x60] sm:$0xff] %vm2067_vm4, %v1883_v30  ;;  %v963_v38 = vadd.f32 %v3840_v10, %v962_v36 }
 0x10f   :  { %2178 = vst.msk [vmem:[%s4827_s3 + $0x370] sm:$0xff] %vm2067_vm4, %v1981_v31  ;;  %v1453_v39 = vadd.f32 %v3840_v10, %v1452_v37  ;;  %v1886_v40 = vmax.f32 %v968_v34, 0.0 }
 0x110   :  { %v1984_v41 = vmax.f32 %v1458_v35, 0.0  ;;  %v1885_v42 = vmax.f32 %v963_v38, 0.0  ;;  %v2701_v44 = vpop.f32.mrb[16].mxu0 }
 0x111   :  { %v1983_v43 = vmax.f32 %v1453_v39, 0.0  ;;  %v2848_v45 = vpop.f32.mrb[16].mxu1  ;;  %2083 = vst.msk [vmem:[%s4827_s3 + $0x78] sm:$0xff] %vm2067_vm4, %v1886_v40  ;;  %v978_v46 = vadd.f32 %v2701_v44, %v3840_v10  ;;  %v972_v48 = vpop.f32.mrb[17].mxu0 }
 0x112   :  { %2181 = vst.msk [vmem:[%s4827_s3 + $0x388] sm:$0xff] %vm2067_vm4, %v1984_v41  ;;  %v1468_v47 = vadd.f32 %v2848_v45, %v3840_v10  ;;  %v1462_v49 = vpop.f32.mrb[17].mxu1  ;;  %2082 = vst.msk [vmem:[%s4827_s3 + $0x70] sm:$0xff] %vm2067_vm4, %v1885_v42  ;;  %v973_v50 = vadd.f32 %v3840_v10, %v972_v48 }
 0x113   :  { %2180 = vst.msk [vmem:[%s4827_s3 + $0x380] sm:$0xff] %vm2067_vm4, %v1983_v43  ;;  %v1463_v51 = vadd.f32 %v3840_v10, %v1462_v49  ;;  %v1888_v52 = vmax.f32 %v978_v46, 0.0 }
 0x114   :  { %v1986_v53 = vmax.f32 %v1468_v47, 0.0  ;;  %v1887_v54 = vmax.f32 %v973_v50, 0.0  ;;  %v2704_v56 = vpop.f32.mrb[18].mxu0 }
 0x115   :  { %v1985_v55 = vmax.f32 %v1463_v51, 0.0  ;;  %v2851_v57 = vpop.f32.mrb[18].mxu1  ;;  %2085 = vst.msk [vmem:[%s4827_s3 + $0x88] sm:$0xff] %vm2067_vm4, %v1888_v52  ;;  %v988_v58 = vadd.f32 %v2704_v56, %v3840_v10  ;;  %v982_v60 = vpop.f32.mrb[19].mxu0 }
 0x116   :  { %2183 = vst.msk [vmem:[%s4827_s3 + $0x398] sm:$0xff] %vm2067_vm4, %v1986_v53  ;;  %v1478_v59 = vadd.f32 %v2851_v57, %v3840_v10  ;;  %v1472_v61 = vpop.f32.mrb[19].mxu1  ;;  %2084 = vst.msk [vmem:[%s4827_s3 + $0x80] sm:$0xff] %vm2067_vm4, %v1887_v54  ;;  %v983_v62 = vadd.f32 %v3840_v10, %v982_v60 }
 0x117   :  { %2182 = vst.msk [vmem:[%s4827_s3 + $0x390] sm:$0xff] %vm2067_vm4, %v1985_v55  ;;  %v1473_v63 = vadd.f32 %v3840_v10, %v1472_v61  ;;  %v1890_v0 = vmax.f32 %v988_v58, 0.0 }
 0x118   :  { %v1988_v1 = vmax.f32 %v1478_v59, 0.0  ;;  %v1889_v2 = vmax.f32 %v983_v62, 0.0  ;;  %v2707_v4 = vpop.f32.mrb[20].mxu0 }
 0x119   :  { %v1987_v3 = vmax.f32 %v1473_v63, 0.0  ;;  %v2854_v5 = vpop.f32.mrb[20].mxu1  ;;  %2087 = vst.msk [vmem:[%s4827_s3 + $0x98] sm:$0xff] %vm2067_vm4, %v1890_v0  ;;  %v998_v6 = vadd.f32 %v2707_v4, %v3840_v10  ;;  %v992_v8 = vpop.f32.mrb[21].mxu0 }
 0x11a   :  { %2185 = vst.msk [vmem:[%s4827_s3 + $0x3a8] sm:$0xff] %vm2067_vm4, %v1988_v1  ;;  %v1488_v7 = vadd.f32 %v2854_v5, %v3840_v10  ;;  %v1482_v9 = vpop.f32.mrb[21].mxu1  ;;  %2086 = vst.msk [vmem:[%s4827_s3 + $0x90] sm:$0xff] %vm2067_vm4, %v1889_v2  ;;  %v993_v11 = vadd.f32 %v3840_v10, %v992_v8 }
 0x11b   :  { %2184 = vst.msk [vmem:[%s4827_s3 + $0x3a0] sm:$0xff] %vm2067_vm4, %v1987_v3  ;;  %v1483_v12 = vadd.f32 %v3840_v10, %v1482_v9  ;;  %v1892_v13 = vmax.f32 %v998_v6, 0.0 }
 0x11c   :  { %v1990_v14 = vmax.f32 %v1488_v7, 0.0  ;;  %v1891_v15 = vmax.f32 %v993_v11, 0.0  ;;  %v2710_v17 = vpop.f32.mrb[22].mxu0 }
 0x11d   :  { %v1989_v16 = vmax.f32 %v1483_v12, 0.0  ;;  %v2857_v18 = vpop.f32.mrb[22].mxu1  ;;  %2089 = vst.msk [vmem:[%s4827_s3 + $0xa8] sm:$0xff] %vm2067_vm4, %v1892_v13  ;;  %v1008_v19 = vadd.f32 %v2710_v17, %v3840_v10  ;;  %v1002_v21 = vpop.f32.mrb[23].mxu0 }
 0x11e   :  { %2187 = vst.msk [vmem:[%s4827_s3 + $0x3b8] sm:$0xff] %vm2067_vm4, %v1990_v14  ;;  %v1498_v20 = vadd.f32 %v2857_v18, %v3840_v10  ;;  %v1492_v22 = vpop.f32.mrb[23].mxu1  ;;  %2088 = vst.msk [vmem:[%s4827_s3 + $0xa0] sm:$0xff] %vm2067_vm4, %v1891_v15  ;;  %v1003_v23 = vadd.f32 %v3840_v10, %v1002_v21 }
 0x11f   :  { %2186 = vst.msk [vmem:[%s4827_s3 + $0x3b0] sm:$0xff] %vm2067_vm4, %v1989_v16  ;;  %v1493_v24 = vadd.f32 %v3840_v10, %v1492_v22  ;;  %v1894_v25 = vmax.f32 %v1008_v19, 0.0 }
 0x120   :  { %v1992_v26 = vmax.f32 %v1498_v20, 0.0  ;;  %v1893_v27 = vmax.f32 %v1003_v23, 0.0  ;;  %v2713_v29 = vpop.f32.mrb[24].mxu0 }
 0x121   :  { %v1991_v28 = vmax.f32 %v1493_v24, 0.0  ;;  %v2860_v30 = vpop.f32.mrb[24].mxu1  ;;  %2091 = vst.msk [vmem:[%s4827_s3 + $0xb8] sm:$0xff] %vm2067_vm4, %v1894_v25  ;;  %v1018_v31 = vadd.f32 %v2713_v29, %v3840_v10  ;;  %v1012_v33 = vpop.f32.mrb[25].mxu0 }
 0x122   :  { %2189 = vst.msk [vmem:[%s4827_s3 + $0x3c8] sm:$0xff] %vm2067_vm4, %v1992_v26  ;;  %v1508_v32 = vadd.f32 %v2860_v30, %v3840_v10  ;;  %v1502_v34 = vpop.f32.mrb[25].mxu1  ;;  %2090 = vst.msk [vmem:[%s4827_s3 + $0xb0] sm:$0xff] %vm2067_vm4, %v1893_v27  ;;  %v1013_v35 = vadd.f32 %v3840_v10, %v1012_v33 }
 0x123   :  { %2188 = vst.msk [vmem:[%s4827_s3 + $0x3c0] sm:$0xff] %vm2067_vm4, %v1991_v28  ;;  %v1503_v36 = vadd.f32 %v3840_v10, %v1502_v34  ;;  %v1896_v37 = vmax.f32 %v1018_v31, 0.0 }
 0x124   :  { %v1994_v38 = vmax.f32 %v1508_v32, 0.0  ;;  %v1895_v39 = vmax.f32 %v1013_v35, 0.0  ;;  %v2716_v41 = vpop.f32.mrb[26].mxu0 }
 0x125   :  { %v1993_v40 = vmax.f32 %v1503_v36, 0.0  ;;  %v2863_v42 = vpop.f32.mrb[26].mxu1  ;;  %2093 = vst.msk [vmem:[%s4827_s3 + $0xc8] sm:$0xff] %vm2067_vm4, %v1896_v37  ;;  %v1028_v43 = vadd.f32 %v2716_v41, %v3840_v10  ;;  %v1022_v45 = vpop.f32.mrb[27].mxu0 }
 0x126   :  { %2191 = vst.msk [vmem:[%s4827_s3 + $0x3d8] sm:$0xff] %vm2067_vm4, %v1994_v38  ;;  %v1518_v44 = vadd.f32 %v2863_v42, %v3840_v10  ;;  %v1512_v46 = vpop.f32.mrb[27].mxu1  ;;  %2092 = vst.msk [vmem:[%s4827_s3 + $0xc0] sm:$0xff] %vm2067_vm4, %v1895_v39  ;;  %v1023_v47 = vadd.f32 %v3840_v10, %v1022_v45 }
 0x127   :  { %2190 = vst.msk [vmem:[%s4827_s3 + $0x3d0] sm:$0xff] %vm2067_vm4, %v1993_v40  ;;  %v1513_v48 = vadd.f32 %v3840_v10, %v1512_v46  ;;  %v1898_v49 = vmax.f32 %v1028_v43, 0.0 }
 0x128   :  { %v1996_v50 = vmax.f32 %v1518_v44, 0.0  ;;  %v1897_v51 = vmax.f32 %v1023_v47, 0.0  ;;  %v2719_v53 = vpop.f32.mrb[28].mxu0 }
 0x129   :  { %v1995_v52 = vmax.f32 %v1513_v48, 0.0  ;;  %v2866_v54 = vpop.f32.mrb[28].mxu1  ;;  %2095 = vst.msk [vmem:[%s4827_s3 + $0xd8] sm:$0xff] %vm2067_vm4, %v1898_v49  ;;  %v1038_v55 = vadd.f32 %v2719_v53, %v3840_v10  ;;  %v1032_v57 = vpop.f32.mrb[29].mxu0 }
 0x12a   :  { %2193 = vst.msk [vmem:[%s4827_s3 + $0x3e8] sm:$0xff] %vm2067_vm4, %v1996_v50  ;;  %v1528_v56 = vadd.f32 %v2866_v54, %v3840_v10  ;;  %v1522_v58 = vpop.f32.mrb[29].mxu1  ;;  %2094 = vst.msk [vmem:[%s4827_s3 + $0xd0] sm:$0xff] %vm2067_vm4, %v1897_v51  ;;  %v1033_v59 = vadd.f32 %v3840_v10, %v1032_v57 }
 0x12b   :  { %2192 = vst.msk [vmem:[%s4827_s3 + $0x3e0] sm:$0xff] %vm2067_vm4, %v1995_v52  ;;  %v1523_v60 = vadd.f32 %v3840_v10, %v1522_v58  ;;  %v1900_v61 = vmax.f32 %v1038_v55, 0.0 }
 0x12c   :  { %v1998_v62 = vmax.f32 %v1528_v56, 0.0  ;;  %v1899_v63 = vmax.f32 %v1033_v59, 0.0  ;;  %v2722_v1 = vpop.f32.mrb[30].mxu0 }
 0x12d   :  { %v1997_v0 = vmax.f32 %v1523_v60, 0.0  ;;  %v2869_v2 = vpop.f32.mrb[30].mxu1  ;;  %2097 = vst.msk [vmem:[%s4827_s3 + $0xe8] sm:$0xff] %vm2067_vm4, %v1900_v61  ;;  %v1048_v3 = vadd.f32 %v2722_v1, %v3840_v10  ;;  %v1042_v5 = vpop.f32.mrb[31].mxu0 }
 0x12e   :  { %2195 = vst.msk [vmem:[%s4827_s3 + $0x3f8] sm:$0xff] %vm2067_vm4, %v1998_v62  ;;  %v1538_v4 = vadd.f32 %v2869_v2, %v3840_v10  ;;  %v1532_v6 = vpop.f32.mrb[31].mxu1  ;;  %2096 = vst.msk [vmem:[%s4827_s3 + $0xe0] sm:$0xff] %vm2067_vm4, %v1899_v63  ;;  %v1043_v7 = vadd.f32 %v3840_v10, %v1042_v5 }
 0x12f   :  { %2194 = vst.msk [vmem:[%s4827_s3 + $0x3f0] sm:$0xff] %vm2067_vm4, %v1997_v0  ;;  %v1533_v8 = vadd.f32 %v3840_v10, %v1532_v6  ;;  %v1902_v9 = vmax.f32 %v1048_v3, 0.0 }
 0x130   :  { %v2000_v11 = vmax.f32 %v1538_v4, 0.0  ;;  %v1901_v12 = vmax.f32 %v1043_v7, 0.0  ;;  %v2725_v14 = vpop.f32.mrb[32].mxu0 }
 0x131   :  { %v1999_v13 = vmax.f32 %v1533_v8, 0.0  ;;  %v2872_v15 = vpop.f32.mrb[32].mxu1  ;;  %2099 = vst.msk [vmem:[%s4827_s3 + $0xf8] sm:$0xff] %vm2067_vm4, %v1902_v9  ;;  %v1058_v16 = vadd.f32 %v2725_v14, %v3840_v10  ;;  %v1052_v18 = vpop.f32.mrb[33].mxu0 }
 0x132   :  { %2197 = vst.msk [vmem:[%s4827_s3 + $0x408] sm:$0xff] %vm2067_vm4, %v2000_v11  ;;  %v1548_v17 = vadd.f32 %v2872_v15, %v3840_v10  ;;  %v1542_v19 = vpop.f32.mrb[33].mxu1  ;;  %2098 = vst.msk [vmem:[%s4827_s3 + $0xf0] sm:$0xff] %vm2067_vm4, %v1901_v12  ;;  %v1053_v20 = vadd.f32 %v3840_v10, %v1052_v18 }
 0x133   :  { %2196 = vst.msk [vmem:[%s4827_s3 + $0x400] sm:$0xff] %vm2067_vm4, %v1999_v13  ;;  %v1543_v21 = vadd.f32 %v3840_v10, %v1542_v19  ;;  %v1904_v22 = vmax.f32 %v1058_v16, 0.0 }
 0x134   :  { %v2002_v23 = vmax.f32 %v1548_v17, 0.0  ;;  %v1903_v24 = vmax.f32 %v1053_v20, 0.0  ;;  %v2728_v26 = vpop.f32.mrb[34].mxu0 }
 0x135   :  { %v2001_v25 = vmax.f32 %v1543_v21, 0.0  ;;  %v2875_v27 = vpop.f32.mrb[34].mxu1  ;;  %2101 = vst.msk [vmem:[%s4827_s3 + $0x108] sm:$0xff] %vm2067_vm4, %v1904_v22  ;;  %v1068_v28 = vadd.f32 %v2728_v26, %v3840_v10  ;;  %v1062_v30 = vpop.f32.mrb[35].mxu0 }
 0x136   :  { %2199 = vst.msk [vmem:[%s4827_s3 + $0x418] sm:$0xff] %vm2067_vm4, %v2002_v23  ;;  %v1558_v29 = vadd.f32 %v2875_v27, %v3840_v10  ;;  %v1552_v31 = vpop.f32.mrb[35].mxu1  ;;  %2100 = vst.msk [vmem:[%s4827_s3 + $0x100] sm:$0xff] %vm2067_vm4, %v1903_v24  ;;  %v1063_v32 = vadd.f32 %v3840_v10, %v1062_v30 }
 0x137   :  { %2198 = vst.msk [vmem:[%s4827_s3 + $0x410] sm:$0xff] %vm2067_vm4, %v2001_v25  ;;  %v1553_v33 = vadd.f32 %v3840_v10, %v1552_v31  ;;  %v1906_v34 = vmax.f32 %v1068_v28, 0.0 }
 0x138   :  { %v2004_v35 = vmax.f32 %v1558_v29, 0.0  ;;  %v1905_v36 = vmax.f32 %v1063_v32, 0.0  ;;  %v2731_v38 = vpop.f32.mrb[36].mxu0 }
 0x139   :  { %v2003_v37 = vmax.f32 %v1553_v33, 0.0  ;;  %v2878_v39 = vpop.f32.mrb[36].mxu1  ;;  %2103 = vst.msk [vmem:[%s4827_s3 + $0x118] sm:$0xff] %vm2067_vm4, %v1906_v34  ;;  %v1078_v40 = vadd.f32 %v2731_v38, %v3840_v10  ;;  %v1072_v42 = vpop.f32.mrb[37].mxu0 }
 0x13a   :  { %2201 = vst.msk [vmem:[%s4827_s3 + $0x428] sm:$0xff] %vm2067_vm4, %v2004_v35  ;;  %v1568_v41 = vadd.f32 %v2878_v39, %v3840_v10  ;;  %v1562_v43 = vpop.f32.mrb[37].mxu1  ;;  %2102 = vst.msk [vmem:[%s4827_s3 + $0x110] sm:$0xff] %vm2067_vm4, %v1905_v36  ;;  %v1073_v44 = vadd.f32 %v3840_v10, %v1072_v42 }
 0x13b   :  { %2200 = vst.msk [vmem:[%s4827_s3 + $0x420] sm:$0xff] %vm2067_vm4, %v2003_v37  ;;  %v1563_v45 = vadd.f32 %v3840_v10, %v1562_v43  ;;  %v1908_v46 = vmax.f32 %v1078_v40, 0.0 }
 0x13c   :  { %v2006_v47 = vmax.f32 %v1568_v41, 0.0  ;;  %v1907_v48 = vmax.f32 %v1073_v44, 0.0  ;;  %v2734_v50 = vpop.f32.mrb[38].mxu0 }
 0x13d   :  { %v2005_v49 = vmax.f32 %v1563_v45, 0.0  ;;  %v2881_v51 = vpop.f32.mrb[38].mxu1  ;;  %2105 = vst.msk [vmem:[%s4827_s3 + $0x128] sm:$0xff] %vm2067_vm4, %v1908_v46  ;;  %v1088_v52 = vadd.f32 %v2734_v50, %v3840_v10  ;;  %v1082_v54 = vpop.f32.mrb[39].mxu0 }
 0x13e   :  { %2203 = vst.msk [vmem:[%s4827_s3 + $0x438] sm:$0xff] %vm2067_vm4, %v2006_v47  ;;  %v1578_v53 = vadd.f32 %v2881_v51, %v3840_v10  ;;  %v1572_v55 = vpop.f32.mrb[39].mxu1  ;;  %2104 = vst.msk [vmem:[%s4827_s3 + $0x120] sm:$0xff] %vm2067_vm4, %v1907_v48  ;;  %v1083_v56 = vadd.f32 %v3840_v10, %v1082_v54 }
 0x13f   :  { %2202 = vst.msk [vmem:[%s4827_s3 + $0x430] sm:$0xff] %vm2067_vm4, %v2005_v49  ;;  %v1573_v57 = vadd.f32 %v3840_v10, %v1572_v55  ;;  %v1910_v58 = vmax.f32 %v1088_v52, 0.0 }
 0x140   :  { %v2008_v59 = vmax.f32 %v1578_v53, 0.0  ;;  %v1909_v60 = vmax.f32 %v1083_v56, 0.0  ;;  %v2737_v62 = vpop.f32.mrb[40].mxu0 }
 0x141   :  { %v2007_v61 = vmax.f32 %v1573_v57, 0.0  ;;  %v2884_v63 = vpop.f32.mrb[40].mxu1  ;;  %2107 = vst.msk [vmem:[%s4827_s3 + $0x138] sm:$0xff] %vm2067_vm4, %v1910_v58  ;;  %v1098_v0 = vadd.f32 %v2737_v62, %v3840_v10  ;;  %v1092_v2 = vpop.f32.mrb[41].mxu0 }
 0x142   :  { %2205 = vst.msk [vmem:[%s4827_s3 + $0x448] sm:$0xff] %vm2067_vm4, %v2008_v59  ;;  %v1588_v1 = vadd.f32 %v2884_v63, %v3840_v10  ;;  %v1582_v3 = vpop.f32.mrb[41].mxu1  ;;  %2106 = vst.msk [vmem:[%s4827_s3 + $0x130] sm:$0xff] %vm2067_vm4, %v1909_v60  ;;  %v1093_v4 = vadd.f32 %v3840_v10, %v1092_v2 }
 0x143   :  { %2204 = vst.msk [vmem:[%s4827_s3 + $0x440] sm:$0xff] %vm2067_vm4, %v2007_v61  ;;  %v1583_v5 = vadd.f32 %v3840_v10, %v1582_v3  ;;  %v1912_v6 = vmax.f32 %v1098_v0, 0.0 }
 0x144   :  { %v2010_v7 = vmax.f32 %v1588_v1, 0.0  ;;  %v1911_v8 = vmax.f32 %v1093_v4, 0.0  ;;  %v2740_v11 = vpop.f32.mrb[42].mxu0 }
 0x145   :  { %v2009_v9 = vmax.f32 %v1583_v5, 0.0  ;;  %v2887_v12 = vpop.f32.mrb[42].mxu1  ;;  %2109 = vst.msk [vmem:[%s4827_s3 + $0x148] sm:$0xff] %vm2067_vm4, %v1912_v6  ;;  %v1108_v13 = vadd.f32 %v2740_v11, %v3840_v10  ;;  %v1102_v15 = vpop.f32.mrb[43].mxu0 }
 0x146   :  { %2207 = vst.msk [vmem:[%s4827_s3 + $0x458] sm:$0xff] %vm2067_vm4, %v2010_v7  ;;  %v1598_v14 = vadd.f32 %v2887_v12, %v3840_v10  ;;  %v1592_v16 = vpop.f32.mrb[43].mxu1  ;;  %2108 = vst.msk [vmem:[%s4827_s3 + $0x140] sm:$0xff] %vm2067_vm4, %v1911_v8  ;;  %v1103_v17 = vadd.f32 %v3840_v10, %v1102_v15 }
 0x147   :  { %2206 = vst.msk [vmem:[%s4827_s3 + $0x450] sm:$0xff] %vm2067_vm4, %v2009_v9  ;;  %v1593_v18 = vadd.f32 %v3840_v10, %v1592_v16  ;;  %v1914_v19 = vmax.f32 %v1108_v13, 0.0 }
 0x148   :  { %v2012_v20 = vmax.f32 %v1598_v14, 0.0  ;;  %v1913_v21 = vmax.f32 %v1103_v17, 0.0  ;;  %v2743_v23 = vpop.f32.mrb[44].mxu0 }
 0x149   :  { %v2011_v22 = vmax.f32 %v1593_v18, 0.0  ;;  %v2890_v24 = vpop.f32.mrb[44].mxu1  ;;  %2111 = vst.msk [vmem:[%s4827_s3 + $0x158] sm:$0xff] %vm2067_vm4, %v1914_v19  ;;  %v1118_v25 = vadd.f32 %v2743_v23, %v3840_v10  ;;  %v1112_v27 = vpop.f32.mrb[45].mxu0 }
 0x14a   :  { %2209 = vst.msk [vmem:[%s4827_s3 + $0x468] sm:$0xff] %vm2067_vm4, %v2012_v20  ;;  %v1608_v26 = vadd.f32 %v2890_v24, %v3840_v10  ;;  %v1602_v28 = vpop.f32.mrb[45].mxu1  ;;  %2110 = vst.msk [vmem:[%s4827_s3 + $0x150] sm:$0xff] %vm2067_vm4, %v1913_v21  ;;  %v1113_v29 = vadd.f32 %v3840_v10, %v1112_v27 }
 0x14b   :  { %2208 = vst.msk [vmem:[%s4827_s3 + $0x460] sm:$0xff] %vm2067_vm4, %v2011_v22  ;;  %v1603_v30 = vadd.f32 %v3840_v10, %v1602_v28  ;;  %v1916_v31 = vmax.f32 %v1118_v25, 0.0 }
 0x14c   :  { %v2014_v32 = vmax.f32 %v1608_v26, 0.0  ;;  %v1915_v33 = vmax.f32 %v1113_v29, 0.0  ;;  %v2746_v35 = vpop.f32.mrb[46].mxu0 }
 0x14d   :  { %v2013_v34 = vmax.f32 %v1603_v30, 0.0  ;;  %v2893_v36 = vpop.f32.mrb[46].mxu1  ;;  %2113 = vst.msk [vmem:[%s4827_s3 + $0x168] sm:$0xff] %vm2067_vm4, %v1916_v31  ;;  %v1128_v37 = vadd.f32 %v2746_v35, %v3840_v10  ;;  %v1122_v39 = vpop.f32.mrb[47].mxu0 }
 0x14e   :  { %2211 = vst.msk [vmem:[%s4827_s3 + $0x478] sm:$0xff] %vm2067_vm4, %v2014_v32  ;;  %v1618_v38 = vadd.f32 %v2893_v36, %v3840_v10  ;;  %v1612_v40 = vpop.f32.mrb[47].mxu1  ;;  %2112 = vst.msk [vmem:[%s4827_s3 + $0x160] sm:$0xff] %vm2067_vm4, %v1915_v33  ;;  %v1123_v41 = vadd.f32 %v3840_v10, %v1122_v39 }
 0x14f   :  { %2210 = vst.msk [vmem:[%s4827_s3 + $0x470] sm:$0xff] %vm2067_vm4, %v2013_v34  ;;  %v1613_v42 = vadd.f32 %v3840_v10, %v1612_v40  ;;  %v1918_v43 = vmax.f32 %v1128_v37, 0.0 }
 0x150   :  { %v2016_v44 = vmax.f32 %v1618_v38, 0.0  ;;  %v1917_v45 = vmax.f32 %v1123_v41, 0.0  ;;  %v2749_v47 = vpop.f32.mrb[48].mxu0 }
 0x151   :  { %v2015_v46 = vmax.f32 %v1613_v42, 0.0  ;;  %v2896_v48 = vpop.f32.mrb[48].mxu1  ;;  %2115 = vst.msk [vmem:[%s4827_s3 + $0x178] sm:$0xff] %vm2067_vm4, %v1918_v43  ;;  %v1138_v49 = vadd.f32 %v2749_v47, %v3840_v10  ;;  %v1132_v51 = vpop.f32.mrb[49].mxu0 }
 0x152   :  { %2213 = vst.msk [vmem:[%s4827_s3 + $0x488] sm:$0xff] %vm2067_vm4, %v2016_v44  ;;  %v1628_v50 = vadd.f32 %v2896_v48, %v3840_v10  ;;  %v1622_v52 = vpop.f32.mrb[49].mxu1  ;;  %2114 = vst.msk [vmem:[%s4827_s3 + $0x170] sm:$0xff] %vm2067_vm4, %v1917_v45  ;;  %v1133_v53 = vadd.f32 %v3840_v10, %v1132_v51 }
 0x153   :  { %2212 = vst.msk [vmem:[%s4827_s3 + $0x480] sm:$0xff] %vm2067_vm4, %v2015_v46  ;;  %v1623_v54 = vadd.f32 %v3840_v10, %v1622_v52  ;;  %v1920_v55 = vmax.f32 %v1138_v49, 0.0 }
 0x154   :  { %v2018_v56 = vmax.f32 %v1628_v50, 0.0  ;;  %v1919_v57 = vmax.f32 %v1133_v53, 0.0  ;;  %v2752_v59 = vpop.f32.mrb[50].mxu0 }
 0x155   :  { %v2017_v58 = vmax.f32 %v1623_v54, 0.0  ;;  %v2899_v60 = vpop.f32.mrb[50].mxu1  ;;  %2117 = vst.msk [vmem:[%s4827_s3 + $0x188] sm:$0xff] %vm2067_vm4, %v1920_v55  ;;  %v1148_v61 = vadd.f32 %v2752_v59, %v3840_v10  ;;  %v1142_v63 = vpop.f32.mrb[51].mxu0 }
 0x156   :  { %2215 = vst.msk [vmem:[%s4827_s3 + $0x498] sm:$0xff] %vm2067_vm4, %v2018_v56  ;;  %v1638_v62 = vadd.f32 %v2899_v60, %v3840_v10  ;;  %v1632_v0 = vpop.f32.mrb[51].mxu1  ;;  %2116 = vst.msk [vmem:[%s4827_s3 + $0x180] sm:$0xff] %vm2067_vm4, %v1919_v57  ;;  %v1143_v1 = vadd.f32 %v3840_v10, %v1142_v63 }
 0x157   :  { %2214 = vst.msk [vmem:[%s4827_s3 + $0x490] sm:$0xff] %vm2067_vm4, %v2017_v58  ;;  %v1633_v2 = vadd.f32 %v3840_v10, %v1632_v0  ;;  %v1922_v3 = vmax.f32 %v1148_v61, 0.0 }
 0x158   :  { %v2020_v4 = vmax.f32 %v1638_v62, 0.0  ;;  %v1921_v5 = vmax.f32 %v1143_v1, 0.0  ;;  %v2755_v7 = vpop.f32.mrb[52].mxu0 }
 0x159   :  { %v2019_v6 = vmax.f32 %v1633_v2, 0.0  ;;  %v2902_v8 = vpop.f32.mrb[52].mxu1  ;;  %2119 = vst.msk [vmem:[%s4827_s3 + $0x198] sm:$0xff] %vm2067_vm4, %v1922_v3  ;;  %v1158_v9 = vadd.f32 %v2755_v7, %v3840_v10  ;;  %v1152_v12 = vpop.f32.mrb[53].mxu0 }
 0x15a   :  { %2217 = vst.msk [vmem:[%s4827_s3 + $0x4a8] sm:$0xff] %vm2067_vm4, %v2020_v4  ;;  %v1648_v11 = vadd.f32 %v2902_v8, %v3840_v10  ;;  %v1642_v13 = vpop.f32.mrb[53].mxu1  ;;  %2118 = vst.msk [vmem:[%s4827_s3 + $0x190] sm:$0xff] %vm2067_vm4, %v1921_v5  ;;  %v1153_v14 = vadd.f32 %v3840_v10, %v1152_v12 }
 0x15b   :  { %2216 = vst.msk [vmem:[%s4827_s3 + $0x4a0] sm:$0xff] %vm2067_vm4, %v2019_v6  ;;  %v1643_v15 = vadd.f32 %v3840_v10, %v1642_v13  ;;  %v1924_v16 = vmax.f32 %v1158_v9, 0.0 }
 0x15c   :  { %v2022_v17 = vmax.f32 %v1648_v11, 0.0  ;;  %v1923_v18 = vmax.f32 %v1153_v14, 0.0  ;;  %v2758_v20 = vpop.f32.mrb[54].mxu0 }
 0x15d   :  { %v2021_v19 = vmax.f32 %v1643_v15, 0.0  ;;  %v2905_v21 = vpop.f32.mrb[54].mxu1  ;;  %2121 = vst.msk [vmem:[%s4827_s3 + $0x1a8] sm:$0xff] %vm2067_vm4, %v1924_v16  ;;  %v1168_v22 = vadd.f32 %v2758_v20, %v3840_v10  ;;  %v1162_v24 = vpop.f32.mrb[55].mxu0 }
 0x15e   :  { %2219 = vst.msk [vmem:[%s4827_s3 + $0x4b8] sm:$0xff] %vm2067_vm4, %v2022_v17  ;;  %v1658_v23 = vadd.f32 %v2905_v21, %v3840_v10  ;;  %v1652_v25 = vpop.f32.mrb[55].mxu1  ;;  %2120 = vst.msk [vmem:[%s4827_s3 + $0x1a0] sm:$0xff] %vm2067_vm4, %v1923_v18  ;;  %v1163_v26 = vadd.f32 %v3840_v10, %v1162_v24 }
 0x15f   :  { %2218 = vst.msk [vmem:[%s4827_s3 + $0x4b0] sm:$0xff] %vm2067_vm4, %v2021_v19  ;;  %v1653_v27 = vadd.f32 %v3840_v10, %v1652_v25  ;;  %v1926_v28 = vmax.f32 %v1168_v22, 0.0  ;;  %v4474_v19 = vld [vmem:[#allocation2] ss:$0 sm:$0xff] }
 0x160   :  { %v2024_v29 = vmax.f32 %v1658_v23, 0.0  ;;  %v1925_v30 = vmax.f32 %v1163_v26, 0.0  ;;  %v2761_v32 = vpop.f32.mrb[56].mxu0 }
 0x161   :  { %v2023_v31 = vmax.f32 %v1653_v27, 0.0  ;;  %v2908_v33 = vpop.f32.mrb[56].mxu1  ;;  %2123 = vst.msk [vmem:[%s4827_s3 + $0x1b8] sm:$0xff] %vm2067_vm4, %v1926_v28  ;;  %v1178_v34 = vadd.f32 %v2761_v32, %v3840_v10  ;;  %v1172_v36 = vpop.f32.mrb[57].mxu0 }
 0x162   :  { %2221 = vst.msk [vmem:[%s4827_s3 + $0x4c8] sm:$0xff] %vm2067_vm4, %v2024_v29  ;;  %v1668_v35 = vadd.f32 %v2908_v33, %v3840_v10  ;;  %v1662_v37 = vpop.f32.mrb[57].mxu1  ;;  %2122 = vst.msk [vmem:[%s4827_s3 + $0x1b0] sm:$0xff] %vm2067_vm4, %v1925_v30  ;;  %v1173_v38 = vadd.f32 %v3840_v10, %v1172_v36 }
 0x163   :  { %2220 = vst.msk [vmem:[%s4827_s3 + $0x4c0] sm:$0xff] %vm2067_vm4, %v2023_v31  ;;  %v1663_v39 = vadd.f32 %v3840_v10, %v1662_v37  ;;  %v1928_v40 = vmax.f32 %v1178_v34, 0.0 }
 0x164   :  { %v2026_v41 = vmax.f32 %v1668_v35, 0.0  ;;  %v1927_v42 = vmax.f32 %v1173_v38, 0.0  ;;  %v2764_v44 = vpop.f32.mrb[58].mxu0 }
 0x165   :  { %v2025_v43 = vmax.f32 %v1663_v39, 0.0  ;;  %v2911_v45 = vpop.f32.mrb[58].mxu1  ;;  %2125 = vst.msk [vmem:[%s4827_s3 + $0x1c8] sm:$0xff] %vm2067_vm4, %v1928_v40  ;;  %v1188_v46 = vadd.f32 %v2764_v44, %v3840_v10  ;;  %v1182_v48 = vpop.f32.mrb[59].mxu0 }
 0x166   :  { %2223 = vst.msk [vmem:[%s4827_s3 + $0x4d8] sm:$0xff] %vm2067_vm4, %v2026_v41  ;;  %v1678_v47 = vadd.f32 %v2911_v45, %v3840_v10  ;;  %v1672_v49 = vpop.f32.mrb[59].mxu1  ;;  %2124 = vst.msk [vmem:[%s4827_s3 + $0x1c0] sm:$0xff] %vm2067_vm4, %v1927_v42  ;;  %v1183_v50 = vadd.f32 %v3840_v10, %v1182_v48 }
 0x167   :  { %2222 = vst.msk [vmem:[%s4827_s3 + $0x4d0] sm:$0xff] %vm2067_vm4, %v2025_v43  ;;  %v1673_v51 = vadd.f32 %v3840_v10, %v1672_v49  ;;  %v1930_v52 = vmax.f32 %v1188_v46, 0.0 }
 0x168   :  { %v2028_v53 = vmax.f32 %v1678_v47, 0.0  ;;  %v1929_v54 = vmax.f32 %v1183_v50, 0.0  ;;  %v2767_v56 = vpop.f32.mrb[60].mxu0 }
 0x169   :  { %v2027_v55 = vmax.f32 %v1673_v51, 0.0  ;;  %v2914_v57 = vpop.f32.mrb[60].mxu1  ;;  %2127 = vst.msk [vmem:[%s4827_s3 + $0x1d8] sm:$0xff] %vm2067_vm4, %v1930_v52  ;;  %v1198_v58 = vadd.f32 %v2767_v56, %v3840_v10  ;;  %v1192_v60 = vpop.f32.mrb[61].mxu0 }
 0x16a   :  { %2225 = vst.msk [vmem:[%s4827_s3 + $0x4e8] sm:$0xff] %vm2067_vm4, %v2028_v53  ;;  %v1688_v59 = vadd.f32 %v2914_v57, %v3840_v10  ;;  %v1682_v61 = vpop.f32.mrb[61].mxu1  ;;  %2126 = vst.msk [vmem:[%s4827_s3 + $0x1d0] sm:$0xff] %vm2067_vm4, %v1929_v54  ;;  %v1193_v62 = vadd.f32 %v3840_v10, %v1192_v60 }
 0x16b   :  { %2224 = vst.msk [vmem:[%s4827_s3 + $0x4e0] sm:$0xff] %vm2067_vm4, %v2027_v55  ;;  %v1683_v63 = vadd.f32 %v3840_v10, %v1682_v61  ;;  %v1932_v0 = vmax.f32 %v1198_v58, 0.0 }
 0x16c   :  { %v2030_v1 = vmax.f32 %v1688_v59, 0.0  ;;  %v1931_v2 = vmax.f32 %v1193_v62, 0.0  ;;  %v2770_v4 = vpop.f32.mrb[62].mxu0 }
 0x16d   :  { %v2029_v3 = vmax.f32 %v1683_v63, 0.0  ;;  %v2917_v5 = vpop.f32.mrb[62].mxu1  ;;  %2129 = vst.msk [vmem:[%s4827_s3 + $0x1e8] sm:$0xff] %vm2067_vm4, %v1932_v0  ;;  %v1208_v6 = vadd.f32 %v2770_v4, %v3840_v10  ;;  %v1202_v8 = vpop.f32.mrb[63].mxu0 }
 0x16e   :  { %2227 = vst.msk [vmem:[%s4827_s3 + $0x4f8] sm:$0xff] %vm2067_vm4, %v2030_v1  ;;  %v1698_v7 = vadd.f32 %v2917_v5, %v3840_v10  ;;  %v1692_v9 = vpop.f32.mrb[63].mxu1  ;;  %2128 = vst.msk [vmem:[%s4827_s3 + $0x1e0] sm:$0xff] %vm2067_vm4, %v1931_v2  ;;  %v1203_v11 = vadd.f32 %v3840_v10, %v1202_v8 }
 0x16f   :  { %2226 = vst.msk [vmem:[%s4827_s3 + $0x4f0] sm:$0xff] %vm2067_vm4, %v2029_v3  ;;  %v1693_v12 = vadd.f32 %v3840_v10, %v1692_v9  ;;  %v1934_v13 = vmax.f32 %v1208_v6, 0.0 }
 0x170   :  { %v2032_v14 = vmax.f32 %v1698_v7, 0.0  ;;  %v1933_v15 = vmax.f32 %v1203_v11, 0.0  ;;  %v2773_v17 = vpop.f32.mrb[64].mxu0 }
 0x171   :  { %v2031_v16 = vmax.f32 %v1693_v12, 0.0  ;;  %v2920_v18 = vpop.f32.mrb[64].mxu1  ;;  %2131 = vst.msk [vmem:[%s4827_s3 + $0x1f8] sm:$0xff] %vm2067_vm4, %v1934_v13  ;;  %v1218_v10 = vadd.f32 %v4474_v19, %v2773_v17  ;;  %v1212_v21 = vpop.f32.mrb[65].mxu0 }
 0x172   :  { %2229 = vst.msk [vmem:[%s4827_s3 + $0x508] sm:$0xff] %vm2067_vm4, %v2032_v14  ;;  %v1708_v20 = vadd.f32 %v4474_v19, %v2920_v18  ;;  %v1702_v22 = vpop.f32.mrb[65].mxu1  ;;  %2130 = vst.msk [vmem:[%s4827_s3 + $0x1f0] sm:$0xff] %vm2067_vm4, %v1933_v15  ;;  %v1213_v23 = vadd.f32 %v4474_v19, %v1212_v21 }
 0x173   :  { %2228 = vst.msk [vmem:[%s4827_s3 + $0x500] sm:$0xff] %vm2067_vm4, %v2031_v16  ;;  %v1703_v24 = vadd.f32 %v4474_v19, %v1702_v22  ;;  %v1936_v25 = vmax.f32 %v1218_v10, 0.0 }
 0x174   :  { %v2034_v26 = vmax.f32 %v1708_v20, 0.0  ;;  %v1935_v27 = vmax.f32 %v1213_v23, 0.0  ;;  %v2776_v29 = vpop.f32.mrb[66].mxu0 }
 0x175   :  { %v2033_v28 = vmax.f32 %v1703_v24, 0.0  ;;  %v2923_v30 = vpop.f32.mrb[66].mxu1  ;;  %2133 = vst.msk [vmem:[%s4827_s3 + $0x208] sm:$0xff] %vm2067_vm4, %v1936_v25  ;;  %v1228_v31 = vadd.f32 %v4474_v19, %v2776_v29  ;;  %v1222_v33 = vpop.f32.mrb[67].mxu0 }
 0x176   :  { %2231 = vst.msk [vmem:[%s4827_s3 + $0x518] sm:$0xff] %vm2067_vm4, %v2034_v26  ;;  %v1718_v32 = vadd.f32 %v4474_v19, %v2923_v30  ;;  %v1712_v34 = vpop.f32.mrb[67].mxu1  ;;  %2132 = vst.msk [vmem:[%s4827_s3 + $0x200] sm:$0xff] %vm2067_vm4, %v1935_v27  ;;  %v1223_v35 = vadd.f32 %v4474_v19, %v1222_v33 }
 0x177   :  { %2230 = vst.msk [vmem:[%s4827_s3 + $0x510] sm:$0xff] %vm2067_vm4, %v2033_v28  ;;  %v1713_v36 = vadd.f32 %v4474_v19, %v1712_v34  ;;  %v1938_v37 = vmax.f32 %v1228_v31, 0.0 }
 0x178   :  { %v2036_v38 = vmax.f32 %v1718_v32, 0.0  ;;  %v1937_v39 = vmax.f32 %v1223_v35, 0.0  ;;  %v2779_v41 = vpop.f32.mrb[68].mxu0 }
 0x179   :  { %v2035_v40 = vmax.f32 %v1713_v36, 0.0  ;;  %v2926_v42 = vpop.f32.mrb[68].mxu1  ;;  %2135 = vst.msk [vmem:[%s4827_s3 + $0x218] sm:$0xff] %vm2067_vm4, %v1938_v37  ;;  %v1238_v43 = vadd.f32 %v4474_v19, %v2779_v41  ;;  %v1232_v45 = vpop.f32.mrb[69].mxu0 }
 0x17a   :  { %2233 = vst.msk [vmem:[%s4827_s3 + $0x528] sm:$0xff] %vm2067_vm4, %v2036_v38  ;;  %v1728_v44 = vadd.f32 %v4474_v19, %v2926_v42  ;;  %v1722_v46 = vpop.f32.mrb[69].mxu1  ;;  %2134 = vst.msk [vmem:[%s4827_s3 + $0x210] sm:$0xff] %vm2067_vm4, %v1937_v39  ;;  %v1233_v47 = vadd.f32 %v4474_v19, %v1232_v45 }
 0x17b   :  { %2232 = vst.msk [vmem:[%s4827_s3 + $0x520] sm:$0xff] %vm2067_vm4, %v2035_v40  ;;  %v1723_v48 = vadd.f32 %v4474_v19, %v1722_v46  ;;  %v1940_v49 = vmax.f32 %v1238_v43, 0.0 }
 0x17c   :  { %v2038_v50 = vmax.f32 %v1728_v44, 0.0  ;;  %v1939_v51 = vmax.f32 %v1233_v47, 0.0  ;;  %v2782_v53 = vpop.f32.mrb[70].mxu0 }
 0x17d   :  { %v2037_v52 = vmax.f32 %v1723_v48, 0.0  ;;  %v2929_v54 = vpop.f32.mrb[70].mxu1  ;;  %2137 = vst.msk [vmem:[%s4827_s3 + $0x228] sm:$0xff] %vm2067_vm4, %v1940_v49  ;;  %v1248_v55 = vadd.f32 %v4474_v19, %v2782_v53  ;;  %v1242_v57 = vpop.f32.mrb[71].mxu0 }
 0x17e   :  { %2235 = vst.msk [vmem:[%s4827_s3 + $0x538] sm:$0xff] %vm2067_vm4, %v2038_v50  ;;  %v1738_v56 = vadd.f32 %v4474_v19, %v2929_v54  ;;  %v1732_v58 = vpop.f32.mrb[71].mxu1  ;;  %2136 = vst.msk [vmem:[%s4827_s3 + $0x220] sm:$0xff] %vm2067_vm4, %v1939_v51  ;;  %v1243_v59 = vadd.f32 %v4474_v19, %v1242_v57 }
 0x17f   :  { %2234 = vst.msk [vmem:[%s4827_s3 + $0x530] sm:$0xff] %vm2067_vm4, %v2037_v52  ;;  %v1733_v60 = vadd.f32 %v4474_v19, %v1732_v58  ;;  %v1942_v61 = vmax.f32 %v1248_v55, 0.0 }
 0x180   :  { %v2040_v62 = vmax.f32 %v1738_v56, 0.0  ;;  %v1941_v63 = vmax.f32 %v1243_v59, 0.0  ;;  %v2785_v1 = vpop.f32.mrb[72].mxu0 }
 0x181   :  { %v2039_v0 = vmax.f32 %v1733_v60, 0.0  ;;  %v2932_v2 = vpop.f32.mrb[72].mxu1  ;;  %2139 = vst.msk [vmem:[%s4827_s3 + $0x238] sm:$0xff] %vm2067_vm4, %v1942_v61  ;;  %v1258_v3 = vadd.f32 %v4474_v19, %v2785_v1  ;;  %v1252_v5 = vpop.f32.mrb[73].mxu0 }
 0x182   :  { %2237 = vst.msk [vmem:[%s4827_s3 + $0x548] sm:$0xff] %vm2067_vm4, %v2040_v62  ;;  %v1748_v4 = vadd.f32 %v4474_v19, %v2932_v2  ;;  %v1742_v6 = vpop.f32.mrb[73].mxu1  ;;  %2138 = vst.msk [vmem:[%s4827_s3 + $0x230] sm:$0xff] %vm2067_vm4, %v1941_v63  ;;  %v1253_v7 = vadd.f32 %v4474_v19, %v1252_v5 }
 0x183   :  { %2236 = vst.msk [vmem:[%s4827_s3 + $0x540] sm:$0xff] %vm2067_vm4, %v2039_v0  ;;  %v1743_v8 = vadd.f32 %v4474_v19, %v1742_v6  ;;  %v1944_v9 = vmax.f32 %v1258_v3, 0.0 }
 0x184   :  { %v2042_v11 = vmax.f32 %v1748_v4, 0.0  ;;  %v1943_v12 = vmax.f32 %v1253_v7, 0.0  ;;  %v2788_v14 = vpop.f32.mrb[74].mxu0 }
 0x185   :  { %v2041_v13 = vmax.f32 %v1743_v8, 0.0  ;;  %v2935_v15 = vpop.f32.mrb[74].mxu1  ;;  %2141 = vst.msk [vmem:[%s4827_s3 + $0x248] sm:$0xff] %vm2067_vm4, %v1944_v9  ;;  %v1268_v16 = vadd.f32 %v4474_v19, %v2788_v14  ;;  %v1262_v18 = vpop.f32.mrb[75].mxu0 }
 0x186   :  { %2239 = vst.msk [vmem:[%s4827_s3 + $0x558] sm:$0xff] %vm2067_vm4, %v2042_v11  ;;  %v1758_v17 = vadd.f32 %v4474_v19, %v2935_v15  ;;  %v1752_v10 = vpop.f32.mrb[75].mxu1  ;;  %2140 = vst.msk [vmem:[%s4827_s3 + $0x240] sm:$0xff] %vm2067_vm4, %v1943_v12  ;;  %v1263_v20 = vadd.f32 %v4474_v19, %v1262_v18 }
 0x187   :  { %2238 = vst.msk [vmem:[%s4827_s3 + $0x550] sm:$0xff] %vm2067_vm4, %v2041_v13  ;;  %v1753_v21 = vadd.f32 %v4474_v19, %v1752_v10  ;;  %v1946_v22 = vmax.f32 %v1268_v16, 0.0 }
 0x188   :  { %v2044_v23 = vmax.f32 %v1758_v17, 0.0  ;;  %v1945_v24 = vmax.f32 %v1263_v20, 0.0  ;;  %v2791_v26 = vpop.f32.mrb[76].mxu0 }
 0x189   :  { %v2043_v25 = vmax.f32 %v1753_v21, 0.0  ;;  %v2938_v27 = vpop.f32.mrb[76].mxu1  ;;  %2143 = vst.msk [vmem:[%s4827_s3 + $0x258] sm:$0xff] %vm2067_vm4, %v1946_v22  ;;  %v1278_v28 = vadd.f32 %v4474_v19, %v2791_v26  ;;  %v1272_v30 = vpop.f32.mrb[77].mxu0 }
 0x18a   :  { %2241 = vst.msk [vmem:[%s4827_s3 + $0x568] sm:$0xff] %vm2067_vm4, %v2044_v23  ;;  %v1768_v29 = vadd.f32 %v4474_v19, %v2938_v27  ;;  %v1762_v31 = vpop.f32.mrb[77].mxu1  ;;  %2142 = vst.msk [vmem:[%s4827_s3 + $0x250] sm:$0xff] %vm2067_vm4, %v1945_v24  ;;  %v1273_v32 = vadd.f32 %v4474_v19, %v1272_v30 }
 0x18b   :  { %2240 = vst.msk [vmem:[%s4827_s3 + $0x560] sm:$0xff] %vm2067_vm4, %v2043_v25  ;;  %v1763_v33 = vadd.f32 %v4474_v19, %v1762_v31  ;;  %v1948_v34 = vmax.f32 %v1278_v28, 0.0 }
 0x18c   :  { %v2046_v35 = vmax.f32 %v1768_v29, 0.0  ;;  %v1947_v36 = vmax.f32 %v1273_v32, 0.0  ;;  %v2794_v38 = vpop.f32.mrb[78].mxu0 }
 0x18d   :  { %v2045_v37 = vmax.f32 %v1763_v33, 0.0  ;;  %v2941_v39 = vpop.f32.mrb[78].mxu1  ;;  %2145 = vst.msk [vmem:[%s4827_s3 + $0x268] sm:$0xff] %vm2067_vm4, %v1948_v34  ;;  %v1288_v40 = vadd.f32 %v4474_v19, %v2794_v38  ;;  %v1282_v42 = vpop.f32.mrb[79].mxu0 }
 0x18e   :  { %2243 = vst.msk [vmem:[%s4827_s3 + $0x578] sm:$0xff] %vm2067_vm4, %v2046_v35  ;;  %v1778_v41 = vadd.f32 %v4474_v19, %v2941_v39  ;;  %v1772_v43 = vpop.f32.mrb[79].mxu1  ;;  %2144 = vst.msk [vmem:[%s4827_s3 + $0x260] sm:$0xff] %vm2067_vm4, %v1947_v36  ;;  %v1283_v44 = vadd.f32 %v4474_v19, %v1282_v42 }
 0x18f   :  { %2242 = vst.msk [vmem:[%s4827_s3 + $0x570] sm:$0xff] %vm2067_vm4, %v2045_v37  ;;  %v1773_v45 = vadd.f32 %v4474_v19, %v1772_v43  ;;  %v1950_v46 = vmax.f32 %v1288_v40, 0.0 }
 0x190   :  { %v2048_v47 = vmax.f32 %v1778_v41, 0.0  ;;  %v1949_v48 = vmax.f32 %v1283_v44, 0.0  ;;  %v2797_v50 = vpop.f32.mrb[80].mxu0 }
 0x191   :  { %v2047_v49 = vmax.f32 %v1773_v45, 0.0  ;;  %v2944_v51 = vpop.f32.mrb[80].mxu1  ;;  %2147 = vst.msk [vmem:[%s4827_s3 + $0x278] sm:$0xff] %vm2067_vm4, %v1950_v46  ;;  %v1298_v52 = vadd.f32 %v4474_v19, %v2797_v50  ;;  %v1292_v54 = vpop.f32.mrb[81].mxu0 }
 0x192   :  { %2245 = vst.msk [vmem:[%s4827_s3 + $0x588] sm:$0xff] %vm2067_vm4, %v2048_v47  ;;  %v1788_v53 = vadd.f32 %v4474_v19, %v2944_v51  ;;  %v1782_v55 = vpop.f32.mrb[81].mxu1  ;;  %2146 = vst.msk [vmem:[%s4827_s3 + $0x270] sm:$0xff] %vm2067_vm4, %v1949_v48  ;;  %v1293_v56 = vadd.f32 %v4474_v19, %v1292_v54 }
 0x193   :  { %2244 = vst.msk [vmem:[%s4827_s3 + $0x580] sm:$0xff] %vm2067_vm4, %v2047_v49  ;;  %v1783_v57 = vadd.f32 %v4474_v19, %v1782_v55  ;;  %v1952_v58 = vmax.f32 %v1298_v52, 0.0 }
 0x194   :  { %v2050_v59 = vmax.f32 %v1788_v53, 0.0  ;;  %v1951_v60 = vmax.f32 %v1293_v56, 0.0  ;;  %v2800_v62 = vpop.f32.mrb[82].mxu0 }
 0x195   :  { %v2049_v61 = vmax.f32 %v1783_v57, 0.0  ;;  %v2947_v63 = vpop.f32.mrb[82].mxu1  ;;  %2149 = vst.msk [vmem:[%s4827_s3 + $0x288] sm:$0xff] %vm2067_vm4, %v1952_v58  ;;  %v1308_v0 = vadd.f32 %v4474_v19, %v2800_v62  ;;  %v1302_v2 = vpop.f32.mrb[83].mxu0 }
 0x196   :  { %2247 = vst.msk [vmem:[%s4827_s3 + $0x598] sm:$0xff] %vm2067_vm4, %v2050_v59  ;;  %v1798_v1 = vadd.f32 %v4474_v19, %v2947_v63  ;;  %v1792_v3 = vpop.f32.mrb[83].mxu1  ;;  %2148 = vst.msk [vmem:[%s4827_s3 + $0x280] sm:$0xff] %vm2067_vm4, %v1951_v60  ;;  %v1303_v4 = vadd.f32 %v4474_v19, %v1302_v2 }
 0x197   :  { %2246 = vst.msk [vmem:[%s4827_s3 + $0x590] sm:$0xff] %vm2067_vm4, %v2049_v61  ;;  %v1793_v5 = vadd.f32 %v4474_v19, %v1792_v3  ;;  %v1954_v6 = vmax.f32 %v1308_v0, 0.0 }
 0x198   :  { %v2052_v7 = vmax.f32 %v1798_v1, 0.0  ;;  %v1953_v8 = vmax.f32 %v1303_v4, 0.0  ;;  %v2803_v11 = vpop.f32.mrb[84].mxu0 }
 0x199   :  { %v2051_v9 = vmax.f32 %v1793_v5, 0.0  ;;  %v2950_v12 = vpop.f32.mrb[84].mxu1  ;;  %2151 = vst.msk [vmem:[%s4827_s3 + $0x298] sm:$0xff] %vm2067_vm4, %v1954_v6  ;;  %v1318_v13 = vadd.f32 %v4474_v19, %v2803_v11  ;;  %v1312_v15 = vpop.f32.mrb[85].mxu0 }
 0x19a   :  { %2249 = vst.msk [vmem:[%s4827_s3 + $0x5a8] sm:$0xff] %vm2067_vm4, %v2052_v7  ;;  %v1808_v14 = vadd.f32 %v4474_v19, %v2950_v12  ;;  %v1802_v16 = vpop.f32.mrb[85].mxu1  ;;  %2150 = vst.msk [vmem:[%s4827_s3 + $0x290] sm:$0xff] %vm2067_vm4, %v1953_v8  ;;  %v1313_v17 = vadd.f32 %v4474_v19, %v1312_v15 }
 0x19b   :  { %2248 = vst.msk [vmem:[%s4827_s3 + $0x5a0] sm:$0xff] %vm2067_vm4, %v2051_v9  ;;  %v1803_v18 = vadd.f32 %v4474_v19, %v1802_v16  ;;  %v1956_v10 = vmax.f32 %v1318_v13, 0.0 }
 0x19c   :  { %v2054_v20 = vmax.f32 %v1808_v14, 0.0  ;;  %v1955_v21 = vmax.f32 %v1313_v17, 0.0  ;;  %v2806_v23 = vpop.f32.mrb[86].mxu0 }
 0x19d   :  { %v2053_v22 = vmax.f32 %v1803_v18, 0.0  ;;  %v2953_v24 = vpop.f32.mrb[86].mxu1  ;;  %2153 = vst.msk [vmem:[%s4827_s3 + $0x2a8] sm:$0xff] %vm2067_vm4, %v1956_v10  ;;  %v1328_v25 = vadd.f32 %v4474_v19, %v2806_v23  ;;  %v1322_v27 = vpop.f32.mrb[87].mxu0 }
 0x19e   :  { %2251 = vst.msk [vmem:[%s4827_s3 + $0x5b8] sm:$0xff] %vm2067_vm4, %v2054_v20  ;;  %v1818_v26 = vadd.f32 %v4474_v19, %v2953_v24  ;;  %v1812_v28 = vpop.f32.mrb[87].mxu1  ;;  %2152 = vst.msk [vmem:[%s4827_s3 + $0x2a0] sm:$0xff] %vm2067_vm4, %v1955_v21  ;;  %v1323_v29 = vadd.f32 %v4474_v19, %v1322_v27 }
 0x19f   :  { %2250 = vst.msk [vmem:[%s4827_s3 + $0x5b0] sm:$0xff] %vm2067_vm4, %v2053_v22  ;;  %v1813_v30 = vadd.f32 %v4474_v19, %v1812_v28  ;;  %v1958_v31 = vmax.f32 %v1328_v25, 0.0 }
 0x1a0   :  { %v2056_v32 = vmax.f32 %v1818_v26, 0.0  ;;  %v1957_v33 = vmax.f32 %v1323_v29, 0.0  ;;  %v2809_v35 = vpop.f32.mrb[88].mxu0 }
 0x1a1   :  { %v2055_v34 = vmax.f32 %v1813_v30, 0.0  ;;  %v2956_v36 = vpop.f32.mrb[88].mxu1  ;;  %2155 = vst.msk [vmem:[%s4827_s3 + $0x2b8] sm:$0xff] %vm2067_vm4, %v1958_v31  ;;  %v1338_v37 = vadd.f32 %v4474_v19, %v2809_v35  ;;  %v1332_v39 = vpop.f32.mrb[89].mxu0 }
 0x1a2   :  { %2253 = vst.msk [vmem:[%s4827_s3 + $0x5c8] sm:$0xff] %vm2067_vm4, %v2056_v32  ;;  %v1828_v38 = vadd.f32 %v4474_v19, %v2956_v36  ;;  %v1822_v40 = vpop.f32.mrb[89].mxu1  ;;  %2154 = vst.msk [vmem:[%s4827_s3 + $0x2b0] sm:$0xff] %vm2067_vm4, %v1957_v33  ;;  %v1333_v41 = vadd.f32 %v4474_v19, %v1332_v39 }
 0x1a3   :  { %2252 = vst.msk [vmem:[%s4827_s3 + $0x5c0] sm:$0xff] %vm2067_vm4, %v2055_v34  ;;  %v1823_v42 = vadd.f32 %v4474_v19, %v1822_v40  ;;  %v1960_v43 = vmax.f32 %v1338_v37, 0.0 }
 0x1a4   :  { %v2058_v44 = vmax.f32 %v1828_v38, 0.0  ;;  %v1959_v45 = vmax.f32 %v1333_v41, 0.0  ;;  %v2812_v47 = vpop.f32.mrb[90].mxu0 }
 0x1a5   :  { %v2057_v46 = vmax.f32 %v1823_v42, 0.0  ;;  %v2959_v48 = vpop.f32.mrb[90].mxu1  ;;  %2157 = vst.msk [vmem:[%s4827_s3 + $0x2c8] sm:$0xff] %vm2067_vm4, %v1960_v43  ;;  %v1348_v49 = vadd.f32 %v4474_v19, %v2812_v47  ;;  %v1342_v51 = vpop.f32.mrb[91].mxu0 }
 0x1a6   :  { %2255 = vst.msk [vmem:[%s4827_s3 + $0x5d8] sm:$0xff] %vm2067_vm4, %v2058_v44  ;;  %v1838_v50 = vadd.f32 %v4474_v19, %v2959_v48  ;;  %v1832_v52 = vpop.f32.mrb[91].mxu1  ;;  %2156 = vst.msk [vmem:[%s4827_s3 + $0x2c0] sm:$0xff] %vm2067_vm4, %v1959_v45  ;;  %v1343_v53 = vadd.f32 %v4474_v19, %v1342_v51 }
 0x1a7   :  { %2254 = vst.msk [vmem:[%s4827_s3 + $0x5d0] sm:$0xff] %vm2067_vm4, %v2057_v46  ;;  %v1833_v54 = vadd.f32 %v4474_v19, %v1832_v52  ;;  %v1962_v55 = vmax.f32 %v1348_v49, 0.0 }
 0x1a8   :  { %v2060_v56 = vmax.f32 %v1838_v50, 0.0  ;;  %v1961_v57 = vmax.f32 %v1343_v53, 0.0  ;;  %v2815_v59 = vpop.f32.mrb[92].mxu0 }
 0x1a9   :  { %v2059_v58 = vmax.f32 %v1833_v54, 0.0  ;;  %v2962_v60 = vpop.f32.mrb[92].mxu1  ;;  %2159 = vst.msk [vmem:[%s4827_s3 + $0x2d8] sm:$0xff] %vm2067_vm4, %v1962_v55  ;;  %v1358_v61 = vadd.f32 %v4474_v19, %v2815_v59  ;;  %v1352_v63 = vpop.f32.mrb[93].mxu0 }
 0x1aa   :  { %2257 = vst.msk [vmem:[%s4827_s3 + $0x5e8] sm:$0xff] %vm2067_vm4, %v2060_v56  ;;  %v1848_v62 = vadd.f32 %v4474_v19, %v2962_v60  ;;  %v1842_v0 = vpop.f32.mrb[93].mxu1  ;;  %2158 = vst.msk [vmem:[%s4827_s3 + $0x2d0] sm:$0xff] %vm2067_vm4, %v1961_v57  ;;  %v1353_v1 = vadd.f32 %v4474_v19, %v1352_v63 }
 0x1ab   :  { %2256 = vst.msk [vmem:[%s4827_s3 + $0x5e0] sm:$0xff] %vm2067_vm4, %v2059_v58  ;;  %v1843_v2 = vadd.f32 %v4474_v19, %v1842_v0  ;;  %v1964_v3 = vmax.f32 %v1358_v61, 0.0 }
 0x1ac   :  { %v2062_v4 = vmax.f32 %v1848_v62, 0.0  ;;  %v1963_v5 = vmax.f32 %v1353_v1, 0.0  ;;  %v2818_v7 = vpop.f32.mrb[94].mxu0 }
 0x1ad   :  { %v2061_v6 = vmax.f32 %v1843_v2, 0.0  ;;  %v2965_v8 = vpop.f32.mrb[94].mxu1  ;;  %2161 = vst.msk [vmem:[%s4827_s3 + $0x2e8] sm:$0xff] %vm2067_vm4, %v1964_v3  ;;  %v1368_v9 = vadd.f32 %v4474_v19, %v2818_v7  ;;  %v1362_v12 = vpop.f32.mrb[95].mxu0 }
 0x1ae   :  { %2259 = vst.msk [vmem:[%s4827_s3 + $0x5f8] sm:$0xff] %vm2067_vm4, %v2062_v4  ;;  %v1858_v11 = vadd.f32 %v4474_v19, %v2965_v8  ;;  %v1852_v13 = vpop.f32.mrb[95].mxu1  ;;  %2160 = vst.msk [vmem:[%s4827_s3 + $0x2e0] sm:$0xff] %vm2067_vm4, %v1963_v5  ;;  %v1363_v14 = vadd.f32 %v4474_v19, %v1362_v12 }
 0x1af   :  { %2258 = vst.msk [vmem:[%s4827_s3 + $0x5f0] sm:$0xff] %vm2067_vm4, %v2061_v6  ;;  %v1853_v15 = vadd.f32 %v4474_v19, %v1852_v13  ;;  %v1966_v16 = vmax.f32 %v1368_v9, 0.0 }
 0x1b0   :  { %v2064_v17 = vmax.f32 %v1858_v11, 0.0  ;;  %v1965_v18 = vmax.f32 %v1363_v14, 0.0  ;;  %v2821_v20 = vpop.f32.mrb[96].mxu0 }
 0x1b1   :  { %v2063_v10 = vmax.f32 %v1853_v15, 0.0  ;;  %v2968_v21 = vpop.f32.mrb[96].mxu1  ;;  %2163 = vst.msk [vmem:[%s4827_s3 + $0x2f8] sm:$0xff] %vm2067_vm4, %v1966_v16  ;;  %v1378_v22 = vadd.f32 %v4474_v19, %v2821_v20  ;;  %v1372_v24 = vpop.f32.mrb[97].mxu0 }
 0x1b2   :  { %2261 = vst.msk [vmem:[%s4827_s3 + $0x608] sm:$0xff] %vm2067_vm4, %v2064_v17  ;;  %v1868_v23 = vadd.f32 %v4474_v19, %v2968_v21  ;;  %v1862_v25 = vpop.f32.mrb[97].mxu1  ;;  %2162 = vst.msk [vmem:[%s4827_s3 + $0x2f0] sm:$0xff] %vm2067_vm4, %v1965_v18  ;;  %v1373_v26 = vadd.f32 %v4474_v19, %v1372_v24 }
 0x1b3   :  { %2260 = vst.msk [vmem:[%s4827_s3 + $0x600] sm:$0xff] %vm2067_vm4, %v2063_v10  ;;  %v1863_v27 = vadd.f32 %v4474_v19, %v1862_v25  ;;  %v1968_v28 = vmax.f32 %v1378_v22, 0.0 }
 0x1b4   :  { %v2066_v29 = vmax.f32 %v1868_v23, 0.0  ;;  %v1967_v30 = vmax.f32 %v1373_v26, 0.0 }
 0x1b5   :  { %v2065_v31 = vmax.f32 %v1863_v27, 0.0  ;;  %2165 = vst.msk [vmem:[%s4827_s3 + $0x308] sm:$0xff] %vm2067_vm4, %v1968_v28 }
 0x1b6   :  { %2263 = vst.msk [vmem:[%s4827_s3 + $0x618] sm:$0xff] %vm2067_vm4, %v2066_v29  ;;  %2164 = vst.msk [vmem:[%s4827_s3 + $0x300] sm:$0xff] %vm2067_vm4, %v1967_v30 }
 0x1b7   :  { %2262 = vst.msk [vmem:[%s4827_s3 + $0x610] sm:$0xff] %vm2067_vm4, %v2065_v31 }
 0x1b8   :  { %2268 = vsyncpa [#allocation3], 1 }

// kernel: lenet_forward.4
= control target key start
LH: loop header
LB: loop body
LE: loop exit
PB: predicated region body
PF: predicated region fallthrough
CT: control target
= control target key end

     0   :  { %v491_v0 = vmov 0.0|0.0   ;;  %vm90_vm0 = vcmask 179200   ;;  %v492_v30 = vmov 0.0   ;;  %vm166_vm1 = vcmask 1045504   ;;  %s893_s1 = inlined_call_operand.vmem [shape: f32[150,16], index: 1, kind: input, shape index: {}]   ;;  %s894_s0 = inlined_call_operand.vmem [shape: f32[200,150], index: 0, kind: input, shape index: {}]   ;;  %s895_s2 = inlined_call_operand.vmem [shape: f32[1,16], index: 2, kind: input, shape index: {}]   ;;  %s896_s3 = inlined_call_operand.vmem [shape: f32[200,16], index: 3, kind: output, shape index: {}]  }
   0x1   :  { %442 = vmatprep.subr.bf16.mxu0 %v491_v0  ;;  %v64_v1 = vld [vmem:[%s893_s1] sm:$0xff]  ;;  %v65_v2 = vld [vmem:[%s893_s1 + $0x8] sm:$0xff]  ;;  %469 = vmatprep.subr.bf16.mxu1 %v491_v0  ;;  %v66_v3 = vld [vmem:[%s893_s1 + $0x10] sm:$0xff]  ;;  %vm385_vm2 = vcmask 130048  }
   0x2   :  { %v443_v4 = vpack.c.bf16 %v65_v2, %v64_v1  ;;  %v67_v5 = vld [vmem:[%s893_s1 + $0x18] sm:$0xff]  ;;  %v68_v7 = vld [vmem:[%s893_s1 + $0x20] sm:$0xff]  ;;  %v69_v8 = vld [vmem:[%s893_s1 + $0x28] sm:$0xff] }
   0x3   :  { %v446_v6 = vpack.c.bf16 %v67_v5, %v66_v3  ;;  %v15_v9 = vld [vmem:[%s894_s0 + $0x8] sm:$0xff]  ;;  %v449_v10 = vpack.c.bf16 %v69_v8, %v68_v7  ;;  %v41_v11 = vld [vmem:[%s894_s0 + $0xd8] sm:$0xff]  ;;  %v70_v12 = vld [vmem:[%s893_s1 + $0x30] sm:$0xff] }
   0x4   :  { %444 = vmatpush1.bf16.msra.mxu0 %v443_v4  ;;  %479 = vmatpush1.bf16.msra.mxu1 %v443_v4  ;;  %v71_v13 = vld [vmem:[%s893_s1 + $0x38] sm:$0xff]  ;;  %v72_v15 = vld [vmem:[%s893_s1 + $0x40] sm:$0xff]  ;;  %v73_v16 = vld [vmem:[%s893_s1 + $0x48] sm:$0xff] }
   0x5   :  { %445 = vmatprep.subr.bf16.mxu0 %v491_v0  ;;  %470 = vmatprep.subr.bf16.mxu1 %v491_v0  ;;  %v452_v14 = vpack.c.bf16 %v71_v13, %v70_v12  ;;  %v455_v17 = vpack.c.bf16 %v73_v16, %v72_v15  ;;  %v74_v18 = vld [vmem:[%s893_s1 + $0x50] sm:$0xff]  ;;  %v75_v19 = vld [vmem:[%s893_s1 + $0x58] sm:$0xff]  ;;  %v76_v21 = vld [vmem:[%s893_s1 + $0x60] sm:$0xff] }
   0x6   :  { %417 = vmatprep.mubr.msk.f32.mxu0 %vm90_vm0, %v15_v9  ;;  %430 = vmatprep.mubr.msk.f32.mxu1 %vm90_vm0, %v41_v11  ;;  %v458_v20 = vpack.c.bf16 %v75_v19, %v74_v18  ;;  %v77_v22 = vld [vmem:[%s893_s1 + $0x68] sm:$0xff]  ;;  %v78_v24 = vld [vmem:[%s893_s1 + $0x70] sm:$0xff]  ;;  %v79_v25 = vld [vmem:[%s893_s1 + $0x78] sm:$0xff] }
   0x7   :  { %v461_v23 = vpack.c.bf16 %v77_v22, %v76_v21  ;;  %v464_v26 = vpack.c.bf16 %v79_v25, %v78_v24  ;;  %v80_v27 = vld [vmem:[%s893_s1 + $0x80] sm:$0xff]  ;;  %v81_v28 = vld [vmem:[%s893_s1 + $0x88] sm:$0xff]  ;;  %v82_v31 = vld [vmem:[%s893_s1 + $0x90] sm:$0x3f] }
   0x8   :  { %447 = vmatpush1.bf16.msra.mxu0 %v446_v6  ;;  %480 = vmatpush1.bf16.msra.mxu1 %v446_v6  ;;  %v467_v29 = vpack.c.bf16 %v81_v28, %v80_v27  ;;  %v14_v32 = vld [vmem:[%s894_s0] sm:$0xff]  ;;  %v40_v33 = vld [vmem:[%s894_s0 + $0xd0] sm:$0xff]  ;;  %v17_v34 = vld [vmem:[%s894_s0 + $0x18] sm:$0xff] }
   0x9   :  { %448 = vmatprep.subr.bf16.mxu0 %v491_v0  ;;  %471 = vmatprep.subr.bf16.mxu1 %v491_v0  ;;  %v43_v35 = vld [vmem:[%s894_s0 + $0xe8] sm:$0xff]  ;;  %v16_v36 = vld [vmem:[%s894_s0 + $0x10] sm:$0xff]  ;;  %v42_v37 = vld [vmem:[%s894_s0 + $0xe0] sm:$0xff] }
   0xa   :  { %v19_v38 = vld [vmem:[%s894_s0 + $0x28] sm:$0xff]  ;;  %v45_v39 = vld [vmem:[%s894_s0 + $0xf8] sm:$0xff]  ;;  %v18_v40 = vld [vmem:[%s894_s0 + $0x20] sm:$0xff] }
   0xb   :  { %v44_v41 = vld [vmem:[%s894_s0 + $0xf0] sm:$0xff]  ;;  %v21_v42 = vld [vmem:[%s894_s0 + $0x38] sm:$0xff]  ;;  %v47_v43 = vld [vmem:[%s894_s0 + $0x108] sm:$0xff] }
   0xc   :  { %450 = vmatpush1.bf16.msra.mxu0 %v449_v10  ;;  %481 = vmatpush1.bf16.msra.mxu1 %v449_v10  ;;  %v20_v44 = vld [vmem:[%s894_s0 + $0x30] sm:$0xff]  ;;  %v46_v45 = vld [vmem:[%s894_s0 + $0x100] sm:$0xff]  ;;  %v23_v46 = vld [vmem:[%s894_s0 + $0x48] sm:$0xff] }
   0xd   :  { %451 = vmatprep.subr.bf16.mxu0 %v491_v0  ;;  %472 = vmatprep.subr.bf16.mxu1 %v491_v0  ;;  %v49_v47 = vld [vmem:[%s894_s0 + $0x118] sm:$0xff]  ;;  %v22_v48 = vld [vmem:[%s894_s0 + $0x40] sm:$0xff]  ;;  %v48_v49 = vld [vmem:[%s894_s0 + $0x110] sm:$0xff] }
   0xe   :  { %v25_v50 = vld [vmem:[%s894_s0 + $0x58] sm:$0xff]  ;;  %v51_v51 = vld [vmem:[%s894_s0 + $0x128] sm:$0xff]  ;;  %v24_v52 = vld [vmem:[%s894_s0 + $0x50] sm:$0xff] }
   0xf   :  { %v50_v53 = vld [vmem:[%s894_s0 + $0x120] sm:$0xff]  ;;  %v27_v54 = vld [vmem:[%s894_s0 + $0x68] sm:$0xff]  ;;  %v53_v55 = vld [vmem:[%s894_s0 + $0x138] sm:$0xff] }
  0x10   :  { %453 = vmatpush1.bf16.msra.mxu0 %v452_v14  ;;  %482 = vmatpush1.bf16.msra.mxu1 %v452_v14  ;;  %v26_v56 = vld [vmem:[%s894_s0 + $0x60] sm:$0xff]  ;;  %v52_v57 = vld [vmem:[%s894_s0 + $0x130] sm:$0xff]  ;;  %v29_v58 = vld [vmem:[%s894_s0 + $0x78] sm:$0xff] }
  0x11   :  { %454 = vmatprep.subr.bf16.mxu0 %v491_v0  ;;  %473 = vmatprep.subr.bf16.mxu1 %v491_v0  ;;  %v55_v59 = vld [vmem:[%s894_s0 + $0x148] sm:$0xff]  ;;  %v28_v60 = vld [vmem:[%s894_s0 + $0x70] sm:$0xff]  ;;  %v54_v61 = vld [vmem:[%s894_s0 + $0x140] sm:$0xff] }
  0x12   :  { %v31_v62 = vld [vmem:[%s894_s0 + $0x88] sm:$0xff]  ;;  %v57_v63 = vld [vmem:[%s894_s0 + $0x158] sm:$0xff]  ;;  %v56_v1 = vld [vmem:[%s894_s0 + $0x150] sm:$0xff] }
  0x13   :  { %v33_v2 = vld [vmem:[%s894_s0 + $0x98] sm:$0xff]  ;;  %v59_v3 = vld [vmem:[%s894_s0 + $0x168] sm:$0xff]  ;;  %v32_v4 = vld [vmem:[%s894_s0 + $0x90] sm:$0xff] }
  0x14   :  { %456 = vmatpush1.bf16.msra.mxu0 %v455_v17  ;;  %483 = vmatpush1.bf16.msra.mxu1 %v455_v17  ;;  %v58_v5 = vld [vmem:[%s894_s0 + $0x160] sm:$0xff]  ;;  %v35_v6 = vld [vmem:[%s894_s0 + $0xa8] sm:$0xff]  ;;  %v61_v7 = vld [vmem:[%s894_s0 + $0x178] sm:$0xff] }
  0x15   :  { %457 = vmatprep.subr.bf16.mxu0 %v491_v0  ;;  %474 = vmatprep.subr.bf16.mxu1 %v491_v0  ;;  %v34_v8 = vld [vmem:[%s894_s0 + $0xa0] sm:$0xff]  ;;  %v60_v9 = vld [vmem:[%s894_s0 + $0x170] sm:$0xff]  ;;  %v37_v10 = vld [vmem:[%s894_s0 + $0xb8] sm:$0xff] }
  0x16   :  { %v63_v11 = vld [vmem:[%s894_s0 + $0x188] sm:$0xff]  ;;  %v36_v12 = vld [vmem:[%s894_s0 + $0xb0] sm:$0xff]  ;;  %v62_v13 = vld [vmem:[%s894_s0 + $0x180] sm:$0xff] }
  0x17   :  { %v39_v14 = vld [vmem:[%s894_s0 + $0xc8] sm:$0xff]  ;;  %v38_v15 = vld [vmem:[%s894_s0 + $0xc0] sm:$0xff] }
  0x18   :  { %459 = vmatpush1.bf16.msra.mxu0 %v458_v20  ;;  %484 = vmatpush1.bf16.msra.mxu1 %v458_v20  ;;  %v766_v16 = vld [vmem:[%s895_s2] ss:$0 sm:$0xff] }
  0x19   :  { %460 = vmatprep.subr.bf16.mxu0 %v491_v0  ;;  %475 = vmatprep.subr.bf16.mxu1 %v491_v0 }
  0x1c   :  { %462 = vmatpush1.bf16.msra.mxu0 %v461_v23  ;;  %485 = vmatpush1.bf16.msra.mxu1 %v461_v23 }
  0x1d   :  { %463 = vmatprep.subr.bf16.mxu0 %v491_v0  ;;  %476 = vmatprep.subr.bf16.mxu1 %v491_v0 }
  0x20   :  { %465 = vmatpush1.bf16.msra.mxu0 %v464_v26  ;;  %486 = vmatpush1.bf16.msra.mxu1 %v464_v26 }
  0x21   :  { %466 = vmatprep.subr.bf16.mxu0 %v491_v0  ;;  %477 = vmatprep.subr.bf16.mxu1 %v491_v0  ;;  %v30_v0 = vld [vmem:[%s894_s0 + $0x80] sm:$0xff] }
  0x24   :  { %468 = vmatpush1.bf16.msra.mxu0 %v467_v29  ;;  %487 = vmatpush1.bf16.msra.mxu1 %v467_v29 }
  0x25   :  { %206 = vmatprep.subr.mxu0 %v492_v30  ;;  %478 = vmatprep.subr.mxu1 %v492_v30 }
  0x28   :  { %416 = vmatpush1.msk.msra.mxu0 %vm166_vm1, %v82_v31  ;;  %488 = vmatpush1.msk.msra.mxu1 %vm166_vm1, %v82_v31 }
  0x29   :  { %235 = vmatmul.mubr.f32.vlgmr.msra.gmra.mrb[0].mxu0 %v14_v32  ;;  %300 = vmatmul.mubr.f32.vlgmr.msra.gmra.mrb[0].mxu1 %v40_v33 }
  0x2a   :  { %418 = vmatprep.mubr.msk.f32.mxu0 %vm90_vm0, %v17_v34  ;;  %431 = vmatprep.mubr.msk.f32.mxu1 %vm90_vm0, %v43_v35 }
  0x2d   :  { %240 = vmatmul.mubr.f32.gmra.mrb[2].mxu0 %v16_v36  ;;  %305 = vmatmul.mubr.f32.gmra.mrb[2].mxu1 %v42_v37 }
  0x2e   :  { %419 = vmatprep.mubr.msk.f32.mxu0 %vm90_vm0, %v19_v38  ;;  %432 = vmatprep.mubr.msk.f32.mxu1 %vm90_vm0, %v45_v39 }
  0x31   :  { %245 = vmatmul.mubr.f32.gmra.mrb[4].mxu0 %v18_v40  ;;  %310 = vmatmul.mubr.f32.gmra.mrb[4].mxu1 %v44_v41 }
  0x32   :  { %420 = vmatprep.mubr.msk.f32.mxu0 %vm90_vm0, %v21_v42  ;;  %433 = vmatprep.mubr.msk.f32.mxu1 %vm90_vm0, %v47_v43 }
  0x35   :  { %250 = vmatmul.mubr.f32.gmra.mrb[6].mxu0 %v20_v44  ;;  %315 = vmatmul.mubr.f32.gmra.mrb[6].mxu1 %v46_v45 }
  0x36   :  { %421 = vmatprep.mubr.msk.f32.mxu0 %vm90_vm0, %v23_v46  ;;  %434 = vmatprep.mubr.msk.f32.mxu1 %vm90_vm0, %v49_v47 }
  0x39   :  { %255 = vmatmul.mubr.f32.gmra.mrb[8].mxu0 %v22_v48  ;;  %320 = vmatmul.mubr.f32.gmra.mrb[8].mxu1 %v48_v49 }
  0x3a   :  { %422 = vmatprep.mubr.msk.f32.mxu0 %vm90_vm0, %v25_v50  ;;  %435 = vmatprep.mubr.msk.f32.mxu1 %vm90_vm0, %v51_v51 }
  0x3d   :  { %260 = vmatmul.mubr.f32.gmra.mrb[10].mxu0 %v24_v52  ;;  %325 = vmatmul.mubr.f32.gmra.mrb[10].mxu1 %v50_v53 }
  0x3e   :  { %423 = vmatprep.mubr.msk.f32.mxu0 %vm90_vm0, %v27_v54  ;;  %436 = vmatprep.mubr.msk.f32.mxu1 %vm90_vm0, %v53_v55 }
  0x41   :  { %265 = vmatmul.mubr.f32.gmra.mrb[12].mxu0 %v26_v56  ;;  %330 = vmatmul.mubr.f32.gmra.mrb[12].mxu1 %v52_v57 }
  0x42   :  { %424 = vmatprep.mubr.msk.f32.mxu0 %vm90_vm0, %v29_v58  ;;  %437 = vmatprep.mubr.msk.f32.mxu1 %vm90_vm0, %v55_v59 }
  0x45   :  { %270 = vmatmul.mubr.f32.gmra.mrb[14].mxu0 %v28_v60  ;;  %335 = vmatmul.mubr.f32.gmra.mrb[14].mxu1 %v54_v61 }
  0x46   :  { %425 = vmatprep.mubr.msk.f32.mxu0 %vm90_vm0, %v31_v62  ;;  %438 = vmatprep.mubr.msk.f32.mxu1 %vm90_vm0, %v57_v63 }
  0x49   :  { %275 = vmatmul.mubr.f32.gmra.mrb[16].mxu0 %v30_v0  ;;  %340 = vmatmul.mubr.f32.gmra.mrb[16].mxu1 %v56_v1 }
  0x4a   :  { %426 = vmatprep.mubr.msk.f32.mxu0 %vm90_vm0, %v33_v2  ;;  %439 = vmatprep.mubr.msk.f32.mxu1 %vm90_vm0, %v59_v3 }
  0x4d   :  { %280 = vmatmul.mubr.f32.gmra.mrb[18].mxu0 %v32_v4  ;;  %345 = vmatmul.mubr.f32.gmra.mrb[18].mxu1 %v58_v5 }
  0x4e   :  { %427 = vmatprep.mubr.msk.f32.mxu0 %vm90_vm0, %v35_v6  ;;  %440 = vmatprep.mubr.msk.f32.mxu1 %vm90_vm0, %v61_v7 }
  0x51   :  { %285 = vmatmul.mubr.f32.gmra.mrb[20].mxu0 %v34_v8  ;;  %350 = vmatmul.mubr.f32.gmra.mrb[20].mxu1 %v60_v9 }
  0x52   :  { %428 = vmatprep.mubr.msk.f32.mxu0 %vm90_vm0, %v37_v10  ;;  %441 = vmatprep.mubr.msk.f32.mxu1 %vm90_vm0, %v63_v11 }
  0x55   :  { %290 = vmatmul.mubr.f32.gmra.mrb[22].mxu0 %v36_v12  ;;  %355 = vmatmul.mubr.f32.gmra.mrb[22].mxu1 %v62_v13 }
  0x56   :  { %429 = vmatprep.mubr.msk.f32.mxu0 %vm90_vm0, %v39_v14 }
  0x59   :  { %295 = vmatmul.mubr.f32.gmra.mrb[24].mxu0 %v38_v15 }
  0xfc   :  { %v236_v17 = vpop.f32.mrb[0].mxu0  ;;  %v301_v18 = vpop.f32.mrb[0].mxu1 }
  0xfd   :  { %v237_v19 = vadd.f32 %v766_v16, %v236_v17  ;;  %v238_v20 = vpop.f32.mrb[1].mxu0  ;;  %v302_v21 = vadd.f32 %v766_v16, %v301_v18  ;;  %v303_v22 = vpop.f32.mrb[1].mxu1 }
  0xff   :  { %v360_v23 = vmax.f32 %v237_v19, 0.0  ;;  %v373_v24 = vmax.f32 %v302_v21, 0.0 }
 0x100   :  { %v241_v25 = vpop.f32.mrb[2].mxu0  ;;  %v306_v26 = vpop.f32.mrb[2].mxu1 }
 0x101   :  { %386 = vst.msk [vmem:[%s896_s3] sm:$0xff] %vm385_vm2, %v360_v23  ;;  %399 = vst.msk [vmem:[%s896_s3 + $0x68] sm:$0xff] %vm385_vm2, %v373_v24  ;;  %v242_v27 = vadd.f32 %v766_v16, %v241_v25  ;;  %v243_v28 = vpop.f32.mrb[3].mxu0  ;;  %v307_v29 = vadd.f32 %v766_v16, %v306_v26  ;;  %v308_v30 = vpop.f32.mrb[3].mxu1 }
 0x103   :  { %v361_v31 = vmax.f32 %v242_v27, 0.0  ;;  %v374_v32 = vmax.f32 %v307_v29, 0.0 }
 0x104   :  { %v246_v33 = vpop.f32.mrb[4].mxu0  ;;  %v311_v34 = vpop.f32.mrb[4].mxu1 }
 0x105   :  { %387 = vst.msk [vmem:[%s896_s3 + $0x8] sm:$0xff] %vm385_vm2, %v361_v31  ;;  %400 = vst.msk [vmem:[%s896_s3 + $0x70] sm:$0xff] %vm385_vm2, %v374_v32  ;;  %v247_v35 = vadd.f32 %v766_v16, %v246_v33  ;;  %v248_v36 = vpop.f32.mrb[5].mxu0  ;;  %v312_v37 = vadd.f32 %v766_v16, %v311_v34  ;;  %v313_v38 = vpop.f32.mrb[5].mxu1 }
 0x107   :  { %v362_v39 = vmax.f32 %v247_v35, 0.0  ;;  %v375_v40 = vmax.f32 %v312_v37, 0.0 }
 0x108   :  { %v251_v41 = vpop.f32.mrb[6].mxu0  ;;  %v316_v42 = vpop.f32.mrb[6].mxu1 }
 0x109   :  { %388 = vst.msk [vmem:[%s896_s3 + $0x10] sm:$0xff] %vm385_vm2, %v362_v39  ;;  %401 = vst.msk [vmem:[%s896_s3 + $0x78] sm:$0xff] %vm385_vm2, %v375_v40  ;;  %v252_v43 = vadd.f32 %v766_v16, %v251_v41  ;;  %v253_v44 = vpop.f32.mrb[7].mxu0  ;;  %v317_v45 = vadd.f32 %v766_v16, %v316_v42  ;;  %v318_v46 = vpop.f32.mrb[7].mxu1 }
 0x10b   :  { %v363_v47 = vmax.f32 %v252_v43, 0.0  ;;  %v376_v48 = vmax.f32 %v317_v45, 0.0 }
 0x10c   :  { %v256_v49 = vpop.f32.mrb[8].mxu0  ;;  %v321_v50 = vpop.f32.mrb[8].mxu1 }
 0x10d   :  { %389 = vst.msk [vmem:[%s896_s3 + $0x18] sm:$0xff] %vm385_vm2, %v363_v47  ;;  %402 = vst.msk [vmem:[%s896_s3 + $0x80] sm:$0xff] %vm385_vm2, %v376_v48  ;;  %v257_v51 = vadd.f32 %v766_v16, %v256_v49  ;;  %v258_v52 = vpop.f32.mrb[9].mxu0  ;;  %v322_v53 = vadd.f32 %v766_v16, %v321_v50  ;;  %v323_v54 = vpop.f32.mrb[9].mxu1 }
 0x10f   :  { %v364_v55 = vmax.f32 %v257_v51, 0.0  ;;  %v377_v56 = vmax.f32 %v322_v53, 0.0 }
 0x110   :  { %v261_v57 = vpop.f32.mrb[10].mxu0  ;;  %v326_v58 = vpop.f32.mrb[10].mxu1 }
 0x111   :  { %390 = vst.msk [vmem:[%s896_s3 + $0x20] sm:$0xff] %vm385_vm2, %v364_v55  ;;  %403 = vst.msk [vmem:[%s896_s3 + $0x88] sm:$0xff] %vm385_vm2, %v377_v56  ;;  %v262_v59 = vadd.f32 %v766_v16, %v261_v57  ;;  %v263_v60 = vpop.f32.mrb[11].mxu0  ;;  %v327_v61 = vadd.f32 %v766_v16, %v326_v58  ;;  %v328_v62 = vpop.f32.mrb[11].mxu1 }
 0x113   :  { %v365_v63 = vmax.f32 %v262_v59, 0.0  ;;  %v378_v0 = vmax.f32 %v327_v61, 0.0 }
 0x114   :  { %v266_v1 = vpop.f32.mrb[12].mxu0  ;;  %v331_v2 = vpop.f32.mrb[12].mxu1 }
 0x115   :  { %391 = vst.msk [vmem:[%s896_s3 + $0x28] sm:$0xff] %vm385_vm2, %v365_v63  ;;  %404 = vst.msk [vmem:[%s896_s3 + $0x90] sm:$0xff] %vm385_vm2, %v378_v0  ;;  %v267_v3 = vadd.f32 %v766_v16, %v266_v1  ;;  %v268_v4 = vpop.f32.mrb[13].mxu0  ;;  %v332_v5 = vadd.f32 %v766_v16, %v331_v2  ;;  %v333_v6 = vpop.f32.mrb[13].mxu1 }
 0x117   :  { %v366_v7 = vmax.f32 %v267_v3, 0.0  ;;  %v379_v8 = vmax.f32 %v332_v5, 0.0 }
 0x118   :  { %v271_v9 = vpop.f32.mrb[14].mxu0  ;;  %v336_v10 = vpop.f32.mrb[14].mxu1 }
 0x119   :  { %392 = vst.msk [vmem:[%s896_s3 + $0x30] sm:$0xff] %vm385_vm2, %v366_v7  ;;  %405 = vst.msk [vmem:[%s896_s3 + $0x98] sm:$0xff] %vm385_vm2, %v379_v8  ;;  %v272_v11 = vadd.f32 %v766_v16, %v271_v9  ;;  %v273_v12 = vpop.f32.mrb[15].mxu0  ;;  %v337_v13 = vadd.f32 %v766_v16, %v336_v10  ;;  %v338_v14 = vpop.f32.mrb[15].mxu1 }
 0x11b   :  { %v367_v15 = vmax.f32 %v272_v11, 0.0  ;;  %v380_v17 = vmax.f32 %v337_v13, 0.0 }
 0x11c   :  { %v276_v18 = vpop.f32.mrb[16].mxu0  ;;  %v341_v19 = vpop.f32.mrb[16].mxu1 }
 0x11d   :  { %393 = vst.msk [vmem:[%s896_s3 + $0x38] sm:$0xff] %vm385_vm2, %v367_v15  ;;  %406 = vst.msk [vmem:[%s896_s3 + $0xa0] sm:$0xff] %vm385_vm2, %v380_v17  ;;  %v277_v20 = vadd.f32 %v766_v16, %v276_v18  ;;  %v278_v21 = vpop.f32.mrb[17].mxu0  ;;  %v342_v22 = vadd.f32 %v766_v16, %v341_v19  ;;  %v343_v23 = vpop.f32.mrb[17].mxu1 }
 0x11f   :  { %v368_v24 = vmax.f32 %v277_v20, 0.0  ;;  %v381_v25 = vmax.f32 %v342_v22, 0.0 }
 0x120   :  { %v281_v26 = vpop.f32.mrb[18].mxu0  ;;  %v346_v27 = vpop.f32.mrb[18].mxu1 }
 0x121   :  { %394 = vst.msk [vmem:[%s896_s3 + $0x40] sm:$0xff] %vm385_vm2, %v368_v24  ;;  %407 = vst.msk [vmem:[%s896_s3 + $0xa8] sm:$0xff] %vm385_vm2, %v381_v25  ;;  %v282_v28 = vadd.f32 %v766_v16, %v281_v26  ;;  %v283_v29 = vpop.f32.mrb[19].mxu0  ;;  %v347_v30 = vadd.f32 %v766_v16, %v346_v27  ;;  %v348_v31 = vpop.f32.mrb[19].mxu1 }
 0x123   :  { %v369_v32 = vmax.f32 %v282_v28, 0.0  ;;  %v382_v33 = vmax.f32 %v347_v30, 0.0 }
 0x124   :  { %v286_v34 = vpop.f32.mrb[20].mxu0  ;;  %v351_v35 = vpop.f32.mrb[20].mxu1 }
 0x125   :  { %395 = vst.msk [vmem:[%s896_s3 + $0x48] sm:$0xff] %vm385_vm2, %v369_v32  ;;  %408 = vst.msk [vmem:[%s896_s3 + $0xb0] sm:$0xff] %vm385_vm2, %v382_v33  ;;  %v287_v36 = vadd.f32 %v766_v16, %v286_v34  ;;  %v288_v37 = vpop.f32.mrb[21].mxu0  ;;  %v352_v38 = vadd.f32 %v766_v16, %v351_v35  ;;  %v353_v39 = vpop.f32.mrb[21].mxu1 }
 0x127   :  { %v370_v40 = vmax.f32 %v287_v36, 0.0  ;;  %v383_v41 = vmax.f32 %v352_v38, 0.0 }
 0x128   :  { %v291_v42 = vpop.f32.mrb[22].mxu0  ;;  %v356_v43 = vpop.f32.mrb[22].mxu1 }
 0x129   :  { %396 = vst.msk [vmem:[%s896_s3 + $0x50] sm:$0xff] %vm385_vm2, %v370_v40  ;;  %409 = vst.msk [vmem:[%s896_s3 + $0xb8] sm:$0xff] %vm385_vm2, %v383_v41  ;;  %v292_v44 = vadd.f32 %v766_v16, %v291_v42  ;;  %v293_v45 = vpop.f32.mrb[23].mxu0  ;;  %v357_v46 = vadd.f32 %v766_v16, %v356_v43  ;;  %v358_v47 = vpop.f32.mrb[23].mxu1 }
 0x12b   :  { %v371_v48 = vmax.f32 %v292_v44, 0.0  ;;  %v384_v49 = vmax.f32 %v357_v46, 0.0 }
 0x12c   :  { %v296_v50 = vpop.f32.mrb[24].mxu0 }
 0x12d   :  { %397 = vst.msk [vmem:[%s896_s3 + $0x58] sm:$0xff] %vm385_vm2, %v371_v48  ;;  %410 = vst.msk [vmem:[%s896_s3 + $0xc0] sm:$0xff] %vm385_vm2, %v384_v49  ;;  %v297_v51 = vadd.f32 %v766_v16, %v296_v50  ;;  %v298_v52 = vpop.f32.mrb[25].mxu0 }
 0x12f   :  { %v372_v53 = vmax.f32 %v297_v51, 0.0 }
 0x131   :  { %398 = vst.msk [vmem:[%s896_s3 + $0x60] sm:$0xff] %vm385_vm2, %v372_v53 }

// kernel: lenet_forward.5
= control target key start
LH: loop header
LB: loop body
LE: loop exit
PB: predicated region body
PF: predicated region fallthrough
CT: control target
= control target key end

     0   :  { %s8480_s24 = smov 0   ;;  %s8482_s25 = smov 0   ;;  %s10238_s0 = inlined_call_operand.vmem [shape: bf16[8,512], index: 0, kind: input, shape index: {}]   ;;  %s10239_s1 = inlined_call_operand.vmem [shape: bf16[512,4096], index: 1, kind: input, shape index: {}]   ;;  %s10240_s2 = inlined_call_operand.vmem [shape: f32[1,4096], index: 2, kind: input, shape index: {}]   ;;  %s10241_s3 = inlined_call_operand.vmem [shape: bf16[4096,1024], index: 3, kind: input, shape index: {}]   ;;  %s10242_s4 = inlined_call_operand.vmem [shape: bf16[1024,128], index: 4, kind: input, shape index: {}]   ;;  %s10243_s5 = inlined_call_operand.vmem [shape: f32[1,1024], index: 5, kind: input, shape index: {}]   ;;  %s10244_s6 = inlined_call_operand.vmem [shape: f32[1,128], index: 6, kind: input, shape index: {}]   ;;  %s10245_s7 = inlined_call_operand.vmem [shape: f32[8,128], index: 7, kind: output, shape index: {}]  }
   0x1   :  { %s8484_s26 = smov 0  }
   0x2 LB: > { %s8496_s27 = sadd.s32 4294967295, %s8437_s26   ;;  %s8499_s28 = sadd.s32 1, %s8437_s26   ;;  %s8437_s26 = sphi %s8484_s26, %s10248_s26   ;;  %s8433_s25 = sphi %s8482_s25, %s10247_s25   ;;  %s8429_s24 = sphi %s8480_s24, %s10246_s24  }
   0x3   : > { %s42_s29 = ssub.s32 %s8437_s26, %s8499_s28  ;;  %s45_s30 = sadd.s32 1, %s8433_s25 }
   0x4   : > { %p43_p0 = scmp.eq.s32.totalorder %s42_s29, 0  ;;  %p52_p1 = scmp.ne.s32.totalorder %s8433_s25, %s8429_s24 }
   0x5   : > { %p53_p2 = scmp.eq.s32.totalorder %s8437_s26, 0  ;;  %p7357_p4 = scmp.ge.s32.totalorder %s8437_s26, 4 }
   0x6   : > { %s8508_s8 = scalar_select %p43_p0, %s8433_s25, %s45_s30  }
   0x7   : > { %p54_p3 = por %p53_p2, %p52_p1  ;;  %226 = sbr.rel (%p7357_p4) target bundleno = 146 (0x92), region = 32 }
   0xe   : > { %229 = sbr.rel (!%p54_p3) target bundleno = 146 (0x92), region = 36  ;;  %s231_s9 = sand.u32 (%p54_p3), 1, %s8433_s25  }
   0xf   : > { %s8208_s10 = sshll.u32 (%p54_p3), %s8437_s26, 5  ;;  %s7358_s11 = sshll.u32 (%p54_p3), %s231_s9, 11 }
  0x10   : > { %s8516_s14 = scalar_lea.vmem (%p54_p3), %s10239_s1, %s8208_s10  ;;  %s8521_s15 = scalar_lea.vmem (%p54_p3), [#allocation3], %s7358_s11 }
  0x11   : > { %v249_v0 = vld [vmem:[%s8516_s14] sm:$0xff] (%p54_p3)  ;;  %v251_v1 = vld [vmem:[%s8516_s14 + $0x8] sm:$0xff] (%p54_p3)  ;;  %v253_v2 = vld [vmem:[%s8516_s14 + $0x10] sm:$0xff] (%p54_p3) }
  0x12   : > { %250 = vst [vmem:[%s8521_s15] sm:$0xff] (%p54_p3), %v249_v0  ;;  %252 = vst [vmem:[%s8521_s15 + $0x8] sm:$0xff] (%p54_p3), %v251_v1  ;;  %v255_v3 = vld [vmem:[%s8516_s14 + $0x18] sm:$0xff] (%p54_p3)  ;;  %v257_v4 = vld [vmem:[%s8516_s14 + $0x80] sm:$0xff] (%p54_p3) }
  0x13   : > { %254 = vst [vmem:[%s8521_s15 + $0x10] sm:$0xff] (%p54_p3), %v253_v2  ;;  %v259_v5 = vld [vmem:[%s8516_s14 + $0x88] sm:$0xff] (%p54_p3)  ;;  %256 = vst [vmem:[%s8521_s15 + $0x18] sm:$0xff] (%p54_p3), %v255_v3  ;;  %v261_v6 = vld [vmem:[%s8516_s14 + $0x90] sm:$0xff] (%p54_p3) }
  0x14   : > { %258 = vst [vmem:[%s8521_s15 + $0x20] sm:$0xff] (%p54_p3), %v257_v4  ;;  %260 = vst [vmem:[%s8521_s15 + $0x28] sm:$0xff] (%p54_p3), %v259_v5  ;;  %v263_v7 = vld [vmem:[%s8516_s14 + $0x98] sm:$0xff] (%p54_p3)  ;;  %v265_v8 = vld [vmem:[%s8516_s14 + $0x100] sm:$0xff] (%p54_p3) }
  0x15   : > { %262 = vst [vmem:[%s8521_s15 + $0x30] sm:$0xff] %v261_v6  ;;  %264 = vst [vmem:[%s8521_s15 + $0x38] sm:$0xff] %v263_v7  ;;  %v267_v9 = vld [vmem:[%s8516_s14 + $0x108] sm:$0xff]  ;;  %v269_v10 = vld [vmem:[%s8516_s14 + $0x110] sm:$0xff] }
  0x16   : > { %266 = vst [vmem:[%s8521_s15 + $0x40] sm:$0xff] %v265_v8  ;;  %v271_v11 = vld [vmem:[%s8516_s14 + $0x118] sm:$0xff]  ;;  %268 = vst [vmem:[%s8521_s15 + $0x48] sm:$0xff] %v267_v9  ;;  %v273_v12 = vld [vmem:[%s8516_s14 + $0x180] sm:$0xff] }
  0x17   : > { %270 = vst [vmem:[%s8521_s15 + $0x50] sm:$0xff] %v269_v10  ;;  %272 = vst [vmem:[%s8521_s15 + $0x58] sm:$0xff] %v271_v11  ;;  %v275_v13 = vld [vmem:[%s8516_s14 + $0x188] sm:$0xff]  ;;  %v277_v14 = vld [vmem:[%s8516_s14 + $0x190] sm:$0xff] }
  0x18   : > { %274 = vst [vmem:[%s8521_s15 + $0x60] sm:$0xff] %v273_v12  ;;  %276 = vst [vmem:[%s8521_s15 + $0x68] sm:$0xff] %v275_v13  ;;  %v279_v15 = vld [vmem:[%s8516_s14 + $0x198] sm:$0xff]  ;;  %v281_v16 = vld [vmem:[%s8516_s14 + $0x200] sm:$0xff] }
  0x19   : > { %278 = vst [vmem:[%s8521_s15 + $0x70] sm:$0xff] %v277_v14  ;;  %v283_v17 = vld [vmem:[%s8516_s14 + $0x208] sm:$0xff]  ;;  %280 = vst [vmem:[%s8521_s15 + $0x78] sm:$0xff] %v279_v15  ;;  %v285_v18 = vld [vmem:[%s8516_s14 + $0x210] sm:$0xff] }
  0x1a   : > { %282 = vst [vmem:[%s8521_s15 + $0x80] sm:$0xff] %v281_v16  ;;  %284 = vst [vmem:[%s8521_s15 + $0x88] sm:$0xff] %v283_v17  ;;  %v287_v19 = vld [vmem:[%s8516_s14 + $0x218] sm:$0xff]  ;;  %v289_v20 = vld [vmem:[%s8516_s14 + $0x280] sm:$0xff] }
  0x1b   : > { %286 = vst [vmem:[%s8521_s15 + $0x90] sm:$0xff] %v285_v18  ;;  %288 = vst [vmem:[%s8521_s15 + $0x98] sm:$0xff] %v287_v19  ;;  %v291_v21 = vld [vmem:[%s8516_s14 + $0x288] sm:$0xff]  ;;  %v293_v22 = vld [vmem:[%s8516_s14 + $0x290] sm:$0xff] }
  0x1c   : > { %290 = vst [vmem:[%s8521_s15 + $0xa0] sm:$0xff] %v289_v20  ;;  %v295_v23 = vld [vmem:[%s8516_s14 + $0x298] sm:$0xff]  ;;  %292 = vst [vmem:[%s8521_s15 + $0xa8] sm:$0xff] %v291_v21  ;;  %v297_v24 = vld [vmem:[%s8516_s14 + $0x300] sm:$0xff] }
  0x1d   : > { %294 = vst [vmem:[%s8521_s15 + $0xb0] sm:$0xff] %v293_v22  ;;  %296 = vst [vmem:[%s8521_s15 + $0xb8] sm:$0xff] %v295_v23  ;;  %v299_v25 = vld [vmem:[%s8516_s14 + $0x308] sm:$0xff]  ;;  %v301_v26 = vld [vmem:[%s8516_s14 + $0x310] sm:$0xff] }
  0x1e   : > { %298 = vst [vmem:[%s8521_s15 + $0xc0] sm:$0xff] %v297_v24  ;;  %300 = vst [vmem:[%s8521_s15 + $0xc8] sm:$0xff] %v299_v25  ;;  %v303_v27 = vld [vmem:[%s8516_s14 + $0x318] sm:$0xff]  ;;  %v305_v28 = vld [vmem:[%s8516_s14 + $0x380] sm:$0xff] }
  0x1f   : > { %302 = vst [vmem:[%s8521_s15 + $0xd0] sm:$0xff] %v301_v26  ;;  %v307_v29 = vld [vmem:[%s8516_s14 + $0x388] sm:$0xff]  ;;  %304 = vst [vmem:[%s8521_s15 + $0xd8] sm:$0xff] %v303_v27  ;;  %v309_v30 = vld [vmem:[%s8516_s14 + $0x390] sm:$0xff] }
  0x20   : > { %306 = vst [vmem:[%s8521_s15 + $0xe0] sm:$0xff] %v305_v28  ;;  %308 = vst [vmem:[%s8521_s15 + $0xe8] sm:$0xff] %v307_v29  ;;  %v311_v31 = vld [vmem:[%s8516_s14 + $0x398] sm:$0xff]  ;;  %v313_v32 = vld [vmem:[%s8516_s14 + $0x400] sm:$0xff] }
  0x21   : > { %310 = vst [vmem:[%s8521_s15 + $0xf0] sm:$0xff] %v309_v30  ;;  %312 = vst [vmem:[%s8521_s15 + $0xf8] sm:$0xff] %v311_v31  ;;  %v315_v33 = vld [vmem:[%s8516_s14 + $0x408] sm:$0xff]  ;;  %v317_v34 = vld [vmem:[%s8516_s14 + $0x410] sm:$0xff] }
  0x22   : > { %314 = vst [vmem:[%s8521_s15 + $0x100] sm:$0xff] %v313_v32  ;;  %v319_v35 = vld [vmem:[%s8516_s14 + $0x418] sm:$0xff]  ;;  %316 = vst [vmem:[%s8521_s15 + $0x108] sm:$0xff] %v315_v33  ;;  %v321_v36 = vld [vmem:[%s8516_s14 + $0x480] sm:$0xff] }
  0x23   : > { %318 = vst [vmem:[%s8521_s15 + $0x110] sm:$0xff] %v317_v34  ;;  %320 = vst [vmem:[%s8521_s15 + $0x118] sm:$0xff] %v319_v35  ;;  %v323_v37 = vld [vmem:[%s8516_s14 + $0x488] sm:$0xff]  ;;  %v325_v38 = vld [vmem:[%s8516_s14 + $0x490] sm:$0xff] }
  0x24   : > { %322 = vst [vmem:[%s8521_s15 + $0x120] sm:$0xff] %v321_v36  ;;  %324 = vst [vmem:[%s8521_s15 + $0x128] sm:$0xff] %v323_v37  ;;  %v327_v39 = vld [vmem:[%s8516_s14 + $0x498] sm:$0xff]  ;;  %v329_v40 = vld [vmem:[%s8516_s14 + $0x500] sm:$0xff] }
  0x25   : > { %326 = vst [vmem:[%s8521_s15 + $0x130] sm:$0xff] %v325_v38  ;;  %v331_v41 = vld [vmem:[%s8516_s14 + $0x508] sm:$0xff]  ;;  %328 = vst [vmem:[%s8521_s15 + $0x138] sm:$0xff] %v327_v39  ;;  %v333_v42 = vld [vmem:[%s8516_s14 + $0x510] sm:$0xff] }
  0x26   : > { %330 = vst [vmem:[%s8521_s15 + $0x140] sm:$0xff] %v329_v40  ;;  %332 = vst [vmem:[%s8521_s15 + $0x148] sm:$0xff] %v331_v41  ;;  %v335_v43 = vld [vmem:[%s8516_s14 + $0x518] sm:$0xff]  ;;  %v337_v44 = vld [vmem:[%s8516_s14 + $0x580] sm:$0xff] }
  0x27   : > { %334 = vst [vmem:[%s8521_s15 + $0x150] sm:$0xff] %v333_v42  ;;  %336 = vst [vmem:[%s8521_s15 + $0x158] sm:$0xff] %v335_v43  ;;  %v339_v45 = vld [vmem:[%s8516_s14 + $0x588] sm:$0xff]  ;;  %v341_v46 = vld [vmem:[%s8516_s14 + $0x590] sm:$0xff] }
  0x28   : > { %338 = vst [vmem:[%s8521_s15 + $0x160] sm:$0xff] %v337_v44  ;;  %v343_v47 = vld [vmem:[%s8516_s14 + $0x598] sm:$0xff]  ;;  %340 = vst [vmem:[%s8521_s15 + $0x168] sm:$0xff] %v339_v45  ;;  %v345_v48 = vld [vmem:[%s8516_s14 + $0x600] sm:$0xff] }
  0x29   : > { %342 = vst [vmem:[%s8521_s15 + $0x170] sm:$0xff] %v341_v46  ;;  %344 = vst [vmem:[%s8521_s15 + $0x178] sm:$0xff] %v343_v47  ;;  %v347_v49 = vld [vmem:[%s8516_s14 + $0x608] sm:$0xff]  ;;  %v349_v50 = vld [vmem:[%s8516_s14 + $0x610] sm:$0xff] }
  0x2a   : > { %346 = vst [vmem:[%s8521_s15 + $0x180] sm:$0xff] %v345_v48  ;;  %348 = vst [vmem:[%s8521_s15 + $0x188] sm:$0xff] %v347_v49  ;;  %v351_v51 = vld [vmem:[%s8516_s14 + $0x618] sm:$0xff]  ;;  %v353_v52 = vld [vmem:[%s8516_s14 + $0x680] sm:$0xff] }
  0x2b   : > { %350 = vst [vmem:[%s8521_s15 + $0x190] sm:$0xff] %v349_v50  ;;  %v355_v53 = vld [vmem:[%s8516_s14 + $0x688] sm:$0xff]  ;;  %352 = vst [vmem:[%s8521_s15 + $0x198] sm:$0xff] %v351_v51  ;;  %v357_v54 = vld [vmem:[%s8516_s14 + $0x690] sm:$0xff] }
  0x2c   : > { %354 = vst [vmem:[%s8521_s15 + $0x1a0] sm:$0xff] %v353_v52  ;;  %356 = vst [vmem:[%s8521_s15 + $0x1a8] sm:$0xff] %v355_v53  ;;  %v359_v55 = vld [vmem:[%s8516_s14 + $0x698] sm:$0xff]  ;;  %v361_v56 = vld [vmem:[%s8516_s14 + $0x700] sm:$0xff] }
  0x2d   : > { %358 = vst [vmem:[%s8521_s15 + $0x1b0] sm:$0xff] %v357_v54  ;;  %360 = vst [vmem:[%s8521_s15 + $0x1b8] sm:$0xff] %v359_v55  ;;  %v363_v57 = vld [vmem:[%s8516_s14 + $0x708] sm:$0xff]  ;;  %v365_v58 = vld [vmem:[%s8516_s14 + $0x710] sm:$0xff] }
  0x2e   : > { %362 = vst [vmem:[%s8521_s15 + $0x1c0] sm:$0xff] %v361_v56  ;;  %v367_v59 = vld [vmem:[%s8516_s14 + $0x718] sm:$0xff]  ;;  %364 = vst [vmem:[%s8521_s15 + $0x1c8] sm:$0xff] %v363_v57  ;;  %v369_v60 = vld [vmem:[%s8516_s14 + $0x780] sm:$0xff] }
  0x2f   : > { %366 = vst [vmem:[%s8521_s15 + $0x1d0] sm:$0xff] %v365_v58  ;;  %368 = vst [vmem:[%s8521_s15 + $0x1d8] sm:$0xff] %v367_v59  ;;  %v371_v61 = vld [vmem:[%s8516_s14 + $0x788] sm:$0xff]  ;;  %v373_v62 = vld [vmem:[%s8516_s14 + $0x790] sm:$0xff] }
  0x30   : > { %370 = vst [vmem:[%s8521_s15 + $0x1e0] sm:$0xff] %v369_v60  ;;  %372 = vst [vmem:[%s8521_s15 + $0x1e8] sm:$0xff] %v371_v61  ;;  %v375_v63 = vld [vmem:[%s8516_s14 + $0x798] sm:$0xff]  ;;  %v377_v0 = vld [vmem:[%s8516_s14 + $0x800] sm:$0xff] }
  0x31   : > { %374 = vst [vmem:[%s8521_s15 + $0x1f0] sm:$0xff] %v373_v62  ;;  %v379_v1 = vld [vmem:[%s8516_s14 + $0x808] sm:$0xff]  ;;  %376 = vst [vmem:[%s8521_s15 + $0x1f8] sm:$0xff] %v375_v63  ;;  %v381_v2 = vld [vmem:[%s8516_s14 + $0x810] sm:$0xff] }
  0x32   : > { %378 = vst [vmem:[%s8521_s15 + $0x200] sm:$0xff] %v377_v0  ;;  %380 = vst [vmem:[%s8521_s15 + $0x208] sm:$0xff] %v379_v1  ;;  %v383_v3 = vld [vmem:[%s8516_s14 + $0x818] sm:$0xff]  ;;  %v385_v4 = vld [vmem:[%s8516_s14 + $0x880] sm:$0xff] }
  0x33   : > { %382 = vst [vmem:[%s8521_s15 + $0x210] sm:$0xff] %v381_v2  ;;  %384 = vst [vmem:[%s8521_s15 + $0x218] sm:$0xff] %v383_v3  ;;  %v387_v5 = vld [vmem:[%s8516_s14 + $0x888] sm:$0xff]  ;;  %v389_v6 = vld [vmem:[%s8516_s14 + $0x890] sm:$0xff] }
  0x34   : > { %386 = vst [vmem:[%s8521_s15 + $0x220] sm:$0xff] %v385_v4  ;;  %v391_v7 = vld [vmem:[%s8516_s14 + $0x898] sm:$0xff]  ;;  %388 = vst [vmem:[%s8521_s15 + $0x228] sm:$0xff] %v387_v5  ;;  %v393_v8 = vld [vmem:[%s8516_s14 + $0x900] sm:$0xff] }
  0x35   : > { %390 = vst [vmem:[%s8521_s15 + $0x230] sm:$0xff] %v389_v6  ;;  %392 = vst [vmem:[%s8521_s15 + $0x238] sm:$0xff] %v391_v7  ;;  %v395_v9 = vld [vmem:[%s8516_s14 + $0x908] sm:$0xff]  ;;  %v397_v10 = vld [vmem:[%s8516_s14 + $0x910] sm:$0xff] }
  0x36   : > { %394 = vst [vmem:[%s8521_s15 + $0x240] sm:$0xff] %v393_v8  ;;  %396 = vst [vmem:[%s8521_s15 + $0x248] sm:$0xff] %v395_v9  ;;  %v399_v11 = vld [vmem:[%s8516_s14 + $0x918] sm:$0xff]  ;;  %v401_v12 = vld [vmem:[%s8516_s14 + $0x980] sm:$0xff] }
  0x37   : > { %398 = vst [vmem:[%s8521_s15 + $0x250] sm:$0xff] %v397_v10  ;;  %v403_v13 = vld [vmem:[%s8516_s14 + $0x988] sm:$0xff]  ;;  %400 = vst [vmem:[%s8521_s15 + $0x258] sm:$0xff] %v399_v11  ;;  %v405_v14 = vld [vmem:[%s8516_s14 + $0x990] sm:$0xff] }
  0x38   : > { %402 = vst [vmem:[%s8521_s15 + $0x260] sm:$0xff] %v401_v12  ;;  %404 = vst [vmem:[%s8521_s15 + $0x268] sm:$0xff] %v403_v13  ;;  %v407_v15 = vld [vmem:[%s8516_s14 + $0x998] sm:$0xff]  ;;  %v409_v16 = vld [vmem:[%s8516_s14 + $0xa00] sm:$0xff] }
  0x39   : > { %406 = vst [vmem:[%s8521_s15 + $0x270] sm:$0xff] %v405_v14  ;;  %408 = vst [vmem:[%s8521_s15 + $0x278] sm:$0xff] %v407_v15  ;;  %v411_v17 = vld [vmem:[%s8516_s14 + $0xa08] sm:$0xff]  ;;  %v413_v18 = vld [vmem:[%s8516_s14 + $0xa10] sm:$0xff] }
  0x3a   : > { %410 = vst [vmem:[%s8521_s15 + $0x280] sm:$0xff] %v409_v16  ;;  %v415_v19 = vld [vmem:[%s8516_s14 + $0xa18] sm:$0xff]  ;;  %412 = vst [vmem:[%s8521_s15 + $0x288] sm:$0xff] %v411_v17  ;;  %v417_v20 = vld [vmem:[%s8516_s14 + $0xa80] sm:$0xff] }
  0x3b   : > { %414 = vst [vmem:[%s8521_s15 + $0x290] sm:$0xff] %v413_v18  ;;  %416 = vst [vmem:[%s8521_s15 + $0x298] sm:$0xff] %v415_v19  ;;  %v419_v21 = vld [vmem:[%s8516_s14 + $0xa88] sm:$0xff]  ;;  %v421_v22 = vld [vmem:[%s8516_s14 + $0xa90] sm:$0xff] }
  0x3c   : > { %418 = vst [vmem:[%s8521_s15 + $0x2a0] sm:$0xff] %v417_v20  ;;  %420 = vst [vmem:[%s8521_s15 + $0x2a8] sm:$0xff] %v419_v21  ;;  %v423_v23 = vld [vmem:[%s8516_s14 + $0xa98] sm:$0xff]  ;;  %v425_v24 = vld [vmem:[%s8516_s14 + $0xb00] sm:$0xff] }
  0x3d   : > { %422 = vst [vmem:[%s8521_s15 + $0x2b0] sm:$0xff] %v421_v22  ;;  %v427_v25 = vld [vmem:[%s8516_s14 + $0xb08] sm:$0xff]  ;;  %424 = vst [vmem:[%s8521_s15 + $0x2b8] sm:$0xff] %v423_v23  ;;  %v429_v26 = vld [vmem:[%s8516_s14 + $0xb10] sm:$0xff] }
  0x3e   : > { %426 = vst [vmem:[%s8521_s15 + $0x2c0] sm:$0xff] %v425_v24  ;;  %428 = vst [vmem:[%s8521_s15 + $0x2c8] sm:$0xff] %v427_v25  ;;  %v431_v27 = vld [vmem:[%s8516_s14 + $0xb18] sm:$0xff]  ;;  %v433_v28 = vld [vmem:[%s8516_s14 + $0xb80] sm:$0xff] }
  0x3f   : > { %430 = vst [vmem:[%s8521_s15 + $0x2d0] sm:$0xff] %v429_v26  ;;  %432 = vst [vmem:[%s8521_s15 + $0x2d8] sm:$0xff] %v431_v27  ;;  %v435_v29 = vld [vmem:[%s8516_s14 + $0xb88] sm:$0xff]  ;;  %v437_v30 = vld [vmem:[%s8516_s14 + $0xb90] sm:$0xff] }
  0x40   : > { %434 = vst [vmem:[%s8521_s15 + $0x2e0] sm:$0xff] %v433_v28  ;;  %v439_v31 = vld [vmem:[%s8516_s14 + $0xb98] sm:$0xff]  ;;  %436 = vst [vmem:[%s8521_s15 + $0x2e8] sm:$0xff] %v435_v29  ;;  %v441_v32 = vld [vmem:[%s8516_s14 + $0xc00] sm:$0xff] }
  0x41   : > { %438 = vst [vmem:[%s8521_s15 + $0x2f0] sm:$0xff] %v437_v30  ;;  %440 = vst [vmem:[%s8521_s15 + $0x2f8] sm:$0xff] %v439_v31  ;;  %v443_v33 = vld [vmem:[%s8516_s14 + $0xc08] sm:$0xff]  ;;  %v445_v34 = vld [vmem:[%s8516_s14 + $0xc10] sm:$0xff] }
  0x42   : > { %442 = vst [vmem:[%s8521_s15 + $0x300] sm:$0xff] %v441_v32  ;;  %444 = vst [vmem:[%s8521_s15 + $0x308] sm:$0xff] %v443_v33  ;;  %v447_v35 = vld [vmem:[%s8516_s14 + $0xc18] sm:$0xff]  ;;  %v449_v36 = vld [vmem:[%s8516_s14 + $0xc80] sm:$0xff] }
  0x43   : > { %446 = vst [vmem:[%s8521_s15 + $0x310] sm:$0xff] %v445_v34  ;;  %v451_v37 = vld [vmem:[%s8516_s14 + $0xc88] sm:$0xff]  ;;  %448 = vst [vmem:[%s8521_s15 + $0x318] sm:$0xff] %v447_v35  ;;  %v453_v38 = vld [vmem:[%s8516_s14 + $0xc90] sm:$0xff] }
  0x44   : > { %450 = vst [vmem:[%s8521_s15 + $0x320] sm:$0xff] %v449_v36  ;;  %452 = vst [vmem:[%s8521_s15 + $0x328] sm:$0xff] %v451_v37  ;;  %v455_v39 = vld [vmem:[%s8516_s14 + $0xc98] sm:$0xff]  ;;  %v457_v40 = vld [vmem:[%s8516_s14 + $0xd00] sm:$0xff] }
  0x45   : > { %454 = vst [vmem:[%s8521_s15 + $0x330] sm:$0xff] %v453_v38  ;;  %456 = vst [vmem:[%s8521_s15 + $0x338] sm:$0xff] %v455_v39  ;;  %v459_v41 = vld [vmem:[%s8516_s14 + $0xd08] sm:$0xff]  ;;  %v461_v42 = vld [vmem:[%s8516_s14 + $0xd10] sm:$0xff] }
  0x46   : > { %458 = vst [vmem:[%s8521_s15 + $0x340] sm:$0xff] %v457_v40  ;;  %v463_v43 = vld [vmem:[%s8516_s14 + $0xd18] sm:$0xff]  ;;  %460 = vst [vmem:[%s8521_s15 + $0x348] sm:$0xff] %v459_v41  ;;  %v465_v44 = vld [vmem:[%s8516_s14 + $0xd80] sm:$0xff] }
  0x47   : > { %462 = vst [vmem:[%s8521_s15 + $0x350] sm:$0xff] %v461_v42  ;;  %464 = vst [vmem:[%s8521_s15 + $0x358] sm:$0xff] %v463_v43  ;;  %v467_v45 = vld [vmem:[%s8516_s14 + $0xd88] sm:$0xff]  ;;  %v469_v46 = vld [vmem:[%s8516_s14 + $0xd90] sm:$0xff] }
  0x48   : > { %466 = vst [vmem:[%s8521_s15 + $0x360] sm:$0xff] %v465_v44  ;;  %468 = vst [vmem:[%s8521_s15 + $0x368] sm:$0xff] %v467_v45  ;;  %v471_v47 = vld [vmem:[%s8516_s14 + $0xd98] sm:$0xff]  ;;  %v473_v48 = vld [vmem:[%s8516_s14 + $0xe00] sm:$0xff] }
  0x49   : > { %470 = vst [vmem:[%s8521_s15 + $0x370] sm:$0xff] %v469_v46  ;;  %v475_v49 = vld [vmem:[%s8516_s14 + $0xe08] sm:$0xff]  ;;  %472 = vst [vmem:[%s8521_s15 + $0x378] sm:$0xff] %v471_v47  ;;  %v477_v50 = vld [vmem:[%s8516_s14 + $0xe10] sm:$0xff] }
  0x4a   : > { %474 = vst [vmem:[%s8521_s15 + $0x380] sm:$0xff] %v473_v48  ;;  %476 = vst [vmem:[%s8521_s15 + $0x388] sm:$0xff] %v475_v49  ;;  %v479_v51 = vld [vmem:[%s8516_s14 + $0xe18] sm:$0xff]  ;;  %v481_v52 = vld [vmem:[%s8516_s14 + $0xe80] sm:$0xff] }
  0x4b   : > { %478 = vst [vmem:[%s8521_s15 + $0x390] sm:$0xff] %v477_v50  ;;  %480 = vst [vmem:[%s8521_s15 + $0x398] sm:$0xff] %v479_v51  ;;  %v483_v53 = vld [vmem:[%s8516_s14 + $0xe88] sm:$0xff]  ;;  %v485_v54 = vld [vmem:[%s8516_s14 + $0xe90] sm:$0xff] }
  0x4c   : > { %482 = vst [vmem:[%s8521_s15 + $0x3a0] sm:$0xff] %v481_v52  ;;  %v487_v55 = vld [vmem:[%s8516_s14 + $0xe98] sm:$0xff]  ;;  %484 = vst [vmem:[%s8521_s15 + $0x3a8] sm:$0xff] %v483_v53  ;;  %v489_v56 = vld [vmem:[%s8516_s14 + $0xf00] sm:$0xff] }
  0x4d   : > { %486 = vst [vmem:[%s8521_s15 + $0x3b0] sm:$0xff] %v485_v54  ;;  %488 = vst [vmem:[%s8521_s15 + $0x3b8] sm:$0xff] %v487_v55  ;;  %v491_v57 = vld [vmem:[%s8516_s14 + $0xf08] sm:$0xff]  ;;  %v493_v58 = vld [vmem:[%s8516_s14 + $0xf10] sm:$0xff] }
  0x4e   : > { %490 = vst [vmem:[%s8521_s15 + $0x3c0] sm:$0xff] %v489_v56  ;;  %492 = vst [vmem:[%s8521_s15 + $0x3c8] sm:$0xff] %v491_v57  ;;  %v495_v59 = vld [vmem:[%s8516_s14 + $0xf18] sm:$0xff]  ;;  %v497_v60 = vld [vmem:[%s8516_s14 + $0xf80] sm:$0xff] }
  0x4f   : > { %494 = vst [vmem:[%s8521_s15 + $0x3d0] sm:$0xff] %v493_v58  ;;  %v499_v61 = vld [vmem:[%s8516_s14 + $0xf88] sm:$0xff]  ;;  %496 = vst [vmem:[%s8521_s15 + $0x3d8] sm:$0xff] %v495_v59  ;;  %v501_v62 = vld [vmem:[%s8516_s14 + $0xf90] sm:$0xff] }
  0x50   : > { %498 = vst [vmem:[%s8521_s15 + $0x3e0] sm:$0xff] %v497_v60  ;;  %500 = vst [vmem:[%s8521_s15 + $0x3e8] sm:$0xff] %v499_v61  ;;  %v503_v63 = vld [vmem:[%s8516_s14 + $0xf98] sm:$0xff]  ;;  %v505_v0 = vld [vmem:[%s8516_s14 + $0x1000] sm:$0xff] }
  0x51   : > { %502 = vst [vmem:[%s8521_s15 + $0x3f0] sm:$0xff] %v501_v62  ;;  %504 = vst [vmem:[%s8521_s15 + $0x3f8] sm:$0xff] %v503_v63  ;;  %v507_v1 = vld [vmem:[%s8516_s14 + $0x1008] sm:$0xff]  ;;  %v509_v2 = vld [vmem:[%s8516_s14 + $0x1010] sm:$0xff] }
  0x52   : > { %506 = vst [vmem:[%s8521_s15 + $0x400] sm:$0xff] %v505_v0  ;;  %v511_v3 = vld [vmem:[%s8516_s14 + $0x1018] sm:$0xff]  ;;  %508 = vst [vmem:[%s8521_s15 + $0x408] sm:$0xff] %v507_v1  ;;  %v513_v4 = vld [vmem:[%s8516_s14 + $0x1080] sm:$0xff] }
  0x53   : > { %510 = vst [vmem:[%s8521_s15 + $0x410] sm:$0xff] %v509_v2  ;;  %512 = vst [vmem:[%s8521_s15 + $0x418] sm:$0xff] %v511_v3  ;;  %v515_v5 = vld [vmem:[%s8516_s14 + $0x1088] sm:$0xff]  ;;  %v517_v6 = vld [vmem:[%s8516_s14 + $0x1090] sm:$0xff] }
  0x54   : > { %514 = vst [vmem:[%s8521_s15 + $0x420] sm:$0xff] %v513_v4  ;;  %516 = vst [vmem:[%s8521_s15 + $0x428] sm:$0xff] %v515_v5  ;;  %v519_v7 = vld [vmem:[%s8516_s14 + $0x1098] sm:$0xff]  ;;  %v521_v8 = vld [vmem:[%s8516_s14 + $0x1100] sm:$0xff] }
  0x55   : > { %518 = vst [vmem:[%s8521_s15 + $0x430] sm:$0xff] %v517_v6  ;;  %v523_v9 = vld [vmem:[%s8516_s14 + $0x1108] sm:$0xff]  ;;  %520 = vst [vmem:[%s8521_s15 + $0x438] sm:$0xff] %v519_v7  ;;  %v525_v10 = vld [vmem:[%s8516_s14 + $0x1110] sm:$0xff] }
  0x56   : > { %522 = vst [vmem:[%s8521_s15 + $0x440] sm:$0xff] %v521_v8  ;;  %524 = vst [vmem:[%s8521_s15 + $0x448] sm:$0xff] %v523_v9  ;;  %v527_v11 = vld [vmem:[%s8516_s14 + $0x1118] sm:$0xff]  ;;  %v529_v12 = vld [vmem:[%s8516_s14 + $0x1180] sm:$0xff] }
  0x57   : > { %526 = vst [vmem:[%s8521_s15 + $0x450] sm:$0xff] %v525_v10  ;;  %528 = vst [vmem:[%s8521_s15 + $0x458] sm:$0xff] %v527_v11  ;;  %v531_v13 = vld [vmem:[%s8516_s14 + $0x1188] sm:$0xff]  ;;  %v533_v14 = vld [vmem:[%s8516_s14 + $0x1190] sm:$0xff] }
  0x58   : > { %530 = vst [vmem:[%s8521_s15 + $0x460] sm:$0xff] %v529_v12  ;;  %v535_v15 = vld [vmem:[%s8516_s14 + $0x1198] sm:$0xff]  ;;  %532 = vst [vmem:[%s8521_s15 + $0x468] sm:$0xff] %v531_v13  ;;  %v537_v16 = vld [vmem:[%s8516_s14 + $0x1200] sm:$0xff] }
  0x59   : > { %534 = vst [vmem:[%s8521_s15 + $0x470] sm:$0xff] %v533_v14  ;;  %536 = vst [vmem:[%s8521_s15 + $0x478] sm:$0xff] %v535_v15  ;;  %v539_v17 = vld [vmem:[%s8516_s14 + $0x1208] sm:$0xff]  ;;  %v541_v18 = vld [vmem:[%s8516_s14 + $0x1210] sm:$0xff] }
  0x5a   : > { %538 = vst [vmem:[%s8521_s15 + $0x480] sm:$0xff] %v537_v16  ;;  %540 = vst [vmem:[%s8521_s15 + $0x488] sm:$0xff] %v539_v17  ;;  %v543_v19 = vld [vmem:[%s8516_s14 + $0x1218] sm:$0xff]  ;;  %v545_v20 = vld [vmem:[%s8516_s14 + $0x1280] sm:$0xff] }
  0x5b   : > { %542 = vst [vmem:[%s8521_s15 + $0x490] sm:$0xff] %v541_v18  ;;  %v547_v21 = vld [vmem:[%s8516_s14 + $0x1288] sm:$0xff]  ;;  %544 = vst [vmem:[%s8521_s15 + $0x498] sm:$0xff] %v543_v19  ;;  %v549_v22 = vld [vmem:[%s8516_s14 + $0x1290] sm:$0xff] }
  0x5c   : > { %546 = vst [vmem:[%s8521_s15 + $0x4a0] sm:$0xff] %v545_v20  ;;  %548 = vst [vmem:[%s8521_s15 + $0x4a8] sm:$0xff] %v547_v21  ;;  %v551_v23 = vld [vmem:[%s8516_s14 + $0x1298] sm:$0xff]  ;;  %v553_v24 = vld [vmem:[%s8516_s14 + $0x1300] sm:$0xff] }
  0x5d   : > { %550 = vst [vmem:[%s8521_s15 + $0x4b0] sm:$0xff] %v549_v22  ;;  %552 = vst [vmem:[%s8521_s15 + $0x4b8] sm:$0xff] %v551_v23  ;;  %v555_v25 = vld [vmem:[%s8516_s14 + $0x1308] sm:$0xff]  ;;  %v557_v26 = vld [vmem:[%s8516_s14 + $0x1310] sm:$0xff] }
  0x5e   : > { %554 = vst [vmem:[%s8521_s15 + $0x4c0] sm:$0xff] %v553_v24  ;;  %v559_v27 = vld [vmem:[%s8516_s14 + $0x1318] sm:$0xff]  ;;  %556 = vst [vmem:[%s8521_s15 + $0x4c8] sm:$0xff] %v555_v25  ;;  %v561_v28 = vld [vmem:[%s8516_s14 + $0x1380] sm:$0xff] }
  0x5f   : > { %558 = vst [vmem:[%s8521_s15 + $0x4d0] sm:$0xff] %v557_v26  ;;  %560 = vst [vmem:[%s8521_s15 + $0x4d8] sm:$0xff] %v559_v27  ;;  %v563_v29 = vld [vmem:[%s8516_s14 + $0x1388] sm:$0xff]  ;;  %v565_v30 = vld [vmem:[%s8516_s14 + $0x1390] sm:$0xff] }
  0x60   : > { %562 = vst [vmem:[%s8521_s15 + $0x4e0] sm:$0xff] %v561_v28  ;;  %564 = vst [vmem:[%s8521_s15 + $0x4e8] sm:$0xff] %v563_v29  ;;  %v567_v31 = vld [vmem:[%s8516_s14 + $0x1398] sm:$0xff]  ;;  %v569_v32 = vld [vmem:[%s8516_s14 + $0x1400] sm:$0xff] }
  0x61   : > { %566 = vst [vmem:[%s8521_s15 + $0x4f0] sm:$0xff] %v565_v30  ;;  %v571_v33 = vld [vmem:[%s8516_s14 + $0x1408] sm:$0xff]  ;;  %568 = vst [vmem:[%s8521_s15 + $0x4f8] sm:$0xff] %v567_v31  ;;  %v573_v34 = vld [vmem:[%s8516_s14 + $0x1410] sm:$0xff] }
  0x62   : > { %570 = vst [vmem:[%s8521_s15 + $0x500] sm:$0xff] %v569_v32  ;;  %572 = vst [vmem:[%s8521_s15 + $0x508] sm:$0xff] %v571_v33  ;;  %v575_v35 = vld [vmem:[%s8516_s14 + $0x1418] sm:$0xff]  ;;  %v577_v36 = vld [vmem:[%s8516_s14 + $0x1480] sm:$0xff] }
  0x63   : > { %574 = vst [vmem:[%s8521_s15 + $0x510] sm:$0xff] %v573_v34  ;;  %576 = vst [vmem:[%s8521_s15 + $0x518] sm:$0xff] %v575_v35  ;;  %v579_v37 = vld [vmem:[%s8516_s14 + $0x1488] sm:$0xff]  ;;  %v581_v38 = vld [vmem:[%s8516_s14 + $0x1490] sm:$0xff] }
  0x64   : > { %578 = vst [vmem:[%s8521_s15 + $0x520] sm:$0xff] %v577_v36  ;;  %v583_v39 = vld [vmem:[%s8516_s14 + $0x1498] sm:$0xff]  ;;  %580 = vst [vmem:[%s8521_s15 + $0x528] sm:$0xff] %v579_v37  ;;  %v585_v40 = vld [vmem:[%s8516_s14 + $0x1500] sm:$0xff] }
  0x65   : > { %582 = vst [vmem:[%s8521_s15 + $0x530] sm:$0xff] %v581_v38  ;;  %584 = vst [vmem:[%s8521_s15 + $0x538] sm:$0xff] %v583_v39  ;;  %v587_v41 = vld [vmem:[%s8516_s14 + $0x1508] sm:$0xff]  ;;  %v589_v42 = vld [vmem:[%s8516_s14 + $0x1510] sm:$0xff] }
  0x66   : > { %586 = vst [vmem:[%s8521_s15 + $0x540] sm:$0xff] %v585_v40  ;;  %588 = vst [vmem:[%s8521_s15 + $0x548] sm:$0xff] %v587_v41  ;;  %v591_v43 = vld [vmem:[%s8516_s14 + $0x1518] sm:$0xff]  ;;  %v593_v44 = vld [vmem:[%s8516_s14 + $0x1580] sm:$0xff] }
  0x67   : > { %590 = vst [vmem:[%s8521_s15 + $0x550] sm:$0xff] %v589_v42  ;;  %v595_v45 = vld [vmem:[%s8516_s14 + $0x1588] sm:$0xff]  ;;  %592 = vst [vmem:[%s8521_s15 + $0x558] sm:$0xff] %v591_v43  ;;  %v597_v46 = vld [vmem:[%s8516_s14 + $0x1590] sm:$0xff] }
  0x68   : > { %594 = vst [vmem:[%s8521_s15 + $0x560] sm:$0xff] %v593_v44  ;;  %596 = vst [vmem:[%s8521_s15 + $0x568] sm:$0xff] %v595_v45  ;;  %v599_v47 = vld [vmem:[%s8516_s14 + $0x1598] sm:$0xff]  ;;  %v601_v48 = vld [vmem:[%s8516_s14 + $0x1600] sm:$0xff] }
  0x69   : > { %598 = vst [vmem:[%s8521_s15 + $0x570] sm:$0xff] %v597_v46  ;;  %600 = vst [vmem:[%s8521_s15 + $0x578] sm:$0xff] %v599_v47  ;;  %v603_v49 = vld [vmem:[%s8516_s14 + $0x1608] sm:$0xff]  ;;  %v605_v50 = vld [vmem:[%s8516_s14 + $0x1610] sm:$0xff] }
  0x6a   : > { %602 = vst [vmem:[%s8521_s15 + $0x580] sm:$0xff] %v601_v48  ;;  %v607_v51 = vld [vmem:[%s8516_s14 + $0x1618] sm:$0xff]  ;;  %604 = vst [vmem:[%s8521_s15 + $0x588] sm:$0xff] %v603_v49  ;;  %v609_v52 = vld [vmem:[%s8516_s14 + $0x1680] sm:$0xff] }
  0x6b   : > { %606 = vst [vmem:[%s8521_s15 + $0x590] sm:$0xff] %v605_v50  ;;  %608 = vst [vmem:[%s8521_s15 + $0x598] sm:$0xff] %v607_v51  ;;  %v611_v53 = vld [vmem:[%s8516_s14 + $0x1688] sm:$0xff]  ;;  %v613_v54 = vld [vmem:[%s8516_s14 + $0x1690] sm:$0xff] }
  0x6c   : > { %610 = vst [vmem:[%s8521_s15 + $0x5a0] sm:$0xff] %v609_v52  ;;  %612 = vst [vmem:[%s8521_s15 + $0x5a8] sm:$0xff] %v611_v53  ;;  %v615_v55 = vld [vmem:[%s8516_s14 + $0x1698] sm:$0xff]  ;;  %v617_v56 = vld [vmem:[%s8516_s14 + $0x1700] sm:$0xff] }
  0x6d   : > { %614 = vst [vmem:[%s8521_s15 + $0x5b0] sm:$0xff] %v613_v54  ;;  %v619_v57 = vld [vmem:[%s8516_s14 + $0x1708] sm:$0xff]  ;;  %616 = vst [vmem:[%s8521_s15 + $0x5b8] sm:$0xff] %v615_v55  ;;  %v621_v58 = vld [vmem:[%s8516_s14 + $0x1710] sm:$0xff] }
  0x6e   : > { %618 = vst [vmem:[%s8521_s15 + $0x5c0] sm:$0xff] %v617_v56  ;;  %620 = vst [vmem:[%s8521_s15 + $0x5c8] sm:$0xff] %v619_v57  ;;  %v623_v59 = vld [vmem:[%s8516_s14 + $0x1718] sm:$0xff]  ;;  %v625_v60 = vld [vmem:[%s8516_s14 + $0x1780] sm:$0xff] }
  0x6f   : > { %622 = vst [vmem:[%s8521_s15 + $0x5d0] sm:$0xff] %v621_v58  ;;  %624 = vst [vmem:[%s8521_s15 + $0x5d8] sm:$0xff] %v623_v59  ;;  %v627_v61 = vld [vmem:[%s8516_s14 + $0x1788] sm:$0xff]  ;;  %v629_v62 = vld [vmem:[%s8516_s14 + $0x1790] sm:$0xff] }
  0x70   : > { %626 = vst [vmem:[%s8521_s15 + $0x5e0] sm:$0xff] %v625_v60  ;;  %v631_v63 = vld [vmem:[%s8516_s14 + $0x1798] sm:$0xff]  ;;  %628 = vst [vmem:[%s8521_s15 + $0x5e8] sm:$0xff] %v627_v61  ;;  %v633_v0 = vld [vmem:[%s8516_s14 + $0x1800] sm:$0xff] }
  0x71   : > { %630 = vst [vmem:[%s8521_s15 + $0x5f0] sm:$0xff] %v629_v62  ;;  %632 = vst [vmem:[%s8521_s15 + $0x5f8] sm:$0xff] %v631_v63  ;;  %v635_v1 = vld [vmem:[%s8516_s14 + $0x1808] sm:$0xff]  ;;  %v637_v2 = vld [vmem:[%s8516_s14 + $0x1810] sm:$0xff] }
  0x72   : > { %634 = vst [vmem:[%s8521_s15 + $0x600] sm:$0xff] %v633_v0  ;;  %636 = vst [vmem:[%s8521_s15 + $0x608] sm:$0xff] %v635_v1  ;;  %v639_v3 = vld [vmem:[%s8516_s14 + $0x1818] sm:$0xff]  ;;  %v641_v4 = vld [vmem:[%s8516_s14 + $0x1880] sm:$0xff] }
  0x73   : > { %638 = vst [vmem:[%s8521_s15 + $0x610] sm:$0xff] %v637_v2  ;;  %v643_v5 = vld [vmem:[%s8516_s14 + $0x1888] sm:$0xff]  ;;  %640 = vst [vmem:[%s8521_s15 + $0x618] sm:$0xff] %v639_v3  ;;  %v645_v6 = vld [vmem:[%s8516_s14 + $0x1890] sm:$0xff] }
  0x74   : > { %642 = vst [vmem:[%s8521_s15 + $0x620] sm:$0xff] %v641_v4  ;;  %644 = vst [vmem:[%s8521_s15 + $0x628] sm:$0xff] %v643_v5  ;;  %v647_v7 = vld [vmem:[%s8516_s14 + $0x1898] sm:$0xff]  ;;  %v649_v8 = vld [vmem:[%s8516_s14 + $0x1900] sm:$0xff] }
  0x75   : > { %646 = vst [vmem:[%s8521_s15 + $0x630] sm:$0xff] %v645_v6  ;;  %648 = vst [vmem:[%s8521_s15 + $0x638] sm:$0xff] %v647_v7  ;;  %v651_v9 = vld [vmem:[%s8516_s14 + $0x1908] sm:$0xff]  ;;  %v653_v10 = vld [vmem:[%s8516_s14 + $0x1910] sm:$0xff] }
  0x76   : > { %650 = vst [vmem:[%s8521_s15 + $0x640] sm:$0xff] %v649_v8  ;;  %v655_v11 = vld [vmem:[%s8516_s14 + $0x1918] sm:$0xff]  ;;  %652 = vst [vmem:[%s8521_s15 + $0x648] sm:$0xff] %v651_v9  ;;  %v657_v12 = vld [vmem:[%s8516_s14 + $0x1980] sm:$0xff] }
  0x77   : > { %654 = vst [vmem:[%s8521_s15 + $0x650] sm:$0xff] %v653_v10  ;;  %656 = vst [vmem:[%s8521_s15 + $0x658] sm:$0xff] %v655_v11  ;;  %v659_v13 = vld [vmem:[%s8516_s14 + $0x1988] sm:$0xff]  ;;  %v661_v14 = vld [vmem:[%s8516_s14 + $0x1990] sm:$0xff] }
  0x78   : > { %658 = vst [vmem:[%s8521_s15 + $0x660] sm:$0xff] %v657_v12  ;;  %660 = vst [vmem:[%s8521_s15 + $0x668] sm:$0xff] %v659_v13  ;;  %v663_v15 = vld [vmem:[%s8516_s14 + $0x1998] sm:$0xff]  ;;  %v665_v16 = vld [vmem:[%s8516_s14 + $0x1a00] sm:$0xff] }
  0x79   : > { %662 = vst [vmem:[%s8521_s15 + $0x670] sm:$0xff] %v661_v14  ;;  %v667_v17 = vld [vmem:[%s8516_s14 + $0x1a08] sm:$0xff]  ;;  %664 = vst [vmem:[%s8521_s15 + $0x678] sm:$0xff] %v663_v15  ;;  %v669_v18 = vld [vmem:[%s8516_s14 + $0x1a10] sm:$0xff] }
  0x7a   : > { %666 = vst [vmem:[%s8521_s15 + $0x680] sm:$0xff] %v665_v16  ;;  %668 = vst [vmem:[%s8521_s15 + $0x688] sm:$0xff] %v667_v17  ;;  %v671_v19 = vld [vmem:[%s8516_s14 + $0x1a18] sm:$0xff]  ;;  %v673_v20 = vld [vmem:[%s8516_s14 + $0x1a80] sm:$0xff] }
  0x7b   : > { %670 = vst [vmem:[%s8521_s15 + $0x690] sm:$0xff] %v669_v18  ;;  %672 = vst [vmem:[%s8521_s15 + $0x698] sm:$0xff] %v671_v19  ;;  %v675_v21 = vld [vmem:[%s8516_s14 + $0x1a88] sm:$0xff]  ;;  %v677_v22 = vld [vmem:[%s8516_s14 + $0x1a90] sm:$0xff] }
  0x7c   : > { %674 = vst [vmem:[%s8521_s15 + $0x6a0] sm:$0xff] %v673_v20  ;;  %v679_v23 = vld [vmem:[%s8516_s14 + $0x1a98] sm:$0xff]  ;;  %676 = vst [vmem:[%s8521_s15 + $0x6a8] sm:$0xff] %v675_v21  ;;  %v681_v24 = vld [vmem:[%s8516_s14 + $0x1b00] sm:$0xff] }
  0x7d   : > { %678 = vst [vmem:[%s8521_s15 + $0x6b0] sm:$0xff] %v677_v22  ;;  %680 = vst [vmem:[%s8521_s15 + $0x6b8] sm:$0xff] %v679_v23  ;;  %v683_v25 = vld [vmem:[%s8516_s14 + $0x1b08] sm:$0xff]  ;;  %v685_v26 = vld [vmem:[%s8516_s14 + $0x1b10] sm:$0xff] }
  0x7e   : > { %682 = vst [vmem:[%s8521_s15 + $0x6c0] sm:$0xff] %v681_v24  ;;  %684 = vst [vmem:[%s8521_s15 + $0x6c8] sm:$0xff] %v683_v25  ;;  %v687_v27 = vld [vmem:[%s8516_s14 + $0x1b18] sm:$0xff]  ;;  %v689_v28 = vld [vmem:[%s8516_s14 + $0x1b80] sm:$0xff] }
  0x7f   : > { %686 = vst [vmem:[%s8521_s15 + $0x6d0] sm:$0xff] %v685_v26  ;;  %v691_v29 = vld [vmem:[%s8516_s14 + $0x1b88] sm:$0xff]  ;;  %688 = vst [vmem:[%s8521_s15 + $0x6d8] sm:$0xff] %v687_v27  ;;  %v693_v30 = vld [vmem:[%s8516_s14 + $0x1b90] sm:$0xff] }
  0x80   : > { %690 = vst [vmem:[%s8521_s15 + $0x6e0] sm:$0xff] %v689_v28  ;;  %692 = vst [vmem:[%s8521_s15 + $0x6e8] sm:$0xff] %v691_v29  ;;  %v695_v31 = vld [vmem:[%s8516_s14 + $0x1b98] sm:$0xff]  ;;  %v697_v32 = vld [vmem:[%s8516_s14 + $0x1c00] sm:$0xff] }
  0x81   : > { %694 = vst [vmem:[%s8521_s15 + $0x6f0] sm:$0xff] %v693_v30  ;;  %696 = vst [vmem:[%s8521_s15 + $0x6f8] sm:$0xff] %v695_v31  ;;  %v699_v33 = vld [vmem:[%s8516_s14 + $0x1c08] sm:$0xff]  ;;  %v701_v34 = vld [vmem:[%s8516_s14 + $0x1c10] sm:$0xff] }
  0x82   : > { %698 = vst [vmem:[%s8521_s15 + $0x700] sm:$0xff] %v697_v32  ;;  %v703_v35 = vld [vmem:[%s8516_s14 + $0x1c18] sm:$0xff]  ;;  %700 = vst [vmem:[%s8521_s15 + $0x708] sm:$0xff] %v699_v33  ;;  %v705_v36 = vld [vmem:[%s8516_s14 + $0x1c80] sm:$0xff] }
  0x83   : > { %702 = vst [vmem:[%s8521_s15 + $0x710] sm:$0xff] %v701_v34  ;;  %704 = vst [vmem:[%s8521_s15 + $0x718] sm:$0xff] %v703_v35  ;;  %v707_v37 = vld [vmem:[%s8516_s14 + $0x1c88] sm:$0xff]  ;;  %v709_v38 = vld [vmem:[%s8516_s14 + $0x1c90] sm:$0xff] }
  0x84   : > { %706 = vst [vmem:[%s8521_s15 + $0x720] sm:$0xff] %v705_v36  ;;  %708 = vst [vmem:[%s8521_s15 + $0x728] sm:$0xff] %v707_v37  ;;  %v711_v39 = vld [vmem:[%s8516_s14 + $0x1c98] sm:$0xff]  ;;  %v713_v40 = vld [vmem:[%s8516_s14 + $0x1d00] sm:$0xff] }
  0x85   : > { %710 = vst [vmem:[%s8521_s15 + $0x730] sm:$0xff] %v709_v38  ;;  %v715_v41 = vld [vmem:[%s8516_s14 + $0x1d08] sm:$0xff]  ;;  %712 = vst [vmem:[%s8521_s15 + $0x738] sm:$0xff] %v711_v39  ;;  %v717_v42 = vld [vmem:[%s8516_s14 + $0x1d10] sm:$0xff] }
  0x86   : > { %714 = vst [vmem:[%s8521_s15 + $0x740] sm:$0xff] %v713_v40  ;;  %716 = vst [vmem:[%s8521_s15 + $0x748] sm:$0xff] %v715_v41  ;;  %v719_v43 = vld [vmem:[%s8516_s14 + $0x1d18] sm:$0xff]  ;;  %v721_v44 = vld [vmem:[%s8516_s14 + $0x1d80] sm:$0xff] }
  0x87   : > { %718 = vst [vmem:[%s8521_s15 + $0x750] sm:$0xff] %v717_v42  ;;  %720 = vst [vmem:[%s8521_s15 + $0x758] sm:$0xff] %v719_v43  ;;  %v723_v45 = vld [vmem:[%s8516_s14 + $0x1d88] sm:$0xff]  ;;  %v725_v46 = vld [vmem:[%s8516_s14 + $0x1d90] sm:$0xff] }
  0x88   : > { %722 = vst [vmem:[%s8521_s15 + $0x760] sm:$0xff] %v721_v44  ;;  %v727_v47 = vld [vmem:[%s8516_s14 + $0x1d98] sm:$0xff]  ;;  %724 = vst [vmem:[%s8521_s15 + $0x768] sm:$0xff] %v723_v45  ;;  %v729_v48 = vld [vmem:[%s8516_s14 + $0x1e00] sm:$0xff] }
  0x89   : > { %726 = vst [vmem:[%s8521_s15 + $0x770] sm:$0xff] %v725_v46  ;;  %728 = vst [vmem:[%s8521_s15 + $0x778] sm:$0xff] %v727_v47  ;;  %v731_v49 = vld [vmem:[%s8516_s14 + $0x1e08] sm:$0xff]  ;;  %v733_v50 = vld [vmem:[%s8516_s14 + $0x1e10] sm:$0xff] }
  0x8a   : > { %730 = vst [vmem:[%s8521_s15 + $0x780] sm:$0xff] %v729_v48  ;;  %732 = vst [vmem:[%s8521_s15 + $0x788] sm:$0xff] %v731_v49  ;;  %v735_v51 = vld [vmem:[%s8516_s14 + $0x1e18] sm:$0xff]  ;;  %v737_v52 = vld [vmem:[%s8516_s14 + $0x1e80] sm:$0xff] }
  0x8b   : > { %734 = vst [vmem:[%s8521_s15 + $0x790] sm:$0xff] %v733_v50  ;;  %v739_v53 = vld [vmem:[%s8516_s14 + $0x1e88] sm:$0xff]  ;;  %736 = vst [vmem:[%s8521_s15 + $0x798] sm:$0xff] %v735_v51  ;;  %v741_v54 = vld [vmem:[%s8516_s14 + $0x1e90] sm:$0xff] }
  0x8c   : > { %738 = vst [vmem:[%s8521_s15 + $0x7a0] sm:$0xff] %v737_v52  ;;  %740 = vst [vmem:[%s8521_s15 + $0x7a8] sm:$0xff] %v739_v53  ;;  %v743_v55 = vld [vmem:[%s8516_s14 + $0x1e98] sm:$0xff]  ;;  %v745_v56 = vld [vmem:[%s8516_s14 + $0x1f00] sm:$0xff] }
  0x8d   : > { %742 = vst [vmem:[%s8521_s15 + $0x7b0] sm:$0xff] %v741_v54  ;;  %744 = vst [vmem:[%s8521_s15 + $0x7b8] sm:$0xff] %v743_v55  ;;  %v747_v57 = vld [vmem:[%s8516_s14 + $0x1f08] sm:$0xff]  ;;  %v749_v58 = vld [vmem:[%s8516_s14 + $0x1f10] sm:$0xff] }
  0x8e   : > { %746 = vst [vmem:[%s8521_s15 + $0x7c0] sm:$0xff] %v745_v56  ;;  %v751_v59 = vld [vmem:[%s8516_s14 + $0x1f18] sm:$0xff]  ;;  %748 = vst [vmem:[%s8521_s15 + $0x7c8] sm:$0xff] %v747_v57  ;;  %v753_v60 = vld [vmem:[%s8516_s14 + $0x1f80] sm:$0xff] }
  0x8f   : > { %750 = vst [vmem:[%s8521_s15 + $0x7d0] sm:$0xff] %v749_v58  ;;  %752 = vst [vmem:[%s8521_s15 + $0x7d8] sm:$0xff] %v751_v59  ;;  %v755_v61 = vld [vmem:[%s8516_s14 + $0x1f88] sm:$0xff]  ;;  %v757_v62 = vld [vmem:[%s8516_s14 + $0x1f90] sm:$0xff] }
  0x90   : > { %754 = vst [vmem:[%s8521_s15 + $0x7e0] sm:$0xff] %v753_v60  ;;  %756 = vst [vmem:[%s8521_s15 + $0x7e8] sm:$0xff] %v755_v61  ;;  %v759_v63 = vld [vmem:[%s8516_s14 + $0x1f98] sm:$0xff] }
  0x91   : > { %758 = vst [vmem:[%s8521_s15 + $0x7f0] sm:$0xff] %v757_v62  ;;  %760 = vst [vmem:[%s8521_s15 + $0x7f8] sm:$0xff] %v759_v63 }
  0x92 PF: > { %p7361_p5 = scmp.ge.s32.totalorder %s8437_s26, 1  ;;  %p783_p6 = scmp.lt.s32.totalorder %s8437_s26, 5 }
  0x94   : > { %p784_p7 = pnand %p7361_p5, %p783_p6 }
  0x95   : > { %s790_s16 = sand.u32 (!%p784_p7), 1, %s8429_s24   ;;  %s7363_s17 = sshll.u32 (!%p784_p7), %s8496_s27, 3 }
  0x96   : > { %787 = sbr.rel (%p784_p7) target bundleno = 1504 (0x5e0), region = 67  ;;  %s7362_s18 = sshll.u32 (!%p784_p7), %s790_s16, 11 }
  0x97   : > { %p828_p8 = scmp.lt.s32.totalorder (!%p784_p7), %s7363_s17, 31  ;;  %s7364_s19 = sshll.u32 (!%p784_p7), %s8496_s27, 7 }
  0x98   : > { %p833_p9 = scmp.lt.s32.totalorder (!%p784_p7), %s7364_s19, 511  ;;  %s9048_s24 = scalar_lea.vmem (!%p784_p7), [#allocation3], %s7362_s18 }
  0x99   : > { %p7367_p10 = scmp.ne.s32.totalorder (!%p784_p7), %s8496_s27, 0 }
  0x9d   : > { %s10250_s17 = smov (!%p828_p8, %s7363_s17), 31  ;;  %s10252_s19 = smov (!%p833_p9, %s7364_s19), 511 }
  0x9e   : > { %s830_s22 = scalar_lea.vmem %s10240_s2, %s10250_s17  ;;  %s8209_s23 = sshll.u32 %s10252_s19, 5  ;;  %v8439_v0 = vmov (!%p7367_p10), 0.0  }
  0x9f   : > { %s9046_s30 = scalar_lea.vmem %s10241_s3, %s8209_s23  ;;  %843 = sbr.rel (%p7367_p10) target bundleno = 166 (0xa6), region = 75  ;;  %844 = vst [vmem:[#allocation2] sm:$0xff] (!%p7367_p10), %v8439_v0  ;;  %845 = vst [vmem:[#allocation2 + $0x8] sm:$0xff] (!%p7367_p10), %v8439_v0 }
  0xa0   : > { %846 = vst [vmem:[#allocation2 + $0x10] sm:$0xff] (!%p7367_p10), %v8439_v0  ;;  %847 = vst [vmem:[#allocation2 + $0x18] sm:$0xff] (!%p7367_p10), %v8439_v0 }
  0xa1   : > { %848 = vst [vmem:[#allocation2 + $0x20] sm:$0xff] (!%p7367_p10), %v8439_v0  ;;  %849 = vst [vmem:[#allocation2 + $0x28] sm:$0xff] (!%p7367_p10), %v8439_v0 }
  0xa2   : > { %850 = vst [vmem:[#allocation2 + $0x30] sm:$0xff] (!%p7367_p10), %v8439_v0  ;;  %851 = vst [vmem:[#allocation2 + $0x38] sm:$0xff] (!%p7367_p10), %v8439_v0 }
  0xa6 PF: > { %v854_v1 = vld [vmem:[%s9048_s24] sm:$0xff]  ;;  %v855_v3 = vld [vmem:[%s9048_s24 + $0x8] sm:$0xff]  ;;  %p8140_p11 = scmp.ne.s32.totalorder %s8496_s27, 3 }
  0xa7   : > { %v858_v2 = vld [vmem:[%s9048_s24 + $0x20] sm:$0xff]  ;;  %v859_v5 = vld [vmem:[%s9048_s24 + $0x28] sm:$0xff] }
  0xa8   : > { %v7373_v4 = vcombine.high %v854_v1, %v858_v2  ;;  %v7372_v6 = vcombine.low %v854_v1, %v858_v2  ;;  %v862_v7 = vld [vmem:[%s9048_s24 + $0x40] sm:$0xff]  ;;  %v7375_v9 = vcombine.high %v855_v3, %v859_v5  ;;  %v7374_v10 = vcombine.low %v855_v3, %v859_v5  ;;  %v863_v12 = vld [vmem:[%s9048_s24 + $0x48] sm:$0xff] }
  0xa9   : > { %v866_v8 = vld [vmem:[%s9048_s24 + $0x60] sm:$0xff]  ;;  %v867_v13 = vld [vmem:[%s9048_s24 + $0x68] sm:$0xff] }
  0xaa   : > { %v7381_v11 = vcombine.high %v862_v7, %v866_v8  ;;  %v870_v14 = vld [vmem:[%s9048_s24 + $0x80] sm:$0xff]  ;;  %2446 = vmatprep.subr.bf16.mxu0 %v7373_v4  ;;  %v7383_v15 = vcombine.high %v863_v12, %v867_v13  ;;  %v871_v17 = vld [vmem:[%s9048_s24 + $0x88] sm:$0xff]  ;;  %2528 = vmatprep.subr.bf16.mxu1 %v7375_v9  ;;  %v7380_v19 = vcombine.low %v862_v7, %v866_v8 }
  0xab   : > { %v874_v16 = vld [vmem:[%s9048_s24 + $0xa0] sm:$0xff]  ;;  %v875_v18 = vld [vmem:[%s9048_s24 + $0xa8] sm:$0xff]  ;;  %2447 = vmatpush1.bf16.msra.mxu0 %v7372_v6  ;;  %2529 = vmatpush1.bf16.msra.mxu1 %v7374_v10  ;;  %v7382_v20 = vcombine.low %v863_v12, %v867_v13 }
  0xac   : > { %2448 = vmatprep.subr.bf16.mxu0 %v7381_v11  ;;  %v7389_v21 = vcombine.high %v870_v14, %v874_v16  ;;  %2530 = vmatprep.subr.bf16.mxu1 %v7383_v15  ;;  %v7391_v22 = vcombine.high %v871_v17, %v875_v18  ;;  %v878_v23 = vld [vmem:[%s9048_s24 + $0xc0] sm:$0xff]  ;;  %v879_v25 = vld [vmem:[%s9048_s24 + $0xc8] sm:$0xff]  ;;  %v7388_v27 = vcombine.low %v870_v14, %v874_v16 }
  0xad   : > { %v882_v24 = vld [vmem:[%s9048_s24 + $0xe0] sm:$0xff]  ;;  %v883_v26 = vld [vmem:[%s9048_s24 + $0xe8] sm:$0xff]  ;;  %v7390_v28 = vcombine.low %v871_v17, %v875_v18 }
  0xae   : > { %v7397_v29 = vcombine.high %v878_v23, %v882_v24  ;;  %v7399_v30 = vcombine.high %v879_v25, %v883_v26  ;;  %v886_v31 = vld [vmem:[%s9048_s24 + $0x100] sm:$0xff]  ;;  %v887_v33 = vld [vmem:[%s9048_s24 + $0x108] sm:$0xff]  ;;  %v7396_v35 = vcombine.low %v878_v23, %v882_v24  ;;  %v7398_v36 = vcombine.low %v879_v25, %v883_v26 }
  0xaf   : > { %2449 = vmatpush1.bf16.msra.mxu0 %v7380_v19  ;;  %2531 = vmatpush1.bf16.msra.mxu1 %v7382_v20  ;;  %v890_v32 = vld [vmem:[%s9048_s24 + $0x120] sm:$0xff]  ;;  %v891_v34 = vld [vmem:[%s9048_s24 + $0x128] sm:$0xff] }
  0xb0   : > { %2450 = vmatprep.subr.bf16.mxu0 %v7389_v21  ;;  %2532 = vmatprep.subr.bf16.mxu1 %v7391_v22  ;;  %v7405_v37 = vcombine.high %v886_v31, %v890_v32  ;;  %v7407_v38 = vcombine.high %v887_v33, %v891_v34  ;;  %v894_v39 = vld [vmem:[%s9048_s24 + $0x140] sm:$0xff]  ;;  %v895_v41 = vld [vmem:[%s9048_s24 + $0x148] sm:$0xff]  ;;  %v7404_v43 = vcombine.low %v886_v31, %v890_v32 }
  0xb1   : > { %v898_v40 = vld [vmem:[%s9048_s24 + $0x160] sm:$0xff]  ;;  %v899_v42 = vld [vmem:[%s9048_s24 + $0x168] sm:$0xff]  ;;  %v7406_v44 = vcombine.low %v887_v33, %v891_v34 }
  0xb2   : > { %v7413_v45 = vcombine.high %v894_v39, %v898_v40  ;;  %v7415_v46 = vcombine.high %v895_v41, %v899_v42  ;;  %v902_v47 = vld [vmem:[%s9048_s24 + $0x180] sm:$0xff]  ;;  %v903_v49 = vld [vmem:[%s9048_s24 + $0x188] sm:$0xff]  ;;  %v7412_v51 = vcombine.low %v894_v39, %v898_v40  ;;  %v7414_v52 = vcombine.low %v895_v41, %v899_v42 }
  0xb3   : > { %2451 = vmatpush1.bf16.msra.mxu0 %v7388_v27  ;;  %2533 = vmatpush1.bf16.msra.mxu1 %v7390_v28  ;;  %v906_v48 = vld [vmem:[%s9048_s24 + $0x1a0] sm:$0xff]  ;;  %v907_v50 = vld [vmem:[%s9048_s24 + $0x1a8] sm:$0xff] }
  0xb4   : > { %2452 = vmatprep.subr.bf16.mxu0 %v7397_v29  ;;  %2534 = vmatprep.subr.bf16.mxu1 %v7399_v30  ;;  %v7421_v53 = vcombine.high %v902_v47, %v906_v48  ;;  %v9082_v54 = vld [vmem:[%s10238_s0] sm:$0xff]  ;;  %v7423_v55 = vcombine.high %v903_v49, %v907_v50  ;;  %v911_v59 = vld [vmem:[%s9048_s24 + $0x1c8] sm:$0xff]  ;;  %v7420_v61 = vcombine.low %v902_v47, %v906_v48 }
  0xb5   : > { %v910_v56 = vld [vmem:[%s9048_s24 + $0x1c0] sm:$0xff]  ;;  %v9088_v58 = vcombine.high %v9082_v54, %v9082_v54  ;;  %v915_v60 = vld [vmem:[%s9048_s24 + $0x1e8] sm:$0xff]  ;;  %v7422_v62 = vcombine.low %v903_v49, %v907_v50 }
  0xb6   : > { %v914_v57 = vld [vmem:[%s9048_s24 + $0x1e0] sm:$0xff]  ;;  %v7431_v0 = vcombine.high %v911_v59, %v915_v60  ;;  %v919_v3 = vld [vmem:[%s9048_s24 + $0x208] sm:$0xff]  ;;  %v7430_v6 = vcombine.low %v911_v59, %v915_v60 }
  0xb7   : > { %2453 = vmatpush1.bf16.msra.mxu0 %v7396_v35  ;;  %2535 = vmatpush1.bf16.msra.mxu1 %v7398_v36  ;;  %v7429_v63 = vcombine.high %v910_v56, %v914_v57  ;;  %v918_v1 = vld [vmem:[%s9048_s24 + $0x200] sm:$0xff]  ;;  %v923_v4 = vld [vmem:[%s9048_s24 + $0x228] sm:$0xff]  ;;  %v7428_v5 = vcombine.low %v910_v56, %v914_v57 }
  0xb8   : > { %2454 = vmatprep.subr.bf16.mxu0 %v7405_v37  ;;  %2536 = vmatprep.subr.bf16.mxu1 %v7407_v38  ;;  %v922_v2 = vld [vmem:[%s9048_s24 + $0x220] sm:$0xff]  ;;  %v7439_v8 = vcombine.high %v919_v3, %v923_v4  ;;  %v927_v11 = vld [vmem:[%s9048_s24 + $0x248] sm:$0xff]  ;;  %v7438_v14 = vcombine.low %v919_v3, %v923_v4 }
  0xb9   : > { %2478 = vmatprep.mubr.bf16.mxu0 %v9088_v58  ;;  %2560 = vmatprep.mubr.bf16.mxu1 %v9088_v58  ;;  %v7437_v7 = vcombine.high %v918_v1, %v922_v2  ;;  %v926_v9 = vld [vmem:[%s9048_s24 + $0x240] sm:$0xff]  ;;  %v931_v12 = vld [vmem:[%s9048_s24 + $0x268] sm:$0xff]  ;;  %v7436_v13 = vcombine.low %v918_v1, %v922_v2 }
  0xba   : > { %v930_v10 = vld [vmem:[%s9048_s24 + $0x260] sm:$0xff]  ;;  %v7447_v16 = vcombine.high %v927_v11, %v931_v12  ;;  %v935_v19 = vld [vmem:[%s9048_s24 + $0x288] sm:$0xff]  ;;  %v7446_v22 = vcombine.low %v927_v11, %v931_v12 }
  0xbb   : > { %2455 = vmatpush1.bf16.msra.mxu0 %v7404_v43  ;;  %2537 = vmatpush1.bf16.msra.mxu1 %v7406_v44  ;;  %v7445_v15 = vcombine.high %v926_v9, %v930_v10  ;;  %v934_v17 = vld [vmem:[%s9048_s24 + $0x280] sm:$0xff]  ;;  %v939_v20 = vld [vmem:[%s9048_s24 + $0x2a8] sm:$0xff]  ;;  %v7444_v21 = vcombine.low %v926_v9, %v930_v10 }
  0xbc   : > { %2456 = vmatprep.subr.bf16.mxu0 %v7413_v45  ;;  %2538 = vmatprep.subr.bf16.mxu1 %v7415_v46  ;;  %v938_v18 = vld [vmem:[%s9048_s24 + $0x2a0] sm:$0xff]  ;;  %v7455_v24 = vcombine.high %v935_v19, %v939_v20  ;;  %v943_v27 = vld [vmem:[%s9048_s24 + $0x2c8] sm:$0xff]  ;;  %v7454_v30 = vcombine.low %v935_v19, %v939_v20 }
  0xbd   : > { %v7453_v23 = vcombine.high %v934_v17, %v938_v18  ;;  %v942_v25 = vld [vmem:[%s9048_s24 + $0x2c0] sm:$0xff]  ;;  %v947_v28 = vld [vmem:[%s9048_s24 + $0x2e8] sm:$0xff]  ;;  %v7452_v29 = vcombine.low %v934_v17, %v938_v18 }
  0xbe   : > { %v946_v26 = vld [vmem:[%s9048_s24 + $0x2e0] sm:$0xff]  ;;  %v7463_v32 = vcombine.high %v943_v27, %v947_v28  ;;  %v951_v35 = vld [vmem:[%s9048_s24 + $0x308] sm:$0xff]  ;;  %v7462_v38 = vcombine.low %v943_v27, %v947_v28 }
  0xbf   : > { %2457 = vmatpush1.bf16.msra.mxu0 %v7412_v51  ;;  %2539 = vmatpush1.bf16.msra.mxu1 %v7414_v52  ;;  %v7461_v31 = vcombine.high %v942_v25, %v946_v26  ;;  %v950_v33 = vld [vmem:[%s9048_s24 + $0x300] sm:$0xff]  ;;  %v955_v36 = vld [vmem:[%s9048_s24 + $0x328] sm:$0xff]  ;;  %v7460_v37 = vcombine.low %v942_v25, %v946_v26 }
  0xc0   : > { %2458 = vmatprep.subr.bf16.mxu0 %v7421_v53  ;;  %2540 = vmatprep.subr.bf16.mxu1 %v7423_v55  ;;  %v954_v34 = vld [vmem:[%s9048_s24 + $0x320] sm:$0xff]  ;;  %v7471_v40 = vcombine.high %v951_v35, %v955_v36  ;;  %v959_v43 = vld [vmem:[%s9048_s24 + $0x348] sm:$0xff]  ;;  %v7470_v46 = vcombine.low %v951_v35, %v955_v36 }
  0xc1   : > { %v7469_v39 = vcombine.high %v950_v33, %v954_v34  ;;  %v958_v41 = vld [vmem:[%s9048_s24 + $0x340] sm:$0xff]  ;;  %v963_v44 = vld [vmem:[%s9048_s24 + $0x368] sm:$0xff]  ;;  %v7468_v45 = vcombine.low %v950_v33, %v954_v34 }
  0xc2   : > { %v962_v42 = vld [vmem:[%s9048_s24 + $0x360] sm:$0xff]  ;;  %v7479_v48 = vcombine.high %v959_v43, %v963_v44  ;;  %v967_v51 = vld [vmem:[%s9048_s24 + $0x388] sm:$0xff]  ;;  %v7478_v55 = vcombine.low %v959_v43, %v963_v44 }
  0xc3   : > { %2459 = vmatpush1.bf16.msra.mxu0 %v7420_v61  ;;  %2541 = vmatpush1.bf16.msra.mxu1 %v7422_v62  ;;  %v7477_v47 = vcombine.high %v958_v41, %v962_v42  ;;  %v966_v49 = vld [vmem:[%s9048_s24 + $0x380] sm:$0xff]  ;;  %v971_v52 = vld [vmem:[%s9048_s24 + $0x3a8] sm:$0xff]  ;;  %v7476_v53 = vcombine.low %v958_v41, %v962_v42 }
  0xc4   : > { %2460 = vmatprep.subr.bf16.mxu0 %v7429_v63  ;;  %2542 = vmatprep.subr.bf16.mxu1 %v7431_v0  ;;  %v970_v50 = vld [vmem:[%s9048_s24 + $0x3a0] sm:$0xff]  ;;  %v7487_v57 = vcombine.high %v967_v51, %v971_v52  ;;  %v975_v61 = vld [vmem:[%s9048_s24 + $0x3c8] sm:$0xff]  ;;  %v7486_v0 = vcombine.low %v967_v51, %v971_v52 }
  0xc5   : > { %v7485_v56 = vcombine.high %v966_v49, %v970_v50  ;;  %v974_v59 = vld [vmem:[%s9048_s24 + $0x3c0] sm:$0xff]  ;;  %v979_v62 = vld [vmem:[%s9048_s24 + $0x3e8] sm:$0xff]  ;;  %v7484_v63 = vcombine.low %v966_v49, %v970_v50 }
  0xc6   : > { %v978_v60 = vld [vmem:[%s9048_s24 + $0x3e0] sm:$0xff]  ;;  %v7495_v2 = vcombine.high %v975_v61, %v979_v62 }
  0xc7   : > { %2461 = vmatpush1.bf16.msra.mxu0 %v7428_v5  ;;  %2543 = vmatpush1.bf16.msra.mxu1 %v7430_v6  ;;  %v7493_v1 = vcombine.high %v974_v59, %v978_v60  ;;  %v982_v3 = vld [vmem:[%s9048_s24 + $0x400] sm:$0xff]  ;;  %v983_v5 = vld [vmem:[%s9048_s24 + $0x408] sm:$0xff] }
  0xc8   : > { %2462 = vmatprep.subr.bf16.mxu0 %v7437_v7  ;;  %2544 = vmatprep.subr.bf16.mxu1 %v7439_v8  ;;  %v986_v4 = vld [vmem:[%s9048_s24 + $0x420] sm:$0xff]  ;;  %v987_v6 = vld [vmem:[%s9048_s24 + $0x428] sm:$0xff]  ;;  %v7492_v7 = vcombine.low %v974_v59, %v978_v60  ;;  %v7494_v8 = vcombine.low %v975_v61, %v979_v62 }
  0xc9   : > { %v7501_v9 = vcombine.high %v982_v3, %v986_v4  ;;  %v7503_v10 = vcombine.high %v983_v5, %v987_v6  ;;  %v990_v11 = vld [vmem:[%s9048_s24 + $0x440] sm:$0xff]  ;;  %v7500_v17 = vcombine.low %v982_v3, %v986_v4  ;;  %v7502_v18 = vcombine.low %v983_v5, %v987_v6 }
  0xca   : > { %v994_v12 = vld [vmem:[%s9048_s24 + $0x460] sm:$0xff] }
  0xcb   : > { %2463 = vmatpush1.bf16.msra.mxu0 %v7436_v13  ;;  %2545 = vmatpush1.bf16.msra.mxu1 %v7438_v14  ;;  %v9134_v13 = vcombine.low %v9082_v54, %v9082_v54  ;;  %v991_v14 = vld [vmem:[%s9048_s24 + $0x448] sm:$0xff]  ;;  %v7509_v19 = vcombine.high %v990_v11, %v994_v12  ;;  %v998_v54 = vld [vmem:[%s9048_s24 + $0x480] sm:$0xff]  ;;  %v7508_v25 = vcombine.low %v990_v11, %v994_v12 }
  0xcc   : > { %2464 = vmatprep.subr.bf16.mxu0 %v7445_v15  ;;  %2546 = vmatprep.subr.bf16.mxu1 %v7447_v16  ;;  %v995_v15 = vld [vmem:[%s9048_s24 + $0x468] sm:$0xff] }
  0xcd   : > { %v9141_v16 = vld [vmem:[%s10238_s0 + $0x8] sm:$0xff]  ;;  %v7511_v20 = vcombine.high %v991_v14, %v995_v15  ;;  %v7510_v26 = vcombine.low %v991_v14, %v995_v15 }
  0xcf   : > { %2465 = vmatpush1.bf16.msra.mxu0 %v7444_v21  ;;  %2547 = vmatpush1.bf16.msra.mxu1 %v7446_v22  ;;  %v1002_v21 = vld [vmem:[%s9048_s24 + $0x4a0] sm:$0xff]  ;;  %v9147_v22 = vcombine.high %v9141_v16, %v9141_v16 }
  0xd0   : > { %2466 = vmatprep.subr.bf16.mxu0 %v7453_v23  ;;  %2548 = vmatprep.subr.bf16.mxu1 %v7455_v24  ;;  %v999_v23 = vld [vmem:[%s9048_s24 + $0x488] sm:$0xff]  ;;  %v7517_v27 = vcombine.high %v998_v54, %v1002_v21  ;;  %v7516_v33 = vcombine.low %v998_v54, %v1002_v21 }
  0xd1   : > { %v1003_v24 = vld [vmem:[%s9048_s24 + $0x4a8] sm:$0xff] }
  0xd2   : > { %v7519_v28 = vcombine.high %v999_v23, %v1003_v24  ;;  %v7518_v34 = vcombine.low %v999_v23, %v1003_v24 }
  0xd3   : > { %2467 = vmatpush1.bf16.msra.mxu0 %v7452_v29  ;;  %2549 = vmatpush1.bf16.msra.mxu1 %v7454_v30  ;;  %v1006_v29 = vld [vmem:[%s9048_s24 + $0x4c0] sm:$0xff] }
  0xd4   : > { %2468 = vmatprep.subr.bf16.mxu0 %v7461_v31  ;;  %2550 = vmatprep.subr.bf16.mxu1 %v7463_v32  ;;  %v1010_v30 = vld [vmem:[%s9048_s24 + $0x4e0] sm:$0xff]  ;;  %v1007_v31 = vld [vmem:[%s9048_s24 + $0x4c8] sm:$0xff] }
  0xd5   : > { %v1011_v32 = vld [vmem:[%s9048_s24 + $0x4e8] sm:$0xff]  ;;  %v7525_v35 = vcombine.high %v1006_v29, %v1010_v30  ;;  %v7524_v41 = vcombine.low %v1006_v29, %v1010_v30 }
  0xd6   : > { %v7527_v36 = vcombine.high %v1007_v31, %v1011_v32  ;;  %v7526_v42 = vcombine.low %v1007_v31, %v1011_v32 }
  0xd7   : > { %2469 = vmatpush1.bf16.msra.mxu0 %v7460_v37  ;;  %2551 = vmatpush1.bf16.msra.mxu1 %v7462_v38  ;;  %v1014_v37 = vld [vmem:[%s9048_s24 + $0x500] sm:$0xff] }
  0xd8   : > { %2470 = vmatprep.subr.bf16.mxu0 %v7469_v39  ;;  %2552 = vmatprep.subr.bf16.mxu1 %v7471_v40  ;;  %v1018_v38 = vld [vmem:[%s9048_s24 + $0x520] sm:$0xff]  ;;  %v1015_v39 = vld [vmem:[%s9048_s24 + $0x508] sm:$0xff] }
  0xd9   : > { %v1019_v40 = vld [vmem:[%s9048_s24 + $0x528] sm:$0xff]  ;;  %v7533_v43 = vcombine.high %v1014_v37, %v1018_v38  ;;  %v7532_v49 = vcombine.low %v1014_v37, %v1018_v38 }
  0xda   : > { %v7535_v44 = vcombine.high %v1015_v39, %v1019_v40  ;;  %v7534_v50 = vcombine.low %v1015_v39, %v1019_v40 }
  0xdb   : > { %2471 = vmatpush1.bf16.msra.mxu0 %v7468_v45  ;;  %2553 = vmatpush1.bf16.msra.mxu1 %v7470_v46  ;;  %v1022_v45 = vld [vmem:[%s9048_s24 + $0x540] sm:$0xff] }
  0xdc   : > { %2472 = vmatprep.subr.bf16.mxu0 %v7477_v47  ;;  %2554 = vmatprep.subr.bf16.mxu1 %v7479_v48  ;;  %v1026_v46 = vld [vmem:[%s9048_s24 + $0x560] sm:$0xff]  ;;  %v1023_v47 = vld [vmem:[%s9048_s24 + $0x548] sm:$0xff] }
  0xdd   : > { %v1027_v48 = vld [vmem:[%s9048_s24 + $0x568] sm:$0xff]  ;;  %v7541_v51 = vcombine.high %v1022_v45, %v1026_v46  ;;  %v7540_v59 = vcombine.low %v1022_v45, %v1026_v46 }
  0xde   : > { %v7543_v52 = vcombine.high %v1023_v47, %v1027_v48  ;;  %v7542_v60 = vcombine.low %v1023_v47, %v1027_v48 }
  0xdf   : > { %2473 = vmatpush1.bf16.msra.mxu0 %v7476_v53  ;;  %2555 = vmatpush1.bf16.msra.mxu1 %v7478_v55  ;;  %v1030_v53 = vld [vmem:[%s9048_s24 + $0x580] sm:$0xff] }
  0xe0   : > { %2474 = vmatprep.subr.bf16.mxu0 %v7485_v56  ;;  %2556 = vmatprep.subr.bf16.mxu1 %v7487_v57  ;;  %v1034_v55 = vld [vmem:[%s9048_s24 + $0x5a0] sm:$0xff]  ;;  %v1031_v56 = vld [vmem:[%s9048_s24 + $0x588] sm:$0xff] }
  0xe1   : > { %v1035_v57 = vld [vmem:[%s9048_s24 + $0x5a8] sm:$0xff]  ;;  %v7549_v61 = vcombine.high %v1030_v53, %v1034_v55  ;;  %v7548_v3 = vcombine.low %v1030_v53, %v1034_v55 }
  0xe2   : > { %v7551_v62 = vcombine.high %v1031_v56, %v1035_v57  ;;  %v7550_v4 = vcombine.low %v1031_v56, %v1035_v57 }
  0xe3   : > { %2475 = vmatpush1.bf16.msra.mxu0 %v7484_v63  ;;  %2557 = vmatpush1.bf16.msra.mxu1 %v7486_v0  ;;  %v1038_v63 = vld [vmem:[%s9048_s24 + $0x5c0] sm:$0xff] }
  0xe4   : > { %2476 = vmatprep.subr.bf16.mxu0 %v7493_v1  ;;  %2558 = vmatprep.subr.bf16.mxu1 %v7495_v2  ;;  %v1042_v0 = vld [vmem:[%s9048_s24 + $0x5e0] sm:$0xff]  ;;  %v1039_v1 = vld [vmem:[%s9048_s24 + $0x5c8] sm:$0xff] }
  0xe5   : > { %v1043_v2 = vld [vmem:[%s9048_s24 + $0x5e8] sm:$0xff]  ;;  %v7557_v5 = vcombine.high %v1038_v63, %v1042_v0  ;;  %v7556_v11 = vcombine.low %v1038_v63, %v1042_v0 }
  0xe6   : > { %v7559_v6 = vcombine.high %v1039_v1, %v1043_v2  ;;  %v7558_v12 = vcombine.low %v1039_v1, %v1043_v2 }
  0xe7   : > { %2477 = vmatpush1.bf16.msra.mxu0 %v7492_v7  ;;  %2559 = vmatpush1.bf16.msra.mxu1 %v7494_v8  ;;  %v1046_v7 = vld [vmem:[%s9048_s24 + $0x600] sm:$0xff] }
  0xe8   : > { %2487 = vmatprep.subr.bf16.mxu0 %v7501_v9  ;;  %2569 = vmatprep.subr.bf16.mxu1 %v7503_v10  ;;  %v1050_v8 = vld [vmem:[%s9048_s24 + $0x620] sm:$0xff]  ;;  %v1047_v9 = vld [vmem:[%s9048_s24 + $0x608] sm:$0xff] }
  0xe9   : > { %v1051_v10 = vld [vmem:[%s9048_s24 + $0x628] sm:$0xff]  ;;  %v7565_v14 = vcombine.high %v1046_v7, %v1050_v8  ;;  %v7564_v54 = vcombine.low %v1046_v7, %v1050_v8 }
  0xea   : > { %2479 = vmatmul.mubr.bf16.vlgmr.msra.gmra.mrb[0].mxu0 %v9134_v13  ;;  %2561 = vmatmul.mubr.bf16.vlgmr.msra.gmra.mrb[0].mxu1 %v9134_v13  ;;  %v7567_v15 = vcombine.high %v1047_v9, %v1051_v10  ;;  %v7566_v21 = vcombine.low %v1047_v9, %v1051_v10 }
  0xeb   : > { %2488 = vmatpush1.bf16.msra.mxu0 %v7500_v17  ;;  %2570 = vmatpush1.bf16.msra.mxu1 %v7502_v18  ;;  %v1054_v17 = vld [vmem:[%s9048_s24 + $0x640] sm:$0xff] }
  0xec   : > { %2489 = vmatprep.subr.bf16.mxu0 %v7509_v19  ;;  %2571 = vmatprep.subr.bf16.mxu1 %v7511_v20  ;;  %v1058_v18 = vld [vmem:[%s9048_s24 + $0x660] sm:$0xff]  ;;  %v1055_v19 = vld [vmem:[%s9048_s24 + $0x648] sm:$0xff] }
  0xed   : > { %2519 = vmatprep.mubr.bf16.mxu0 %v9147_v22  ;;  %2601 = vmatprep.mubr.bf16.mxu1 %v9147_v22  ;;  %v1059_v20 = vld [vmem:[%s9048_s24 + $0x668] sm:$0xff]  ;;  %v7573_v23 = vcombine.high %v1054_v17, %v1058_v18  ;;  %v7572_v29 = vcombine.low %v1054_v17, %v1058_v18 }
  0xee   : > { %v7575_v24 = vcombine.high %v1055_v19, %v1059_v20  ;;  %v7574_v30 = vcombine.low %v1055_v19, %v1059_v20 }
  0xef   : > { %2490 = vmatpush1.bf16.msra.mxu0 %v7508_v25  ;;  %2572 = vmatpush1.bf16.msra.mxu1 %v7510_v26  ;;  %v1062_v25 = vld [vmem:[%s9048_s24 + $0x680] sm:$0xff] }
  0xf0   : > { %2491 = vmatprep.subr.bf16.mxu0 %v7517_v27  ;;  %2573 = vmatprep.subr.bf16.mxu1 %v7519_v28  ;;  %v1066_v26 = vld [vmem:[%s9048_s24 + $0x6a0] sm:$0xff]  ;;  %v1063_v27 = vld [vmem:[%s9048_s24 + $0x688] sm:$0xff] }
  0xf1   : > { %v1067_v28 = vld [vmem:[%s9048_s24 + $0x6a8] sm:$0xff]  ;;  %v7581_v31 = vcombine.high %v1062_v25, %v1066_v26  ;;  %v7580_v37 = vcombine.low %v1062_v25, %v1066_v26  ;;  %v869_v25 = vld [vmem:[%s9048_s24 + $0x78] sm:$0xff] }
  0xf2   : > { %v7583_v32 = vcombine.high %v1063_v27, %v1067_v28  ;;  %v7582_v38 = vcombine.low %v1063_v27, %v1067_v28 }
  0xf3   : > { %2492 = vmatpush1.bf16.msra.mxu0 %v7516_v33  ;;  %2574 = vmatpush1.bf16.msra.mxu1 %v7518_v34  ;;  %v1070_v33 = vld [vmem:[%s9048_s24 + $0x6c0] sm:$0xff] }
  0xf4   : > { %2493 = vmatprep.subr.bf16.mxu0 %v7525_v35  ;;  %2575 = vmatprep.subr.bf16.mxu1 %v7527_v36  ;;  %v1074_v34 = vld [vmem:[%s9048_s24 + $0x6e0] sm:$0xff]  ;;  %v1071_v35 = vld [vmem:[%s9048_s24 + $0x6c8] sm:$0xff] }
  0xf5   : > { %v1075_v36 = vld [vmem:[%s9048_s24 + $0x6e8] sm:$0xff]  ;;  %v7589_v39 = vcombine.high %v1070_v33, %v1074_v34  ;;  %v7588_v45 = vcombine.low %v1070_v33, %v1074_v34 }
  0xf6   : > { %v7591_v40 = vcombine.high %v1071_v35, %v1075_v36  ;;  %v7590_v46 = vcombine.low %v1071_v35, %v1075_v36 }
  0xf7   : > { %2494 = vmatpush1.bf16.msra.mxu0 %v7524_v41  ;;  %2576 = vmatpush1.bf16.msra.mxu1 %v7526_v42  ;;  %v1078_v41 = vld [vmem:[%s9048_s24 + $0x700] sm:$0xff] }
  0xf8   : > { %2495 = vmatprep.subr.bf16.mxu0 %v7533_v43  ;;  %2577 = vmatprep.subr.bf16.mxu1 %v7535_v44  ;;  %v1082_v42 = vld [vmem:[%s9048_s24 + $0x720] sm:$0xff]  ;;  %v1079_v43 = vld [vmem:[%s9048_s24 + $0x708] sm:$0xff] }
  0xf9   : > { %v1083_v44 = vld [vmem:[%s9048_s24 + $0x728] sm:$0xff]  ;;  %v7597_v47 = vcombine.high %v1078_v41, %v1082_v42  ;;  %v7596_v53 = vcombine.low %v1078_v41, %v1082_v42 }
  0xfa   : > { %v7599_v48 = vcombine.high %v1079_v43, %v1083_v44  ;;  %v7598_v55 = vcombine.low %v1079_v43, %v1083_v44 }
  0xfb   : > { %2496 = vmatpush1.bf16.msra.mxu0 %v7532_v49  ;;  %2578 = vmatpush1.bf16.msra.mxu1 %v7534_v50  ;;  %v1086_v49 = vld [vmem:[%s9048_s24 + $0x740] sm:$0xff] }
  0xfc   : > { %2497 = vmatprep.subr.bf16.mxu0 %v7541_v51  ;;  %2579 = vmatprep.subr.bf16.mxu1 %v7543_v52  ;;  %v1090_v50 = vld [vmem:[%s9048_s24 + $0x760] sm:$0xff]  ;;  %v1087_v51 = vld [vmem:[%s9048_s24 + $0x748] sm:$0xff] }
  0xfd   : > { %v1091_v52 = vld [vmem:[%s9048_s24 + $0x768] sm:$0xff]  ;;  %v7605_v56 = vcombine.high %v1086_v49, %v1090_v50  ;;  %v7604_v63 = vcombine.low %v1086_v49, %v1090_v50 }
  0xfe   : > { %v7607_v57 = vcombine.high %v1087_v51, %v1091_v52  ;;  %v7606_v0 = vcombine.low %v1087_v51, %v1091_v52  ;;  %v896_v52 = vld [vmem:[%s9048_s24 + $0x150] sm:$0xff] }
  0xff   : > { %2498 = vmatpush1.bf16.msra.mxu0 %v7540_v59  ;;  %2580 = vmatpush1.bf16.msra.mxu1 %v7542_v60  ;;  %v1094_v59 = vld [vmem:[%s9048_s24 + $0x780] sm:$0xff] }
 0x100   : > { %2499 = vmatprep.subr.bf16.mxu0 %v7549_v61  ;;  %2581 = vmatprep.subr.bf16.mxu1 %v7551_v62  ;;  %v1098_v60 = vld [vmem:[%s9048_s24 + $0x7a0] sm:$0xff]  ;;  %v1095_v61 = vld [vmem:[%s9048_s24 + $0x788] sm:$0xff] }
 0x101   : > { %v1099_v62 = vld [vmem:[%s9048_s24 + $0x7a8] sm:$0xff]  ;;  %v7613_v1 = vcombine.high %v1094_v59, %v1098_v60  ;;  %v7612_v7 = vcombine.low %v1094_v59, %v1098_v60 }
 0x102   : > { %v7615_v2 = vcombine.high %v1095_v61, %v1099_v62  ;;  %v7614_v8 = vcombine.low %v1095_v61, %v1099_v62  ;;  %v904_v62 = vld [vmem:[%s9048_s24 + $0x190] sm:$0xff] }
 0x103   : > { %2500 = vmatpush1.bf16.msra.mxu0 %v7548_v3  ;;  %2582 = vmatpush1.bf16.msra.mxu1 %v7550_v4  ;;  %v1102_v3 = vld [vmem:[%s9048_s24 + $0x7c0] sm:$0xff] }
 0x104   : > { %2501 = vmatprep.subr.bf16.mxu0 %v7557_v5  ;;  %2583 = vmatprep.subr.bf16.mxu1 %v7559_v6  ;;  %v1106_v4 = vld [vmem:[%s9048_s24 + $0x7e0] sm:$0xff]  ;;  %v1103_v5 = vld [vmem:[%s9048_s24 + $0x7c8] sm:$0xff] }
 0x105   : > { %v1107_v6 = vld [vmem:[%s9048_s24 + $0x7e8] sm:$0xff]  ;;  %v7621_v9 = vcombine.high %v1102_v3, %v1106_v4  ;;  %v7620_v17 = vcombine.low %v1102_v3, %v1106_v4 }
 0x106   : > { %v7623_v10 = vcombine.high %v1103_v5, %v1107_v6  ;;  %v7622_v18 = vcombine.low %v1103_v5, %v1107_v6  ;;  %v912_v6 = vld [vmem:[%s9048_s24 + $0x1d0] sm:$0xff] }
 0x107   : > { %2502 = vmatpush1.bf16.msra.mxu0 %v7556_v11  ;;  %2584 = vmatpush1.bf16.msra.mxu1 %v7558_v12  ;;  %v856_v11 = vld [vmem:[%s9048_s24 + $0x10] sm:$0xff] }
 0x108   : > { %2503 = vmatprep.subr.bf16.mxu0 %v7565_v14  ;;  %2585 = vmatprep.subr.bf16.mxu1 %v7567_v15  ;;  %v860_v12 = vld [vmem:[%s9048_s24 + $0x30] sm:$0xff]  ;;  %v857_v14 = vld [vmem:[%s9048_s24 + $0x18] sm:$0xff] }
 0x109   : > { %v861_v15 = vld [vmem:[%s9048_s24 + $0x38] sm:$0xff]  ;;  %v7377_v19 = vcombine.high %v856_v11, %v860_v12  ;;  %v7376_v26 = vcombine.low %v856_v11, %v860_v12 }
 0x10a   : > { %v7379_v20 = vcombine.high %v857_v14, %v861_v15  ;;  %v7378_v27 = vcombine.low %v857_v14, %v861_v15  ;;  %v920_v15 = vld [vmem:[%s9048_s24 + $0x210] sm:$0xff] }
 0x10b   : > { %2504 = vmatpush1.bf16.msra.mxu0 %v7564_v54  ;;  %2586 = vmatpush1.bf16.msra.mxu1 %v7566_v21  ;;  %v864_v54 = vld [vmem:[%s9048_s24 + $0x50] sm:$0xff] }
 0x10c   : > { %2505 = vmatprep.subr.bf16.mxu0 %v7573_v23  ;;  %2587 = vmatprep.subr.bf16.mxu1 %v7575_v24  ;;  %v868_v21 = vld [vmem:[%s9048_s24 + $0x70] sm:$0xff]  ;;  %v9215_v23 = vcombine.low %v9141_v16, %v9141_v16  ;;  %v865_v24 = vld [vmem:[%s9048_s24 + $0x58] sm:$0xff] }
 0x10d   : > { %v7385_v28 = vcombine.high %v864_v54, %v868_v21  ;;  %v873_v16 = vld [vmem:[%s9048_s24 + $0x98] sm:$0xff]  ;;  %v7384_v33 = vcombine.low %v864_v54, %v868_v21  ;;  %v7386_v34 = vcombine.low %v865_v24, %v869_v25 }
 0x10f   : > { %2506 = vmatpush1.bf16.msra.mxu0 %v7572_v29  ;;  %2588 = vmatpush1.bf16.msra.mxu1 %v7574_v30  ;;  %v7387_v29 = vcombine.high %v865_v24, %v869_v25  ;;  %v872_v30 = vld [vmem:[%s9048_s24 + $0x90] sm:$0xff] }
 0x110   : > { %2507 = vmatprep.subr.bf16.mxu0 %v7581_v31  ;;  %2589 = vmatprep.subr.bf16.mxu1 %v7583_v32  ;;  %v876_v31 = vld [vmem:[%s9048_s24 + $0xb0] sm:$0xff]  ;;  %v877_v32 = vld [vmem:[%s9048_s24 + $0xb8] sm:$0xff] }
 0x111   : > { %v7393_v35 = vcombine.high %v872_v30, %v876_v31  ;;  %v7395_v36 = vcombine.high %v873_v16, %v877_v32  ;;  %v7392_v41 = vcombine.low %v872_v30, %v876_v31  ;;  %v7394_v42 = vcombine.low %v873_v16, %v877_v32  ;;  %v928_v25 = vld [vmem:[%s9048_s24 + $0x250] sm:$0xff] }
 0x112   : > { %v936_v32 = vld [vmem:[%s9048_s24 + $0x290] sm:$0xff] }
 0x113   : > { %2508 = vmatpush1.bf16.msra.mxu0 %v7580_v37  ;;  %2590 = vmatpush1.bf16.msra.mxu1 %v7582_v38  ;;  %v880_v37 = vld [vmem:[%s9048_s24 + $0xd0] sm:$0xff] }
 0x114   : > { %2509 = vmatprep.subr.bf16.mxu0 %v7589_v39  ;;  %2591 = vmatprep.subr.bf16.mxu1 %v7591_v40  ;;  %v884_v38 = vld [vmem:[%s9048_s24 + $0xf0] sm:$0xff]  ;;  %v881_v39 = vld [vmem:[%s9048_s24 + $0xd8] sm:$0xff] }
 0x115   : > { %v885_v40 = vld [vmem:[%s9048_s24 + $0xf8] sm:$0xff]  ;;  %v7401_v43 = vcombine.high %v880_v37, %v884_v38  ;;  %v7400_v49 = vcombine.low %v880_v37, %v884_v38 }
 0x116   : > { %v7403_v44 = vcombine.high %v881_v39, %v885_v40 }
 0x117   : > { %2510 = vmatpush1.bf16.msra.mxu0 %v7588_v45  ;;  %2592 = vmatpush1.bf16.msra.mxu1 %v7590_v46  ;;  %v888_v45 = vld [vmem:[%s9048_s24 + $0x110] sm:$0xff] }
 0x118   : > { %2511 = vmatprep.subr.bf16.mxu0 %v7597_v47  ;;  %2593 = vmatprep.subr.bf16.mxu1 %v7599_v48  ;;  %v892_v46 = vld [vmem:[%s9048_s24 + $0x130] sm:$0xff]  ;;  %v889_v47 = vld [vmem:[%s9048_s24 + $0x118] sm:$0xff] }
 0x119   : > { %v893_v48 = vld [vmem:[%s9048_s24 + $0x138] sm:$0xff]  ;;  %v7409_v50 = vcombine.high %v888_v45, %v892_v46 }
 0x11a   : > { %v7411_v51 = vcombine.high %v889_v47, %v893_v48  ;;  %v7410_v59 = vcombine.low %v889_v47, %v893_v48  ;;  %v952_v48 = vld [vmem:[%s9048_s24 + $0x310] sm:$0xff] }
 0x11b   : > { %2512 = vmatpush1.bf16.msra.mxu0 %v7596_v53  ;;  %2594 = vmatpush1.bf16.msra.mxu1 %v7598_v55  ;;  %v900_v53 = vld [vmem:[%s9048_s24 + $0x170] sm:$0xff]  ;;  %v897_v55 = vld [vmem:[%s9048_s24 + $0x158] sm:$0xff] }
 0x11c   : > { %2513 = vmatprep.subr.bf16.mxu0 %v7605_v56  ;;  %2595 = vmatprep.subr.bf16.mxu1 %v7607_v57  ;;  %v901_v56 = vld [vmem:[%s9048_s24 + $0x178] sm:$0xff]  ;;  %v7408_v57 = vcombine.low %v888_v45, %v892_v46  ;;  %v7417_v60 = vcombine.high %v896_v52, %v900_v53 }
 0x11d   : > { %v7419_v61 = vcombine.high %v897_v55, %v901_v56  ;;  %v7418_v3 = vcombine.low %v897_v55, %v901_v56  ;;  %v960_v56 = vld [vmem:[%s9048_s24 + $0x350] sm:$0xff] }
 0x11f   : > { %2514 = vmatpush1.bf16.msra.mxu0 %v7604_v63  ;;  %2596 = vmatpush1.bf16.msra.mxu1 %v7606_v0  ;;  %v908_v63 = vld [vmem:[%s9048_s24 + $0x1b0] sm:$0xff]  ;;  %v905_v0 = vld [vmem:[%s9048_s24 + $0x198] sm:$0xff] }
 0x120   : > { %2515 = vmatprep.subr.bf16.mxu0 %v7613_v1  ;;  %2597 = vmatprep.subr.bf16.mxu1 %v7615_v2  ;;  %v909_v1 = vld [vmem:[%s9048_s24 + $0x1b8] sm:$0xff]  ;;  %v7416_v2 = vcombine.low %v896_v52, %v900_v53  ;;  %v7425_v4 = vcombine.high %v904_v62, %v908_v63 }
 0x121   : > { %v7427_v5 = vcombine.high %v905_v0, %v909_v1  ;;  %v7426_v11 = vcombine.low %v905_v0, %v909_v1  ;;  %v968_v1 = vld [vmem:[%s9048_s24 + $0x390] sm:$0xff] }
 0x123   : > { %2516 = vmatpush1.bf16.msra.mxu0 %v7612_v7  ;;  %2598 = vmatpush1.bf16.msra.mxu1 %v7614_v8  ;;  %v916_v7 = vld [vmem:[%s9048_s24 + $0x1f0] sm:$0xff]  ;;  %v913_v8 = vld [vmem:[%s9048_s24 + $0x1d8] sm:$0xff] }
 0x124   : > { %2517 = vmatprep.subr.bf16.mxu0 %v7621_v9  ;;  %2599 = vmatprep.subr.bf16.mxu1 %v7623_v10  ;;  %v917_v9 = vld [vmem:[%s9048_s24 + $0x1f8] sm:$0xff]  ;;  %v7424_v10 = vcombine.low %v904_v62, %v908_v63  ;;  %v7433_v12 = vcombine.high %v912_v6, %v916_v7 }
 0x125   : > { %v7435_v14 = vcombine.high %v913_v8, %v917_v9  ;;  %v7434_v54 = vcombine.low %v913_v8, %v917_v9  ;;  %v976_v9 = vld [vmem:[%s9048_s24 + $0x3d0] sm:$0xff] }
 0x127   : > { %2518 = vmatpush1.bf16.msra.mxu0 %v7620_v17  ;;  %2600 = vmatpush1.bf16.msra.mxu1 %v7622_v18  ;;  %v924_v17 = vld [vmem:[%s9048_s24 + $0x230] sm:$0xff]  ;;  %v921_v18 = vld [vmem:[%s9048_s24 + $0x218] sm:$0xff] }
 0x128   : > { %2610 = vmatprep.subr.bf16.mxu0 %v7377_v19  ;;  %2692 = vmatprep.subr.bf16.mxu1 %v7379_v20  ;;  %v925_v19 = vld [vmem:[%s9048_s24 + $0x238] sm:$0xff]  ;;  %v7432_v20 = vcombine.low %v912_v6, %v916_v7  ;;  %v7441_v21 = vcombine.high %v920_v15, %v924_v17 }
 0x129   : > { %v7443_v24 = vcombine.high %v921_v18, %v925_v19  ;;  %v7442_v30 = vcombine.low %v921_v18, %v925_v19  ;;  %v984_v19 = vld [vmem:[%s9048_s24 + $0x410] sm:$0xff] }
 0x12a   : > { %2520 = vmatmul.mubr.bf16.vlgmr.msra.gmra.mrb[0].mxu0 %v9215_v23  ;;  %2602 = vmatmul.mubr.bf16.vlgmr.msra.gmra.mrb[0].mxu1 %v9215_v23 }
 0x12b   : > { %2611 = vmatpush1.bf16.msra.mxu0 %v7376_v26  ;;  %2693 = vmatpush1.bf16.msra.mxu1 %v7378_v27  ;;  %v932_v26 = vld [vmem:[%s9048_s24 + $0x270] sm:$0xff]  ;;  %v929_v27 = vld [vmem:[%s9048_s24 + $0x258] sm:$0xff] }
 0x12c   : > { %2612 = vmatprep.subr.bf16.mxu0 %v7385_v28  ;;  %2694 = vmatprep.subr.bf16.mxu1 %v7387_v29  ;;  %v933_v28 = vld [vmem:[%s9048_s24 + $0x278] sm:$0xff]  ;;  %v7440_v29 = vcombine.low %v920_v15, %v924_v17  ;;  %v7449_v31 = vcombine.high %v928_v25, %v932_v26 }
 0x12d   : > { %2642 = vmatprep.mubr.bf16.mxu0 %v9088_v58  ;;  %2724 = vmatprep.mubr.bf16.mxu1 %v9088_v58  ;;  %v7402_v58 = vcombine.low %v881_v39, %v885_v40  ;;  %v7451_v16 = vcombine.high %v929_v27, %v933_v28  ;;  %v7450_v37 = vcombine.low %v929_v27, %v933_v28  ;;  %v944_v40 = vld [vmem:[%s9048_s24 + $0x2d0] sm:$0xff] }
 0x12e   : > { %v992_v28 = vld [vmem:[%s9048_s24 + $0x450] sm:$0xff] }
 0x12f   : > { %2613 = vmatpush1.bf16.msra.mxu0 %v7384_v33  ;;  %2695 = vmatpush1.bf16.msra.mxu1 %v7386_v34  ;;  %v940_v33 = vld [vmem:[%s9048_s24 + $0x2b0] sm:$0xff]  ;;  %v937_v34 = vld [vmem:[%s9048_s24 + $0x298] sm:$0xff] }
 0x130   : > { %2614 = vmatprep.subr.bf16.mxu0 %v7393_v35  ;;  %2696 = vmatprep.subr.bf16.mxu1 %v7395_v36  ;;  %v941_v35 = vld [vmem:[%s9048_s24 + $0x2b8] sm:$0xff]  ;;  %v7448_v36 = vcombine.low %v928_v25, %v932_v26  ;;  %v7457_v38 = vcombine.high %v936_v32, %v940_v33 }
 0x131   : > { %v7459_v39 = vcombine.high %v937_v34, %v941_v35  ;;  %v7458_v45 = vcombine.low %v937_v34, %v941_v35  ;;  %v1000_v35 = vld [vmem:[%s9048_s24 + $0x490] sm:$0xff] }
 0x133   : > { %2615 = vmatpush1.bf16.msra.mxu0 %v7392_v41  ;;  %2697 = vmatpush1.bf16.msra.mxu1 %v7394_v42  ;;  %v948_v41 = vld [vmem:[%s9048_s24 + $0x2f0] sm:$0xff]  ;;  %v945_v42 = vld [vmem:[%s9048_s24 + $0x2d8] sm:$0xff] }
 0x134   : > { %2616 = vmatprep.subr.bf16.mxu0 %v7401_v43  ;;  %2698 = vmatprep.subr.bf16.mxu1 %v7403_v44  ;;  %v949_v43 = vld [vmem:[%s9048_s24 + $0x2f8] sm:$0xff]  ;;  %v7456_v44 = vcombine.low %v936_v32, %v940_v33  ;;  %v7465_v46 = vcombine.high %v944_v40, %v948_v41 }
 0x135   : > { %v7467_v47 = vcombine.high %v945_v42, %v949_v43  ;;  %v7466_v52 = vcombine.low %v945_v42, %v949_v43  ;;  %v1008_v43 = vld [vmem:[%s9048_s24 + $0x4d0] sm:$0xff] }
 0x137   : > { %2617 = vmatpush1.bf16.msra.mxu0 %v7400_v49  ;;  %2699 = vmatpush1.bf16.msra.mxu1 %v7402_v58  ;;  %v956_v49 = vld [vmem:[%s9048_s24 + $0x330] sm:$0xff]  ;;  %v953_v58 = vld [vmem:[%s9048_s24 + $0x318] sm:$0xff] }
 0x138   : > { %2618 = vmatprep.subr.bf16.mxu0 %v7409_v50  ;;  %2700 = vmatprep.subr.bf16.mxu1 %v7411_v51  ;;  %v957_v50 = vld [vmem:[%s9048_s24 + $0x338] sm:$0xff]  ;;  %v7464_v51 = vcombine.low %v944_v40, %v948_v41  ;;  %v7473_v53 = vcombine.high %v952_v48, %v956_v49 }
 0x139   : > { %v7475_v55 = vcombine.high %v953_v58, %v957_v50  ;;  %v7474_v62 = vcombine.low %v953_v58, %v957_v50  ;;  %v1016_v58 = vld [vmem:[%s9048_s24 + $0x510] sm:$0xff] }
 0x13a   : > { %v1020_v50 = vld [vmem:[%s9048_s24 + $0x530] sm:$0xff] }
 0x13b   : > { %2619 = vmatpush1.bf16.msra.mxu0 %v7408_v57  ;;  %2701 = vmatpush1.bf16.msra.mxu1 %v7410_v59  ;;  %v964_v57 = vld [vmem:[%s9048_s24 + $0x370] sm:$0xff]  ;;  %v961_v59 = vld [vmem:[%s9048_s24 + $0x358] sm:$0xff] }
 0x13c   : > { %2620 = vmatprep.subr.bf16.mxu0 %v7417_v60  ;;  %2702 = vmatprep.subr.bf16.mxu1 %v7419_v61  ;;  %v965_v60 = vld [vmem:[%s9048_s24 + $0x378] sm:$0xff]  ;;  %v7472_v61 = vcombine.low %v952_v48, %v956_v49  ;;  %v7481_v63 = vcombine.high %v960_v56, %v964_v57 }
 0x13d   : > { %v7483_v0 = vcombine.high %v961_v59, %v965_v60  ;;  %v7482_v6 = vcombine.low %v961_v59, %v965_v60  ;;  %v1028_v59 = vld [vmem:[%s9048_s24 + $0x570] sm:$0xff]  ;;  %v1025_v60 = vld [vmem:[%s9048_s24 + $0x558] sm:$0xff] }
 0x13f   : > { %2621 = vmatpush1.bf16.msra.mxu0 %v7416_v2  ;;  %2703 = vmatpush1.bf16.msra.mxu1 %v7418_v3  ;;  %v972_v2 = vld [vmem:[%s9048_s24 + $0x3b0] sm:$0xff]  ;;  %v969_v3 = vld [vmem:[%s9048_s24 + $0x398] sm:$0xff] }
 0x140   : > { %2622 = vmatprep.subr.bf16.mxu0 %v7425_v4  ;;  %2704 = vmatprep.subr.bf16.mxu1 %v7427_v5  ;;  %v973_v4 = vld [vmem:[%s9048_s24 + $0x3b8] sm:$0xff]  ;;  %v7480_v5 = vcombine.low %v960_v56, %v964_v57  ;;  %v7489_v7 = vcombine.high %v968_v1, %v972_v2  ;;  %v1024_v57 = vld [vmem:[%s9048_s24 + $0x550] sm:$0xff] }
 0x141   : > { %v7491_v8 = vcombine.high %v969_v3, %v973_v4  ;;  %v7490_v15 = vcombine.low %v969_v3, %v973_v4  ;;  %v1036_v3 = vld [vmem:[%s9048_s24 + $0x5b0] sm:$0xff]  ;;  %v1033_v4 = vld [vmem:[%s9048_s24 + $0x598] sm:$0xff] }
 0x143   : > { %2623 = vmatpush1.bf16.msra.mxu0 %v7424_v10  ;;  %2705 = vmatpush1.bf16.msra.mxu1 %v7426_v11  ;;  %v980_v10 = vld [vmem:[%s9048_s24 + $0x3f0] sm:$0xff]  ;;  %v977_v11 = vld [vmem:[%s9048_s24 + $0x3d8] sm:$0xff] }
 0x144   : > { %2624 = vmatprep.subr.bf16.mxu0 %v7433_v12  ;;  %2706 = vmatprep.subr.bf16.mxu1 %v7435_v14  ;;  %v981_v12 = vld [vmem:[%s9048_s24 + $0x3f8] sm:$0xff]  ;;  %v7488_v14 = vcombine.low %v968_v1, %v972_v2  ;;  %v7497_v17 = vcombine.high %v976_v9, %v980_v10  ;;  %v1032_v2 = vld [vmem:[%s9048_s24 + $0x590] sm:$0xff] }
 0x145   : > { %v7499_v18 = vcombine.high %v977_v11, %v981_v12  ;;  %v7498_v25 = vcombine.low %v977_v11, %v981_v12  ;;  %v1044_v11 = vld [vmem:[%s9048_s24 + $0x5f0] sm:$0xff]  ;;  %v1041_v12 = vld [vmem:[%s9048_s24 + $0x5d8] sm:$0xff] }
 0x147   : > { %2625 = vmatpush1.bf16.msra.mxu0 %v7432_v20  ;;  %2707 = vmatpush1.bf16.msra.mxu1 %v7434_v54  ;;  %v988_v20 = vld [vmem:[%s9048_s24 + $0x430] sm:$0xff]  ;;  %v985_v54 = vld [vmem:[%s9048_s24 + $0x418] sm:$0xff] }
 0x148   : > { %2626 = vmatprep.subr.bf16.mxu0 %v7441_v21  ;;  %2708 = vmatprep.subr.bf16.mxu1 %v7443_v24  ;;  %v989_v21 = vld [vmem:[%s9048_s24 + $0x438] sm:$0xff]  ;;  %v7496_v24 = vcombine.low %v976_v9, %v980_v10  ;;  %v7505_v26 = vcombine.high %v984_v19, %v988_v20  ;;  %v1040_v10 = vld [vmem:[%s9048_s24 + $0x5d0] sm:$0xff] }
 0x149   : > { %v7507_v27 = vcombine.high %v985_v54, %v989_v21  ;;  %v7506_v32 = vcombine.low %v985_v54, %v989_v21  ;;  %v1052_v54 = vld [vmem:[%s9048_s24 + $0x630] sm:$0xff]  ;;  %v1049_v21 = vld [vmem:[%s9048_s24 + $0x618] sm:$0xff] }
 0x14b   : > { %2627 = vmatpush1.bf16.msra.mxu0 %v7440_v29  ;;  %2709 = vmatpush1.bf16.msra.mxu1 %v7442_v30  ;;  %v996_v29 = vld [vmem:[%s9048_s24 + $0x470] sm:$0xff]  ;;  %v993_v30 = vld [vmem:[%s9048_s24 + $0x458] sm:$0xff] }
 0x14c   : > { %2628 = vmatprep.subr.bf16.mxu0 %v7449_v31  ;;  %2710 = vmatprep.subr.bf16.mxu1 %v7451_v16  ;;  %v997_v31 = vld [vmem:[%s9048_s24 + $0x478] sm:$0xff]  ;;  %v7504_v16 = vcombine.low %v984_v19, %v988_v20  ;;  %v7513_v33 = vcombine.high %v992_v28, %v996_v29  ;;  %v1048_v20 = vld [vmem:[%s9048_s24 + $0x610] sm:$0xff] }
 0x14d   : > { %v7515_v34 = vcombine.high %v993_v30, %v997_v31  ;;  %v7514_v40 = vcombine.low %v993_v30, %v997_v31  ;;  %v1060_v30 = vld [vmem:[%s9048_s24 + $0x670] sm:$0xff]  ;;  %v1057_v31 = vld [vmem:[%s9048_s24 + $0x658] sm:$0xff] }
 0x14f   : > { %2629 = vmatpush1.bf16.msra.mxu0 %v7448_v36  ;;  %2711 = vmatpush1.bf16.msra.mxu1 %v7450_v37  ;;  %v1004_v36 = vld [vmem:[%s9048_s24 + $0x4b0] sm:$0xff]  ;;  %v1001_v37 = vld [vmem:[%s9048_s24 + $0x498] sm:$0xff] }
 0x150   : > { %2630 = vmatprep.subr.bf16.mxu0 %v7457_v38  ;;  %2712 = vmatprep.subr.bf16.mxu1 %v7459_v39  ;;  %v1005_v38 = vld [vmem:[%s9048_s24 + $0x4b8] sm:$0xff]  ;;  %v7512_v39 = vcombine.low %v992_v28, %v996_v29  ;;  %v7521_v41 = vcombine.high %v1000_v35, %v1004_v36  ;;  %v1056_v29 = vld [vmem:[%s9048_s24 + $0x650] sm:$0xff] }
 0x151   : > { %v7523_v42 = vcombine.high %v1001_v37, %v1005_v38 }
 0x153   : > { %2631 = vmatpush1.bf16.msra.mxu0 %v7456_v44  ;;  %2713 = vmatpush1.bf16.msra.mxu1 %v7458_v45  ;;  %v1012_v44 = vld [vmem:[%s9048_s24 + $0x4f0] sm:$0xff]  ;;  %v1009_v45 = vld [vmem:[%s9048_s24 + $0x4d8] sm:$0xff] }
 0x154   : > { %2632 = vmatprep.subr.bf16.mxu0 %v7465_v46  ;;  %2714 = vmatprep.subr.bf16.mxu1 %v7467_v47  ;;  %v1013_v46 = vld [vmem:[%s9048_s24 + $0x4f8] sm:$0xff]  ;;  %v7522_v47 = vcombine.low %v1001_v37, %v1005_v38  ;;  %v7529_v48 = vcombine.high %v1008_v43, %v1012_v44  ;;  %v1068_v37 = vld [vmem:[%s9048_s24 + $0x6b0] sm:$0xff] }
 0x155   : > { %v7531_v49 = vcombine.high %v1009_v45, %v1013_v46  ;;  %v1065_v38 = vld [vmem:[%s9048_s24 + $0x698] sm:$0xff] }
 0x157   : > { %2633 = vmatpush1.bf16.msra.mxu0 %v7464_v51  ;;  %2715 = vmatpush1.bf16.msra.mxu1 %v7466_v52  ;;  %v1017_v51 = vld [vmem:[%s9048_s24 + $0x518] sm:$0xff] }
 0x158   : > { %2634 = vmatprep.subr.bf16.mxu0 %v7473_v53  ;;  %2716 = vmatprep.subr.bf16.mxu1 %v7475_v55  ;;  %v1021_v52 = vld [vmem:[%s9048_s24 + $0x538] sm:$0xff]  ;;  %v7528_v53 = vcombine.low %v1008_v43, %v1012_v44  ;;  %v7537_v55 = vcombine.high %v1016_v58, %v1020_v50  ;;  %v1072_v44 = vld [vmem:[%s9048_s24 + $0x6d0] sm:$0xff] }
 0x159   : > { %v7539_v56 = vcombine.high %v1017_v51, %v1021_v52 }
 0x15b   : > { %2635 = vmatpush1.bf16.msra.mxu0 %v7472_v61  ;;  %2717 = vmatpush1.bf16.msra.mxu1 %v7474_v62  ;;  %v1029_v61 = vld [vmem:[%s9048_s24 + $0x578] sm:$0xff]  ;;  %v7536_v62 = vcombine.low %v1016_v58, %v1020_v50  ;;  %v1080_v50 = vld [vmem:[%s9048_s24 + $0x710] sm:$0xff] }
 0x15c   : > { %2636 = vmatprep.subr.bf16.mxu0 %v7481_v63  ;;  %2718 = vmatprep.subr.bf16.mxu1 %v7483_v0  ;;  %v7538_v63 = vcombine.low %v1017_v51, %v1021_v52  ;;  %v7545_v0 = vcombine.high %v1024_v57, %v1028_v59  ;;  %v7547_v1 = vcombine.high %v1025_v60, %v1029_v61  ;;  %v1084_v51 = vld [vmem:[%s9048_s24 + $0x730] sm:$0xff]  ;;  %v1081_v52 = vld [vmem:[%s9048_s24 + $0x718] sm:$0xff] }
 0x15f   : > { %2637 = vmatpush1.bf16.msra.mxu0 %v7480_v5  ;;  %2719 = vmatpush1.bf16.msra.mxu1 %v7482_v6  ;;  %v1037_v5 = vld [vmem:[%s9048_s24 + $0x5b8] sm:$0xff]  ;;  %v7544_v6 = vcombine.low %v1024_v57, %v1028_v59  ;;  %v1088_v59 = vld [vmem:[%s9048_s24 + $0x750] sm:$0xff] }
 0x160   : > { %2638 = vmatprep.subr.bf16.mxu0 %v7489_v7  ;;  %2720 = vmatprep.subr.bf16.mxu1 %v7491_v8  ;;  %v7546_v7 = vcombine.low %v1025_v60, %v1029_v61  ;;  %v7553_v8 = vcombine.high %v1032_v2, %v1036_v3  ;;  %v7555_v9 = vcombine.high %v1033_v4, %v1037_v5  ;;  %v1092_v60 = vld [vmem:[%s9048_s24 + $0x770] sm:$0xff]  ;;  %v1089_v61 = vld [vmem:[%s9048_s24 + $0x758] sm:$0xff] }
 0x163   : > { %2639 = vmatpush1.bf16.msra.mxu0 %v7488_v14  ;;  %2721 = vmatpush1.bf16.msra.mxu1 %v7490_v15  ;;  %v1045_v14 = vld [vmem:[%s9048_s24 + $0x5f8] sm:$0xff]  ;;  %v7552_v15 = vcombine.low %v1032_v2, %v1036_v3  ;;  %v1096_v3 = vld [vmem:[%s9048_s24 + $0x790] sm:$0xff] }
 0x164   : > { %2640 = vmatprep.subr.bf16.mxu0 %v7497_v17  ;;  %2722 = vmatprep.subr.bf16.mxu1 %v7499_v18  ;;  %v7554_v17 = vcombine.low %v1033_v4, %v1037_v5  ;;  %v7561_v18 = vcombine.high %v1040_v10, %v1044_v11  ;;  %v7563_v19 = vcombine.high %v1041_v12, %v1045_v14  ;;  %v1100_v4 = vld [vmem:[%s9048_s24 + $0x7b0] sm:$0xff]  ;;  %v1097_v5 = vld [vmem:[%s9048_s24 + $0x798] sm:$0xff] }
 0x167   : > { %2641 = vmatpush1.bf16.msra.mxu0 %v7496_v24  ;;  %2723 = vmatpush1.bf16.msra.mxu1 %v7498_v25  ;;  %v1053_v24 = vld [vmem:[%s9048_s24 + $0x638] sm:$0xff]  ;;  %v7560_v25 = vcombine.low %v1040_v10, %v1044_v11  ;;  %v1104_v11 = vld [vmem:[%s9048_s24 + $0x7d0] sm:$0xff] }
 0x168   : > { %2651 = vmatprep.subr.bf16.mxu0 %v7505_v26  ;;  %2733 = vmatprep.subr.bf16.mxu1 %v7507_v27  ;;  %v7562_v26 = vcombine.low %v1041_v12, %v1045_v14  ;;  %v7569_v27 = vcombine.high %v1048_v20, %v1052_v54  ;;  %v7571_v28 = vcombine.high %v1049_v21, %v1053_v24  ;;  %v1108_v12 = vld [vmem:[%s9048_s24 + $0x7f0] sm:$0xff]  ;;  %v1105_v14 = vld [vmem:[%s9048_s24 + $0x7d8] sm:$0xff] }
 0x16a   : > { %2643 = vmatmul.mubr.bf16.vlgmr.msra.gmra.mrb[4].mxu0 %v9134_v13  ;;  %2725 = vmatmul.mubr.bf16.vlgmr.msra.gmra.mrb[4].mxu1 %v9134_v13  ;;  %v7520_v13 = vcombine.low %v1000_v35, %v1004_v36  ;;  %v1064_v36 = vld [vmem:[%s9048_s24 + $0x690] sm:$0xff] }
 0x16b   : > { %2652 = vmatpush1.bf16.msra.mxu0 %v7504_v16  ;;  %2734 = vmatpush1.bf16.msra.mxu1 %v7506_v32  ;;  %v1061_v16 = vld [vmem:[%s9048_s24 + $0x678] sm:$0xff]  ;;  %v7568_v32 = vcombine.low %v1048_v20, %v1052_v54  ;;  %v2798_v54 = vld [vmem:[%s9046_s30] sm:$0xff] }
 0x16c   : > { %2653 = vmatprep.subr.bf16.mxu0 %v7513_v33  ;;  %2735 = vmatprep.subr.bf16.mxu1 %v7515_v34  ;;  %v7570_v33 = vcombine.low %v1049_v21, %v1053_v24  ;;  %v7577_v34 = vcombine.high %v1056_v29, %v1060_v30  ;;  %v7579_v35 = vcombine.high %v1057_v31, %v1061_v16  ;;  %v2802_v21 = vld [vmem:[%s9046_s30 + $0x20] sm:$0xff] }
 0x16d   : > { %2683 = vmatprep.mubr.bf16.mxu0 %v9147_v22  ;;  %2765 = vmatprep.mubr.bf16.mxu1 %v9147_v22  ;;  %v7530_v22 = vcombine.low %v1009_v45, %v1013_v46  ;;  %v1076_v45 = vld [vmem:[%s9048_s24 + $0x6f0] sm:$0xff]  ;;  %v1073_v46 = vld [vmem:[%s9048_s24 + $0x6d8] sm:$0xff]  ;;  %v2926_v24 = vld [vmem:[%s9046_s30 + $0x400] sm:$0xff] }
 0x16f   : > { %2654 = vmatpush1.bf16.msra.mxu0 %v7512_v39  ;;  %2736 = vmatpush1.bf16.msra.mxu1 %v7514_v40  ;;  %v1069_v39 = vld [vmem:[%s9048_s24 + $0x6b8] sm:$0xff]  ;;  %v7576_v40 = vcombine.low %v1056_v29, %v1060_v30  ;;  %v2806_v30 = vld [vmem:[%s9046_s30 + $0x40] sm:$0xff] }
 0x170   : > { %2655 = vmatprep.subr.bf16.mxu0 %v7521_v41  ;;  %2737 = vmatprep.subr.bf16.mxu1 %v7523_v42  ;;  %v7578_v41 = vcombine.low %v1057_v31, %v1061_v16  ;;  %v7585_v42 = vcombine.high %v1064_v36, %v1068_v37  ;;  %v7587_v43 = vcombine.high %v1065_v38, %v1069_v39  ;;  %v2810_v31 = vld [vmem:[%s9046_s30 + $0x60] sm:$0xff] }
 0x171   : > { %v2934_v16 = vld [vmem:[%s9046_s30 + $0x440] sm:$0xff] }
 0x173   : > { %2656 = vmatpush1.bf16.msra.mxu0 %v7520_v13  ;;  %2738 = vmatpush1.bf16.msra.mxu1 %v7522_v47  ;;  %v1077_v13 = vld [vmem:[%s9048_s24 + $0x6f8] sm:$0xff]  ;;  %v7584_v47 = vcombine.low %v1064_v36, %v1068_v37  ;;  %v2814_v37 = vld [vmem:[%s9046_s30 + $0x80] sm:$0xff] }
 0x174   : > { %2657 = vmatprep.subr.bf16.mxu0 %v7529_v48  ;;  %2739 = vmatprep.subr.bf16.mxu1 %v7531_v49  ;;  %v7586_v48 = vcombine.low %v1065_v38, %v1069_v39  ;;  %v7593_v49 = vcombine.high %v1072_v44, %v1076_v45  ;;  %v7595_v58 = vcombine.high %v1073_v46, %v1077_v13  ;;  %v2818_v38 = vld [vmem:[%s9046_s30 + $0xa0] sm:$0xff] }
 0x175   : > { %v2942_v39 = vld [vmem:[%s9046_s30 + $0x480] sm:$0xff] }
 0x177   : > { %2658 = vmatpush1.bf16.msra.mxu0 %v7528_v53  ;;  %2740 = vmatpush1.bf16.msra.mxu1 %v7530_v22  ;;  %v1085_v53 = vld [vmem:[%s9048_s24 + $0x738] sm:$0xff]  ;;  %v7592_v22 = vcombine.low %v1072_v44, %v1076_v45  ;;  %v2822_v45 = vld [vmem:[%s9046_s30 + $0xc0] sm:$0xff] }
 0x178   : > { %2659 = vmatprep.subr.bf16.mxu0 %v7537_v55  ;;  %2741 = vmatprep.subr.bf16.mxu1 %v7539_v56  ;;  %v7594_v55 = vcombine.low %v1073_v46, %v1077_v13  ;;  %v7601_v56 = vcombine.high %v1080_v50, %v1084_v51  ;;  %v7603_v57 = vcombine.high %v1081_v52, %v1085_v53  ;;  %v2826_v46 = vld [vmem:[%s9046_s30 + $0xe0] sm:$0xff] }
 0x179   : > { %v2950_v13 = vld [vmem:[%s9046_s30 + $0x4c0] sm:$0xff] }
 0x17b   : > { %2660 = vmatpush1.bf16.msra.mxu0 %v7536_v62  ;;  %2742 = vmatpush1.bf16.msra.mxu1 %v7538_v63  ;;  %v1093_v62 = vld [vmem:[%s9048_s24 + $0x778] sm:$0xff]  ;;  %v7600_v63 = vcombine.low %v1080_v50, %v1084_v51  ;;  %v2830_v50 = vld [vmem:[%s9046_s30 + $0x100] sm:$0xff] }
 0x17c   : > { %2661 = vmatprep.subr.bf16.mxu0 %v7545_v0  ;;  %2743 = vmatprep.subr.bf16.mxu1 %v7547_v1  ;;  %v7602_v0 = vcombine.low %v1081_v52, %v1085_v53  ;;  %v7609_v1 = vcombine.high %v1088_v59, %v1092_v60  ;;  %v7611_v2 = vcombine.high %v1089_v61, %v1093_v62  ;;  %v2834_v51 = vld [vmem:[%s9046_s30 + $0x120] sm:$0xff] }
 0x17d   : > { %v2958_v52 = vld [vmem:[%s9046_s30 + $0x500] sm:$0xff] }
 0x17e   : > { %v2962_v53 = vld [vmem:[%s9046_s30 + $0x520] sm:$0xff] }
 0x17f   : > { %2662 = vmatpush1.bf16.msra.mxu0 %v7544_v6  ;;  %2744 = vmatpush1.bf16.msra.mxu1 %v7546_v7  ;;  %v1101_v6 = vld [vmem:[%s9048_s24 + $0x7b8] sm:$0xff]  ;;  %v7608_v7 = vcombine.low %v1088_v59, %v1092_v60  ;;  %v2838_v59 = vld [vmem:[%s9046_s30 + $0x140] sm:$0xff] }
 0x180   : > { %2663 = vmatprep.subr.bf16.mxu0 %v7553_v8  ;;  %2745 = vmatprep.subr.bf16.mxu1 %v7555_v9  ;;  %v7610_v8 = vcombine.low %v1089_v61, %v1093_v62  ;;  %v7617_v9 = vcombine.high %v1096_v3, %v1100_v4  ;;  %v7619_v10 = vcombine.high %v1097_v5, %v1101_v6  ;;  %v2842_v60 = vld [vmem:[%s9046_s30 + $0x160] sm:$0xff] }
 0x181   : > { %v2966_v61 = vld [vmem:[%s9046_s30 + $0x540] sm:$0xff] }
 0x182   : > { %v2970_v62 = vld [vmem:[%s9046_s30 + $0x560] sm:$0xff] }
 0x183   : > { %2664 = vmatpush1.bf16.msra.mxu0 %v7552_v15  ;;  %2746 = vmatpush1.bf16.msra.mxu1 %v7554_v17  ;;  %v1109_v15 = vld [vmem:[%s9048_s24 + $0x7f8] sm:$0xff]  ;;  %v7616_v17 = vcombine.low %v1096_v3, %v1100_v4  ;;  %v2846_v3 = vld [vmem:[%s9046_s30 + $0x180] sm:$0xff] }
 0x184   : > { %2665 = vmatprep.subr.bf16.mxu0 %v7561_v18  ;;  %2747 = vmatprep.subr.bf16.mxu1 %v7563_v19  ;;  %v7618_v18 = vcombine.low %v1097_v5, %v1101_v6  ;;  %v7625_v19 = vcombine.high %v1104_v11, %v1108_v12  ;;  %v7627_v20 = vcombine.high %v1105_v14, %v1109_v15  ;;  %v2850_v4 = vld [vmem:[%s9046_s30 + $0x1a0] sm:$0xff] }
 0x185   : > { %v2974_v5 = vld [vmem:[%s9046_s30 + $0x580] sm:$0xff] }
 0x186   : > { %v2978_v6 = vld [vmem:[%s9046_s30 + $0x5a0] sm:$0xff] }
 0x187   : > { %2666 = vmatpush1.bf16.msra.mxu0 %v7560_v25  ;;  %2748 = vmatpush1.bf16.msra.mxu1 %v7562_v26  ;;  %v2930_v25 = vld [vmem:[%s9046_s30 + $0x420] sm:$0xff]  ;;  %v7624_v26 = vcombine.low %v1104_v11, %v1108_v12 }
 0x188   : > { %2667 = vmatprep.subr.bf16.mxu0 %v7569_v27  ;;  %2749 = vmatprep.subr.bf16.mxu1 %v7571_v28  ;;  %v7626_v27 = vcombine.low %v1105_v14, %v1109_v15  ;;  %v7629_v28 = vcombine.high %v2798_v54, %v2802_v21  ;;  %v7757_v29 = vcombine.high %v2926_v24, %v2930_v25  ;;  %v2854_v11 = vld [vmem:[%s9046_s30 + $0x1c0] sm:$0xff] }
 0x189   : > { %v2858_v12 = vld [vmem:[%s9046_s30 + $0x1e0] sm:$0xff] }
 0x18a   : > { %v2982_v14 = vld [vmem:[%s9046_s30 + $0x5c0] sm:$0xff] }
 0x18b   : > { %2668 = vmatpush1.bf16.msra.mxu0 %v7568_v32  ;;  %2750 = vmatpush1.bf16.msra.mxu1 %v7570_v33  ;;  %v2938_v32 = vld [vmem:[%s9046_s30 + $0x460] sm:$0xff]  ;;  %v7628_v33 = vcombine.low %v2798_v54, %v2802_v21 }
 0x18c   : > { %2669 = vmatprep.subr.bf16.mxu0 %v7577_v34  ;;  %2751 = vmatprep.subr.bf16.mxu1 %v7579_v35  ;;  %v7756_v34 = vcombine.low %v2926_v24, %v2930_v25  ;;  %v7637_v35 = vcombine.high %v2806_v30, %v2810_v31  ;;  %v7765_v36 = vcombine.high %v2934_v16, %v2938_v32  ;;  %v2986_v15 = vld [vmem:[%s9046_s30 + $0x5e0] sm:$0xff] }
 0x18d   : > { %v2862_v54 = vld [vmem:[%s9046_s30 + $0x200] sm:$0xff] }
 0x18e   : > { %v2866_v21 = vld [vmem:[%s9046_s30 + $0x220] sm:$0xff] }
 0x18f   : > { %2670 = vmatpush1.bf16.msra.mxu0 %v7576_v40  ;;  %2752 = vmatpush1.bf16.msra.mxu1 %v7578_v41  ;;  %v2946_v40 = vld [vmem:[%s9046_s30 + $0x4a0] sm:$0xff]  ;;  %v7636_v41 = vcombine.low %v2806_v30, %v2810_v31 }
 0x190   : > { %2671 = vmatprep.subr.bf16.mxu0 %v7585_v42  ;;  %2753 = vmatprep.subr.bf16.mxu1 %v7587_v43  ;;  %v7764_v42 = vcombine.low %v2934_v16, %v2938_v32  ;;  %v7645_v43 = vcombine.high %v2814_v37, %v2818_v38  ;;  %v7773_v44 = vcombine.high %v2942_v39, %v2946_v40  ;;  %v2990_v24 = vld [vmem:[%s9046_s30 + $0x600] sm:$0xff] }
 0x191   : > { %v2994_v25 = vld [vmem:[%s9046_s30 + $0x620] sm:$0xff] }
 0x192   : > { %v2870_v30 = vld [vmem:[%s9046_s30 + $0x240] sm:$0xff] }
 0x193   : > { %2672 = vmatpush1.bf16.msra.mxu0 %v7584_v47  ;;  %2754 = vmatpush1.bf16.msra.mxu1 %v7586_v48  ;;  %v2954_v47 = vld [vmem:[%s9046_s30 + $0x4e0] sm:$0xff]  ;;  %v7644_v48 = vcombine.low %v2814_v37, %v2818_v38 }
 0x194   : > { %2673 = vmatprep.subr.bf16.mxu0 %v7593_v49  ;;  %2755 = vmatprep.subr.bf16.mxu1 %v7595_v58  ;;  %v7653_v49 = vcombine.high %v2822_v45, %v2826_v46  ;;  %v7781_v58 = vcombine.high %v2950_v13, %v2954_v47  ;;  %v2874_v31 = vld [vmem:[%s9046_s30 + $0x260] sm:$0xff] }
 0x195   : > { %v2998_v16 = vld [vmem:[%s9046_s30 + $0x640] sm:$0xff] }
 0x196   : > { %v3002_v32 = vld [vmem:[%s9046_s30 + $0x660] sm:$0xff] }
 0x197   : > { %2674 = vmatpush1.bf16.msra.mxu0 %v7592_v22  ;;  %2756 = vmatpush1.bf16.msra.mxu1 %v7594_v55  ;;  %v7652_v22 = vcombine.low %v2822_v45, %v2826_v46  ;;  %v7780_v55 = vcombine.low %v2950_v13, %v2954_v47  ;;  %v2878_v37 = vld [vmem:[%s9046_s30 + $0x280] sm:$0xff] }
 0x198   : > { %2675 = vmatprep.subr.bf16.mxu0 %v7601_v56  ;;  %2757 = vmatprep.subr.bf16.mxu1 %v7603_v57  ;;  %v7661_v56 = vcombine.high %v2830_v50, %v2834_v51  ;;  %v7789_v57 = vcombine.high %v2958_v52, %v2962_v53  ;;  %v2882_v38 = vld [vmem:[%s9046_s30 + $0x2a0] sm:$0xff] }
 0x199   : > { %v2886_v45 = vld [vmem:[%s9046_s30 + $0x2c0] sm:$0xff] }
 0x19a   : > { %v2890_v46 = vld [vmem:[%s9046_s30 + $0x2e0] sm:$0xff] }
 0x19b   : > { %2676 = vmatpush1.bf16.msra.mxu0 %v7600_v63  ;;  %2758 = vmatpush1.bf16.msra.mxu1 %v7602_v0  ;;  %v7660_v63 = vcombine.low %v2830_v50, %v2834_v51  ;;  %v7788_v0 = vcombine.low %v2958_v52, %v2962_v53  ;;  %v3014_v13 = vld [vmem:[%s9046_s30 + $0x6c0] sm:$0xff] }
 0x19c   : > { %2677 = vmatprep.subr.bf16.mxu0 %v7609_v1  ;;  %2759 = vmatprep.subr.bf16.mxu1 %v7611_v2  ;;  %v7669_v1 = vcombine.high %v2838_v59, %v2842_v60  ;;  %v7797_v2 = vcombine.high %v2966_v61, %v2970_v62  ;;  %v3018_v47 = vld [vmem:[%s9046_s30 + $0x6e0] sm:$0xff] }
 0x19d   : > { %v2894_v50 = vld [vmem:[%s9046_s30 + $0x300] sm:$0xff] }
 0x19e   : > { %v2898_v51 = vld [vmem:[%s9046_s30 + $0x320] sm:$0xff] }
 0x19f   : > { %2678 = vmatpush1.bf16.msra.mxu0 %v7608_v7  ;;  %2760 = vmatpush1.bf16.msra.mxu1 %v7610_v8  ;;  %v7668_v7 = vcombine.low %v2838_v59, %v2842_v60  ;;  %v7796_v8 = vcombine.low %v2966_v61, %v2970_v62  ;;  %v3022_v52 = vld [vmem:[%s9046_s30 + $0x700] sm:$0xff] }
 0x1a0   : > { %2679 = vmatprep.subr.bf16.mxu0 %v7617_v9  ;;  %2761 = vmatprep.subr.bf16.mxu1 %v7619_v10  ;;  %v7677_v9 = vcombine.high %v2846_v3, %v2850_v4  ;;  %v7805_v10 = vcombine.high %v2974_v5, %v2978_v6  ;;  %v3026_v53 = vld [vmem:[%s9046_s30 + $0x720] sm:$0xff] }
 0x1a1   : > { %v2902_v59 = vld [vmem:[%s9046_s30 + $0x340] sm:$0xff] }
 0x1a2   : > { %v2906_v60 = vld [vmem:[%s9046_s30 + $0x360] sm:$0xff] }
 0x1a3   : > { %2680 = vmatpush1.bf16.msra.mxu0 %v7616_v17  ;;  %2762 = vmatpush1.bf16.msra.mxu1 %v7618_v18  ;;  %v7676_v17 = vcombine.low %v2846_v3, %v2850_v4  ;;  %v7804_v18 = vcombine.low %v2974_v5, %v2978_v6  ;;  %v3030_v61 = vld [vmem:[%s9046_s30 + $0x740] sm:$0xff] }
 0x1a4   : > { %2681 = vmatprep.subr.bf16.mxu0 %v7625_v19  ;;  %2763 = vmatprep.subr.bf16.mxu1 %v7627_v20  ;;  %v7685_v19 = vcombine.high %v2854_v11, %v2858_v12  ;;  %v7813_v20 = vcombine.high %v2982_v14, %v2986_v15  ;;  %v3034_v62 = vld [vmem:[%s9046_s30 + $0x760] sm:$0xff] }
 0x1a5   : > { %v2910_v3 = vld [vmem:[%s9046_s30 + $0x380] sm:$0xff] }
 0x1a6   : > { %v2914_v4 = vld [vmem:[%s9046_s30 + $0x3a0] sm:$0xff] }
 0x1a7   : > { %2682 = vmatpush1.bf16.msra.mxu0 %v7624_v26  ;;  %2764 = vmatpush1.bf16.msra.mxu1 %v7626_v27  ;;  %v7684_v26 = vcombine.low %v2854_v11, %v2858_v12  ;;  %v7812_v27 = vcombine.low %v2982_v14, %v2986_v15  ;;  %v3038_v5 = vld [vmem:[%s9046_s30 + $0x780] sm:$0xff] }
 0x1a8   : > { %5870 = vmatprep.subr.bf16.mxu0 %v7629_v28  ;;  %5911 = vmatprep.subr.bf16.mxu1 %v7757_v29  ;;  %v7693_v28 = vcombine.high %v2862_v54, %v2866_v21  ;;  %v7821_v29 = vcombine.high %v2990_v24, %v2994_v25  ;;  %v3042_v6 = vld [vmem:[%s9046_s30 + $0x7a0] sm:$0xff] }
 0x1a9   : > { %v2918_v11 = vld [vmem:[%s9046_s30 + $0x3c0] sm:$0xff] }
 0x1aa   : > { %2684 = vmatmul.mubr.bf16.vlgmr.msra.gmra.mrb[4].mxu0 %v9215_v23  ;;  %2766 = vmatmul.mubr.bf16.vlgmr.msra.gmra.mrb[4].mxu1 %v9215_v23  ;;  %v7772_v23 = vcombine.low %v2942_v39, %v2946_v40  ;;  %v3006_v39 = vld [vmem:[%s9046_s30 + $0x680] sm:$0xff] }
 0x1ab   : > { %5871 = vmatpush1.bf16.msra.mxu0 %v7628_v33  ;;  %5912 = vmatpush1.bf16.msra.mxu1 %v7756_v34  ;;  %v7692_v33 = vcombine.low %v2862_v54, %v2866_v21  ;;  %v7820_v34 = vcombine.low %v2990_v24, %v2994_v25  ;;  %v3010_v40 = vld [vmem:[%s9046_s30 + $0x6a0] sm:$0xff] }
 0x1ac   : > { %5872 = vmatprep.subr.bf16.mxu0 %v7637_v35  ;;  %5913 = vmatprep.subr.bf16.mxu1 %v7765_v36  ;;  %v7701_v35 = vcombine.high %v2870_v30, %v2874_v31  ;;  %v7829_v36 = vcombine.high %v2998_v16, %v3002_v32  ;;  %v2922_v12 = vld [vmem:[%s9046_s30 + $0x3e0] sm:$0xff] }
 0x1ad   : > { %v3046_v14 = vld [vmem:[%s9046_s30 + $0x7c0] sm:$0xff] }
 0x1ae   : > { %v3050_v15 = vld [vmem:[%s9046_s30 + $0x7e0] sm:$0xff] }
 0x1af   : > { %5873 = vmatpush1.bf16.msra.mxu0 %v7636_v41  ;;  %5914 = vmatpush1.bf16.msra.mxu1 %v7764_v42  ;;  %v7700_v41 = vcombine.low %v2870_v30, %v2874_v31  ;;  %v7828_v42 = vcombine.low %v2998_v16, %v3002_v32  ;;  %v9414_v54 = vld [vmem:[%s9046_s30 + $0x800] sm:$0xff]  ;;  %v1112_v30 = vlaneseq }
 0x1b0   : > { %5874 = vmatprep.subr.bf16.mxu0 %v7645_v43  ;;  %5915 = vmatprep.subr.bf16.mxu1 %v7773_v44  ;;  %v7709_v43 = vcombine.high %v2878_v37, %v2882_v38  ;;  %v7837_v44 = vcombine.high %v3006_v39, %v3010_v40  ;;  %v9417_v21 = vld [vmem:[%s9046_s30 + $0x820] sm:$0xff] }
 0x1b1   : > { %v9420_v24 = vld [vmem:[%s9046_s30 + $0xc00] sm:$0xff]  ;;  %v9429_v31 = vshrl.u32 %v1112_v30, 7 }
 0x1b2   : > { %v9423_v25 = vld [vmem:[%s9046_s30 + $0xc20] sm:$0xff] }
 0x1b3   : > { %5875 = vmatpush1.bf16.msra.mxu0 %v7644_v48  ;;  %5916 = vmatpush1.bf16.msra.mxu1 %v7772_v23  ;;  %v7708_v48 = vcombine.low %v2878_v37, %v2882_v38  ;;  %v7836_v23 = vcombine.low %v3006_v39, %v3010_v40  ;;  %v1114_v16 = vsub.s32 0, %v9429_v31  ;;  %v9437_v32 = vld [vmem:[%s830_s22] sm:$0xff] }
 0x1b4   : > { %5876 = vmatprep.subr.bf16.mxu0 %v7653_v49  ;;  %5917 = vmatprep.subr.bf16.mxu1 %v7781_v58  ;;  %v7717_v49 = vcombine.high %v2886_v45, %v2890_v46  ;;  %v7845_v58 = vcombine.high %v3014_v13, %v3018_v47  ;;  %v3218_v30 = vld [vmem:[%s9046_s30 + $0xd20] sm:$0xff] }
 0x1b7   : > { %5877 = vmatpush1.bf16.msra.mxu0 %v7652_v22  ;;  %5918 = vmatpush1.bf16.msra.mxu1 %v7780_v55  ;;  %v7716_v22 = vcombine.low %v2886_v45, %v2890_v46  ;;  %v7844_v55 = vcombine.low %v3014_v13, %v3018_v47 }
 0x1b8   : > { %5878 = vmatprep.subr.bf16.mxu0 %v7661_v56  ;;  %5919 = vmatprep.subr.bf16.mxu1 %v7789_v57  ;;  %v7725_v56 = vcombine.high %v2894_v50, %v2898_v51  ;;  %v7853_v57 = vcombine.high %v3022_v52, %v3026_v53 }
 0x1bb   : > { %5879 = vmatpush1.bf16.msra.mxu0 %v7660_v63  ;;  %5920 = vmatpush1.bf16.msra.mxu1 %v7788_v0  ;;  %v7724_v63 = vcombine.low %v2894_v50, %v2898_v51  ;;  %v7852_v0 = vcombine.low %v3022_v52, %v3026_v53  ;;  %v3062_v52 = vld [vmem:[%s9046_s30 + $0x840] sm:$0xff] }
 0x1bc   : > { %5880 = vmatprep.subr.bf16.mxu0 %v7669_v1  ;;  %5921 = vmatprep.subr.bf16.mxu1 %v7797_v2  ;;  %v7733_v1 = vcombine.high %v2902_v59, %v2906_v60  ;;  %v7861_v2 = vcombine.high %v3030_v61, %v3034_v62  ;;  %v3066_v53 = vld [vmem:[%s9046_s30 + $0x860] sm:$0xff] }
 0x1bf   : > { %5881 = vmatpush1.bf16.msra.mxu0 %v7668_v7  ;;  %5922 = vmatpush1.bf16.msra.mxu1 %v7796_v8  ;;  %v7732_v7 = vcombine.low %v2902_v59, %v2906_v60  ;;  %v7860_v8 = vcombine.low %v3030_v61, %v3034_v62  ;;  %v7884_v59 = vcombine.low %v9414_v54, %v9417_v21  ;;  %v9463_v60 = vld [vmem:[%s9046_s30 + $0x8] sm:$0xff] }
 0x1c0   : > { %5882 = vmatprep.subr.bf16.mxu0 %v7677_v9  ;;  %5923 = vmatprep.subr.bf16.mxu1 %v7805_v10  ;;  %v7741_v9 = vcombine.high %v2910_v3, %v2914_v4  ;;  %v7869_v10 = vcombine.high %v3038_v5, %v3042_v6  ;;  %v9466_v61 = vld [vmem:[%s9046_s30 + $0x28] sm:$0xff] }
 0x1c1   : > { %v9469_v62 = vld [vmem:[%s9046_s30 + $0x408] sm:$0xff] }
 0x1c3   : > { %5883 = vmatpush1.bf16.msra.mxu0 %v7676_v17  ;;  %5924 = vmatpush1.bf16.msra.mxu1 %v7804_v18  ;;  %v7740_v17 = vcombine.low %v2910_v3, %v2914_v4  ;;  %v7868_v18 = vcombine.low %v3038_v5, %v3042_v6  ;;  %v9478_v3 = vld [vmem:[%s9046_s30 + $0x428] sm:$0xff]  ;;  %v3070_v6 = vld [vmem:[%s9046_s30 + $0x880] sm:$0xff] }
 0x1c4   : > { %5884 = vmatprep.subr.bf16.mxu0 %v7685_v19  ;;  %5925 = vmatprep.subr.bf16.mxu1 %v7813_v20  ;;  %v7749_v19 = vcombine.high %v2918_v11, %v2922_v12  ;;  %v7877_v20 = vcombine.high %v3046_v14, %v3050_v15 }
 0x1c7   : > { %5885 = vmatpush1.bf16.msra.mxu0 %v7684_v26  ;;  %5926 = vmatpush1.bf16.msra.mxu1 %v7812_v27  ;;  %v7748_v26 = vcombine.low %v2918_v11, %v2922_v12  ;;  %v7876_v27 = vcombine.low %v3046_v14, %v3050_v15  ;;  %v3202_v11 = vld [vmem:[%s9046_s30 + $0xca0] sm:$0xff]  ;;  %v7892_v12 = vcombine.low %v3062_v52, %v3066_v53 }
 0x1c8   : > { %5886 = vmatprep.subr.bf16.mxu0 %v7693_v28  ;;  %5927 = vmatprep.subr.bf16.mxu1 %v7821_v29  ;;  %v7885_v28 = vcombine.high %v9414_v54, %v9417_v21  ;;  %v8013_v29 = vcombine.high %v9420_v24, %v9423_v25  ;;  %v3210_v54 = vld [vmem:[%s9046_s30 + $0xce0] sm:$0xff] }
 0x1cb   : > { %5887 = vmatpush1.bf16.msra.mxu0 %v7692_v33  ;;  %5928 = vmatpush1.bf16.msra.mxu1 %v7820_v34  ;;  %v1122_v33 = vsub.s32 2, %v9429_v31  ;;  %v1118_v34 = vsub.s32 1, %v9429_v31 }
 0x1cc   : > { %5888 = vmatprep.subr.bf16.mxu0 %v7701_v35  ;;  %5929 = vmatprep.subr.bf16.mxu1 %v7829_v36  ;;  %v1126_v35 = vsub.s32 3, %v9429_v31  ;;  %v1115_v36 = vrot.slane %v9437_v32, %v1114_v16 }
 0x1cd   : > { %v1123_v37 = vrot.slane %v9437_v32, %v1122_v33  ;;  %v1119_v38 = vrot.slane %v9437_v32, %v1118_v34 }
 0x1ce   : > { %v1127_v39 = vrot.slane %v9437_v32, %v1126_v35 }
 0x1cf   : > { %5889 = vmatpush1.bf16.msra.mxu0 %v7700_v41  ;;  %5930 = vmatpush1.bf16.msra.mxu1 %v7828_v42 }
 0x1d0   : > { %5890 = vmatprep.subr.bf16.mxu0 %v7709_v43  ;;  %5931 = vmatprep.subr.bf16.mxu1 %v7837_v44 }
 0x1d3   : > { %5891 = vmatpush1.bf16.msra.mxu0 %v7708_v48  ;;  %5932 = vmatpush1.bf16.msra.mxu1 %v7836_v23 }
 0x1d4   : > { %5892 = vmatprep.subr.bf16.mxu0 %v7717_v49  ;;  %5933 = vmatprep.subr.bf16.mxu1 %v7845_v58 }
 0x1d7   : > { %5893 = vmatpush1.bf16.msra.mxu0 %v7716_v22  ;;  %5934 = vmatpush1.bf16.msra.mxu1 %v7844_v55  ;;  %v3190_v55 = vld [vmem:[%s9046_s30 + $0xc40] sm:$0xff] }
 0x1d8   : > { %5894 = vmatprep.subr.bf16.mxu0 %v7725_v56  ;;  %5935 = vmatprep.subr.bf16.mxu1 %v7853_v57  ;;  %v3194_v56 = vld [vmem:[%s9046_s30 + $0xc60] sm:$0xff] }
 0x1d9   : > { %v8021_v5 = vcombine.high %v3190_v55, %v3194_v56  ;;  %v8020_v14 = vcombine.low %v3190_v55, %v3194_v56  ;;  %v3238_v55 = vld [vmem:[%s9046_s30 + $0xdc0] sm:$0xff] }
 0x1da   : > { %v3242_v56 = vld [vmem:[%s9046_s30 + $0xde0] sm:$0xff] }
 0x1db   : > { %5895 = vmatpush1.bf16.msra.mxu0 %v7724_v63  ;;  %5936 = vmatpush1.bf16.msra.mxu1 %v7852_v0 }
 0x1dc   : > { %5896 = vmatprep.subr.bf16.mxu0 %v7733_v1  ;;  %5937 = vmatprep.subr.bf16.mxu1 %v7861_v2  ;;  %v8012_v1 = vcombine.low %v9420_v24, %v9423_v25  ;;  %v7893_v2 = vcombine.high %v3062_v52, %v3066_v53  ;;  %v3110_v53 = vld [vmem:[%s9046_s30 + $0x9c0] sm:$0xff] }
 0x1df   : > { %5897 = vmatpush1.bf16.msra.mxu0 %v7732_v7  ;;  %5938 = vmatpush1.bf16.msra.mxu1 %v7860_v8  ;;  %v3074_v7 = vld [vmem:[%s9046_s30 + $0x8a0] sm:$0xff]  ;;  %v7630_v8 = vcombine.low %v9463_v60, %v9466_v61 }
 0x1e0   : > { %5898 = vmatprep.subr.bf16.mxu0 %v7741_v9  ;;  %5939 = vmatprep.subr.bf16.mxu1 %v7869_v10  ;;  %v7758_v9 = vcombine.low %v9469_v62, %v9478_v3  ;;  %v3198_v10 = vld [vmem:[%s9046_s30 + $0xc80] sm:$0xff]  ;;  %v7901_v15 = vcombine.high %v3070_v6, %v3074_v7  ;;  %v7900_v21 = vcombine.low %v3070_v6, %v3074_v7 }
 0x1e1   : > { %v8028_v24 = vcombine.low %v3198_v10, %v3202_v11  ;;  %v3118_v6 = vld [vmem:[%s9046_s30 + $0xa00] sm:$0xff] }
 0x1e2   : > { %v3122_v7 = vld [vmem:[%s9046_s30 + $0xa20] sm:$0xff] }
 0x1e3   : > { %5899 = vmatpush1.bf16.msra.mxu0 %v7740_v17  ;;  %5940 = vmatpush1.bf16.msra.mxu1 %v7868_v18  ;;  %v8029_v17 = vcombine.high %v3198_v10, %v3202_v11  ;;  %v3078_v18 = vld [vmem:[%s9046_s30 + $0x8c0] sm:$0xff] }
 0x1e4   : > { %5900 = vmatprep.subr.bf16.mxu0 %v7749_v19  ;;  %5941 = vmatprep.subr.bf16.mxu1 %v7877_v20  ;;  %v3082_v19 = vld [vmem:[%s9046_s30 + $0x8e0] sm:$0xff] }
 0x1e5   : > { %v3206_v20 = vld [vmem:[%s9046_s30 + $0xcc0] sm:$0xff]  ;;  %v7909_v25 = vcombine.high %v3078_v18, %v3082_v19 }
 0x1e6   : > { %v3246_v10 = vld [vmem:[%s9046_s30 + $0xe00] sm:$0xff] }
 0x1e7   : > { %5901 = vmatpush1.bf16.msra.mxu0 %v7748_v26  ;;  %5942 = vmatpush1.bf16.msra.mxu1 %v7876_v27  ;;  %v8037_v26 = vcombine.high %v3206_v20, %v3210_v54  ;;  %v3086_v27 = vld [vmem:[%s9046_s30 + $0x900] sm:$0xff] }
 0x1e8   : > { %5952 = vmatprep.subr.bf16.mxu0 %v7885_v28  ;;  %5993 = vmatprep.subr.bf16.mxu1 %v8013_v29  ;;  %v3090_v28 = vld [vmem:[%s9046_s30 + $0x920] sm:$0xff] }
 0x1e9   : > { %v3214_v29 = vld [vmem:[%s9046_s30 + $0xd00] sm:$0xff] }
 0x1ea   : > { %v3250_v11 = vld [vmem:[%s9046_s30 + $0xe20] sm:$0xff] }
 0x1fd   : > { %v2521_v40 = vpop.f32.mrb[0].mxu0  ;;  %v2603_v42 = vpop.f32.mrb[0].mxu1 }
 0x1fe   : > { %v8298_v41 = vadd.f32 %v2521_v40, %v1115_v36  ;;  %v2523_v43 = vpop.f32.mrb[1].mxu0  ;;  %v8300_v44 = vadd.f32 %v2603_v42, %v1123_v37  ;;  %v2605_v46 = vpop.f32.mrb[1].mxu1  ;;  %v7908_v36 = vcombine.low %v3078_v18, %v3082_v19  ;;  %v8036_v37 = vcombine.low %v3206_v20, %v3210_v54  ;;  %v3094_v40 = vld [vmem:[%s9046_s30 + $0x940] sm:$0xff] }
 0x1ff   : > { %v8299_v45 = vadd.f32 %v2523_v43, %v1119_v38  ;;  %v2525_v13 = vpop.f32.mrb[2].mxu0  ;;  %v8301_v48 = vadd.f32 %v2605_v46, %v1127_v39  ;;  %v2607_v23 = vpop.f32.mrb[2].mxu1  ;;  %v7917_v38 = vcombine.high %v3086_v27, %v3090_v28  ;;  %v8045_v39 = vcombine.high %v3214_v29, %v3218_v30  ;;  %v3222_v42 = vld [vmem:[%s9046_s30 + $0xd40] sm:$0xff] }
 0x200   : > { %v2774_v47 = vmax.f32 %v8298_v41, 0.0  ;;  %v2526_v49 = vpop.f32.mrb[3].mxu0  ;;  %v2776_v58 = vmax.f32 %v8300_v44, 0.0  ;;  %v2608_v51 = vpop.f32.mrb[3].mxu1  ;;  %v3098_v41 = vld [vmem:[%s9046_s30 + $0x960] sm:$0xff]  ;;  %v7916_v44 = vcombine.low %v3086_v27, %v3090_v28 }
 0x201   : > { %v2775_v50 = vmax.f32 %v8299_v45, 0.0  ;;  %v2777_v22 = vmax.f32 %v8301_v48, 0.0  ;;  %v3226_v43 = vld [vmem:[%s9046_s30 + $0xd60] sm:$0xff]  ;;  %v8044_v45 = vcombine.low %v3214_v29, %v3218_v30  ;;  %v7925_v46 = vcombine.high %v3094_v40, %v3098_v41 }
 0x202   : > { %v9471_v63 = vpack.c.bf16 %v2774_v47, %v2774_v47  ;;  %v9480_v4 = vpack.c.bf16 %v2776_v58, %v2776_v58  ;;  %v8053_v13 = vcombine.high %v3222_v42, %v3226_v43  ;;  %v3102_v47 = vld [vmem:[%s9046_s30 + $0x980] sm:$0xff]  ;;  %v7924_v58 = vcombine.low %v3094_v40, %v3098_v41 }
 0x203   : > { %v9458_v57 = vpack.c.bf16 %v2775_v50, %v2775_v50  ;;  %v9473_v0 = vpack.c.bf16 %v2777_v22, %v2777_v22  ;;  %v3106_v48 = vld [vmem:[%s9046_s30 + $0x9a0] sm:$0xff]  ;;  %v8052_v50 = vcombine.low %v3222_v42, %v3226_v43 }
 0x204   : > { %v3230_v23 = vld [vmem:[%s9046_s30 + $0xd80] sm:$0xff]  ;;  %v7933_v51 = vcombine.high %v3102_v47, %v3106_v48 }
 0x205   : > { %5902 = vmatprep.mubr.bf16.mxu0 %v9458_v57  ;;  %5943 = vmatprep.mubr.bf16.mxu1 %v9473_v0  ;;  %v3234_v49 = vld [vmem:[%s9046_s30 + $0xda0] sm:$0xff] }
 0x206   : > { %5903 = vmatmul.mubr.bf16.vlgmr.msra.gmra.mrb[8].mxu0 %v9471_v63  ;;  %5944 = vmatmul.mubr.bf16.vlgmr.msra.gmra.mrb[8].mxu1 %v9480_v4  ;;  %v8061_v52 = vcombine.high %v3230_v23, %v3234_v49  ;;  %v3114_v22 = vld [vmem:[%s9046_s30 + $0x9e0] sm:$0xff] }
 0x207   : > { %5953 = vmatpush1.bf16.msra.mxu0 %v7884_v59  ;;  %5994 = vmatpush1.bf16.msra.mxu1 %v8012_v1  ;;  %v7932_v59 = vcombine.low %v3102_v47, %v3106_v48  ;;  %v8060_v1 = vcombine.low %v3230_v23, %v3234_v49  ;;  %v3126_v18 = vld [vmem:[%s9046_s30 + $0xa40] sm:$0xff] }
 0x208   : > { %5954 = vmatprep.subr.bf16.mxu0 %v7893_v2  ;;  %5995 = vmatprep.subr.bf16.mxu1 %v8021_v5  ;;  %v7941_v2 = vcombine.high %v3110_v53, %v3114_v22  ;;  %v8069_v5 = vcombine.high %v3238_v55, %v3242_v56  ;;  %v3130_v19 = vld [vmem:[%s9046_s30 + $0xa60] sm:$0xff] }
 0x209   : > { %v3254_v20 = vld [vmem:[%s9046_s30 + $0xe40] sm:$0xff] }
 0x20a   : > { %v3258_v54 = vld [vmem:[%s9046_s30 + $0xe60] sm:$0xff] }
 0x20b   : > { %5955 = vmatpush1.bf16.msra.mxu0 %v7892_v12  ;;  %5996 = vmatpush1.bf16.msra.mxu1 %v8020_v14  ;;  %v7940_v12 = vcombine.low %v3110_v53, %v3114_v22  ;;  %v8068_v14 = vcombine.low %v3238_v55, %v3242_v56  ;;  %v3134_v27 = vld [vmem:[%s9046_s30 + $0xa80] sm:$0xff] }
 0x20c   : > { %5956 = vmatprep.subr.bf16.mxu0 %v7901_v15  ;;  %5997 = vmatprep.subr.bf16.mxu1 %v8029_v17  ;;  %v7949_v15 = vcombine.high %v3118_v6, %v3122_v7  ;;  %v8077_v17 = vcombine.high %v3246_v10, %v3250_v11  ;;  %v3138_v28 = vld [vmem:[%s9046_s30 + $0xaa0] sm:$0xff] }
 0x20d   : > { %v3262_v29 = vld [vmem:[%s9046_s30 + $0xe80] sm:$0xff] }
 0x20e   : > { %v3266_v30 = vld [vmem:[%s9046_s30 + $0xea0] sm:$0xff] }
 0x20f   : > { %5957 = vmatpush1.bf16.msra.mxu0 %v7900_v21  ;;  %5998 = vmatpush1.bf16.msra.mxu1 %v8028_v24  ;;  %v7948_v21 = vcombine.low %v3118_v6, %v3122_v7  ;;  %v8076_v24 = vcombine.low %v3246_v10, %v3250_v11  ;;  %v3142_v40 = vld [vmem:[%s9046_s30 + $0xac0] sm:$0xff] }
 0x210   : > { %5958 = vmatprep.subr.bf16.mxu0 %v7909_v25  ;;  %5999 = vmatprep.subr.bf16.mxu1 %v8037_v26  ;;  %v7957_v25 = vcombine.high %v3126_v18, %v3130_v19  ;;  %v8085_v26 = vcombine.high %v3254_v20, %v3258_v54  ;;  %v3146_v41 = vld [vmem:[%s9046_s30 + $0xae0] sm:$0xff] }
 0x211   : > { %v3270_v42 = vld [vmem:[%s9046_s30 + $0xec0] sm:$0xff] }
 0x212   : > { %v3274_v43 = vld [vmem:[%s9046_s30 + $0xee0] sm:$0xff] }
 0x213   : > { %5959 = vmatpush1.bf16.msra.mxu0 %v7908_v36  ;;  %6000 = vmatpush1.bf16.msra.mxu1 %v8036_v37  ;;  %v7956_v36 = vcombine.low %v3126_v18, %v3130_v19  ;;  %v8084_v37 = vcombine.low %v3254_v20, %v3258_v54  ;;  %v3150_v47 = vld [vmem:[%s9046_s30 + $0xb00] sm:$0xff] }
 0x214   : > { %5960 = vmatprep.subr.bf16.mxu0 %v7917_v38  ;;  %6001 = vmatprep.subr.bf16.mxu1 %v8045_v39  ;;  %v7965_v38 = vcombine.high %v3134_v27, %v3138_v28  ;;  %v8093_v39 = vcombine.high %v3262_v29, %v3266_v30  ;;  %v3154_v48 = vld [vmem:[%s9046_s30 + $0xb20] sm:$0xff] }
 0x215   : > { %v3278_v23 = vld [vmem:[%s9046_s30 + $0xf00] sm:$0xff] }
 0x216   : > { %v3282_v49 = vld [vmem:[%s9046_s30 + $0xf20] sm:$0xff] }
 0x217   : > { %5961 = vmatpush1.bf16.msra.mxu0 %v7916_v44  ;;  %6002 = vmatpush1.bf16.msra.mxu1 %v8044_v45  ;;  %v7964_v44 = vcombine.low %v3134_v27, %v3138_v28  ;;  %v8092_v45 = vcombine.low %v3262_v29, %v3266_v30  ;;  %v3158_v53 = vld [vmem:[%s9046_s30 + $0xb40] sm:$0xff]  ;;  %v7631_v29 = vcombine.high %v9463_v60, %v9466_v61  ;;  %v2827_v60 = vld [vmem:[%s9046_s30 + $0xe8] sm:$0xff] }
 0x218   : > { %5962 = vmatprep.subr.bf16.mxu0 %v7925_v46  ;;  %6003 = vmatprep.subr.bf16.mxu1 %v8053_v13  ;;  %v7973_v46 = vcombine.high %v3142_v40, %v3146_v41  ;;  %v8101_v13 = vcombine.high %v3270_v42, %v3274_v43  ;;  %v3162_v22 = vld [vmem:[%s9046_s30 + $0xb60] sm:$0xff]  ;;  %v7759_v30 = vcombine.high %v9469_v62, %v9478_v3  ;;  %v2951_v61 = vld [vmem:[%s9046_s30 + $0x4c8] sm:$0xff] }
 0x219   : > { %v3286_v55 = vld [vmem:[%s9046_s30 + $0xf40] sm:$0xff] }
 0x21a   : > { %v3290_v56 = vld [vmem:[%s9046_s30 + $0xf60] sm:$0xff] }
 0x21b   : > { %5963 = vmatpush1.bf16.msra.mxu0 %v7924_v58  ;;  %6004 = vmatpush1.bf16.msra.mxu1 %v8052_v50  ;;  %v7972_v58 = vcombine.low %v3142_v40, %v3146_v41  ;;  %v8100_v50 = vcombine.low %v3270_v42, %v3274_v43  ;;  %v3166_v6 = vld [vmem:[%s9046_s30 + $0xb80] sm:$0xff] }
 0x21c   : > { %5964 = vmatprep.subr.bf16.mxu0 %v7933_v51  ;;  %6005 = vmatprep.subr.bf16.mxu1 %v8061_v52  ;;  %v7981_v51 = vcombine.high %v3150_v47, %v3154_v48  ;;  %v8109_v52 = vcombine.high %v3278_v23, %v3282_v49  ;;  %v3170_v7 = vld [vmem:[%s9046_s30 + $0xba0] sm:$0xff] }
 0x21d   : > { %v3294_v10 = vld [vmem:[%s9046_s30 + $0xf80] sm:$0xff] }
 0x21e   : > { %v3298_v11 = vld [vmem:[%s9046_s30 + $0xfa0] sm:$0xff] }
 0x21f   : > { %5965 = vmatpush1.bf16.msra.mxu0 %v7932_v59  ;;  %6006 = vmatpush1.bf16.msra.mxu1 %v8060_v1  ;;  %v7980_v59 = vcombine.low %v3150_v47, %v3154_v48  ;;  %v8108_v1 = vcombine.low %v3278_v23, %v3282_v49  ;;  %v3174_v18 = vld [vmem:[%s9046_s30 + $0xbc0] sm:$0xff] }
 0x220   : > { %5966 = vmatprep.subr.bf16.mxu0 %v7941_v2  ;;  %6007 = vmatprep.subr.bf16.mxu1 %v8069_v5  ;;  %v7989_v2 = vcombine.high %v3158_v53, %v3162_v22  ;;  %v8117_v5 = vcombine.high %v3286_v55, %v3290_v56  ;;  %v3178_v19 = vld [vmem:[%s9046_s30 + $0xbe0] sm:$0xff] }
 0x221   : > { %v3302_v20 = vld [vmem:[%s9046_s30 + $0xfc0] sm:$0xff]  ;;  %v8004_v27 = vcombine.low %v3174_v18, %v3178_v19 }
 0x222   : > { %v3306_v54 = vld [vmem:[%s9046_s30 + $0xfe0] sm:$0xff] }
 0x223   : > { %5967 = vmatpush1.bf16.msra.mxu0 %v7940_v12  ;;  %6008 = vmatpush1.bf16.msra.mxu1 %v8068_v14  ;;  %v7988_v12 = vcombine.low %v3158_v53, %v3162_v22  ;;  %v8116_v14 = vcombine.low %v3286_v55, %v3290_v56  ;;  %v8132_v28 = vcombine.low %v3302_v20, %v3306_v54  ;;  %v2807_v56 = vld [vmem:[%s9046_s30 + $0x48] sm:$0xff] }
 0x224   : > { %5968 = vmatprep.subr.bf16.mxu0 %v7949_v15  ;;  %6009 = vmatprep.subr.bf16.mxu1 %v8077_v17  ;;  %v7997_v15 = vcombine.high %v3166_v6, %v3170_v7  ;;  %v8125_v17 = vcombine.high %v3294_v10, %v3298_v11 }
 0x227   : > { %5969 = vmatpush1.bf16.msra.mxu0 %v7948_v21  ;;  %6010 = vmatpush1.bf16.msra.mxu1 %v8076_v24  ;;  %v7996_v21 = vcombine.low %v3166_v6, %v3170_v7  ;;  %v8124_v24 = vcombine.low %v3294_v10, %v3298_v11 }
 0x228   : > { %5970 = vmatprep.subr.bf16.mxu0 %v7957_v25  ;;  %6011 = vmatprep.subr.bf16.mxu1 %v8085_v26  ;;  %v8005_v25 = vcombine.high %v3174_v18, %v3178_v19  ;;  %v8133_v26 = vcombine.high %v3302_v20, %v3306_v54  ;;  %v2947_v18 = vld [vmem:[%s9046_s30 + $0x4a8] sm:$0xff] }
 0x22b   : > { %5971 = vmatpush1.bf16.msra.mxu0 %v7956_v36  ;;  %6012 = vmatpush1.bf16.msra.mxu1 %v8084_v37  ;;  %v1130_v36 = vsub.s32 4, %v9429_v31  ;;  %v1138_v37 = vsub.s32 6, %v9429_v31 }
 0x22c   : > { %5972 = vmatprep.subr.bf16.mxu0 %v7965_v38  ;;  %6013 = vmatprep.subr.bf16.mxu1 %v8093_v39  ;;  %v1134_v38 = vsub.s32 5, %v9429_v31  ;;  %v1142_v39 = vsub.s32 7, %v9429_v31 }
 0x22d   : > { %v1131_v40 = vrot.slane %v9437_v32, %v1130_v36  ;;  %v1139_v41 = vrot.slane %v9437_v32, %v1138_v37 }
 0x22e   : > { %v1135_v42 = vrot.slane %v9437_v32, %v1134_v38  ;;  %v1143_v43 = vrot.slane %v9437_v32, %v1142_v39 }
 0x22f   : > { %5973 = vmatpush1.bf16.msra.mxu0 %v7964_v44  ;;  %6014 = vmatpush1.bf16.msra.mxu1 %v8092_v45 }
 0x230   : > { %5974 = vmatprep.subr.bf16.mxu0 %v7973_v46  ;;  %6015 = vmatprep.subr.bf16.mxu1 %v8101_v13 }
 0x233   : > { %5975 = vmatpush1.bf16.msra.mxu0 %v7972_v58  ;;  %6016 = vmatpush1.bf16.msra.mxu1 %v8100_v50 }
 0x234   : > { %5976 = vmatprep.subr.bf16.mxu0 %v7981_v51  ;;  %6017 = vmatprep.subr.bf16.mxu1 %v8109_v52 }
 0x237   : > { %5977 = vmatpush1.bf16.msra.mxu0 %v7980_v59  ;;  %6018 = vmatpush1.bf16.msra.mxu1 %v8108_v1  ;;  %v2811_v59 = vld [vmem:[%s9046_s30 + $0x68] sm:$0xff] }
 0x238   : > { %5978 = vmatprep.subr.bf16.mxu0 %v7989_v2  ;;  %6019 = vmatprep.subr.bf16.mxu1 %v8117_v5  ;;  %v2935_v2 = vld [vmem:[%s9046_s30 + $0x448] sm:$0xff]  ;;  %v7639_v11 = vcombine.high %v2807_v56, %v2811_v59  ;;  %v7638_v19 = vcombine.low %v2807_v56, %v2811_v59 }
 0x239   : > { %v2939_v5 = vld [vmem:[%s9046_s30 + $0x468] sm:$0xff] }
 0x23a   : > { %v7766_v20 = vcombine.low %v2935_v2, %v2939_v5  ;;  %v2859_v56 = vld [vmem:[%s9046_s30 + $0x1e8] sm:$0xff] }
 0x23b   : > { %5979 = vmatpush1.bf16.msra.mxu0 %v7988_v12  ;;  %6020 = vmatpush1.bf16.msra.mxu1 %v8116_v14  ;;  %v2815_v12 = vld [vmem:[%s9046_s30 + $0x88] sm:$0xff] }
 0x23c   : > { %5980 = vmatprep.subr.bf16.mxu0 %v7997_v15  ;;  %6021 = vmatprep.subr.bf16.mxu1 %v8125_v17  ;;  %v2819_v14 = vld [vmem:[%s9046_s30 + $0xa8] sm:$0xff]  ;;  %v7767_v15 = vcombine.high %v2935_v2, %v2939_v5 }
 0x23d   : > { %v2943_v17 = vld [vmem:[%s9046_s30 + $0x488] sm:$0xff]  ;;  %v7647_v54 = vcombine.high %v2815_v12, %v2819_v14  ;;  %v7646_v62 = vcombine.low %v2815_v12, %v2819_v14 }
 0x23e   : > { %v7774_v3 = vcombine.low %v2943_v17, %v2947_v18  ;;  %v2983_v59 = vld [vmem:[%s9046_s30 + $0x5c8] sm:$0xff] }
 0x23f   : > { %5981 = vmatpush1.bf16.msra.mxu0 %v7996_v21  ;;  %6022 = vmatpush1.bf16.msra.mxu1 %v8124_v24  ;;  %v7775_v21 = vcombine.high %v2943_v17, %v2947_v18  ;;  %v2823_v24 = vld [vmem:[%s9046_s30 + $0xc8] sm:$0xff] }
 0x240   : > { %5982 = vmatprep.subr.bf16.mxu0 %v8005_v25  ;;  %6023 = vmatprep.subr.bf16.mxu1 %v8133_v26  ;;  %v2831_v26 = vld [vmem:[%s9046_s30 + $0x108] sm:$0xff] }
 0x241   : > { %v2987_v2 = vld [vmem:[%s9046_s30 + $0x5e8] sm:$0xff] }
 0x242   : > { %v7815_v14 = vcombine.high %v2983_v59, %v2987_v2  ;;  %v2867_v17 = vld [vmem:[%s9046_s30 + $0x228] sm:$0xff] }
 0x243   : > { %5983 = vmatpush1.bf16.msra.mxu0 %v8004_v27  ;;  %6024 = vmatpush1.bf16.msra.mxu1 %v8132_v28  ;;  %v2835_v27 = vld [vmem:[%s9046_s30 + $0x128] sm:$0xff] }
 0x244   : > { %6034 = vmatprep.subr.bf16.mxu0 %v7631_v29  ;;  %6075 = vmatprep.subr.bf16.mxu1 %v7759_v30  ;;  %v2959_v28 = vld [vmem:[%s9046_s30 + $0x508] sm:$0xff]  ;;  %v7654_v30 = vcombine.low %v2823_v24, %v2827_v60 }
 0x245   : > { %v2963_v29 = vld [vmem:[%s9046_s30 + $0x528] sm:$0xff] }
 0x246   : > { %v2991_v18 = vld [vmem:[%s9046_s30 + $0x608] sm:$0xff] }
 0x27d   : > { %v2685_v44 = vpop.f32.mrb[4].mxu0  ;;  %v2767_v46 = vpop.f32.mrb[4].mxu1 }
 0x27e   : > { %v8302_v45 = vadd.f32 %v2685_v44, %v1131_v40  ;;  %v2687_v13 = vpop.f32.mrb[5].mxu0  ;;  %v8304_v47 = vadd.f32 %v2767_v46, %v1139_v41  ;;  %v2769_v23 = vpop.f32.mrb[5].mxu1  ;;  %v7663_v41 = vcombine.high %v2831_v26, %v2835_v27  ;;  %v2843_v44 = vld [vmem:[%s9046_s30 + $0x168] sm:$0xff] }
 0x27f   : > { %v8303_v48 = vadd.f32 %v2687_v13, %v1135_v42  ;;  %v2689_v49 = vpop.f32.mrb[6].mxu0  ;;  %v8305_v50 = vadd.f32 %v2769_v23, %v1143_v43  ;;  %v2771_v51 = vpop.f32.mrb[6].mxu1  ;;  %v7791_v42 = vcombine.high %v2959_v28, %v2963_v29  ;;  %v2839_v43 = vld [vmem:[%s9046_s30 + $0x148] sm:$0xff]  ;;  %v7662_v13 = vcombine.low %v2831_v26, %v2835_v27 }
 0x280   : > { %v2778_v58 = vmax.f32 %v8302_v45, 0.0  ;;  %v2690_v52 = vpop.f32.mrb[7].mxu0  ;;  %v2780_v53 = vmax.f32 %v8304_v47, 0.0  ;;  %v2772_v22 = vpop.f32.mrb[7].mxu1  ;;  %v2967_v45 = vld [vmem:[%s9046_s30 + $0x548] sm:$0xff]  ;;  %v7790_v47 = vcombine.low %v2959_v28, %v2963_v29 }
 0x281   : > { %v2779_v32 = vmax.f32 %v8303_v48, 0.0  ;;  %v2781_v55 = vmax.f32 %v8305_v50, 0.0  ;;  %v2971_v46 = vld [vmem:[%s9046_s30 + $0x568] sm:$0xff]  ;;  %v7671_v48 = vcombine.high %v2839_v43, %v2843_v44  ;;  %v7670_v52 = vcombine.low %v2839_v43, %v2843_v44 }
 0x282   : > { %v9572_v6 = vpack.c.bf16 %v2778_v58, %v2778_v58  ;;  %v9576_v10 = vpack.c.bf16 %v2780_v53, %v2780_v53  ;;  %v7799_v23 = vcombine.high %v2967_v45, %v2971_v46  ;;  %v2847_v49 = vld [vmem:[%s9046_s30 + $0x188] sm:$0xff]  ;;  %v7798_v53 = vcombine.low %v2967_v45, %v2971_v46 }
 0x283   : > { %v9568_v1 = vpack.c.bf16 %v2779_v32, %v2779_v32  ;;  %v9574_v7 = vpack.c.bf16 %v2781_v55, %v2781_v55  ;;  %v2851_v58 = vld [vmem:[%s9046_s30 + $0x1a8] sm:$0xff] }
 0x284   : > { %v2975_v50 = vld [vmem:[%s9046_s30 + $0x588] sm:$0xff]  ;;  %v7679_v32 = vcombine.high %v2847_v49, %v2851_v58  ;;  %v7678_v5 = vcombine.low %v2847_v49, %v2851_v58 }
 0x285   : > { %5984 = vmatprep.mubr.bf16.mxu0 %v9568_v1  ;;  %6025 = vmatprep.mubr.bf16.mxu1 %v9574_v7  ;;  %v2979_v51 = vld [vmem:[%s9046_s30 + $0x5a8] sm:$0xff] }
 0x286   : > { %5985 = vmatmul.mubr.bf16.vlgmr.msra.gmra.mrb[12].mxu0 %v9572_v6  ;;  %6026 = vmatmul.mubr.bf16.vlgmr.msra.gmra.mrb[12].mxu1 %v9576_v10  ;;  %v7807_v22 = vcombine.high %v2975_v50, %v2979_v51  ;;  %v2855_v55 = vld [vmem:[%s9046_s30 + $0x1c8] sm:$0xff] }
 0x287   : > { %6035 = vmatpush1.bf16.msra.mxu0 %v7630_v8  ;;  %6076 = vmatpush1.bf16.msra.mxu1 %v7758_v9  ;;  %v2955_v8 = vld [vmem:[%s9046_s30 + $0x4e8] sm:$0xff]  ;;  %v7655_v9 = vcombine.high %v2823_v24, %v2827_v60  ;;  %v7687_v12 = vcombine.high %v2855_v55, %v2859_v56 }
 0x288   : > { %6066 = vmatprep.mubr.bf16.mxu0 %v9458_v57  ;;  %6107 = vmatprep.mubr.bf16.mxu1 %v9473_v0  ;;  %v7783_v25 = vcombine.high %v2951_v61, %v2955_v8  ;;  %v7782_v40 = vcombine.low %v2951_v61, %v2955_v8  ;;  %v2871_v60 = vld [vmem:[%s9046_s30 + $0x248] sm:$0xff] }
 0x289   : > { %6036 = vmatprep.subr.bf16.mxu0 %v7639_v11  ;;  %6077 = vmatprep.subr.bf16.mxu1 %v7767_v15  ;;  %v7806_v11 = vcombine.low %v2975_v50, %v2979_v51  ;;  %v2863_v15 = vld [vmem:[%s9046_s30 + $0x208] sm:$0xff] }
 0x28a   : > { %v2875_v61 = vld [vmem:[%s9046_s30 + $0x268] sm:$0xff] }
 0x28b   : > { %6037 = vmatpush1.bf16.msra.mxu0 %v7638_v19  ;;  %6078 = vmatpush1.bf16.msra.mxu1 %v7766_v20  ;;  %v2995_v19 = vld [vmem:[%s9046_s30 + $0x628] sm:$0xff]  ;;  %v7686_v20 = vcombine.low %v2855_v55, %v2859_v56 }
 0x28c   : > { %6038 = vmatprep.subr.bf16.mxu0 %v7647_v54  ;;  %6079 = vmatprep.subr.bf16.mxu1 %v7775_v21  ;;  %v7814_v54 = vcombine.low %v2983_v59, %v2987_v2  ;;  %v7695_v21 = vcombine.high %v2863_v15, %v2867_v17  ;;  %v7823_v24 = vcombine.high %v2991_v18, %v2995_v19  ;;  %v2999_v8 = vld [vmem:[%s9046_s30 + $0x648] sm:$0xff] }
 0x28d   : > { %v2879_v27 = vld [vmem:[%s9046_s30 + $0x288] sm:$0xff] }
 0x28e   : > { %v2883_v28 = vld [vmem:[%s9046_s30 + $0x2a8] sm:$0xff] }
 0x28f   : > { %6039 = vmatpush1.bf16.msra.mxu0 %v7646_v62  ;;  %6080 = vmatpush1.bf16.msra.mxu1 %v7774_v3  ;;  %v3003_v62 = vld [vmem:[%s9046_s30 + $0x668] sm:$0xff]  ;;  %v7694_v3 = vcombine.low %v2863_v15, %v2867_v17 }
 0x290   : > { %6040 = vmatprep.subr.bf16.mxu0 %v7655_v9  ;;  %6081 = vmatprep.subr.bf16.mxu1 %v7783_v25  ;;  %v7822_v9 = vcombine.low %v2991_v18, %v2995_v19  ;;  %v7703_v25 = vcombine.high %v2871_v60, %v2875_v61  ;;  %v7831_v26 = vcombine.high %v2999_v8, %v3003_v62  ;;  %v3007_v29 = vld [vmem:[%s9046_s30 + $0x688] sm:$0xff] }
 0x291   : > { %v2887_v44 = vld [vmem:[%s9046_s30 + $0x2c8] sm:$0xff] }
 0x292   : > { %v2891_v45 = vld [vmem:[%s9046_s30 + $0x2e8] sm:$0xff] }
 0x293   : > { %6041 = vmatpush1.bf16.msra.mxu0 %v7654_v30  ;;  %6082 = vmatpush1.bf16.msra.mxu1 %v7782_v40  ;;  %v3011_v30 = vld [vmem:[%s9046_s30 + $0x6a8] sm:$0xff]  ;;  %v7702_v40 = vcombine.low %v2871_v60, %v2875_v61 }
 0x294   : > { %6042 = vmatprep.subr.bf16.mxu0 %v7663_v41  ;;  %6083 = vmatprep.subr.bf16.mxu1 %v7791_v42  ;;  %v7830_v41 = vcombine.low %v2999_v8, %v3003_v62  ;;  %v7711_v42 = vcombine.high %v2879_v27, %v2883_v28  ;;  %v7839_v43 = vcombine.high %v3007_v29, %v3011_v30  ;;  %v3015_v46 = vld [vmem:[%s9046_s30 + $0x6c8] sm:$0xff] }
 0x295   : > { %v2895_v58 = vld [vmem:[%s9046_s30 + $0x308] sm:$0xff] }
 0x296   : > { %v2899_v50 = vld [vmem:[%s9046_s30 + $0x328] sm:$0xff] }
 0x297   : > { %6043 = vmatpush1.bf16.msra.mxu0 %v7662_v13  ;;  %6084 = vmatpush1.bf16.msra.mxu1 %v7790_v47  ;;  %v3019_v13 = vld [vmem:[%s9046_s30 + $0x6e8] sm:$0xff]  ;;  %v7710_v47 = vcombine.low %v2879_v27, %v2883_v28 }
 0x298   : > { %6044 = vmatprep.subr.bf16.mxu0 %v7671_v48  ;;  %6085 = vmatprep.subr.bf16.mxu1 %v7799_v23  ;;  %v7838_v48 = vcombine.low %v3007_v29, %v3011_v30  ;;  %v7719_v23 = vcombine.high %v2887_v44, %v2891_v45  ;;  %v7847_v49 = vcombine.high %v3015_v46, %v3019_v13  ;;  %v3023_v51 = vld [vmem:[%s9046_s30 + $0x708] sm:$0xff] }
 0x299   : > { %v2903_v56 = vld [vmem:[%s9046_s30 + $0x348] sm:$0xff] }
 0x29a   : > { %v2907_v59 = vld [vmem:[%s9046_s30 + $0x368] sm:$0xff] }
 0x29b   : > { %6045 = vmatpush1.bf16.msra.mxu0 %v7670_v52  ;;  %6086 = vmatpush1.bf16.msra.mxu1 %v7798_v53  ;;  %v3027_v52 = vld [vmem:[%s9046_s30 + $0x728] sm:$0xff]  ;;  %v7718_v53 = vcombine.low %v2887_v44, %v2891_v45 }
 0x29c   : > { %6046 = vmatprep.subr.bf16.mxu0 %v7679_v32  ;;  %6087 = vmatprep.subr.bf16.mxu1 %v7807_v22  ;;  %v7846_v32 = vcombine.low %v3015_v46, %v3019_v13  ;;  %v7727_v22 = vcombine.high %v2895_v58, %v2899_v50  ;;  %v7855_v55 = vcombine.high %v3023_v51, %v3027_v52  ;;  %v3031_v2 = vld [vmem:[%s9046_s30 + $0x748] sm:$0xff] }
 0x29d   : > { %v2911_v17 = vld [vmem:[%s9046_s30 + $0x388] sm:$0xff] }
 0x29e   : > { %v2915_v18 = vld [vmem:[%s9046_s30 + $0x3a8] sm:$0xff] }
 0x29f   : > { %6047 = vmatpush1.bf16.msra.mxu0 %v7678_v5  ;;  %6088 = vmatpush1.bf16.msra.mxu1 %v7806_v11  ;;  %v3035_v5 = vld [vmem:[%s9046_s30 + $0x768] sm:$0xff]  ;;  %v7726_v11 = vcombine.low %v2895_v58, %v2899_v50 }
 0x2a0   : > { %6048 = vmatprep.subr.bf16.mxu0 %v7687_v12  ;;  %6089 = vmatprep.subr.bf16.mxu1 %v7815_v14  ;;  %v7854_v12 = vcombine.low %v3023_v51, %v3027_v52  ;;  %v7735_v14 = vcombine.high %v2903_v56, %v2907_v59  ;;  %v7863_v15 = vcombine.high %v3031_v2, %v3035_v5  ;;  %v3039_v19 = vld [vmem:[%s9046_s30 + $0x788] sm:$0xff] }
 0x2a1   : > { %v2919_v61 = vld [vmem:[%s9046_s30 + $0x3c8] sm:$0xff] }
 0x2a2   : > { %v2923_v8 = vld [vmem:[%s9046_s30 + $0x3e8] sm:$0xff] }
 0x2a3   : > { %6049 = vmatpush1.bf16.msra.mxu0 %v7686_v20  ;;  %6090 = vmatpush1.bf16.msra.mxu1 %v7814_v54  ;;  %v3043_v20 = vld [vmem:[%s9046_s30 + $0x7a8] sm:$0xff]  ;;  %v7734_v54 = vcombine.low %v2903_v56, %v2907_v59 }
 0x2a4   : > { %6050 = vmatprep.subr.bf16.mxu0 %v7695_v21  ;;  %6091 = vmatprep.subr.bf16.mxu1 %v7823_v24  ;;  %v7862_v21 = vcombine.low %v3031_v2, %v3035_v5  ;;  %v7743_v24 = vcombine.high %v2911_v17, %v2915_v18  ;;  %v7871_v60 = vcombine.high %v3039_v19, %v3043_v20  ;;  %v3047_v62 = vld [vmem:[%s9046_s30 + $0x7c8] sm:$0xff] }
 0x2a5   : > { %v3055_v28 = vld [vmem:[%s9046_s30 + $0x808] sm:$0xff] }
 0x2a6   : > { %v3059_v29 = vld [vmem:[%s9046_s30 + $0x828] sm:$0xff] }
 0x2a7   : > { %6051 = vmatpush1.bf16.msra.mxu0 %v7694_v3  ;;  %6092 = vmatpush1.bf16.msra.mxu1 %v7822_v9  ;;  %v3051_v3 = vld [vmem:[%s9046_s30 + $0x7e8] sm:$0xff]  ;;  %v7742_v9 = vcombine.low %v2911_v17, %v2915_v18  ;;  %v7886_v13 = vcombine.low %v3055_v28, %v3059_v29 }
 0x2a8   : > { %6052 = vmatprep.subr.bf16.mxu0 %v7703_v25  ;;  %6093 = vmatprep.subr.bf16.mxu1 %v7831_v26  ;;  %v7870_v25 = vcombine.low %v3039_v19, %v3043_v20  ;;  %v7751_v26 = vcombine.high %v2919_v61, %v2923_v8  ;;  %v7879_v27 = vcombine.high %v3047_v62, %v3051_v3  ;;  %v3183_v30 = vld [vmem:[%s9046_s30 + $0xc08] sm:$0xff] }
 0x2a9   : > { %v3063_v45 = vld [vmem:[%s9046_s30 + $0x848] sm:$0xff] }
 0x2aa   : > { %v3067_v46 = vld [vmem:[%s9046_s30 + $0x868] sm:$0xff] }
 0x2ab   : > { %6053 = vmatpush1.bf16.msra.mxu0 %v7702_v40  ;;  %6094 = vmatpush1.bf16.msra.mxu1 %v7830_v41  ;;  %v3187_v40 = vld [vmem:[%s9046_s30 + $0xc28] sm:$0xff]  ;;  %v7750_v41 = vcombine.low %v2919_v61, %v2923_v8 }
 0x2ac   : > { %6054 = vmatprep.subr.bf16.mxu0 %v7711_v42  ;;  %6095 = vmatprep.subr.bf16.mxu1 %v7839_v43  ;;  %v7878_v42 = vcombine.low %v3047_v62, %v3051_v3  ;;  %v7887_v43 = vcombine.high %v3055_v28, %v3059_v29  ;;  %v8015_v44 = vcombine.high %v3183_v30, %v3187_v40  ;;  %v3071_v58 = vld [vmem:[%s9046_s30 + $0x888] sm:$0xff] }
 0x2ad   : > { %v3075_v50 = vld [vmem:[%s9046_s30 + $0x8a8] sm:$0xff] }
 0x2ae   : > { %v3199_v52 = vld [vmem:[%s9046_s30 + $0xc88] sm:$0xff] }
 0x2af   : > { %6055 = vmatpush1.bf16.msra.mxu0 %v7710_v47  ;;  %6096 = vmatpush1.bf16.msra.mxu1 %v7838_v48  ;;  %v3191_v47 = vld [vmem:[%s9046_s30 + $0xc48] sm:$0xff] }
 0x2b0   : > { %6056 = vmatprep.subr.bf16.mxu0 %v7719_v23  ;;  %6097 = vmatprep.subr.bf16.mxu1 %v7847_v49  ;;  %v3195_v48 = vld [vmem:[%s9046_s30 + $0xc68] sm:$0xff]  ;;  %v8014_v23 = vcombine.low %v3183_v30, %v3187_v40  ;;  %v7895_v49 = vcombine.high %v3063_v45, %v3067_v46 }
 0x2b1   : > { %v8023_v51 = vcombine.high %v3191_v47, %v3195_v48  ;;  %v3079_v59 = vld [vmem:[%s9046_s30 + $0x8c8] sm:$0xff] }
 0x2b2   : > { %v3083_v2 = vld [vmem:[%s9046_s30 + $0x8e8] sm:$0xff] }
 0x2b3   : > { %6057 = vmatpush1.bf16.msra.mxu0 %v7718_v53  ;;  %6098 = vmatpush1.bf16.msra.mxu1 %v7846_v32  ;;  %v3203_v53 = vld [vmem:[%s9046_s30 + $0xca8] sm:$0xff]  ;;  %v7894_v32 = vcombine.low %v3063_v45, %v3067_v46 }
 0x2b4   : > { %6058 = vmatprep.subr.bf16.mxu0 %v7727_v22  ;;  %6099 = vmatprep.subr.bf16.mxu1 %v7855_v55  ;;  %v8022_v22 = vcombine.low %v3191_v47, %v3195_v48  ;;  %v7903_v55 = vcombine.high %v3071_v58, %v3075_v50  ;;  %v8031_v56 = vcombine.high %v3199_v52, %v3203_v53  ;;  %v3207_v5 = vld [vmem:[%s9046_s30 + $0xcc8] sm:$0xff] }
 0x2b5   : > { %v3087_v18 = vld [vmem:[%s9046_s30 + $0x908] sm:$0xff] }
 0x2b6   : > { %v3091_v19 = vld [vmem:[%s9046_s30 + $0x928] sm:$0xff] }
 0x2b7   : > { %6059 = vmatpush1.bf16.msra.mxu0 %v7726_v11  ;;  %6100 = vmatpush1.bf16.msra.mxu1 %v7854_v12  ;;  %v3211_v11 = vld [vmem:[%s9046_s30 + $0xce8] sm:$0xff]  ;;  %v7902_v12 = vcombine.low %v3071_v58, %v3075_v50 }
 0x2b8   : > { %6060 = vmatprep.subr.bf16.mxu0 %v7735_v14  ;;  %6101 = vmatprep.subr.bf16.mxu1 %v7863_v15  ;;  %v8030_v14 = vcombine.low %v3199_v52, %v3203_v53  ;;  %v7911_v15 = vcombine.high %v3079_v59, %v3083_v2  ;;  %v8039_v17 = vcombine.high %v3207_v5, %v3211_v11  ;;  %v3215_v20 = vld [vmem:[%s9046_s30 + $0xd08] sm:$0xff] }
 0x2b9   : > { %v3095_v8 = vld [vmem:[%s9046_s30 + $0x948] sm:$0xff] }
 0x2ba   : > { %v3099_v62 = vld [vmem:[%s9046_s30 + $0x968] sm:$0xff] }
 0x2bb   : > { %6061 = vmatpush1.bf16.msra.mxu0 %v7734_v54  ;;  %6102 = vmatpush1.bf16.msra.mxu1 %v7862_v21  ;;  %v3219_v54 = vld [vmem:[%s9046_s30 + $0xd28] sm:$0xff]  ;;  %v7910_v21 = vcombine.low %v3079_v59, %v3083_v2 }
 0x2bc   : > { %6062 = vmatprep.subr.bf16.mxu0 %v7743_v24  ;;  %6103 = vmatprep.subr.bf16.mxu1 %v7871_v60  ;;  %v8038_v24 = vcombine.low %v3207_v5, %v3211_v11  ;;  %v7919_v60 = vcombine.high %v3087_v18, %v3091_v19  ;;  %v8047_v61 = vcombine.high %v3215_v20, %v3219_v54  ;;  %v3223_v3 = vld [vmem:[%s9046_s30 + $0xd48] sm:$0xff] }
 0x2bd   : > { %v3103_v29 = vld [vmem:[%s9046_s30 + $0x988] sm:$0xff] }
 0x2be   : > { %v3107_v30 = vld [vmem:[%s9046_s30 + $0x9a8] sm:$0xff] }
 0x2bf   : > { %6063 = vmatpush1.bf16.msra.mxu0 %v7742_v9  ;;  %6104 = vmatpush1.bf16.msra.mxu1 %v7870_v25  ;;  %v3227_v9 = vld [vmem:[%s9046_s30 + $0xd68] sm:$0xff]  ;;  %v7918_v25 = vcombine.low %v3087_v18, %v3091_v19  ;;  %v7934_v53 = vcombine.low %v3103_v29, %v3107_v30 }
 0x2c0   : > { %6064 = vmatprep.subr.bf16.mxu0 %v7751_v26  ;;  %6105 = vmatprep.subr.bf16.mxu1 %v7879_v27  ;;  %v8046_v26 = vcombine.low %v3215_v20, %v3219_v54  ;;  %v7927_v27 = vcombine.high %v3095_v8, %v3099_v62  ;;  %v8055_v28 = vcombine.high %v3223_v3, %v3227_v9  ;;  %v3231_v40 = vld [vmem:[%s9046_s30 + $0xd88] sm:$0xff] }
 0x2c1   : > { %v3115_v47 = vld [vmem:[%s9046_s30 + $0x9e8] sm:$0xff] }
 0x2c2   : > { %v3243_v58 = vld [vmem:[%s9046_s30 + $0xde8] sm:$0xff] }
 0x2c3   : > { %6065 = vmatpush1.bf16.msra.mxu0 %v7750_v41  ;;  %6106 = vmatpush1.bf16.msra.mxu1 %v7878_v42  ;;  %v3235_v41 = vld [vmem:[%s9046_s30 + $0xda8] sm:$0xff]  ;;  %v7926_v42 = vcombine.low %v3095_v8, %v3099_v62 }
 0x2c4   : > { %6116 = vmatprep.subr.bf16.mxu0 %v7887_v43  ;;  %6157 = vmatprep.subr.bf16.mxu1 %v8015_v44  ;;  %v8054_v43 = vcombine.low %v3223_v3, %v3227_v9  ;;  %v7935_v44 = vcombine.high %v3103_v29, %v3107_v30  ;;  %v8063_v46 = vcombine.high %v3231_v40, %v3235_v41  ;;  %v3119_v11 = vld [vmem:[%s9046_s30 + $0xa08] sm:$0xff] }
 0x2c5   : > { %v3127_v54 = vld [vmem:[%s9046_s30 + $0xa48] sm:$0xff] }
 0x2c6   : > { %6067 = vmatmul.mubr.bf16.vlgmr.msra.gmra.mrb[16].mxu0 %v9471_v63  ;;  %6108 = vmatmul.mubr.bf16.vlgmr.msra.gmra.mrb[16].mxu1 %v9480_v4  ;;  %v3135_v9 = vld [vmem:[%s9046_s30 + $0xa88] sm:$0xff] }
 0x2c7   : > { %6117 = vmatpush1.bf16.msra.mxu0 %v7886_v13  ;;  %6148 = vmatprep.mubr.bf16.mxu0 %v9568_v1  ;;  %v3111_v13 = vld [vmem:[%s9046_s30 + $0x9c8] sm:$0xff] }
 0x2c8   : > { %6158 = vmatpush1.bf16.msra.mxu1 %v8014_v23  ;;  %6189 = vmatprep.mubr.bf16.mxu1 %v9574_v7  ;;  %v7943_v59 = vcombine.high %v3111_v13, %v3115_v47 }
 0x2c9   : > { %6118 = vmatprep.subr.bf16.mxu0 %v7895_v49  ;;  %6159 = vmatprep.subr.bf16.mxu1 %v8023_v51  ;;  %v3239_v49 = vld [vmem:[%s9046_s30 + $0xdc8] sm:$0xff] }
 0x2ca   : > { %v8071_v5 = vcombine.high %v3239_v49, %v3243_v58  ;;  %v8070_v18 = vcombine.low %v3239_v49, %v3243_v58  ;;  %v3279_v49 = vld [vmem:[%s9046_s30 + $0xf08] sm:$0xff] }
 0x2cb   : > { %6119 = vmatpush1.bf16.msra.mxu0 %v7894_v32  ;;  %v3283_v58 = vld [vmem:[%s9046_s30 + $0xf28] sm:$0xff] }
 0x2cc   : > { %6160 = vmatpush1.bf16.msra.mxu1 %v8022_v22  ;;  %6120 = vmatprep.subr.bf16.mxu0 %v7903_v55 }
 0x2cd   : > { %6161 = vmatprep.subr.bf16.mxu1 %v8031_v56  ;;  %v8062_v56 = vcombine.low %v3231_v40, %v3235_v41  ;;  %v3143_v41 = vld [vmem:[%s9046_s30 + $0xac8] sm:$0xff] }
 0x2cf   : > { %6121 = vmatpush1.bf16.msra.mxu0 %v7902_v12  ;;  %v3123_v12 = vld [vmem:[%s9046_s30 + $0xa28] sm:$0xff] }
 0x2d0   : > { %6162 = vmatpush1.bf16.msra.mxu1 %v8030_v14  ;;  %6122 = vmatprep.subr.bf16.mxu0 %v7911_v15  ;;  %v3247_v14 = vld [vmem:[%s9046_s30 + $0xe08] sm:$0xff]  ;;  %v7951_v19 = vcombine.high %v3119_v11, %v3123_v12 }
 0x2d1   : > { %6163 = vmatprep.subr.bf16.mxu1 %v8039_v17  ;;  %v3251_v15 = vld [vmem:[%s9046_s30 + $0xe28] sm:$0xff]  ;;  %v7942_v17 = vcombine.low %v3111_v13, %v3115_v47 }
 0x2d2   : > { %v8079_v20 = vcombine.high %v3247_v14, %v3251_v15  ;;  %v8078_v8 = vcombine.low %v3247_v14, %v3251_v15  ;;  %v3167_v15 = vld [vmem:[%s9046_s30 + $0xb88] sm:$0xff] }
 0x2d3   : > { %6123 = vmatpush1.bf16.msra.mxu0 %v7910_v21  ;;  %v3131_v21 = vld [vmem:[%s9046_s30 + $0xa68] sm:$0xff] }
 0x2d4   : > { %6164 = vmatpush1.bf16.msra.mxu1 %v8038_v24  ;;  %6124 = vmatprep.subr.bf16.mxu0 %v7919_v60  ;;  %v3255_v24 = vld [vmem:[%s9046_s30 + $0xe48] sm:$0xff]  ;;  %v7959_v62 = vcombine.high %v3127_v54, %v3131_v21 }
 0x2d5   : > { %6165 = vmatprep.subr.bf16.mxu1 %v8047_v61  ;;  %v3259_v60 = vld [vmem:[%s9046_s30 + $0xe68] sm:$0xff]  ;;  %v7950_v61 = vcombine.low %v3119_v11, %v3123_v12  ;;  %v8110_v11 = vcombine.low %v3279_v49, %v3283_v58 }
 0x2d6   : > { %v8087_v3 = vcombine.high %v3255_v24, %v3259_v60  ;;  %v8086_v29 = vcombine.low %v3255_v24, %v3259_v60  ;;  %v3175_v60 = vld [vmem:[%s9046_s30 + $0xbc8] sm:$0xff] }
 0x2d7   : > { %6125 = vmatpush1.bf16.msra.mxu0 %v7918_v25  ;;  %v3139_v25 = vld [vmem:[%s9046_s30 + $0xaa8] sm:$0xff] }
 0x2d8   : > { %6166 = vmatpush1.bf16.msra.mxu1 %v8046_v26  ;;  %6126 = vmatprep.subr.bf16.mxu0 %v7927_v27  ;;  %v3263_v26 = vld [vmem:[%s9046_s30 + $0xe88] sm:$0xff]  ;;  %v7967_v30 = vcombine.high %v3135_v9, %v3139_v25 }
 0x2d9   : > { %v5904_v45 = vpop.f32.mrb[8].mxu0  ;;  %6167 = vmatprep.subr.bf16.mxu1 %v8055_v28  ;;  %v5945_v48 = vpop.f32.mrb[8].mxu1  ;;  %v3267_v27 = vld [vmem:[%s9046_s30 + $0xea8] sm:$0xff]  ;;  %v7958_v28 = vcombine.low %v3127_v54, %v3131_v21 }
 0x2da   : > { %v5906_v23 = vpop.f32.mrb[9].mxu0  ;;  %v9682_v50 = vadd.f32 %v5945_v48, %v5904_v45  ;;  %v5947_v51 = vpop.f32.mrb[9].mxu1  ;;  %v8095_v40 = vcombine.high %v3263_v26, %v3267_v27  ;;  %v7966_v45 = vcombine.low %v3135_v9, %v3139_v25  ;;  %v3151_v48 = vld [vmem:[%s9046_s30 + $0xb08] sm:$0xff] }
 0x2db   : > { %6127 = vmatpush1.bf16.msra.mxu0 %v7926_v42  ;;  %v5908_v52 = vpop.f32.mrb[10].mxu0  ;;  %v9684_v32 = vadd.f32 %v5947_v51, %v5906_v23  ;;  %v5949_v22 = vpop.f32.mrb[10].mxu1  ;;  %v3147_v42 = vld [vmem:[%s9046_s30 + $0xae8] sm:$0xff] }
 0x2dc   : > { %6168 = vmatpush1.bf16.msra.mxu1 %v8054_v43  ;;  %v5909_v55 = vpop.f32.mrb[11].mxu0  ;;  %6128 = vmatprep.subr.bf16.mxu0 %v7935_v44  ;;  %v5950_v2 = vpop.f32.mrb[11].mxu1  ;;  %v3271_v43 = vld [vmem:[%s9046_s30 + $0xec8] sm:$0xff]  ;;  %v7975_v13 = vcombine.high %v3143_v41, %v3147_v42  ;;  %v7974_v51 = vcombine.low %v3143_v41, %v3147_v42  ;;  %v8111_v22 = vcombine.high %v3279_v49, %v3283_v58  ;;  %v2816_v49 = vld [vmem:[%s9046_s30 + $0x90] sm:$0xff] }
 0x2dd   : > { %6169 = vmatprep.subr.bf16.mxu1 %v8063_v46  ;;  %v3275_v44 = vld [vmem:[%s9046_s30 + $0xee8] sm:$0xff]  ;;  %v8094_v46 = vcombine.low %v3263_v26, %v3267_v27  ;;  %v2800_v27 = vld [vmem:[%s9046_s30 + $0x10] sm:$0xff] }
 0x2de   : > { %v8103_v47 = vcombine.high %v3271_v43, %v3275_v44  ;;  %v3155_v23 = vld [vmem:[%s9046_s30 + $0xb28] sm:$0xff]  ;;  %v8102_v52 = vcombine.low %v3271_v43, %v3275_v44  ;;  %v2808_v44 = vld [vmem:[%s9046_s30 + $0x50] sm:$0xff] }
 0x2df   : > { %6129 = vmatpush1.bf16.msra.mxu0 %v7934_v53  ;;  %v7983_v53 = vcombine.high %v3151_v48, %v3155_v23  ;;  %v3159_v55 = vld [vmem:[%s9046_s30 + $0xb48] sm:$0xff]  ;;  %v2820_v58 = vld [vmem:[%s9046_s30 + $0xb0] sm:$0xff] }
 0x2e0   : > { %6170 = vmatpush1.bf16.msra.mxu1 %v8062_v56  ;;  %6130 = vmatprep.subr.bf16.mxu0 %v7943_v59  ;;  %v3163_v56 = vld [vmem:[%s9046_s30 + $0xb68] sm:$0xff] }
 0x2e1   : > { %6171 = vmatprep.subr.bf16.mxu1 %v8071_v5  ;;  %v3287_v59 = vld [vmem:[%s9046_s30 + $0xf48] sm:$0xff]  ;;  %v7982_v5 = vcombine.low %v3151_v48, %v3155_v23  ;;  %v7991_v12 = vcombine.high %v3159_v55, %v3163_v56 }
 0x2e2   : > { %v3291_v2 = vld [vmem:[%s9046_s30 + $0xf68] sm:$0xff] }
 0x2e3   : > { %6131 = vmatpush1.bf16.msra.mxu0 %v7942_v17  ;;  %v8119_v14 = vcombine.high %v3287_v59, %v3291_v2  ;;  %v3171_v17 = vld [vmem:[%s9046_s30 + $0xba8] sm:$0xff]  ;;  %v8118_v54 = vcombine.low %v3287_v59, %v3291_v2  ;;  %v2824_v2 = vld [vmem:[%s9046_s30 + $0xd0] sm:$0xff] }
 0x2e4   : > { %6172 = vmatpush1.bf16.msra.mxu1 %v8070_v18  ;;  %6132 = vmatprep.subr.bf16.mxu0 %v7951_v19  ;;  %v3295_v18 = vld [vmem:[%s9046_s30 + $0xf88] sm:$0xff]  ;;  %v7999_v21 = vcombine.high %v3167_v15, %v3171_v17 }
 0x2e5   : > { %6173 = vmatprep.subr.bf16.mxu1 %v8079_v20  ;;  %v3299_v19 = vld [vmem:[%s9046_s30 + $0xfa8] sm:$0xff]  ;;  %v7990_v20 = vcombine.low %v3159_v55, %v3163_v56  ;;  %v7649_v56 = vcombine.high %v2816_v49, %v2820_v58 }
 0x2e6   : > { %v8127_v24 = vcombine.high %v3295_v18, %v3299_v19  ;;  %v8126_v9 = vcombine.low %v3295_v18, %v3299_v19  ;;  %v2832_v19 = vld [vmem:[%s9046_s30 + $0x110] sm:$0xff] }
 0x2e7   : > { %6133 = vmatpush1.bf16.msra.mxu0 %v7950_v61  ;;  %v3179_v61 = vld [vmem:[%s9046_s30 + $0xbe8] sm:$0xff] }
 0x2e8   : > { %6174 = vmatpush1.bf16.msra.mxu1 %v8078_v8  ;;  %6134 = vmatprep.subr.bf16.mxu0 %v7959_v62  ;;  %v3303_v8 = vld [vmem:[%s9046_s30 + $0xfc8] sm:$0xff]  ;;  %v8007_v25 = vcombine.high %v3175_v60, %v3179_v61 }
 0x2e9   : > { %6175 = vmatprep.subr.bf16.mxu1 %v8087_v3  ;;  %v3307_v62 = vld [vmem:[%s9046_s30 + $0xfe8] sm:$0xff]  ;;  %v7998_v3 = vcombine.low %v3167_v15, %v3171_v17 }
 0x2ea   : > { %v8135_v26 = vcombine.high %v3303_v8, %v3307_v62  ;;  %v8134_v41 = vcombine.low %v3303_v8, %v3307_v62  ;;  %v2840_v62 = vld [vmem:[%s9046_s30 + $0x150] sm:$0xff] }
 0x2eb   : > { %6135 = vmatpush1.bf16.msra.mxu0 %v7958_v28  ;;  %v2804_v28 = vld [vmem:[%s9046_s30 + $0x30] sm:$0xff] }
 0x2ec   : > { %6176 = vmatpush1.bf16.msra.mxu1 %v8086_v29  ;;  %6136 = vmatprep.subr.bf16.mxu0 %v7967_v30  ;;  %v2928_v29 = vld [vmem:[%s9046_s30 + $0x410] sm:$0xff]  ;;  %v7633_v42 = vcombine.high %v2800_v27, %v2804_v28 }
 0x2ed   : > { %6177 = vmatprep.subr.bf16.mxu1 %v8095_v40  ;;  %v2932_v30 = vld [vmem:[%s9046_s30 + $0x430] sm:$0xff]  ;;  %v8006_v40 = vcombine.low %v3175_v60, %v3179_v61 }
 0x2ee   : > { %v7761_v43 = vcombine.high %v2928_v29, %v2932_v30  ;;  %v7760_v48 = vcombine.low %v2928_v29, %v2932_v30  ;;  %v2848_v30 = vld [vmem:[%s9046_s30 + $0x190] sm:$0xff] }
 0x2ef   : > { %6137 = vmatpush1.bf16.msra.mxu0 %v7966_v45  ;;  %v2812_v45 = vld [vmem:[%s9046_s30 + $0x70] sm:$0xff] }
 0x2f0   : > { %6178 = vmatpush1.bf16.msra.mxu1 %v8094_v46  ;;  %6138 = vmatprep.subr.bf16.mxu0 %v7975_v13  ;;  %v7632_v46 = vcombine.low %v2800_v27, %v2804_v28  ;;  %v2936_v13 = vld [vmem:[%s9046_s30 + $0x450] sm:$0xff]  ;;  %v7641_v23 = vcombine.high %v2808_v44, %v2812_v45 }
 0x2f1   : > { %6179 = vmatprep.subr.bf16.mxu1 %v8103_v47  ;;  %v2940_v47 = vld [vmem:[%s9046_s30 + $0x470] sm:$0xff] }
 0x2f2   : > { %v7768_v55 = vcombine.low %v2936_v13, %v2940_v47 }
 0x2f3   : > { %6139 = vmatpush1.bf16.msra.mxu0 %v7974_v51  ;;  %v7769_v51 = vcombine.high %v2936_v13, %v2940_v47  ;;  %v2856_v13 = vld [vmem:[%s9046_s30 + $0x1d0] sm:$0xff] }
 0x2f4   : > { %6180 = vmatpush1.bf16.msra.mxu1 %v8102_v52  ;;  %6140 = vmatprep.subr.bf16.mxu0 %v7983_v53  ;;  %v2944_v52 = vld [vmem:[%s9046_s30 + $0x490] sm:$0xff] }
 0x2f5   : > { %6181 = vmatprep.subr.bf16.mxu1 %v8111_v22  ;;  %v2948_v53 = vld [vmem:[%s9046_s30 + $0x4b0] sm:$0xff]  ;;  %v7640_v22 = vcombine.low %v2808_v44, %v2812_v45 }
 0x2f6   : > { %v7777_v59 = vcombine.high %v2944_v52, %v2948_v53  ;;  %v7776_v15 = vcombine.low %v2944_v52, %v2948_v53  ;;  %v2860_v47 = vld [vmem:[%s9046_s30 + $0x1f0] sm:$0xff] }
 0x2f7   : > { %6141 = vmatpush1.bf16.msra.mxu0 %v7982_v5  ;;  %v2828_v5 = vld [vmem:[%s9046_s30 + $0xf0] sm:$0xff] }
 0x2f8   : > { %6182 = vmatpush1.bf16.msra.mxu1 %v8110_v11  ;;  %6142 = vmatprep.subr.bf16.mxu0 %v7991_v12  ;;  %v2952_v11 = vld [vmem:[%s9046_s30 + $0x4d0] sm:$0xff]  ;;  %v7657_v17 = vcombine.high %v2824_v2, %v2828_v5 }
 0x2f9   : > { %6183 = vmatprep.subr.bf16.mxu1 %v8119_v14  ;;  %v2956_v12 = vld [vmem:[%s9046_s30 + $0x4f0] sm:$0xff]  ;;  %v7648_v14 = vcombine.low %v2816_v49, %v2820_v58 }
 0x2fa   : > { %v7785_v18 = vcombine.high %v2952_v11, %v2956_v12  ;;  %v7784_v60 = vcombine.low %v2952_v11, %v2956_v12  ;;  %v2864_v53 = vld [vmem:[%s9046_s30 + $0x210] sm:$0xff] }
 0x2fb   : > { %6143 = vmatpush1.bf16.msra.mxu0 %v7990_v20  ;;  %v2836_v20 = vld [vmem:[%s9046_s30 + $0x130] sm:$0xff] }
 0x2fc   : > { %6184 = vmatpush1.bf16.msra.mxu1 %v8118_v54  ;;  %6144 = vmatprep.subr.bf16.mxu0 %v7999_v21  ;;  %v2960_v54 = vld [vmem:[%s9046_s30 + $0x510] sm:$0xff]  ;;  %v7665_v61 = vcombine.high %v2832_v19, %v2836_v20 }
 0x2fd   : > { %6185 = vmatprep.subr.bf16.mxu1 %v8127_v24  ;;  %v2964_v21 = vld [vmem:[%s9046_s30 + $0x530] sm:$0xff]  ;;  %v7656_v24 = vcombine.low %v2824_v2, %v2828_v5 }
 0x2fe   : > { %v7793_v8 = vcombine.high %v2960_v54, %v2964_v21  ;;  %v7792_v27 = vcombine.low %v2960_v54, %v2964_v21  ;;  %v2872_v12 = vld [vmem:[%s9046_s30 + $0x250] sm:$0xff] }
 0x2ff   : > { %6145 = vmatpush1.bf16.msra.mxu0 %v7998_v3  ;;  %v2844_v3 = vld [vmem:[%s9046_s30 + $0x170] sm:$0xff] }
 0x300   : > { %6186 = vmatpush1.bf16.msra.mxu1 %v8126_v9  ;;  %6146 = vmatprep.subr.bf16.mxu0 %v8007_v25  ;;  %v2968_v9 = vld [vmem:[%s9046_s30 + $0x550] sm:$0xff]  ;;  %v7673_v28 = vcombine.high %v2840_v62, %v2844_v3 }
 0x301   : > { %6187 = vmatprep.subr.bf16.mxu1 %v8135_v26  ;;  %v2972_v25 = vld [vmem:[%s9046_s30 + $0x570] sm:$0xff]  ;;  %v7664_v26 = vcombine.low %v2832_v19, %v2836_v20 }
 0x302   : > { %v7801_v29 = vcombine.high %v2968_v9, %v2972_v25  ;;  %v7800_v44 = vcombine.low %v2968_v9, %v2972_v25  ;;  %v2880_v21 = vld [vmem:[%s9046_s30 + $0x290] sm:$0xff] }
 0x303   : > { %6147 = vmatpush1.bf16.msra.mxu0 %v8006_v40  ;;  %v2852_v40 = vld [vmem:[%s9046_s30 + $0x1b0] sm:$0xff] }
 0x304   : > { %6188 = vmatpush1.bf16.msra.mxu1 %v8134_v41  ;;  %6198 = vmatprep.subr.bf16.mxu0 %v7633_v42  ;;  %v2976_v41 = vld [vmem:[%s9046_s30 + $0x590] sm:$0xff]  ;;  %v7681_v45 = vcombine.high %v2848_v30, %v2852_v40  ;;  %v7680_v49 = vcombine.low %v2848_v30, %v2852_v40 }
 0x305   : > { %6239 = vmatprep.subr.bf16.mxu1 %v7761_v43  ;;  %v2980_v42 = vld [vmem:[%s9046_s30 + $0x5b0] sm:$0xff]  ;;  %v7672_v43 = vcombine.low %v2840_v62, %v2844_v3 }
 0x306   : > { %6149 = vmatmul.mubr.bf16.vlgmr.msra.gmra.mrb[20].mxu0 %v9572_v6  ;;  %v7808_v58 = vcombine.low %v2976_v41, %v2980_v42  ;;  %v2888_v25 = vld [vmem:[%s9046_s30 + $0x2d0] sm:$0xff] }
 0x307   : > { %6190 = vmatmul.mubr.bf16.vlgmr.msra.gmra.mrb[20].mxu1 %v9576_v10  ;;  %6199 = vmatpush1.bf16.msra.mxu0 %v7632_v46  ;;  %v7809_v46 = vcombine.high %v2976_v41, %v2980_v42  ;;  %v2896_v42 = vld [vmem:[%s9046_s30 + $0x310] sm:$0xff] }
 0x308   : > { %6230 = vmatprep.mubr.bf16.mxu0 %v9458_v57  ;;  %6240 = vmatpush1.bf16.msra.mxu1 %v7760_v48  ;;  %v2984_v48 = vld [vmem:[%s9046_s30 + $0x5d0] sm:$0xff] }
 0x309   : > { %6271 = vmatprep.mubr.bf16.mxu1 %v9473_v0  ;;  %6200 = vmatprep.subr.bf16.mxu0 %v7641_v23  ;;  %v2988_v23 = vld [vmem:[%s9046_s30 + $0x5f0] sm:$0xff] }
 0x30a   : > { %6241 = vmatprep.subr.bf16.mxu1 %v7769_v51  ;;  %v7689_v51 = vcombine.high %v2856_v13, %v2860_v47  ;;  %v7817_v52 = vcombine.high %v2984_v48, %v2988_v23  ;;  %v7816_v2 = vcombine.low %v2984_v48, %v2988_v23  ;;  %v2904_v23 = vld [vmem:[%s9046_s30 + $0x350] sm:$0xff] }
 0x30b   : > { %6201 = vmatpush1.bf16.msra.mxu0 %v7640_v22  ;;  %v2868_v22 = vld [vmem:[%s9046_s30 + $0x230] sm:$0xff] }
 0x30c   : > { %6242 = vmatpush1.bf16.msra.mxu1 %v7768_v55  ;;  %6202 = vmatprep.subr.bf16.mxu0 %v7649_v56  ;;  %v2992_v55 = vld [vmem:[%s9046_s30 + $0x610] sm:$0xff]  ;;  %v7697_v5 = vcombine.high %v2864_v53, %v2868_v22 }
 0x30d   : > { %6243 = vmatprep.subr.bf16.mxu1 %v7777_v59  ;;  %v2996_v56 = vld [vmem:[%s9046_s30 + $0x630] sm:$0xff]  ;;  %v7688_v59 = vcombine.low %v2856_v13, %v2860_v47 }
 0x30e   : > { %v7825_v11 = vcombine.high %v2992_v55, %v2996_v56  ;;  %v7824_v19 = vcombine.low %v2992_v55, %v2996_v56  ;;  %v2912_v56 = vld [vmem:[%s9046_s30 + $0x390] sm:$0xff] }
 0x30f   : > { %6203 = vmatpush1.bf16.msra.mxu0 %v7648_v14  ;;  %v2876_v14 = vld [vmem:[%s9046_s30 + $0x270] sm:$0xff] }
 0x310   : > { %6244 = vmatpush1.bf16.msra.mxu1 %v7776_v15  ;;  %6204 = vmatprep.subr.bf16.mxu0 %v7657_v17  ;;  %v3000_v15 = vld [vmem:[%s9046_s30 + $0x650] sm:$0xff]  ;;  %v7705_v20 = vcombine.high %v2872_v12, %v2876_v14 }
 0x311   : > { %6245 = vmatprep.subr.bf16.mxu1 %v7785_v18  ;;  %v3004_v17 = vld [vmem:[%s9046_s30 + $0x670] sm:$0xff]  ;;  %v7696_v18 = vcombine.low %v2864_v53, %v2868_v22 }
 0x312   : > { %v7833_v54 = vcombine.high %v3000_v15, %v3004_v17  ;;  %v7832_v62 = vcombine.low %v3000_v15, %v3004_v17  ;;  %v2920_v17 = vld [vmem:[%s9046_s30 + $0x3d0] sm:$0xff] }
 0x313   : > { %6205 = vmatpush1.bf16.msra.mxu0 %v7656_v24  ;;  %v2884_v24 = vld [vmem:[%s9046_s30 + $0x2b0] sm:$0xff] }
 0x314   : > { %6246 = vmatpush1.bf16.msra.mxu1 %v7784_v60  ;;  %6206 = vmatprep.subr.bf16.mxu0 %v7665_v61  ;;  %v3008_v60 = vld [vmem:[%s9046_s30 + $0x690] sm:$0xff]  ;;  %v7713_v3 = vcombine.high %v2880_v21, %v2884_v24 }
 0x315   : > { %6247 = vmatprep.subr.bf16.mxu1 %v7793_v8  ;;  %v3012_v61 = vld [vmem:[%s9046_s30 + $0x6b0] sm:$0xff]  ;;  %v7704_v8 = vcombine.low %v2872_v12, %v2876_v14 }
 0x316   : > { %v7841_v9 = vcombine.high %v3008_v60, %v3012_v61  ;;  %v7840_v30 = vcombine.low %v3008_v60, %v3012_v61  ;;  %v3056_v61 = vld [vmem:[%s9046_s30 + $0x810] sm:$0xff] }
 0x317   : > { %6207 = vmatpush1.bf16.msra.mxu0 %v7664_v26  ;;  %v2892_v26 = vld [vmem:[%s9046_s30 + $0x2f0] sm:$0xff] }
 0x318   : > { %6248 = vmatpush1.bf16.msra.mxu1 %v7792_v27  ;;  %6208 = vmatprep.subr.bf16.mxu0 %v7673_v28  ;;  %v3016_v27 = vld [vmem:[%s9046_s30 + $0x6d0] sm:$0xff]  ;;  %v7721_v40 = vcombine.high %v2888_v25, %v2892_v26 }
 0x319   : > { %6249 = vmatprep.subr.bf16.mxu1 %v7801_v29  ;;  %v3020_v28 = vld [vmem:[%s9046_s30 + $0x6f0] sm:$0xff]  ;;  %v7712_v29 = vcombine.low %v2880_v21, %v2884_v24 }
 0x31a   : > { %v7849_v41 = vcombine.high %v3016_v27, %v3020_v28  ;;  %v7848_v13 = vcombine.low %v3016_v27, %v3020_v28  ;;  %v3064_v28 = vld [vmem:[%s9046_s30 + $0x850] sm:$0xff] }
 0x31b   : > { %6209 = vmatpush1.bf16.msra.mxu0 %v7672_v43  ;;  %v2900_v43 = vld [vmem:[%s9046_s30 + $0x330] sm:$0xff] }
 0x31c   : > { %6250 = vmatpush1.bf16.msra.mxu1 %v7800_v44  ;;  %6210 = vmatprep.subr.bf16.mxu0 %v7681_v45  ;;  %v3024_v44 = vld [vmem:[%s9046_s30 + $0x710] sm:$0xff]  ;;  %v7729_v47 = vcombine.high %v2896_v42, %v2900_v43 }
 0x31d   : > { %6251 = vmatprep.subr.bf16.mxu1 %v7809_v46  ;;  %v3028_v45 = vld [vmem:[%s9046_s30 + $0x730] sm:$0xff]  ;;  %v7720_v46 = vcombine.low %v2888_v25, %v2892_v26 }
 0x31e   : > { %v7857_v48 = vcombine.high %v3024_v44, %v3028_v45  ;;  %v7856_v53 = vcombine.low %v3024_v44, %v3028_v45  ;;  %v3072_v44 = vld [vmem:[%s9046_s30 + $0x890] sm:$0xff] }
 0x31f   : > { %6211 = vmatpush1.bf16.msra.mxu0 %v7680_v49  ;;  %v2908_v49 = vld [vmem:[%s9046_s30 + $0x370] sm:$0xff] }
 0x320   : > { %6252 = vmatpush1.bf16.msra.mxu1 %v7808_v58  ;;  %6212 = vmatprep.subr.bf16.mxu0 %v7689_v51  ;;  %v3032_v58 = vld [vmem:[%s9046_s30 + $0x750] sm:$0xff]  ;;  %v7737_v22 = vcombine.high %v2904_v23, %v2908_v49 }
 0x321   : > { %6253 = vmatprep.subr.bf16.mxu1 %v7817_v52  ;;  %v3036_v51 = vld [vmem:[%s9046_s30 + $0x770] sm:$0xff]  ;;  %v7728_v52 = vcombine.low %v2896_v42, %v2900_v43 }
 0x322   : > { %v7865_v55 = vcombine.high %v3032_v58, %v3036_v51  ;;  %v7864_v12 = vcombine.low %v3032_v58, %v3036_v51  ;;  %v3076_v45 = vld [vmem:[%s9046_s30 + $0x8b0] sm:$0xff] }
 0x323   : > { %6213 = vmatpush1.bf16.msra.mxu0 %v7688_v59  ;;  %v2916_v59 = vld [vmem:[%s9046_s30 + $0x3b0] sm:$0xff] }
 0x324   : > { %6254 = vmatpush1.bf16.msra.mxu1 %v7816_v2  ;;  %6214 = vmatprep.subr.bf16.mxu0 %v7697_v5  ;;  %v3040_v2 = vld [vmem:[%s9046_s30 + $0x790] sm:$0xff]  ;;  %v7745_v14 = vcombine.high %v2912_v56, %v2916_v59 }
 0x325   : > { %6255 = vmatprep.subr.bf16.mxu1 %v7825_v11  ;;  %v3044_v5 = vld [vmem:[%s9046_s30 + $0x7b0] sm:$0xff]  ;;  %v7736_v11 = vcombine.low %v2904_v23, %v2908_v49  ;;  %v7905_v49 = vcombine.high %v3072_v44, %v3076_v45 }
 0x326   : > { %v7873_v15 = vcombine.high %v3040_v2, %v3044_v5  ;;  %v7872_v21 = vcombine.low %v3040_v2, %v3044_v5  ;;  %v3080_v51 = vld [vmem:[%s9046_s30 + $0x8d0] sm:$0xff] }
 0x327   : > { %6215 = vmatpush1.bf16.msra.mxu0 %v7696_v18  ;;  %v2924_v18 = vld [vmem:[%s9046_s30 + $0x3f0] sm:$0xff] }
 0x328   : > { %6256 = vmatpush1.bf16.msra.mxu1 %v7824_v19  ;;  %6216 = vmatprep.subr.bf16.mxu0 %v7705_v20  ;;  %v3048_v19 = vld [vmem:[%s9046_s30 + $0x7d0] sm:$0xff]  ;;  %v7753_v24 = vcombine.high %v2920_v17, %v2924_v18 }
 0x329   : > { %6257 = vmatprep.subr.bf16.mxu1 %v7833_v54  ;;  %v3052_v20 = vld [vmem:[%s9046_s30 + $0x7f0] sm:$0xff]  ;;  %v7744_v54 = vcombine.low %v2912_v56, %v2916_v59 }
 0x32a   : > { %v7881_v60 = vcombine.high %v3048_v19, %v3052_v20  ;;  %v7880_v25 = vcombine.low %v3048_v19, %v3052_v20  ;;  %v3088_v5 = vld [vmem:[%s9046_s30 + $0x910] sm:$0xff] }
 0x32b   : > { %6217 = vmatpush1.bf16.msra.mxu0 %v7704_v8  ;;  %v3060_v8 = vld [vmem:[%s9046_s30 + $0x830] sm:$0xff] }
 0x32c   : > { %6258 = vmatpush1.bf16.msra.mxu1 %v7832_v62  ;;  %6218 = vmatprep.subr.bf16.mxu0 %v7713_v3  ;;  %v3184_v62 = vld [vmem:[%s9046_s30 + $0xc10] sm:$0xff]  ;;  %v7889_v26 = vcombine.high %v3056_v61, %v3060_v8 }
 0x32d   : > { %6259 = vmatprep.subr.bf16.mxu1 %v7841_v9  ;;  %v3188_v3 = vld [vmem:[%s9046_s30 + $0xc30] sm:$0xff]  ;;  %v7752_v9 = vcombine.low %v2920_v17, %v2924_v18 }
 0x32e   : > { %v8017_v27 = vcombine.high %v3184_v62, %v3188_v3  ;;  %v8016_v42 = vcombine.low %v3184_v62, %v3188_v3  ;;  %v3096_v20 = vld [vmem:[%s9046_s30 + $0x950] sm:$0xff] }
 0x32f   : > { %6219 = vmatpush1.bf16.msra.mxu0 %v7712_v29  ;;  %v3068_v29 = vld [vmem:[%s9046_s30 + $0x870] sm:$0xff] }
 0x330   : > { %6260 = vmatpush1.bf16.msra.mxu1 %v7840_v30  ;;  %6220 = vmatprep.subr.bf16.mxu0 %v7721_v40  ;;  %v7888_v30 = vcombine.low %v3056_v61, %v3060_v8  ;;  %v3192_v40 = vld [vmem:[%s9046_s30 + $0xc50] sm:$0xff]  ;;  %v7897_v43 = vcombine.high %v3064_v28, %v3068_v29 }
 0x331   : > { %6261 = vmatprep.subr.bf16.mxu1 %v7849_v41  ;;  %v3196_v41 = vld [vmem:[%s9046_s30 + $0xc70] sm:$0xff] }
 0x332   : > { %v8024_v23 = vcombine.low %v3192_v40, %v3196_v41  ;;  %v3104_v3 = vld [vmem:[%s9046_s30 + $0x990] sm:$0xff] }
 0x333   : > { %6221 = vmatpush1.bf16.msra.mxu0 %v7720_v46  ;;  %v8025_v46 = vcombine.high %v3192_v40, %v3196_v41  ;;  %v3112_v41 = vld [vmem:[%s9046_s30 + $0x9d0] sm:$0xff] }
 0x334   : > { %6262 = vmatpush1.bf16.msra.mxu1 %v7848_v13  ;;  %6222 = vmatprep.subr.bf16.mxu0 %v7729_v47  ;;  %v3200_v13 = vld [vmem:[%s9046_s30 + $0xc90] sm:$0xff] }
 0x335   : > { %6263 = vmatprep.subr.bf16.mxu1 %v7857_v48  ;;  %v3204_v47 = vld [vmem:[%s9046_s30 + $0xcb0] sm:$0xff]  ;;  %v7896_v48 = vcombine.low %v3064_v28, %v3068_v29 }
 0x336   : > { %v8033_v58 = vcombine.high %v3200_v13, %v3204_v47  ;;  %v8032_v56 = vcombine.low %v3200_v13, %v3204_v47  ;;  %v3244_v13 = vld [vmem:[%s9046_s30 + $0xdf0] sm:$0xff]  ;;  %v2782_v47 = vld [vmem:[#allocation2] sm:$0xff] }
 0x337   : > { %6223 = vmatpush1.bf16.msra.mxu0 %v7728_v52  ;;  %v3084_v52 = vld [vmem:[%s9046_s30 + $0x8f0] sm:$0xff] }
 0x338   : > { %6264 = vmatpush1.bf16.msra.mxu1 %v7856_v53  ;;  %6224 = vmatprep.subr.bf16.mxu0 %v7737_v22  ;;  %v3208_v53 = vld [vmem:[%s9046_s30 + $0xcd0] sm:$0xff]  ;;  %v7913_v59 = vcombine.high %v3080_v51, %v3084_v52 }
 0x339   : > { %6265 = vmatprep.subr.bf16.mxu1 %v7865_v55  ;;  %v3212_v22 = vld [vmem:[%s9046_s30 + $0xcf0] sm:$0xff]  ;;  %v7904_v55 = vcombine.low %v3072_v44, %v3076_v45 }
 0x33a   : > { %v8041_v2 = vcombine.high %v3208_v53, %v3212_v22  ;;  %v8040_v17 = vcombine.low %v3208_v53, %v3212_v22 }
 0x33b   : > { %6225 = vmatpush1.bf16.msra.mxu0 %v7736_v11  ;;  %v3092_v11 = vld [vmem:[%s9046_s30 + $0x930] sm:$0xff] }
 0x33c   : > { %6266 = vmatpush1.bf16.msra.mxu1 %v7864_v12  ;;  %6226 = vmatprep.subr.bf16.mxu0 %v7745_v14  ;;  %v3216_v12 = vld [vmem:[%s9046_s30 + $0xd10] sm:$0xff]  ;;  %v7921_v18 = vcombine.high %v3088_v5, %v3092_v11 }
 0x33d   : > { %6267 = vmatprep.subr.bf16.mxu1 %v7873_v15  ;;  %v3220_v14 = vld [vmem:[%s9046_s30 + $0xd30] sm:$0xff]  ;;  %v7912_v15 = vcombine.low %v3080_v51, %v3084_v52  ;;  %v2783_v52 = vld [vmem:[#allocation2 + $0x8] sm:$0xff] }
 0x33e   : > { %v8049_v19 = vcombine.high %v3216_v12, %v3220_v14  ;;  %v8048_v61 = vcombine.low %v3216_v12, %v3220_v14  ;;  %v3248_v12 = vld [vmem:[%s9046_s30 + $0xe10] sm:$0xff] }
 0x33f   : > { %6227 = vmatpush1.bf16.msra.mxu0 %v7744_v54  ;;  %v3100_v54 = vld [vmem:[%s9046_s30 + $0x970] sm:$0xff] }
 0x340   : > { %6268 = vmatpush1.bf16.msra.mxu1 %v7872_v21  ;;  %6228 = vmatprep.subr.bf16.mxu0 %v7753_v24  ;;  %v3224_v21 = vld [vmem:[%s9046_s30 + $0xd50] sm:$0xff]  ;;  %v7929_v8 = vcombine.high %v3096_v20, %v3100_v54 }
 0x341   : > { %6269 = vmatprep.subr.bf16.mxu1 %v7881_v60  ;;  %v3228_v24 = vld [vmem:[%s9046_s30 + $0xd70] sm:$0xff]  ;;  %v7920_v60 = vcombine.low %v3088_v5, %v3092_v11 }
 0x342   : > { %v8057_v62 = vcombine.high %v3224_v21, %v3228_v24  ;;  %v8056_v28 = vcombine.low %v3224_v21, %v3228_v24  ;;  %v3124_v5 = vld [vmem:[%s9046_s30 + $0xa30] sm:$0xff] }
 0x343   : > { %6229 = vmatpush1.bf16.msra.mxu0 %v7752_v9  ;;  %v3108_v9 = vld [vmem:[%s9046_s30 + $0x9b0] sm:$0xff] }
 0x344   : > { %6270 = vmatpush1.bf16.msra.mxu1 %v7880_v25  ;;  %6280 = vmatprep.subr.bf16.mxu0 %v7889_v26  ;;  %v3232_v25 = vld [vmem:[%s9046_s30 + $0xd90] sm:$0xff]  ;;  %v7937_v29 = vcombine.high %v3104_v3, %v3108_v9 }
 0x345   : > { %6321 = vmatprep.subr.bf16.mxu1 %v8017_v27  ;;  %v3236_v26 = vld [vmem:[%s9046_s30 + $0xdb0] sm:$0xff]  ;;  %v7928_v27 = vcombine.low %v3096_v20, %v3100_v54 }
 0x346   : > { %6231 = vmatmul.mubr.bf16.vlgmr.msra.gmra.mrb[24].mxu0 %v9471_v63  ;;  %v8065_v40 = vcombine.high %v3232_v25, %v3236_v26  ;;  %v8064_v22 = vcombine.low %v3232_v25, %v3236_v26  ;;  %v3252_v14 = vld [vmem:[%s9046_s30 + $0xe30] sm:$0xff] }
 0x347   : > { %6272 = vmatmul.mubr.bf16.vlgmr.msra.gmra.mrb[24].mxu1 %v9480_v4  ;;  %6281 = vmatpush1.bf16.msra.mxu0 %v7888_v30  ;;  %v8081_v20 = vcombine.high %v3248_v12, %v3252_v14  ;;  %v3128_v54 = vld [vmem:[%s9046_s30 + $0xa50] sm:$0xff] }
 0x348   : > { %6312 = vmatprep.mubr.bf16.mxu0 %v9568_v1  ;;  %6322 = vmatpush1.bf16.msra.mxu1 %v8016_v42  ;;  %v3116_v42 = vld [vmem:[%s9046_s30 + $0x9f0] sm:$0xff] }
 0x349   : > { %6353 = vmatprep.mubr.bf16.mxu1 %v9574_v7  ;;  %6282 = vmatprep.subr.bf16.mxu0 %v7897_v43  ;;  %v3132_v21 = vld [vmem:[%s9046_s30 + $0xa70] sm:$0xff] }
 0x34a   : > { %6323 = vmatprep.subr.bf16.mxu1 %v8025_v46  ;;  %v3240_v46 = vld [vmem:[%s9046_s30 + $0xdd0] sm:$0xff] }
 0x34b   : > { %6283 = vmatpush1.bf16.msra.mxu0 %v7896_v48  ;;  %v3256_v24 = vld [vmem:[%s9046_s30 + $0xe50] sm:$0xff] }
 0x34c   : > { %6324 = vmatpush1.bf16.msra.mxu1 %v8024_v23  ;;  %6284 = vmatprep.subr.bf16.mxu0 %v7905_v49  ;;  %v3140_v25 = vld [vmem:[%s9046_s30 + $0xab0] sm:$0xff] }
 0x34d   : > { %6325 = vmatprep.subr.bf16.mxu1 %v8033_v58  ;;  %v7936_v58 = vcombine.low %v3104_v3, %v3108_v9  ;;  %v3136_v9 = vld [vmem:[%s9046_s30 + $0xa90] sm:$0xff] }
 0x34e   : > { %v3264_v26 = vld [vmem:[%s9046_s30 + $0xe90] sm:$0xff] }
 0x34f   : > { %6285 = vmatpush1.bf16.msra.mxu0 %v7904_v55  ;;  %v7945_v55 = vcombine.high %v3112_v41, %v3116_v42 }
 0x350   : > { %6326 = vmatpush1.bf16.msra.mxu1 %v8032_v56  ;;  %6286 = vmatprep.subr.bf16.mxu0 %v7913_v59 }
 0x351   : > { %6327 = vmatprep.subr.bf16.mxu1 %v8041_v2  ;;  %v3120_v2 = vld [vmem:[%s9046_s30 + $0xa10] sm:$0xff] }
 0x353   : > { %6287 = vmatpush1.bf16.msra.mxu0 %v7912_v15 }
 0x354   : > { %6328 = vmatpush1.bf16.msra.mxu1 %v8040_v17  ;;  %6288 = vmatprep.subr.bf16.mxu0 %v7921_v18  ;;  %v7944_v17 = vcombine.low %v3112_v41, %v3116_v42  ;;  %v8072_v18 = vcombine.low %v3240_v46, %v3244_v13  ;;  %v3144_v41 = vld [vmem:[%s9046_s30 + $0xad0] sm:$0xff] }
 0x355   : > { %6329 = vmatprep.subr.bf16.mxu1 %v8049_v19  ;;  %v7953_v19 = vcombine.high %v3120_v2, %v3124_v5  ;;  %v3148_v42 = vld [vmem:[%s9046_s30 + $0xaf0] sm:$0xff] }
 0x357   : > { %6289 = vmatpush1.bf16.msra.mxu0 %v7920_v60  ;;  %v3260_v60 = vld [vmem:[%s9046_s30 + $0xe70] sm:$0xff] }
 0x358   : > { %6330 = vmatpush1.bf16.msra.mxu1 %v8048_v61  ;;  %6290 = vmatprep.subr.bf16.mxu0 %v7929_v8  ;;  %v7952_v61 = vcombine.low %v3120_v2, %v3124_v5  ;;  %v8080_v8 = vcombine.low %v3248_v12, %v3252_v14  ;;  %v8089_v3 = vcombine.high %v3256_v24, %v3260_v60  ;;  %v3168_v12 = vld [vmem:[%s9046_s30 + $0xb90] sm:$0xff] }
 0x359   : > { %v5986_v30 = vpop.f32.mrb[12].mxu0  ;;  %6331 = vmatprep.subr.bf16.mxu1 %v8057_v62  ;;  %v6027_v44 = vpop.f32.mrb[12].mxu1  ;;  %v7961_v62 = vcombine.high %v3128_v54, %v3132_v21  ;;  %v3172_v14 = vld [vmem:[%s9046_s30 + $0xbb0] sm:$0xff] }
 0x35a   : > { %v5987_v43 = vadd.f32 %v5986_v30, %v9682_v50  ;;  %v5988_v45 = vpop.f32.mrb[13].mxu0  ;;  %v6029_v23 = vpop.f32.mrb[13].mxu1  ;;  %v7969_v30 = vcombine.high %v3136_v9, %v3140_v25 }
 0x35b   : > { %v5989_v48 = vadd.f32 %v5988_v45, %v9684_v32  ;;  %6291 = vmatpush1.bf16.msra.mxu0 %v7928_v27  ;;  %v5990_v49 = vpop.f32.mrb[14].mxu0  ;;  %v6031_v53 = vpop.f32.mrb[14].mxu1  ;;  %v8073_v32 = vcombine.high %v3240_v46, %v3244_v13  ;;  %v3268_v27 = vld [vmem:[%s9046_s30 + $0xeb0] sm:$0xff]  ;;  %v7968_v45 = vcombine.low %v3136_v9, %v3140_v25  ;;  %v7977_v13 = vcombine.high %v3144_v41, %v3148_v42  ;;  %v2801_v25 = vld [vmem:[%s9046_s30 + $0x18] sm:$0xff] }
 0x35c   : > { %v6028_v51 = vadd.f32 %v6027_v44, %v5987_v43  ;;  %6332 = vmatpush1.bf16.msra.mxu1 %v8056_v28  ;;  %v5991_v50 = vpop.f32.mrb[15].mxu0  ;;  %6292 = vmatprep.subr.bf16.mxu0 %v7937_v29  ;;  %v6032_v59 = vpop.f32.mrb[15].mxu1  ;;  %v7960_v28 = vcombine.low %v3128_v54, %v3132_v21  ;;  %v8088_v29 = vcombine.low %v3256_v24, %v3260_v60  ;;  %v3272_v43 = vld [vmem:[%s9046_s30 + $0xed0] sm:$0xff] }
 0x35d   : > { %v6030_v56 = vadd.f32 %v6029_v23, %v5989_v48  ;;  %6333 = vmatprep.subr.bf16.mxu1 %v8065_v40  ;;  %v8097_v40 = vcombine.high %v3264_v26, %v3268_v27  ;;  %v3276_v44 = vld [vmem:[%s9046_s30 + $0xef0] sm:$0xff]  ;;  %v8096_v46 = vcombine.low %v3264_v26, %v3268_v27  ;;  %v2805_v26 = vld [vmem:[%s9046_s30 + $0x38] sm:$0xff] }
 0x35e   : > { %v6526_v11 = vadd.f32 %v6028_v51, %v2782_v47  ;;  %v8105_v47 = vcombine.high %v3272_v43, %v3276_v44  ;;  %v3152_v48 = vld [vmem:[%s9046_s30 + $0xb10] sm:$0xff]  ;;  %v7976_v51 = vcombine.low %v3144_v41, %v3148_v42  ;;  %v2929_v27 = vld [vmem:[%s9046_s30 + $0x418] sm:$0xff] }
 0x35f   : > { %v6527_v15 = vadd.f32 %v6030_v56, %v2783_v52  ;;  %6293 = vmatpush1.bf16.msra.mxu0 %v7936_v58  ;;  %v3156_v23 = vld [vmem:[%s9046_s30 + $0xb30] sm:$0xff]  ;;  %v8104_v52 = vcombine.low %v3272_v43, %v3276_v44  ;;  %v2809_v42 = vld [vmem:[%s9046_s30 + $0x58] sm:$0xff]  ;;  %v7634_v44 = vcombine.low %v2801_v25, %v2805_v26 }
 0x360   : > { %6534 = vst [vmem:[#allocation2] sm:$0xff] %v6526_v11  ;;  %6334 = vmatpush1.bf16.msra.mxu1 %v8064_v22  ;;  %6294 = vmatprep.subr.bf16.mxu0 %v7945_v55  ;;  %v3280_v49 = vld [vmem:[%s9046_s30 + $0xf10] sm:$0xff]  ;;  %v7985_v53 = vcombine.high %v3152_v48, %v3156_v23  ;;  %v2813_v43 = vld [vmem:[%s9046_s30 + $0x78] sm:$0xff] }
 0x361   : > { %6535 = vst [vmem:[#allocation2 + $0x8] sm:$0xff] %v6527_v15  ;;  %6335 = vmatprep.subr.bf16.mxu1 %v8073_v32  ;;  %v3284_v58 = vld [vmem:[%s9046_s30 + $0xf30] sm:$0xff]  ;;  %v7984_v32 = vcombine.low %v3152_v48, %v3156_v23  ;;  %v2817_v48 = vld [vmem:[%s9046_s30 + $0x98] sm:$0xff] }
 0x362   : > { %v8113_v50 = vcombine.high %v3280_v49, %v3284_v58  ;;  %v3160_v22 = vld [vmem:[%s9046_s30 + $0xb50] sm:$0xff]  ;;  %v8112_v2 = vcombine.low %v3280_v49, %v3284_v58  ;;  %v2821_v23 = vld [vmem:[%s9046_s30 + $0xb8] sm:$0xff] }
 0x363   : > { %6295 = vmatpush1.bf16.msra.mxu0 %v7944_v17  ;;  %v3164_v55 = vld [vmem:[%s9046_s30 + $0xb70] sm:$0xff]  ;;  %v2945_v58 = vld [vmem:[%s9046_s30 + $0x498] sm:$0xff] }
 0x364   : > { %6336 = vmatpush1.bf16.msra.mxu1 %v8072_v18  ;;  %6296 = vmatprep.subr.bf16.mxu0 %v7953_v19  ;;  %v3288_v56 = vld [vmem:[%s9046_s30 + $0xf50] sm:$0xff]  ;;  %v7993_v5 = vcombine.high %v3160_v22, %v3164_v55  ;;  %v7992_v18 = vcombine.low %v3160_v22, %v3164_v55  ;;  %v2825_v55 = vld [vmem:[%s9046_s30 + $0xd8] sm:$0xff] }
 0x365   : > { %6337 = vmatprep.subr.bf16.mxu1 %v8081_v20  ;;  %v3292_v59 = vld [vmem:[%s9046_s30 + $0xf70] sm:$0xff]  ;;  %v8001_v20 = vcombine.high %v3168_v12, %v3172_v14 }
 0x366   : > { %v8121_v11 = vcombine.high %v3288_v56, %v3292_v59  ;;  %v3296_v15 = vld [vmem:[%s9046_s30 + $0xf90] sm:$0xff]  ;;  %v8120_v19 = vcombine.low %v3288_v56, %v3292_v59  ;;  %v2829_v56 = vld [vmem:[%s9046_s30 + $0xf8] sm:$0xff] }
 0x367   : > { %6297 = vmatpush1.bf16.msra.mxu0 %v7952_v61  ;;  %v3300_v17 = vld [vmem:[%s9046_s30 + $0xfb0] sm:$0xff]  ;;  %v2953_v59 = vld [vmem:[%s9046_s30 + $0x4d8] sm:$0xff] }
 0x368   : > { %6338 = vmatpush1.bf16.msra.mxu1 %v8080_v8  ;;  %6298 = vmatprep.subr.bf16.mxu0 %v7961_v62  ;;  %v8129_v54 = vcombine.high %v3296_v15, %v3300_v17  ;;  %v3176_v21 = vld [vmem:[%s9046_s30 + $0xbd0] sm:$0xff]  ;;  %v8000_v8 = vcombine.low %v3168_v12, %v3172_v14  ;;  %v8128_v62 = vcombine.low %v3296_v15, %v3300_v17  ;;  %v2837_v12 = vld [vmem:[%s9046_s30 + $0x138] sm:$0xff] }
 0x369   : > { %6339 = vmatprep.subr.bf16.mxu1 %v8089_v3  ;;  %v3180_v24 = vld [vmem:[%s9046_s30 + $0xbf0] sm:$0xff]  ;;  %v2961_v14 = vld [vmem:[%s9046_s30 + $0x518] sm:$0xff]  ;;  %v7658_v17 = vcombine.low %v2825_v55, %v2829_v56 }
 0x36a   : > { %v3304_v60 = vld [vmem:[%s9046_s30 + $0xfd0] sm:$0xff]  ;;  %v8009_v3 = vcombine.high %v3176_v21, %v3180_v24  ;;  %v2965_v15 = vld [vmem:[%s9046_s30 + $0x538] sm:$0xff] }
 0x36b   : > { %6299 = vmatpush1.bf16.msra.mxu0 %v7960_v28  ;;  %v3308_v61 = vld [vmem:[%s9046_s30 + $0xff0] sm:$0xff]  ;;  %v2933_v28 = vld [vmem:[%s9046_s30 + $0x438] sm:$0xff] }
 0x36c   : > { %6340 = vmatpush1.bf16.msra.mxu1 %v8088_v29  ;;  %6300 = vmatprep.subr.bf16.mxu0 %v7969_v30  ;;  %v8137_v9 = vcombine.high %v3304_v60, %v3308_v61  ;;  %v8008_v29 = vcombine.low %v3176_v21, %v3180_v24  ;;  %v8136_v30 = vcombine.low %v3304_v60, %v3308_v61  ;;  %v2845_v21 = vld [vmem:[%s9046_s30 + $0x178] sm:$0xff] }
 0x36d   : > { %6341 = vmatprep.subr.bf16.mxu1 %v8097_v40  ;;  %v7635_v40 = vcombine.high %v2801_v25, %v2805_v26  ;;  %v7763_v41 = vcombine.high %v2929_v27, %v2933_v28  ;;  %v2969_v24 = vld [vmem:[%s9046_s30 + $0x558] sm:$0xff] }
 0x36e   : > { %v2973_v60 = vld [vmem:[%s9046_s30 + $0x578] sm:$0xff] }
 0x36f   : > { %6301 = vmatpush1.bf16.msra.mxu0 %v7968_v45  ;;  %v2937_v45 = vld [vmem:[%s9046_s30 + $0x458] sm:$0xff] }
 0x370   : > { %6342 = vmatpush1.bf16.msra.mxu1 %v8096_v46  ;;  %6302 = vmatprep.subr.bf16.mxu0 %v7977_v13  ;;  %v2941_v46 = vld [vmem:[%s9046_s30 + $0x478] sm:$0xff]  ;;  %v7762_v13 = vcombine.low %v2929_v27, %v2933_v28 }
 0x371   : > { %6343 = vmatprep.subr.bf16.mxu1 %v8105_v47  ;;  %v7643_v47 = vcombine.high %v2809_v42, %v2813_v43  ;;  %v7771_v49 = vcombine.high %v2937_v45, %v2941_v46  ;;  %v2853_v25 = vld [vmem:[%s9046_s30 + $0x1b8] sm:$0xff] }
 0x372   : > { %v2977_v26 = vld [vmem:[%s9046_s30 + $0x598] sm:$0xff] }
 0x373   : > { %6303 = vmatpush1.bf16.msra.mxu0 %v7976_v51  ;;  %v2949_v51 = vld [vmem:[%s9046_s30 + $0x4b8] sm:$0xff] }
 0x374   : > { %6344 = vmatpush1.bf16.msra.mxu1 %v8104_v52  ;;  %6304 = vmatprep.subr.bf16.mxu0 %v7985_v53  ;;  %v7642_v52 = vcombine.low %v2809_v42, %v2813_v43  ;;  %v7770_v53 = vcombine.low %v2937_v45, %v2941_v46  ;;  %v7779_v22 = vcombine.high %v2945_v58, %v2949_v51  ;;  %v2981_v27 = vld [vmem:[%s9046_s30 + $0x5b8] sm:$0xff] }
 0x375   : > { %6345 = vmatprep.subr.bf16.mxu1 %v8113_v50  ;;  %v7651_v50 = vcombine.high %v2817_v48, %v2821_v23  ;;  %v2857_v42 = vld [vmem:[%s9046_s30 + $0x1d8] sm:$0xff] }
 0x376   : > { %v2861_v43 = vld [vmem:[%s9046_s30 + $0x1f8] sm:$0xff] }
 0x377   : > { %6305 = vmatpush1.bf16.msra.mxu0 %v7984_v32  ;;  %v2957_v32 = vld [vmem:[%s9046_s30 + $0x4f8] sm:$0xff] }
 0x378   : > { %6346 = vmatpush1.bf16.msra.mxu1 %v8112_v2  ;;  %6306 = vmatprep.subr.bf16.mxu0 %v7993_v5  ;;  %v7650_v2 = vcombine.low %v2817_v48, %v2821_v23  ;;  %v7659_v5 = vcombine.high %v2825_v55, %v2829_v56  ;;  %v2985_v46 = vld [vmem:[%s9046_s30 + $0x5d8] sm:$0xff] }
 0x379   : > { %6347 = vmatprep.subr.bf16.mxu1 %v8121_v11  ;;  %v2833_v11 = vld [vmem:[%s9046_s30 + $0x118] sm:$0xff] }
 0x37a   : > { %v7666_v61 = vcombine.low %v2833_v11, %v2837_v12  ;;  %v2865_v56 = vld [vmem:[%s9046_s30 + $0x218] sm:$0xff] }
 0x37b   : > { %6307 = vmatpush1.bf16.msra.mxu0 %v7992_v18  ;;  %v7786_v18 = vcombine.low %v2953_v59, %v2957_v32 }
 0x37c   : > { %6348 = vmatpush1.bf16.msra.mxu1 %v8120_v19  ;;  %6308 = vmatprep.subr.bf16.mxu0 %v8001_v20  ;;  %v7667_v19 = vcombine.high %v2833_v11, %v2837_v12  ;;  %v7795_v20 = vcombine.high %v2961_v14, %v2965_v15  ;;  %v2873_v12 = vld [vmem:[%s9046_s30 + $0x258] sm:$0xff] }
 0x37d   : > { %6349 = vmatprep.subr.bf16.mxu1 %v8129_v54  ;;  %v2841_v54 = vld [vmem:[%s9046_s30 + $0x158] sm:$0xff] }
 0x37e   : > { %v7674_v28 = vcombine.low %v2841_v54, %v2845_v21 }
 0x37f   : > { %6309 = vmatpush1.bf16.msra.mxu0 %v8000_v8  ;;  %v7794_v8 = vcombine.low %v2961_v14, %v2965_v15  ;;  %v2877_v14 = vld [vmem:[%s9046_s30 + $0x278] sm:$0xff] }
 0x380   : > { %6350 = vmatpush1.bf16.msra.mxu1 %v8128_v62  ;;  %6310 = vmatprep.subr.bf16.mxu0 %v8009_v3  ;;  %v7675_v62 = vcombine.high %v2841_v54, %v2845_v21  ;;  %v7803_v3 = vcombine.high %v2969_v24, %v2973_v60  ;;  %v3001_v15 = vld [vmem:[%s9046_s30 + $0x658] sm:$0xff] }
 0x381   : > { %6351 = vmatprep.subr.bf16.mxu1 %v8137_v9  ;;  %v2849_v9 = vld [vmem:[%s9046_s30 + $0x198] sm:$0xff] }
 0x382   : > { %v2881_v21 = vld [vmem:[%s9046_s30 + $0x298] sm:$0xff] }
 0x383   : > { %6311 = vmatpush1.bf16.msra.mxu0 %v8008_v29  ;;  %v7802_v29 = vcombine.low %v2969_v24, %v2973_v60  ;;  %v2885_v24 = vld [vmem:[%s9046_s30 + $0x2b8] sm:$0xff] }
 0x384   : > { %6352 = vmatpush1.bf16.msra.mxu1 %v8136_v30  ;;  %6362 = vmatprep.subr.bf16.mxu0 %v7635_v40  ;;  %v7683_v30 = vcombine.high %v2849_v9, %v2853_v25  ;;  %v3009_v60 = vld [vmem:[%s9046_s30 + $0x698] sm:$0xff] }
 0x385   : > { %6403 = vmatprep.subr.bf16.mxu1 %v7763_v41  ;;  %v7811_v41 = vcombine.high %v2977_v26, %v2981_v27 }
 0x386   : > { %6313 = vmatmul.mubr.bf16.vlgmr.msra.gmra.mrb[28].mxu0 %v9572_v6 }
 0x387   : > { %6354 = vmatmul.mubr.bf16.vlgmr.msra.gmra.mrb[28].mxu1 %v9576_v10  ;;  %6363 = vmatpush1.bf16.msra.mxu0 %v7634_v44 }
 0x388   : > { %6394 = vmatprep.mubr.bf16.mxu0 %v9458_v57  ;;  %6404 = vmatpush1.bf16.msra.mxu1 %v7762_v13  ;;  %v7778_v57 = vcombine.low %v2945_v58, %v2949_v51  ;;  %v2989_v13 = vld [vmem:[%s9046_s30 + $0x5f8] sm:$0xff] }
 0x389   : > { %6435 = vmatprep.mubr.bf16.mxu1 %v9473_v0  ;;  %6364 = vmatprep.subr.bf16.mxu0 %v7643_v47  ;;  %v7787_v0 = vcombine.high %v2953_v59, %v2957_v32  ;;  %v7819_v55 = vcombine.high %v2985_v46, %v2989_v13  ;;  %v2869_v59 = vld [vmem:[%s9046_s30 + $0x238] sm:$0xff] }
 0x38a   : > { %6405 = vmatprep.subr.bf16.mxu1 %v7771_v49  ;;  %v7682_v49 = vcombine.low %v2849_v9, %v2853_v25  ;;  %v2993_v32 = vld [vmem:[%s9046_s30 + $0x618] sm:$0xff] }
 0x38b   : > { %6365 = vmatpush1.bf16.msra.mxu0 %v7642_v52  ;;  %v2889_v25 = vld [vmem:[%s9046_s30 + $0x2d8] sm:$0xff] }
 0x38c   : > { %6406 = vmatpush1.bf16.msra.mxu1 %v7770_v53  ;;  %6366 = vmatprep.subr.bf16.mxu0 %v7651_v50  ;;  %v7810_v53 = vcombine.low %v2977_v26, %v2981_v27  ;;  %v7691_v50 = vcombine.high %v2857_v42, %v2861_v43  ;;  %v2893_v26 = vld [vmem:[%s9046_s30 + $0x2f8] sm:$0xff] }
 0x38d   : > { %6407 = vmatprep.subr.bf16.mxu1 %v7779_v22  ;;  %v3017_v27 = vld [vmem:[%s9046_s30 + $0x6d8] sm:$0xff] }
 0x38f   : > { %6367 = vmatpush1.bf16.msra.mxu0 %v7650_v2  ;;  %v2997_v2 = vld [vmem:[%s9046_s30 + $0x638] sm:$0xff] }
 0x390   : > { %6408 = vmatpush1.bf16.msra.mxu1 %v7778_v57  ;;  %6368 = vmatprep.subr.bf16.mxu0 %v7659_v5  ;;  %v7690_v57 = vcombine.low %v2857_v42, %v2861_v43  ;;  %v7818_v5 = vcombine.low %v2985_v46, %v2989_v13  ;;  %v7827_v11 = vcombine.high %v2993_v32, %v2997_v2  ;;  %v2897_v42 = vld [vmem:[%s9046_s30 + $0x318] sm:$0xff] }
 0x391   : > { %6409 = vmatprep.subr.bf16.mxu1 %v7787_v0  ;;  %v7699_v0 = vcombine.high %v2865_v56, %v2869_v59  ;;  %v2901_v43 = vld [vmem:[%s9046_s30 + $0x338] sm:$0xff]  ;;  %v7722_v46 = vcombine.low %v2889_v25, %v2893_v26 }
 0x393   : > { %6369 = vmatpush1.bf16.msra.mxu0 %v7658_v17  ;;  %v3005_v17 = vld [vmem:[%s9046_s30 + $0x678] sm:$0xff] }
 0x394   : > { %6410 = vmatpush1.bf16.msra.mxu1 %v7786_v18  ;;  %6370 = vmatprep.subr.bf16.mxu0 %v7667_v19  ;;  %v7698_v18 = vcombine.low %v2865_v56, %v2869_v59  ;;  %v7826_v19 = vcombine.low %v2993_v32, %v2997_v2  ;;  %v7835_v54 = vcombine.high %v3001_v15, %v3005_v17  ;;  %v2913_v59 = vld [vmem:[%s9046_s30 + $0x398] sm:$0xff] }
 0x395   : > { %6411 = vmatprep.subr.bf16.mxu1 %v7795_v20  ;;  %v7707_v20 = vcombine.high %v2873_v12, %v2877_v14  ;;  %v2917_v32 = vld [vmem:[%s9046_s30 + $0x3b8] sm:$0xff] }
 0x396   : > { %v3041_v2 = vld [vmem:[%s9046_s30 + $0x798] sm:$0xff] }
 0x397   : > { %6371 = vmatpush1.bf16.msra.mxu0 %v7666_v61  ;;  %v3013_v61 = vld [vmem:[%s9046_s30 + $0x6b8] sm:$0xff] }
 0x398   : > { %6412 = vmatpush1.bf16.msra.mxu1 %v7794_v8  ;;  %6372 = vmatprep.subr.bf16.mxu0 %v7675_v62  ;;  %v7706_v8 = vcombine.low %v2873_v12, %v2877_v14  ;;  %v7834_v62 = vcombine.low %v3001_v15, %v3005_v17  ;;  %v7843_v9 = vcombine.high %v3009_v60, %v3013_v61  ;;  %v2921_v14 = vld [vmem:[%s9046_s30 + $0x3d8] sm:$0xff] }
 0x399   : > { %v6068_v40 = vpop.f32.mrb[16].mxu0  ;;  %6413 = vmatprep.subr.bf16.mxu1 %v7803_v3  ;;  %v6109_v44 = vpop.f32.mrb[16].mxu1  ;;  %v7715_v3 = vcombine.high %v2881_v21, %v2885_v24  ;;  %v2925_v15 = vld [vmem:[%s9046_s30 + $0x3f8] sm:$0xff] }
 0x39a   : > { %v6070_v45 = vpop.f32.mrb[17].mxu0  ;;  %v9892_v47 = vadd.f32 %v6109_v44, %v6068_v40  ;;  %v6111_v48 = vpop.f32.mrb[17].mxu1  ;;  %v7723_v40 = vcombine.high %v2889_v25, %v2893_v26  ;;  %v3025_v44 = vld [vmem:[%s9046_s30 + $0x718] sm:$0xff] }
 0x39b   : > { %v6072_v23 = vpop.f32.mrb[18].mxu0  ;;  %6373 = vmatpush1.bf16.msra.mxu0 %v7674_v28  ;;  %v9894_v58 = vadd.f32 %v6111_v48, %v6070_v45  ;;  %v6113_v51 = vpop.f32.mrb[18].mxu1  ;;  %v3021_v28 = vld [vmem:[%s9046_s30 + $0x6f8] sm:$0xff]  ;;  %v7731_v48 = vcombine.high %v2897_v42, %v2901_v43 }
 0x39c   : > { %6414 = vmatpush1.bf16.msra.mxu1 %v7802_v29  ;;  %v6073_v52 = vpop.f32.mrb[19].mxu0  ;;  %6374 = vmatprep.subr.bf16.mxu0 %v7683_v30  ;;  %v6114_v22 = vpop.f32.mrb[19].mxu1  ;;  %v7714_v29 = vcombine.low %v2881_v21, %v2885_v24  ;;  %v7842_v30 = vcombine.low %v3009_v60, %v3013_v61  ;;  %v3029_v45 = vld [vmem:[%s9046_s30 + $0x738] sm:$0xff]  ;;  %v7850_v13 = vcombine.low %v3017_v27, %v3021_v28 }
 0x39d   : > { %6415 = vmatprep.subr.bf16.mxu1 %v7811_v41  ;;  %v7851_v41 = vcombine.high %v3017_v27, %v3021_v28  ;;  %v7859_v23 = vcombine.high %v3025_v44, %v3029_v45  ;;  %v2909_v51 = vld [vmem:[%s9046_s30 + $0x378] sm:$0xff]  ;;  %v7858_v22 = vcombine.low %v3025_v44, %v3029_v45 }
 0x39e   : > { %v3033_v52 = vld [vmem:[%s9046_s30 + $0x758] sm:$0xff] }
 0x39f   : > { %6375 = vmatpush1.bf16.msra.mxu0 %v7682_v49  ;;  %v2905_v49 = vld [vmem:[%s9046_s30 + $0x358] sm:$0xff] }
 0x3a0   : > { %6416 = vmatpush1.bf16.msra.mxu1 %v7810_v53  ;;  %6376 = vmatprep.subr.bf16.mxu0 %v7691_v50  ;;  %v3037_v53 = vld [vmem:[%s9046_s30 + $0x778] sm:$0xff]  ;;  %v7730_v50 = vcombine.low %v2897_v42, %v2901_v43 }
 0x3a1   : > { %6417 = vmatprep.subr.bf16.mxu1 %v7819_v55  ;;  %v7739_v55 = vcombine.high %v2905_v49, %v2909_v51  ;;  %v7867_v56 = vcombine.high %v3033_v52, %v3037_v53  ;;  %v3049_v17 = vld [vmem:[%s9046_s30 + $0x7d8] sm:$0xff] }
 0x3a2   : > { %v3057_v24 = vld [vmem:[%s9046_s30 + $0x818] sm:$0xff] }
 0x3a3   : > { %6377 = vmatpush1.bf16.msra.mxu0 %v7690_v57  ;;  %v3045_v57 = vld [vmem:[%s9046_s30 + $0x7b8] sm:$0xff] }
 0x3a4   : > { %6418 = vmatpush1.bf16.msra.mxu1 %v7818_v5  ;;  %6378 = vmatprep.subr.bf16.mxu0 %v7699_v0  ;;  %v7738_v5 = vcombine.low %v2905_v49, %v2909_v51  ;;  %v7866_v0 = vcombine.low %v3033_v52, %v3037_v53  ;;  %v7875_v12 = vcombine.high %v3041_v2, %v3045_v57  ;;  %v3061_v60 = vld [vmem:[%s9046_s30 + $0x838] sm:$0xff] }
 0x3a5   : > { %6419 = vmatprep.subr.bf16.mxu1 %v7827_v11  ;;  %v7747_v11 = vcombine.high %v2913_v59, %v2917_v32  ;;  %v3185_v61 = vld [vmem:[%s9046_s30 + $0xc18] sm:$0xff]  ;;  %v7890_v28 = vcombine.low %v3057_v24, %v3061_v60 }
 0x3a6   : > { %v3065_v26 = vld [vmem:[%s9046_s30 + $0x858] sm:$0xff] }
 0x3a7   : > { %6379 = vmatpush1.bf16.msra.mxu0 %v7698_v18  ;;  %v3053_v18 = vld [vmem:[%s9046_s30 + $0x7f8] sm:$0xff] }
 0x3a8   : > { %6420 = vmatpush1.bf16.msra.mxu1 %v7826_v19  ;;  %6380 = vmatprep.subr.bf16.mxu0 %v7707_v20  ;;  %v7746_v19 = vcombine.low %v2913_v59, %v2917_v32  ;;  %v7874_v20 = vcombine.low %v3041_v2, %v3045_v57  ;;  %v7883_v21 = vcombine.high %v3049_v17, %v3053_v18  ;;  %v3069_v27 = vld [vmem:[%s9046_s30 + $0x878] sm:$0xff] }
 0x3a9   : > { %6421 = vmatprep.subr.bf16.mxu1 %v7835_v54  ;;  %v7755_v54 = vcombine.high %v2921_v14, %v2925_v15  ;;  %v3073_v42 = vld [vmem:[%s9046_s30 + $0x898] sm:$0xff] }
 0x3aa   : > { %v3077_v43 = vld [vmem:[%s9046_s30 + $0x8b8] sm:$0xff] }
 0x3ab   : > { %6381 = vmatpush1.bf16.msra.mxu0 %v7706_v8  ;;  %v3189_v8 = vld [vmem:[%s9046_s30 + $0xc38] sm:$0xff]  ;;  %v7906_v53 = vcombine.low %v3073_v42, %v3077_v43 }
 0x3ac   : > { %6422 = vmatpush1.bf16.msra.mxu1 %v7834_v62  ;;  %6382 = vmatprep.subr.bf16.mxu0 %v7715_v3  ;;  %v7754_v62 = vcombine.low %v2921_v14, %v2925_v15  ;;  %v7882_v3 = vcombine.low %v3049_v17, %v3053_v18  ;;  %v8019_v25 = vcombine.high %v3185_v61, %v3189_v8  ;;  %v3201_v45 = vld [vmem:[%s9046_s30 + $0xc98] sm:$0xff] }
 0x3ad   : > { %6423 = vmatprep.subr.bf16.mxu1 %v7843_v9  ;;  %v7891_v9 = vcombine.high %v3057_v24, %v3061_v60  ;;  %v3081_v49 = vld [vmem:[%s9046_s30 + $0x8d8] sm:$0xff] }
 0x3ae   : > { %v3085_v51 = vld [vmem:[%s9046_s30 + $0x8f8] sm:$0xff] }
 0x3af   : > { %6383 = vmatpush1.bf16.msra.mxu0 %v7714_v29  ;;  %v3193_v29 = vld [vmem:[%s9046_s30 + $0xc58] sm:$0xff]  ;;  %v7914_v32 = vcombine.low %v3081_v49, %v3085_v51 }
 0x3b0   : > { %6424 = vmatpush1.bf16.msra.mxu1 %v7842_v30  ;;  %6384 = vmatprep.subr.bf16.mxu0 %v7723_v40  ;;  %v3197_v30 = vld [vmem:[%s9046_s30 + $0xc78] sm:$0xff]  ;;  %v8018_v40 = vcombine.low %v3185_v61, %v3189_v8 }
 0x3b1   : > { %6425 = vmatprep.subr.bf16.mxu1 %v7851_v41  ;;  %v7899_v41 = vcombine.high %v3065_v26, %v3069_v27  ;;  %v8027_v44 = vcombine.high %v3193_v29, %v3197_v30  ;;  %v3209_v52 = vld [vmem:[%s9046_s30 + $0xcd8] sm:$0xff] }
 0x3b2   : > { %v3221_v59 = vld [vmem:[%s9046_s30 + $0xd38] sm:$0xff] }
 0x3b3   : > { %6385 = vmatpush1.bf16.msra.mxu0 %v7722_v46  ;;  %v3205_v46 = vld [vmem:[%s9046_s30 + $0xcb8] sm:$0xff] }
 0x3b4   : > { %6426 = vmatpush1.bf16.msra.mxu1 %v7850_v13  ;;  %6386 = vmatprep.subr.bf16.mxu0 %v7731_v48  ;;  %v7898_v13 = vcombine.low %v3065_v26, %v3069_v27  ;;  %v8026_v48 = vcombine.low %v3193_v29, %v3197_v30  ;;  %v3229_v14 = vld [vmem:[%s9046_s30 + $0xd78] sm:$0xff] }
 0x3b5   : > { %6427 = vmatprep.subr.bf16.mxu1 %v7859_v23  ;;  %v7907_v23 = vcombine.high %v3073_v42, %v3077_v43  ;;  %v3237_v24 = vld [vmem:[%s9046_s30 + $0xdb8] sm:$0xff] }
 0x3b6   : > { %v3241_v29 = vld [vmem:[%s9046_s30 + $0xdd8] sm:$0xff] }
 0x3b7   : > { %6387 = vmatpush1.bf16.msra.mxu0 %v7730_v50  ;;  %v7915_v50 = vcombine.high %v3081_v49, %v3085_v51  ;;  %v3245_v30 = vld [vmem:[%s9046_s30 + $0xdf8] sm:$0xff] }
 0x3b8   : > { %6428 = vmatpush1.bf16.msra.mxu1 %v7858_v22  ;;  %6388 = vmatprep.subr.bf16.mxu0 %v7739_v55  ;;  %v3089_v22 = vld [vmem:[%s9046_s30 + $0x918] sm:$0xff] }
 0x3b9   : > { %6429 = vmatprep.subr.bf16.mxu1 %v7867_v56  ;;  %v3093_v55 = vld [vmem:[%s9046_s30 + $0x938] sm:$0xff] }
 0x3ba   : > { %v3217_v56 = vld [vmem:[%s9046_s30 + $0xd18] sm:$0xff]  ;;  %v7923_v57 = vcombine.high %v3089_v22, %v3093_v55  ;;  %v7922_v15 = vcombine.low %v3089_v22, %v3093_v55  ;;  %v8074_v22 = vcombine.low %v3241_v29, %v3245_v30 }
 0x3bb   : > { %6389 = vmatpush1.bf16.msra.mxu0 %v7738_v5  ;;  %v8051_v5 = vcombine.high %v3217_v56, %v3221_v59  ;;  %v8050_v17 = vcombine.low %v3217_v56, %v3221_v59  ;;  %v3121_v51 = vld [vmem:[%s9046_s30 + $0xa18] sm:$0xff] }
 0x3bc   : > { %6430 = vmatpush1.bf16.msra.mxu1 %v7866_v0  ;;  %6390 = vmatprep.subr.bf16.mxu0 %v7747_v11  ;;  %v3097_v0 = vld [vmem:[%s9046_s30 + $0x958] sm:$0xff] }
 0x3bd   : > { %6431 = vmatprep.subr.bf16.mxu1 %v7875_v12  ;;  %v3101_v11 = vld [vmem:[%s9046_s30 + $0x978] sm:$0xff] }
 0x3be   : > { %v3225_v12 = vld [vmem:[%s9046_s30 + $0xd58] sm:$0xff]  ;;  %v7931_v18 = vcombine.high %v3097_v0, %v3101_v11  ;;  %v7930_v60 = vcombine.low %v3097_v0, %v3101_v11 }
 0x3bf   : > { %6391 = vmatpush1.bf16.msra.mxu0 %v7746_v19  ;;  %v8059_v19 = vcombine.high %v3225_v12, %v3229_v14  ;;  %v8058_v61 = vcombine.low %v3225_v12, %v3229_v14  ;;  %v3129_v59 = vld [vmem:[%s9046_s30 + $0xa58] sm:$0xff] }
 0x3c0   : > { %6432 = vmatpush1.bf16.msra.mxu1 %v7874_v20  ;;  %6392 = vmatprep.subr.bf16.mxu0 %v7755_v54  ;;  %v3105_v20 = vld [vmem:[%s9046_s30 + $0x998] sm:$0xff] }
 0x3c1   : > { %6433 = vmatprep.subr.bf16.mxu1 %v7883_v21  ;;  %v3109_v54 = vld [vmem:[%s9046_s30 + $0x9b8] sm:$0xff] }
 0x3c2   : > { %v3233_v21 = vld [vmem:[%s9046_s30 + $0xd98] sm:$0xff]  ;;  %v7939_v8 = vcombine.high %v3105_v20, %v3109_v54 }
 0x3c3   : > { %6393 = vmatpush1.bf16.msra.mxu0 %v7754_v62  ;;  %v3137_v14 = vld [vmem:[%s9046_s30 + $0xa98] sm:$0xff] }
 0x3c4   : > { %6434 = vmatpush1.bf16.msra.mxu1 %v7882_v3  ;;  %6444 = vmatprep.subr.bf16.mxu0 %v7891_v9  ;;  %v8067_v3 = vcombine.high %v3233_v21, %v3237_v24  ;;  %v3113_v9 = vld [vmem:[%s9046_s30 + $0x9d8] sm:$0xff] }
 0x3c5   : > { %6485 = vmatprep.subr.bf16.mxu1 %v8019_v25  ;;  %v3117_v25 = vld [vmem:[%s9046_s30 + $0x9f8] sm:$0xff] }
 0x3c6   : > { %6395 = vmatmul.mubr.bf16.vlgmr.msra.gmra.mrb[32].mxu0 %v9471_v63  ;;  %v8035_v63 = vcombine.high %v3201_v45, %v3205_v46 }
 0x3c7   : > { %6436 = vmatmul.mubr.bf16.vlgmr.msra.gmra.mrb[32].mxu1 %v9480_v4  ;;  %6445 = vmatpush1.bf16.msra.mxu0 %v7890_v28  ;;  %v3213_v4 = vld [vmem:[%s9046_s30 + $0xcf8] sm:$0xff] }
 0x3c8   : > { %6476 = vmatprep.mubr.bf16.mxu0 %v9568_v1  ;;  %6486 = vmatpush1.bf16.msra.mxu1 %v8018_v40  ;;  %v8034_v1 = vcombine.low %v3201_v45, %v3205_v46  ;;  %v8042_v2 = vcombine.low %v3209_v52, %v3213_v4  ;;  %v2784_v40 = vld [vmem:[#allocation2 + $0x10] sm:$0xff]  ;;  %v2785_v46 = vld [vmem:[#allocation2 + $0x18] sm:$0xff] }
 0x3c9   : > { %6517 = vmatprep.mubr.bf16.mxu1 %v9574_v7  ;;  %6446 = vmatprep.subr.bf16.mxu0 %v7899_v41  ;;  %v8043_v7 = vcombine.high %v3209_v52, %v3213_v4  ;;  %v3125_v52 = vld [vmem:[%s9046_s30 + $0xa38] sm:$0xff] }
 0x3ca   : > { %6487 = vmatprep.subr.bf16.mxu1 %v8027_v44  ;;  %v7938_v44 = vcombine.low %v3105_v20, %v3109_v54  ;;  %v7955_v55 = vcombine.high %v3121_v51, %v3125_v52 }
 0x3cb   : > { %6447 = vmatpush1.bf16.msra.mxu0 %v7898_v13 }
 0x3cc   : > { %6488 = vmatpush1.bf16.msra.mxu1 %v8026_v48  ;;  %6448 = vmatprep.subr.bf16.mxu0 %v7907_v23  ;;  %v8066_v48 = vcombine.low %v3233_v21, %v3237_v24  ;;  %v7947_v23 = vcombine.high %v3113_v9, %v3117_v25  ;;  %v3145_v24 = vld [vmem:[%s9046_s30 + $0xad8] sm:$0xff] }
 0x3cd   : > { %6489 = vmatprep.subr.bf16.mxu1 %v8035_v63 }
 0x3cf   : > { %6449 = vmatpush1.bf16.msra.mxu0 %v7906_v53  ;;  %v3249_v53 = vld [vmem:[%s9046_s30 + $0xe18] sm:$0xff] }
 0x3d0   : > { %6490 = vmatpush1.bf16.msra.mxu1 %v8034_v1  ;;  %6450 = vmatprep.subr.bf16.mxu0 %v7915_v50  ;;  %v3253_v1 = vld [vmem:[%s9046_s30 + $0xe38] sm:$0xff] }
 0x3d1   : > { %6491 = vmatprep.subr.bf16.mxu1 %v8043_v7  ;;  %v7946_v7 = vcombine.low %v3113_v9, %v3117_v25  ;;  %v8083_v56 = vcombine.high %v3249_v53, %v3253_v1  ;;  %v8082_v0 = vcombine.low %v3249_v53, %v3253_v1 }
 0x3d3   : > { %6451 = vmatpush1.bf16.msra.mxu0 %v7914_v32  ;;  %v3133_v32 = vld [vmem:[%s9046_s30 + $0xa78] sm:$0xff] }
 0x3d4   : > { %6492 = vmatpush1.bf16.msra.mxu1 %v8042_v2  ;;  %6452 = vmatprep.subr.bf16.mxu0 %v7923_v57  ;;  %v3257_v2 = vld [vmem:[%s9046_s30 + $0xe58] sm:$0xff]  ;;  %v7963_v11 = vcombine.high %v3129_v59, %v3133_v32 }
 0x3d5   : > { %6493 = vmatprep.subr.bf16.mxu1 %v8051_v5  ;;  %v3261_v57 = vld [vmem:[%s9046_s30 + $0xe78] sm:$0xff]  ;;  %v7954_v5 = vcombine.low %v3121_v51, %v3125_v52 }
 0x3d6   : > { %v8091_v12 = vcombine.high %v3257_v2, %v3261_v57  ;;  %v8090_v20 = vcombine.low %v3257_v2, %v3261_v57  ;;  %v3301_v51 = vld [vmem:[%s9046_s30 + $0xfb8] sm:$0xff] }
 0x3d7   : > { %6453 = vmatpush1.bf16.msra.mxu0 %v7922_v15  ;;  %v3141_v15 = vld [vmem:[%s9046_s30 + $0xab8] sm:$0xff] }
 0x3d8   : > { %6494 = vmatpush1.bf16.msra.mxu1 %v8050_v17  ;;  %6454 = vmatprep.subr.bf16.mxu0 %v7931_v18  ;;  %v3265_v17 = vld [vmem:[%s9046_s30 + $0xe98] sm:$0xff]  ;;  %v7971_v54 = vcombine.high %v3137_v14, %v3141_v15 }
 0x3d9   : > { %v6150_v62 = vpop.f32.mrb[20].mxu0  ;;  %6495 = vmatprep.subr.bf16.mxu1 %v8059_v19  ;;  %v3269_v18 = vld [vmem:[%s9046_s30 + $0xeb8] sm:$0xff]  ;;  %v7962_v19 = vcombine.low %v3129_v59, %v3133_v32 }
 0x3da   : > { %v6151_v26 = vadd.f32 %v6150_v62, %v9892_v47  ;;  %v6191_v27 = vpop.f32.mrb[20].mxu1  ;;  %v6152_v28 = vpop.f32.mrb[21].mxu0  ;;  %v8099_v21 = vcombine.high %v3265_v17, %v3269_v18  ;;  %v7970_v62 = vcombine.low %v3137_v14, %v3141_v15 }
 0x3db   : > { %v6153_v41 = vadd.f32 %v6152_v28, %v9894_v58  ;;  %v6193_v42 = vpop.f32.mrb[21].mxu1  ;;  %v6154_v43 = vpop.f32.mrb[22].mxu0  ;;  %6455 = vmatpush1.bf16.msra.mxu0 %v7930_v60  ;;  %v8075_v58 = vcombine.high %v3241_v29, %v3245_v30  ;;  %v3149_v60 = vld [vmem:[%s9046_s30 + $0xaf8] sm:$0xff] }
 0x3dc   : > { %v6192_v45 = vadd.f32 %v6191_v27, %v6151_v26  ;;  %v6195_v13 = vpop.f32.mrb[22].mxu1  ;;  %6496 = vmatpush1.bf16.msra.mxu1 %v8058_v61  ;;  %v6155_v47 = vpop.f32.mrb[23].mxu0  ;;  %6456 = vmatprep.subr.bf16.mxu0 %v7939_v8  ;;  %v3273_v61 = vld [vmem:[%s9046_s30 + $0xed8] sm:$0xff]  ;;  %v7979_v9 = vcombine.high %v3145_v24, %v3149_v60  ;;  %v7978_v30 = vcombine.low %v3145_v24, %v3149_v60 }
 0x3dd   : > { %v6194_v63 = vadd.f32 %v6193_v42, %v6153_v41  ;;  %v6196_v49 = vpop.f32.mrb[23].mxu1  ;;  %6497 = vmatprep.subr.bf16.mxu1 %v8067_v3  ;;  %v3277_v8 = vld [vmem:[%s9046_s30 + $0xef8] sm:$0xff]  ;;  %v8098_v3 = vcombine.low %v3265_v17, %v3269_v18 }
 0x3de   : > { %v6528_v4 = vadd.f32 %v6192_v45, %v2784_v40  ;;  %v8107_v25 = vcombine.high %v3273_v61, %v3277_v8  ;;  %v3153_v26 = vld [vmem:[%s9046_s30 + $0xb18] sm:$0xff]  ;;  %v8106_v40 = vcombine.low %v3273_v61, %v3277_v8  ;;  %v2786_v8 = vld [vmem:[#allocation2 + $0x20] sm:$0xff] }
 0x3df   : > { %v6529_v50 = vadd.f32 %v6194_v63, %v2785_v46  ;;  %6457 = vmatpush1.bf16.msra.mxu0 %v7938_v44  ;;  %v3157_v27 = vld [vmem:[%s9046_s30 + $0xb38] sm:$0xff] }
 0x3e0   : > { %6536 = vst [vmem:[#allocation2 + $0x10] sm:$0xff] %v6528_v4  ;;  %6498 = vmatpush1.bf16.msra.mxu1 %v8066_v48  ;;  %6458 = vmatprep.subr.bf16.mxu0 %v7947_v23  ;;  %v3281_v28 = vld [vmem:[%s9046_s30 + $0xf18] sm:$0xff]  ;;  %v7987_v41 = vcombine.high %v3153_v26, %v3157_v27  ;;  %v7986_v13 = vcombine.low %v3153_v26, %v3157_v27 }
 0x3e1   : > { %6537 = vst [vmem:[#allocation2 + $0x18] sm:$0xff] %v6529_v50  ;;  %6499 = vmatprep.subr.bf16.mxu1 %v8075_v58  ;;  %v3285_v29 = vld [vmem:[%s9046_s30 + $0xf38] sm:$0xff] }
 0x3e2   : > { %v8115_v42 = vcombine.high %v3281_v28, %v3285_v29  ;;  %v3161_v43 = vld [vmem:[%s9046_s30 + $0xb58] sm:$0xff]  ;;  %v8114_v47 = vcombine.low %v3281_v28, %v3285_v29 }
 0x3e3   : > { %6459 = vmatpush1.bf16.msra.mxu0 %v7946_v7  ;;  %v3165_v44 = vld [vmem:[%s9046_s30 + $0xb78] sm:$0xff] }
 0x3e4   : > { %6500 = vmatpush1.bf16.msra.mxu1 %v8074_v22  ;;  %6460 = vmatprep.subr.bf16.mxu0 %v7955_v55  ;;  %v3289_v45 = vld [vmem:[%s9046_s30 + $0xf58] sm:$0xff]  ;;  %v7995_v48 = vcombine.high %v3161_v43, %v3165_v44  ;;  %v7994_v52 = vcombine.low %v3161_v43, %v3165_v44 }
 0x3e5   : > { %6501 = vmatprep.subr.bf16.mxu1 %v8083_v56  ;;  %v3293_v46 = vld [vmem:[%s9046_s30 + $0xf78] sm:$0xff] }
 0x3e6   : > { %v8123_v23 = vcombine.high %v3289_v45, %v3293_v46  ;;  %v3169_v63 = vld [vmem:[%s9046_s30 + $0xb98] sm:$0xff]  ;;  %v8122_v4 = vcombine.low %v3289_v45, %v3293_v46 }
 0x3e7   : > { %6461 = vmatpush1.bf16.msra.mxu0 %v7954_v5  ;;  %v3173_v49 = vld [vmem:[%s9046_s30 + $0xbb8] sm:$0xff] }
 0x3e8   : > { %6502 = vmatpush1.bf16.msra.mxu1 %v8082_v0  ;;  %6462 = vmatprep.subr.bf16.mxu0 %v7963_v11  ;;  %v3297_v58 = vld [vmem:[%s9046_s30 + $0xf98] sm:$0xff]  ;;  %v8003_v53 = vcombine.high %v3169_v63, %v3173_v49  ;;  %v8002_v56 = vcombine.low %v3169_v63, %v3173_v49 }
 0x3e9   : > { %6503 = vmatprep.subr.bf16.mxu1 %v8091_v12  ;;  %v8131_v1 = vcombine.high %v3297_v58, %v3301_v51  ;;  %v3177_v50 = vld [vmem:[%s9046_s30 + $0xbd8] sm:$0xff]  ;;  %v8130_v59 = vcombine.low %v3297_v58, %v3301_v51  ;;  %v2788_v51 = vld [vmem:[#allocation2 + $0x30] sm:$0xff] }
 0x3ea   : > { %v3181_v7 = vld [vmem:[%s9046_s30 + $0xbf8] sm:$0xff] }
 0x3eb   : > { %6463 = vmatpush1.bf16.msra.mxu0 %v7962_v19  ;;  %v3305_v22 = vld [vmem:[%s9046_s30 + $0xfd8] sm:$0xff]  ;;  %v8011_v32 = vcombine.high %v3177_v50, %v3181_v7  ;;  %v8010_v57 = vcombine.low %v3177_v50, %v3181_v7 }
 0x3ec   : > { %6504 = vmatpush1.bf16.msra.mxu1 %v8090_v20  ;;  %6464 = vmatprep.subr.bf16.mxu0 %v7971_v54  ;;  %v3309_v55 = vld [vmem:[%s9046_s30 + $0xff8] sm:$0xff] }
 0x3ed   : > { %6505 = vmatprep.subr.bf16.mxu1 %v8099_v21  ;;  %v8139_v2 = vcombine.high %v3305_v22, %v3309_v55  ;;  %v8138_v5 = vcombine.low %v3305_v22, %v3309_v55  ;;  %v2789_v50 = vld [vmem:[#allocation2 + $0x38] sm:$0xff] }
 0x3ef   : > { %6465 = vmatpush1.bf16.msra.mxu0 %v7970_v62 }
 0x3f0   : > { %6506 = vmatpush1.bf16.msra.mxu1 %v8098_v3  ;;  %6466 = vmatprep.subr.bf16.mxu0 %v7979_v9 }
 0x3f1   : > { %6507 = vmatprep.subr.bf16.mxu1 %v8107_v25 }
 0x3f3   : > { %6467 = vmatpush1.bf16.msra.mxu0 %v7978_v30 }
 0x3f4   : > { %6508 = vmatpush1.bf16.msra.mxu1 %v8106_v40  ;;  %6468 = vmatprep.subr.bf16.mxu0 %v7987_v41 }
 0x3f5   : > { %6509 = vmatprep.subr.bf16.mxu1 %v8115_v42 }
 0x3f7   : > { %6469 = vmatpush1.bf16.msra.mxu0 %v7986_v13 }
 0x3f8   : > { %6510 = vmatpush1.bf16.msra.mxu1 %v8114_v47  ;;  %6470 = vmatprep.subr.bf16.mxu0 %v7995_v48 }
 0x3f9   : > { %6511 = vmatprep.subr.bf16.mxu1 %v8123_v23 }
 0x3fb   : > { %6471 = vmatpush1.bf16.msra.mxu0 %v7994_v52 }
 0x3fc   : > { %6512 = vmatpush1.bf16.msra.mxu1 %v8122_v4  ;;  %6472 = vmatprep.subr.bf16.mxu0 %v8003_v53 }
 0x3fd   : > { %6513 = vmatprep.subr.bf16.mxu1 %v8131_v1 }
 0x3ff   : > { %6473 = vmatpush1.bf16.msra.mxu0 %v8002_v56 }
 0x400   : > { %6514 = vmatpush1.bf16.msra.mxu1 %v8130_v59  ;;  %6474 = vmatprep.subr.bf16.mxu0 %v8011_v32 }
 0x401   : > { %6515 = vmatprep.subr.bf16.mxu1 %v8139_v2  ;;  %v8351_v2 = vld [vmem:[%s10242_s4 + $0x40] sm:$0xff] (!%p8140_p11)  }
 0x403   : > { %6475 = vmatpush1.bf16.msra.mxu0 %v8010_v57  ;;  %v8352_v57 = vld [vmem:[%s10242_s4 + $0xc0] sm:$0xff] (!%p8140_p11)  }
 0x404   : > { %6516 = vmatpush1.bf16.msra.mxu1 %v8138_v5  ;;  %8210 = vmatprep.subr.bf16.mxu0 (!%p8140_p11), %v8351_v2  ;;  %v8353_v5 = vld [vmem:[%s10242_s4] sm:$0xff] (!%p8140_p11)   ;;  %v8389_v2 = vld [vmem:[%s10242_s4 + $0x108] sm:$0xff] (!%p8140_p11)  }
 0x405   : > { %8232 = vmatprep.subr.bf16.mxu1 (!%p8140_p11), %v8352_v57  ;;  %v8390_v57 = vld [vmem:[%s10242_s4 + $0x188] sm:$0xff] (!%p8140_p11)  }
 0x406   : > { %6477 = vmatmul.mubr.bf16.vlgmr.msra.gmra.mrb[36].mxu0 %v9572_v6 }
 0x407   : > { %6518 = vmatmul.mubr.bf16.vlgmr.msra.gmra.mrb[36].mxu1 %v9576_v10  ;;  %v2787_v10 = vld [vmem:[#allocation2 + $0x28] sm:$0xff]  ;;  %8211 = vmatpush3.bf16.msra.mxu0 (!%p8140_p11), %v8353_v5  ;;  %v8391_v5 = vld [vmem:[%s10242_s4 + $0x150] sm:$0xff] (!%p8140_p11)  }
 0x419   : > { %v6232_v0 = vpop.f32.mrb[24].mxu0 }
 0x41a   : > { %v6273_v11 = vpop.f32.mrb[24].mxu1  ;;  %v6234_v12 = vpop.f32.mrb[25].mxu0 }
 0x41b   : > { %v6274_v14 = vadd.f32 %v6273_v11, %v6232_v0  ;;  %v6275_v15 = vpop.f32.mrb[25].mxu1  ;;  %v6236_v17 = vpop.f32.mrb[26].mxu0  ;;  %v8354_v0 = vld [vmem:[%s10242_s4 + $0x80] sm:$0xff] (!%p8140_p11)   ;;  %v8355_v11 = vld [vmem:[%s10242_s4 + $0x48] sm:$0xff] (!%p8140_p11)  }
 0x41c   : > { %v6276_v18 = vadd.f32 %v6275_v15, %v6234_v12  ;;  %v6277_v19 = vpop.f32.mrb[26].mxu1  ;;  %v6237_v20 = vpop.f32.mrb[27].mxu0  ;;  %8233 = vmatpush3.bf16.msra.mxu1 (!%p8140_p11), %v8354_v0  ;;  %v8356_v12 = vld [vmem:[%s10242_s4 + $0xc8] sm:$0xff] (!%p8140_p11)   ;;  %8212 = vmatprep.subr.bf16.mxu0 (!%p8140_p11), %v8355_v11  ;;  %v8359_v17 = vld [vmem:[%s10242_s4 + $0x50] sm:$0xff] (!%p8140_p11)  }
 0x41d   : > { %v6278_v54 = vpop.f32.mrb[27].mxu1  ;;  %8234 = vmatprep.subr.bf16.mxu1 (!%p8140_p11), %v8356_v12  ;;  %v8358_v15 = vld [vmem:[%s10242_s4 + $0x88] sm:$0xff] (!%p8140_p11)   ;;  %v8361_v19 = vld [vmem:[%s10242_s4 + $0x10] sm:$0xff] (!%p8140_p11)  }
 0x41e   : > { %v8362_v20 = vld [vmem:[%s10242_s4 + $0x90] sm:$0xff] (!%p8140_p11)   ;;  %v8363_v54 = vld [vmem:[%s10242_s4 + $0x58] sm:$0xff] (!%p8140_p11)  }
 0x41f   : > { %v8392_v0 = vld [vmem:[%s10242_s4 + $0x1d0] sm:$0xff] (!%p8140_p11)  }
 0x420   : > { %8235 = vmatpush3.bf16.msra.mxu1 (!%p8140_p11), %v8358_v15  ;;  %v8393_v11 = vld [vmem:[%s10242_s4 + $0x110] sm:$0xff] (!%p8140_p11)   ;;  %v8396_v15 = vld [vmem:[%s10242_s4 + $0x1d8] sm:$0xff] (!%p8140_p11)  }
 0x421   : > { %v8394_v12 = vld [vmem:[%s10242_s4 + $0x190] sm:$0xff] (!%p8140_p11)  }
 0x459   : > { %v6314_v21 = vpop.f32.mrb[28].mxu0 }
 0x45a   : > { %v6315_v24 = vadd.f32 %v6314_v21, %v6274_v14  ;;  %v6355_v60 = vpop.f32.mrb[28].mxu1  ;;  %v6316_v61 = vpop.f32.mrb[29].mxu0  ;;  %v8357_v14 = vld [vmem:[%s10242_s4 + $0x8] sm:$0xff] (!%p8140_p11)   ;;  %v8364_v21 = vld [vmem:[%s10242_s4 + $0xd8] sm:$0xff] (!%p8140_p11)  }
 0x45b   : > { %v6317_v62 = vadd.f32 %v6316_v61, %v6276_v18  ;;  %v6357_v3 = vpop.f32.mrb[29].mxu1  ;;  %v6318_v6 = vpop.f32.mrb[30].mxu0  ;;  %8213 = vmatpush3.bf16.msra.mxu0 (!%p8140_p11), %v8357_v14  ;;  %v8360_v18 = vld [vmem:[%s10242_s4 + $0xd0] sm:$0xff] (!%p8140_p11)   ;;  %v8367_v61 = vld [vmem:[%s10242_s4 + $0x60] sm:$0xff] (!%p8140_p11)   ;;  %v8395_v14 = vld [vmem:[%s10242_s4 + $0x158] sm:$0xff] (!%p8140_p11)  }
 0x45c   : > { %v6356_v9 = vadd.f32 %v6355_v60, %v6315_v24  ;;  %v6359_v25 = vpop.f32.mrb[30].mxu1  ;;  %v6319_v26 = vpop.f32.mrb[31].mxu0  ;;  %8214 = vmatprep.subr.bf16.mxu0 (!%p8140_p11), %v8359_v17  ;;  %8236 = vmatprep.subr.bf16.mxu1 (!%p8140_p11), %v8360_v18  ;;  %v8365_v24 = vld [vmem:[%s10242_s4 + $0x18] sm:$0xff] (!%p8140_p11)   ;;  %v8371_v6 = vld [vmem:[%s10242_s4 + $0x68] sm:$0xff] (!%p8140_p11)  }
 0x45d   : > { %v6358_v27 = vadd.f32 %v6357_v3, %v6317_v62  ;;  %v6360_v28 = vpop.f32.mrb[31].mxu1  ;;  %8237 = vmatpush3.bf16.msra.mxu1 (!%p8140_p11), %v8362_v20  ;;  %v8366_v60 = vld [vmem:[%s10242_s4 + $0x98] sm:$0xff] (!%p8140_p11)   ;;  %v8369_v62 = vld [vmem:[%s10242_s4 + $0x20] sm:$0xff] (!%p8140_p11)   ;;  %v8374_v25 = vld [vmem:[%s10242_s4 + $0xa8] sm:$0xff] (!%p8140_p11)  }
 0x45e   : > { %v6530_v29 = vadd.f32 %v6356_v9, %v2786_v8  ;;  %8238 = vmatprep.subr.bf16.mxu1 (!%p8140_p11), %v8364_v21  ;;  %v8368_v8 = vld [vmem:[%s10242_s4 + $0xe0] sm:$0xff] (!%p8140_p11)   ;;  %v8372_v9 = vld [vmem:[%s10242_s4 + $0xe8] sm:$0xff] (!%p8140_p11)   ;;  %v8375_v26 = vld [vmem:[%s10242_s4 + $0x70] sm:$0xff] (!%p8140_p11)  }
 0x45f   : > { %v6531_v30 = vadd.f32 %v6358_v27, %v2787_v10  ;;  %8215 = vmatpush3.bf16.msra.mxu0 (!%p8140_p11), %v8361_v19  ;;  %v8370_v3 = vld [vmem:[%s10242_s4 + $0xa0] sm:$0xff] (!%p8140_p11)   ;;  %v8373_v10 = vld [vmem:[%s10242_s4 + $0x28] sm:$0xff] (!%p8140_p11)   ;;  %v8376_v27 = vld [vmem:[%s10242_s4 + $0xf0] sm:$0xff] (!%p8140_p11)  }
 0x460   : > { %6538 = vst [vmem:[#allocation2 + $0x20] sm:$0xff] %v6530_v29  ;;  %8216 = vmatprep.subr.bf16.mxu0 (!%p8140_p11), %v8363_v54  ;;  %v8377_v28 = vld [vmem:[%s10242_s4 + $0x30] sm:$0xff] (!%p8140_p11)   ;;  %v8397_v17 = vld [vmem:[%s10242_s4 + $0x118] sm:$0xff] (!%p8140_p11)   ;;  %v8399_v19 = vld [vmem:[%s10242_s4 + $0x160] sm:$0xff] (!%p8140_p11)  }
 0x461   : > { %6539 = vst [vmem:[#allocation2 + $0x28] sm:$0xff] %v6531_v30  ;;  %8239 = vmatpush3.bf16.msra.mxu1 (!%p8140_p11), %v8366_v60  ;;  %v8378_v29 = vld [vmem:[%s10242_s4 + $0xb0] sm:$0xff] (!%p8140_p11)   ;;  %v8379_v30 = vld [vmem:[%s10242_s4 + $0x78] sm:$0xff] (!%p8140_p11)   ;;  %v8400_v20 = vld [vmem:[%s10242_s4 + $0x1e0] sm:$0xff] (!%p8140_p11)  }
 0x462   : > { %8240 = vmatprep.subr.bf16.mxu1 (!%p8140_p11), %v8368_v8  ;;  %v8398_v18 = vld [vmem:[%s10242_s4 + $0x198] sm:$0xff] (!%p8140_p11)   ;;  %v8401_v54 = vld [vmem:[%s10242_s4 + $0x120] sm:$0xff] (!%p8140_p11)   ;;  %v8404_v60 = vld [vmem:[%s10242_s4 + $0x1e8] sm:$0xff] (!%p8140_p11)  }
 0x463   : > { %8217 = vmatpush3.bf16.msra.mxu0 (!%p8140_p11), %v8365_v24  ;;  %v8402_v21 = vld [vmem:[%s10242_s4 + $0x1a0] sm:$0xff] (!%p8140_p11)   ;;  %v8403_v24 = vld [vmem:[%s10242_s4 + $0x168] sm:$0xff] (!%p8140_p11)  }
 0x464   : > { %8218 = vmatprep.subr.bf16.mxu0 (!%p8140_p11), %v8367_v61  ;;  %v8405_v61 = vld [vmem:[%s10242_s4 + $0x128] sm:$0xff] (!%p8140_p11)  }
 0x465   : > { %8241 = vmatpush3.bf16.msra.mxu1 (!%p8140_p11), %v8370_v3  ;;  %v8406_v8 = vld [vmem:[%s10242_s4 + $0x1a8] sm:$0xff] (!%p8140_p11)   ;;  %v8408_v3 = vld [vmem:[%s10242_s4 + $0x1f0] sm:$0xff] (!%p8140_p11)  }
 0x466   : > { %8242 = vmatprep.subr.bf16.mxu1 (!%p8140_p11), %v8372_v9  ;;  %v8410_v9 = vld [vmem:[%s10242_s4 + $0x1b0] sm:$0xff] (!%p8140_p11)  }
 0x467   : > { %8219 = vmatpush3.bf16.msra.mxu0 (!%p8140_p11), %v8369_v62  ;;  %v8407_v62 = vld [vmem:[%s10242_s4 + $0x170] sm:$0xff] (!%p8140_p11)  }
 0x468   : > { %8220 = vmatprep.subr.bf16.mxu0 (!%p8140_p11), %v8371_v6  ;;  %v8409_v6 = vld [vmem:[%s10242_s4 + $0x130] sm:$0xff] (!%p8140_p11)  }
 0x469   : > { %8243 = vmatpush3.bf16.msra.mxu1 (!%p8140_p11), %v8374_v25 }
 0x46a   : > { %8244 = vmatprep.subr.bf16.mxu1 (!%p8140_p11), %v8376_v27  ;;  %v8412_v27 = vld [vmem:[%s10242_s4 + $0x1f8] sm:$0xff] (!%p8140_p11)  }
 0x46b   : > { %8221 = vmatpush3.bf16.msra.mxu0 (!%p8140_p11), %v8373_v10  ;;  %v8411_v10 = vld [vmem:[%s10242_s4 + $0x178] sm:$0xff] (!%p8140_p11)  }
 0x46c   : > { %8222 = vmatprep.subr.bf16.mxu0 (!%p8140_p11), %v8375_v26 }
 0x46d   : > { %8245 = vmatpush3.bf16.msra.mxu1 (!%p8140_p11), %v8378_v29 }
 0x46f   : > { %8223 = vmatpush3.bf16.msra.mxu0 (!%p8140_p11), %v8377_v28 }
 0x470   : > { %8224 = vmatprep.subr.bf16.mxu0 (!%p8140_p11), %v8379_v30  ;;  %v6551_v30 = vld [vmem:[#allocation2 + $0x28] sm:$0xff] (!%p8140_p11) }
 0x499   : > { %v6396_v40 = vpop.f32.mrb[32].mxu0 }
 0x49a   : > { %v6437_v41 = vpop.f32.mrb[32].mxu1  ;;  %v6398_v42 = vpop.f32.mrb[33].mxu0 }
 0x49b   : > { %v6438_v43 = vadd.f32 %v6437_v41, %v6396_v40  ;;  %v6439_v44 = vpop.f32.mrb[33].mxu1  ;;  %v6400_v45 = vpop.f32.mrb[34].mxu0  ;;  %v8380_v40 = vld [vmem:[%s10242_s4 + $0xf8] sm:$0xff] (!%p8140_p11)  }
 0x49c   : > { %v6440_v46 = vadd.f32 %v6439_v44, %v6398_v42  ;;  %v6441_v13 = vpop.f32.mrb[34].mxu1  ;;  %v6401_v47 = vpop.f32.mrb[35].mxu0  ;;  %v8381_v41 = vld [vmem:[%s10242_s4 + $0x38] sm:$0xff] (!%p8140_p11)   ;;  %8246 = vmatprep.subr.bf16.mxu1 (!%p8140_p11), %v8380_v40  ;;  %v10100_v44 = vld [vmem:[%s10243_s5] sm:$0xff] (!%p8140_p11) }
 0x49d   : > { %v6442_v48 = vpop.f32.mrb[35].mxu1  ;;  %v8382_v42 = vld [vmem:[%s10242_s4 + $0xb8] sm:$0xff] (!%p8140_p11)   ;;  %8225 = vmatpush3.bf16.msra.mxu0 (!%p8140_p11), %v8381_v41  ;;  %v6571_v13 = vrot.slane (!%p8140_p11), %v10100_v44, %v1126_v35  ;;  %v6546_v47 = vld [vmem:[#allocation2] sm:$0xff] (!%p8140_p11)  ;;  %v6579_v25 = vrot.slane (!%p8140_p11), %v10100_v44, %v1134_v38  ;;  %v6587_v26 = vrot.slane (!%p8140_p11), %v10100_v44, %v1142_v39  ;;  %v6575_v28 = vrot.slane (!%p8140_p11), %v10100_v44, %v1130_v36 }
 0x49e   : > { %v6549_v45 = vld [vmem:[#allocation2 + $0x18] sm:$0xff] (!%p8140_p11)  ;;  %8247 = vmatpush3.bf16.msra.mxu1 (!%p8140_p11), %v8382_v42  ;;  %v6559_v48 = vrot.slane (!%p8140_p11), %v10100_v44, %v1114_v16  ;;  %v8384_v35 = vld [vmem:[%s10242_s4 + $0x1c0] sm:$0xff] (!%p8140_p11)   ;;  %v6583_v29 = vrot.slane (!%p8140_p11), %v10100_v44, %v1138_v37 }
 0x49f   : > { %8276 = vmatprep.subr.bf16.mxu1 (!%p8140_p11), %v8384_v35  ;;  %v8413_v38 = vld [vmem:[%s10242_s4 + $0x138] sm:$0xff] (!%p8140_p11)   ;;  %v6601_v41 = vadd.f32 (!%p8140_p11), %v6579_v25, %v6551_v30 }
 0x4a0   : > { %v8414_v40 = vld [vmem:[%s10242_s4 + $0x1b8] sm:$0xff] (!%p8140_p11)  }
 0x4d9   : > { %v6478_v23 = vpop.f32.mrb[36].mxu0 }
 0x4da   : > { %v6479_v63 = vadd.f32 %v6478_v23, %v6438_v43  ;;  %v6519_v49 = vpop.f32.mrb[36].mxu1  ;;  %v6480_v58 = vpop.f32.mrb[37].mxu0  ;;  %v6547_v43 = vld [vmem:[#allocation2 + $0x8] sm:$0xff] (!%p8140_p11)  ;;  %v6548_v23 = vld [vmem:[#allocation2 + $0x10] sm:$0xff] (!%p8140_p11) }
 0x4db   : > { %v6481_v52 = vadd.f32 %v6480_v58, %v6440_v46  ;;  %v6521_v4 = vpop.f32.mrb[37].mxu1  ;;  %v6482_v53 = vpop.f32.mrb[38].mxu0  ;;  %6545 = sbr.rel (%p8140_p11) target bundleno = 1504 (0x5e0), region = 79  ;;  %v6563_v46 = vrot.slane (!%p8140_p11), %v10100_v44, %v1118_v34  ;;  %v6599_v34 = vadd.f32 (!%p8140_p11), %v6571_v13, %v6549_v45 }
 0x4dc   : > { %v6520_v1 = vadd.f32 %v6519_v49, %v6479_v63  ;;  %v6523_v7 = vpop.f32.mrb[38].mxu1  ;;  %v6483_v22 = vpop.f32.mrb[39].mxu0  ;;  %v6567_v63 = vrot.slane (!%p8140_p11), %v10100_v44, %v1122_v33  ;;  %v8383_v49 = vld [vmem:[%s10242_s4 + $0x140] sm:$0xff] (!%p8140_p11)   ;;  %v6609_v44 = vmax.f32 (!%p8140_p11), %v6601_v41, 0.0 }
 0x4dd   : > { %v6522_v55 = vadd.f32 %v6521_v4, %v6481_v52  ;;  %v6524_v56 = vpop.f32.mrb[39].mxu1  ;;  %v6597_v58 = vadd.f32 (!%p8140_p11), %v6563_v46, %v6547_v43  ;;  %8254 = vmatprep.subr.bf16.mxu0 (!%p8140_p11), %v8383_v49  ;;  %v6607_v16 = vmax.f32 (!%p8140_p11), %v6599_v34, 0.0  ;;  %v8385_v33 = vld [vmem:[%s10242_s4 + $0x100] sm:$0xff] (!%p8140_p11)  }
 0x4de   : > { %v6532_v59 = vadd.f32 %v6520_v1, %v2788_v51  ;;  %v6596_v51 = vadd.f32 (!%p8140_p11), %v6559_v48, %v6546_v47  ;;  %v6598_v52 = vadd.f32 (!%p8140_p11), %v6567_v63, %v6548_v23  ;;  %v6550_v43 = vld [vmem:[#allocation2 + $0x20] sm:$0xff] (!%p8140_p11)  ;;  %v6617_v47 = vpack.c.bf16 (!%p8140_p11), %v6609_v44, %v6609_v44 }
 0x4df   : > { %v6533_v32 = vadd.f32 %v6522_v55, %v2789_v50  ;;  %v6605_v4 = vmax.f32 (!%p8140_p11), %v6597_v58, 0.0  ;;  %v8386_v50 = vld [vmem:[%s10242_s4 + $0x180] sm:$0xff] (!%p8140_p11)   ;;  %v6615_v22 = vpack.c.bf16 (!%p8140_p11), %v6607_v16, %v6607_v16  ;;  %v6600_v31 = vadd.f32 (!%p8140_p11), %v6575_v28, %v6550_v43 }
 0x4e0   : > { %6540 = vst [vmem:[#allocation2 + $0x30] sm:$0xff] %v6532_v59  ;;  %v6604_v53 = vmax.f32 (!%p8140_p11), %v6596_v51, 0.0  ;;  %v6606_v1 = vmax.f32 (!%p8140_p11), %v6598_v52, 0.0  ;;  %v8387_v59 = vld [vmem:[%s10242_s4 + $0x148] sm:$0xff] (!%p8140_p11)   ;;  %v8141_v34 = vld [vmem:[%s10244_s6] ss:$0 sm:$0xff] (!%p8140_p11) }
 0x4e1   : > { %6541 = vst [vmem:[#allocation2 + $0x38] sm:$0xff] %v6533_v32  ;;  %v6613_v7 = vpack.c.bf16 (!%p8140_p11), %v6605_v4, %v6605_v4  ;;  %v8388_v32 = vld [vmem:[%s10242_s4 + $0x1c8] sm:$0xff] (!%p8140_p11)   ;;  %7211 = vmatprep.mubr.bf16.mxu1 (!%p8140_p11), %v6615_v22  ;;  %v6608_v46 = vmax.f32 (!%p8140_p11), %v6600_v31, 0.0 }
 0x4e2   : > { %v6612_v55 = vpack.c.bf16 %v6604_v53, %v6604_v53  ;;  %v6614_v56 = vpack.c.bf16 %v6606_v1, %v6606_v1 }
 0x4e3   : > { %7171 = vmatprep.mubr.bf16.mxu0 %v6613_v7  ;;  %v6616_v23 = vpack.c.bf16 %v6608_v46, %v6608_v46 }
 0x4e4   : > { %7172 = vmatmul.mubr.bf16.vlgmr.msra.gmra.mrb[0].mxu0 %v6612_v55  ;;  %7212 = vmatmul.mubr.bf16.vlgmr.msra.gmra.mrb[0].mxu1 %v6614_v56 }
 0x4e5   : > { %8255 = vmatpush3.bf16.msra.mxu0 %v8385_v33  ;;  %8277 = vmatpush3.bf16.msra.mxu1 %v8386_v50 }
 0x4e6   : > { %8256 = vmatprep.subr.bf16.mxu0 %v8387_v59  ;;  %8278 = vmatprep.subr.bf16.mxu1 %v8388_v32 }
 0x4e7   : > { %v6552_v36 = vld [vmem:[#allocation2 + $0x30] sm:$0xff]  ;;  %7251 = vmatprep.mubr.bf16.mxu0 %v6617_v47 }
 0x4e8   : > { %v6553_v39 = vld [vmem:[#allocation2 + $0x38] sm:$0xff]  ;;  %v6602_v37 = vadd.f32 %v6583_v29, %v6552_v36 }
 0x4e9   : > { %8257 = vmatpush3.bf16.msra.mxu0 %v8389_v2  ;;  %8279 = vmatpush3.bf16.msra.mxu1 %v8390_v57  ;;  %v6603_v42 = vadd.f32 %v6587_v26, %v6553_v39 }
 0x4ea   : > { %8258 = vmatprep.subr.bf16.mxu0 %v8391_v5  ;;  %8280 = vmatprep.subr.bf16.mxu1 %v8392_v0  ;;  %v6610_v13 = vmax.f32 %v6602_v37, 0.0 }
 0x4eb   : > { %v6611_v45 = vmax.f32 %v6603_v42, 0.0 }
 0x4ec   : > { %v6618_v63 = vpack.c.bf16 %v6610_v13, %v6610_v13 }
 0x4ed   : > { %8259 = vmatpush3.bf16.msra.mxu0 %v8393_v11  ;;  %8281 = vmatpush3.bf16.msra.mxu1 %v8394_v12  ;;  %v6619_v48 = vpack.c.bf16 %v6611_v45, %v6611_v45 }
 0x4ee   : > { %8260 = vmatprep.subr.bf16.mxu0 %v8395_v14  ;;  %8282 = vmatprep.subr.bf16.mxu1 %v8396_v15 }
 0x4ef   : > { %7291 = vmatprep.mubr.bf16.mxu1 %v6619_v48 }
 0x4f1   : > { %8261 = vmatpush3.bf16.msra.mxu0 %v8397_v17  ;;  %8283 = vmatpush3.bf16.msra.mxu1 %v8398_v18 }
 0x4f2   : > { %8262 = vmatprep.subr.bf16.mxu0 %v8399_v19  ;;  %8284 = vmatprep.subr.bf16.mxu1 %v8400_v20 }
 0x4f5   : > { %8263 = vmatpush3.bf16.msra.mxu0 %v8401_v54  ;;  %8285 = vmatpush3.bf16.msra.mxu1 %v8402_v21 }
 0x4f6   : > { %8264 = vmatprep.subr.bf16.mxu0 %v8403_v24  ;;  %8286 = vmatprep.subr.bf16.mxu1 %v8404_v60 }
 0x4f9   : > { %8265 = vmatpush3.bf16.msra.mxu0 %v8405_v61  ;;  %8287 = vmatpush3.bf16.msra.mxu1 %v8406_v8 }
 0x4fa   : > { %8266 = vmatprep.subr.bf16.mxu0 %v8407_v62  ;;  %8288 = vmatprep.subr.bf16.mxu1 %v8408_v3 }
 0x4fd   : > { %8267 = vmatpush3.bf16.msra.mxu0 %v8409_v6  ;;  %8289 = vmatpush3.bf16.msra.mxu1 %v8410_v9 }
 0x4fe   : > { %8268 = vmatprep.subr.bf16.mxu0 %v8411_v10  ;;  %8290 = vmatprep.subr.bf16.mxu1 %v8412_v27 }
 0x501   : > { %8269 = vmatpush3.bf16.msra.mxu0 %v8413_v38  ;;  %8291 = vmatpush3.bf16.msra.mxu1 %v8414_v40 }
 0x504   : > { %7252 = vmatmul.mubr.bf16.vlgmr.msra.gmra.mrb[4].mxu0 %v6616_v23  ;;  %7292 = vmatmul.mubr.bf16.vlgmr.msra.gmra.mrb[4].mxu1 %v6618_v63 }
 0x5b7   : > { %v8226_v49 = vpop.f32.mrb[0].mxu0  ;;  %v8248_v58 = vpop.f32.mrb[0].mxu1 }
 0x5b8   : > { %v8227_v51 = vpop.f32.mrb[1].mxu0  ;;  %v8249_v52 = vpop.f32.mrb[1].mxu1 }
 0x5b9   : > { %v8228_v35 = vadd.f32 %v8227_v51, %v8226_v49  ;;  %v8250_v4 = vadd.f32 %v8249_v52, %v8248_v58  ;;  %v8229_v16 = vpop.f32.mrb[2].mxu0  ;;  %v8251_v53 = vpop.f32.mrb[2].mxu1 }
 0x5ba   : > { %v8230_v1 = vpop.f32.mrb[3].mxu0  ;;  %v8252_v33 = vpop.f32.mrb[3].mxu1 }
 0x5bb   : > { %v7174_v50 = vadd.f32 %v8228_v35, %v8141_v34 }
 0x5bd   : > { %v7214_v7 = vadd.f32 %v8250_v4, %v7174_v50 }
 0x5d7   : > { %v8270_v22 = vpop.f32.mrb[4].mxu0  ;;  %v8292_v55 = vpop.f32.mrb[4].mxu1 }
 0x5d8   : > { %v8271_v56 = vpop.f32.mrb[5].mxu0  ;;  %v8293_v59 = vpop.f32.mrb[5].mxu1 }
 0x5d9   : > { %v8272_v32 = vadd.f32 %v8271_v56, %v8270_v22  ;;  %v8294_v2 = vadd.f32 %v8293_v59, %v8292_v55  ;;  %v8273_v57 = vpop.f32.mrb[6].mxu0  ;;  %v8295_v5 = vpop.f32.mrb[6].mxu1 }
 0x5da   : > { %v8274_v0 = vpop.f32.mrb[7].mxu0  ;;  %v8296_v11 = vpop.f32.mrb[7].mxu1 }
 0x5db   : > { %v7254_v12 = vadd.f32 %v8272_v32, %v7214_v7 }
 0x5dd   : > { %v7294_v14 = vadd.f32 %v8294_v2, %v7254_v12 }
 0x5df   : > { %7299 = vst [vmem:[%s10245_s7] sm:$0xff] %v7294_v14 }
 0x5e0 PF: > { %p14_p12 = scmp.ge.s32.totalorder %s8499_s28, 6   ;;  %s10246_s24 = smov %s8433_s25 }
 0x5e1   : > { %s10247_s25 = smov %s8508_s8  ;;  %s10248_s26 = smov %s8499_s28 }
 0x5e2   :  { %16 = sbr.rel (!%p14_p12) target bundleno = 2 (0x2), region = 116 }

</bundles_post_ra>
